<compile_context>
chip_gen: v5e
topology: v5e:2x2
jax: 0.10.0
libtpu: 0.0.40
codegen_flags: <defaults>
</compile_context>

<pallas_src>
import jax
import jax.numpy as jnp
from jax.experimental import pallas as pl
from jax.experimental.pallas import tpu as pltpu


# ----------------------------------------------------------------------------
# Helpers
# ----------------------------------------------------------------------------
def _round_up(x, m):
    return ((x + m - 1) // m) * m


def _vmem_capacity_bytes():
    """Generation-aware VMEM capacity (falls back to a conservative 64 MiB)."""
    try:
        info = pltpu.get_tpu_info()
        cap = getattr(info, "vmem_capacity_bytes", None)
        if cap:
            return int(cap)
    except Exception:
        pass
    return 64 * 1024 * 1024


def init_params(key, in_channels, dim):
    """Raw parameters matching the PyTorch module init."""
    k1, k2, k3 = jax.random.split(key, 3)
    # PyTorch conv weight (out, in, 1, 1) stored here transposed as (in, out).
    w_cls = 0.01 * jax.random.normal(k1, (in_channels, 2), jnp.float32)
    b_cls = jnp.zeros((1, 2), jnp.float32)
    w_reid = 0.01 * jax.random.normal(k2, (in_channels, dim), jnp.float32)
    b_reid = jnp.zeros((1, dim), jnp.float32)
    gamma = 0.01 * jax.random.normal(k3, (1, dim), jnp.float32)
    beta = jnp.zeros((1, dim), jnp.float32)
    r_mean = jnp.zeros((1, dim), jnp.float32)
    r_var = jnp.ones((1, dim), jnp.float32)
    return (w_cls, b_cls, w_reid, b_reid, gamma, beta, r_mean, r_var)


def fold_params(params, *, cls_scalar=1.0, bn_eps=1e-5):
    """One-time constant fold: eval-BN into reid weights, cls_scalar into cls
    weights, then concatenate both heads into one lane-padded (C, P) matrix."""
    w_cls, b_cls, w_reid, b_reid, gamma, beta, r_mean, r_var = params
    in_channels, dim = w_reid.shape

    bn_scale = gamma / jnp.sqrt(r_var + bn_eps)                  # (1, dim)
    w_reid_f = w_reid * bn_scale                                 # (C, dim)
    b_reid_f = (b_reid - r_mean) * bn_scale + beta               # (1, dim)
    w_cls_f = w_cls * cls_scalar                                 # (C, 2)
    b_cls_f = b_cls * cls_scalar                                 # (1, 2)

    p = _round_up(dim + 2, 128)
    w_fused = (jnp.zeros((in_channels, p), jnp.float32)
               .at[:, :dim].set(w_reid_f)
               .at[:, dim:dim + 2].set(w_cls_f))
    b_fused = (jnp.zeros((1, p), jnp.float32)
               .at[:, :dim].set(b_reid_f)
               .at[:, dim:dim + 2].set(b_cls_f))
    col_mask = jnp.zeros((1, p), jnp.float32).at[:, :dim].set(1.0)
    return w_fused, b_fused, col_mask, dim


# ----------------------------------------------------------------------------
# Kernel
# ----------------------------------------------------------------------------
def _make_kernel(*, s_tile, pool_lanes, s_total, needs_mask):
    """Grid = (batch blocks, spatial blocks); spatial is the reduction axis.

    x_ref    : (n_tile, C, s_tile)   feature block (NCHW layout, spatial on lanes)
    w_ref    : (C, P)                fused [reid(BN-folded) | cls*scalar | 0-pad]
    b_ref    : (1, P)                fused bias
    mask_ref : (1, P)                1.0 on reid columns, 0.0 elsewhere
    out_ref  : (1, n_tile, P)        fused output block
    pool_acc : (n_tile, C, pool_lanes) VMEM running per-lane max accumulator
    """
    n_chunks = s_tile // pool_lanes

    def kernel(x_ref, w_ref, b_ref, mask_ref, out_ref, pool_acc):
        j = pl.program_id(1)
        num_s = pl.num_programs(1)

        @pl.when(j == 0)
        def _init():
            pool_acc[...] = jnp.full(pool_acc.shape, -jnp.inf, pool_acc.dtype)

        def accumulate(mask_tail):
            # Pure-VPU elementwise running max: fold the block's lane groups
            # into the <=128-lane accumulator; no cross-lane work per step.
            acc = pool_acc[...]
            for t in range(n_chunks):
                chunk = x_ref[:, :, t * pool_lanes:(t + 1) * pool_lanes]
                if mask_tail and t == n_chunks - 1:
                    # Ragged spatial tail: mask out-of-range lanes with -inf
                    # (only on the last spatial block / last lane group).
                    lane = jax.lax.broadcasted_iota(jnp.int32, chunk.shape, 2)
                    valid = (j * s_tile + t * pool_lanes + lane) < s_total
                    chunk = jnp.where(valid, chunk, -jnp.inf)
                acc = jnp.maximum(acc, chunk)
            pool_acc[...] = acc

        if needs_mask:
            @pl.when(j < num_s - 1)
            def _acc_body():
                accumulate(False)

            @pl.when(j == num_s - 1)
            def _acc_tail():
                accumulate(True)
        else:
            accumulate(False)

        @pl.when(j == num_s - 1)
        def _finalize():
            # Single cross-lane reduce + relayout per batch block (amortized
            # over the whole spatial sweep), then one fused MXU matmul.
            pooled = jnp.max(pool_acc[...], axis=2).astype(jnp.float32)  # (n_tile, C)
            y = jnp.dot(pooled, w_ref[...],
                        preferred_element_type=jnp.float32,
                        precision=jax.lax.Precision.HIGHEST) + b_ref[...]
            m = mask_ref[...]                                   # (1, P)
            # L2-normalize the reid columns only:  1 / clamp(norm, 1e-12)
            ss = jnp.sum(jnp.square(y * m), axis=-1, keepdims=True)
            inv_norm = jax.lax.rsqrt(jnp.maximum(ss, 1e-24))
            scale = m * inv_norm + (1.0 - m)                    # cls cols untouched
            out_ref[0] = (y * scale).astype(out_ref.dtype)

    return kernel


# ----------------------------------------------------------------------------
# Wrapper
# ----------------------------------------------------------------------------
def embedding_proj_forward(x_nchw, folded_params, *, n_tile=None, s_tile=None,
                           x_block_bytes=None, vmem_limit_bytes=None):
    """x_nchw: (N, C, H, W) float32 or bfloat16.
    Returns (embeddings (N, dim, 1, 1), projected (N, 2, 1, 1))."""
    w_fused, b_fused, col_mask, dim = folded_params
    n, c, h, w = x_nchw.shape
    s = h * w
    p = w_fused.shape[1]
    itemsize = jnp.dtype(x_nchw.dtype).itemsize

    # NCHW -> (N, C, H*W): collapse of contiguous minor dims (no HBM copy),
    # channels stay on sublanes, spatial positions go to the lane axis.
    x = x_nchw.reshape(n, c, s)

    # ---- generation-aware block / VMEM budget -------------------------------
    vmem_cap = _vmem_capacity_bytes()
    big_vmem = vmem_cap >= 96 * (2 ** 20)            # v5e / v6e (128 MiB)
    if x_block_bytes is None:
        x_block_bytes = (24 if big_vmem else 10) * (2 ** 20)

    # ---- batch tile: always >= 2 batch blocks when batch >= 2 (megacore) ----
    if n_tile is None:
        n_tile = max(1, min(8, n // 2)) if n > 1 else 1
        # Shrink if even a minimal 128-lane block would blow the budget.
        while n_tile > 1 and n_tile * c * itemsize * 128 > x_block_bytes:
            n_tile = (n_tile + 1) // 2
    assert 1 <= n_tile <= n
    grid_n = pl.cdiv(n, n_tile)

    # ---- spatial tile: lane-aligned (x128) or the full extent ---------------
    per_lane = n_tile * c * itemsize
    if s_tile is None:
        if s * per_lane <= x_block_bytes:
            s_tile = s
        else:
            s_tile = max(128, (x_block_bytes // per_lane) // 128 * 128)
    assert s_tile == s or s_tile % 128 == 0, "s_tile must be x128 or full extent"
    grid_s = pl.cdiv(s, s_tile)
    needs_mask = (s % s_tile) != 0
    pool_lanes = 128 if s_tile % 128 == 0 else s_tile

    kernel = _make_kernel(s_tile=s_tile, pool_lanes=pool_lanes,
                          s_total=s, needs_mask=needs_mask)

    # ---- VMEM limit: double-buffered x/out/constants + scratch + headroom ---
    x_blk = n_tile * c * s_tile * itemsize
    acc_blk = n_tile * c * pool_lanes * itemsize
    tmp_headroom = 3 * n_tile * c * max(pool_lanes, 128) * 4
    est = (2 * x_blk                      # feature blocks (double-buffered)
           + 2 * c * p * 4                # fused weight (grid-invariant, x2 budget)
           + 2 * 2 * p * 4                # bias + column mask
           + 2 * n_tile * p * 4           # output block
           + acc_blk                      # running-max scratch
           + tmp_headroom)                # iota/select + finalize temporaries
    if vmem_limit_bytes is None:
        cap = min(vmem_cap - 8 * (2 ** 20), 100 * (2 ** 20))
        vmem_limit_bytes = int(min(cap, max(est * 5 // 4, 16 * (2 ** 20))))

    out = pl.pallas_call(
        kernel,
        out_shape=jax.ShapeDtypeStruct((grid_n, n_tile, p), jnp.float32),
        grid_spec=pltpu.PrefetchScalarGridSpec(
            num_scalar_prefetch=0,
            grid=(grid_n, grid_s),
            in_specs=[
                pl.BlockSpec((n_tile, c, s_tile), lambda i, j: (i, 0, j)),
                pl.BlockSpec((c, p), lambda i, j: (0, 0)),
                pl.BlockSpec((1, p), lambda i, j: (0, 0)),
                pl.BlockSpec((1, p), lambda i, j: (0, 0)),
            ],
            out_specs=pl.BlockSpec((1, n_tile, p), lambda i, j: (i, 0, 0)),
            scratch_shapes=[pltpu.VMEM((n_tile, c, pool_lanes), x.dtype)],
        ),
        compiler_params=pltpu.CompilerParams(
            dimension_semantics=("parallel", "arbitrary"),
            vmem_limit_bytes=vmem_limit_bytes,
        ),
    )(x, w_fused, b_fused, col_mask)

    out = out.reshape(grid_n * n_tile, p)
    emb = out[:n, :dim].reshape(n, dim, 1, 1)
    proj = out[:n, dim:dim + 2].reshape(n, 2, 1, 1)
    return emb, proj


# ----------------------------------------------------------------------------
# Pure-JAX reference (eval-mode BN, un-folded params)
# ----------------------------------------------------------------------------
def _reference_forward(x_nchw, params, cls_scalar=1.0, bn_eps=1e-5):
    w_cls, b_cls, w_reid, b_reid, gamma, beta, r_mean, r_var = params
    n, c, h, w = x_nchw.shape
    hp = jax.lax.Precision.HIGHEST
    xf = x_nchw.astype(jnp.float32)
    pooled = jnp.max(xf.reshape(n, c, h * w), axis=-1)             # (N, C)
    proj = (jnp.dot(pooled, w_cls, precision=hp) + b_cls) * cls_scalar
    e = jnp.dot(pooled, w_reid, precision=hp) + b_reid             # (N, dim)
    e = (e - r_mean) / jnp.sqrt(r_var + bn_eps) * gamma + beta
    norm = jnp.maximum(jnp.linalg.norm(e, axis=1, keepdims=True), 1e-12)
    e = e / norm
    return e.reshape(n, -1, 1, 1), proj.reshape(n, 2, 1, 1)


if __name__ == "__main__":
    def run_case(n, c, h, w, dim, cls_scalar, dtype, **kw):
        key = jax.random.PRNGKey(0)
        kx, kp = jax.random.split(key)
        x = jax.random.normal(kx, (n, c, h, w), jnp.float32).astype(dtype)
        params = init_params(kp, c, dim)
        folded = fold_params(params, cls_scalar=cls_scalar)
        emb, proj = embedding_proj_forward(x, folded, **kw)
        emb = jax.block_until_ready(emb)
        proj = jax.block_until_ready(proj)
        emb_r, proj_r = _reference_forward(x, params, cls_scalar)
        assert emb.shape == (n, dim, 1, 1) and proj.shape == (n, 2, 1, 1)
        assert jnp.allclose(emb, emb_r, atol=2e-5, rtol=2e-5), \
            float(jnp.max(jnp.abs(emb - emb_r)))
        assert jnp.allclose(proj, proj_r, atol=2e-5, rtol=2e-5), \
            float(jnp.max(jnp.abs(proj - proj_r)))

    # A: multi-step spatial reduction with a ragged (-inf masked) tail block
    #    and two batch blocks (parallel axis + running-max accumulator paths).
    run_case(16, 256, 12, 12, 64, 2.0, jnp.float32, s_tile=128)
    # B: single-spatial-block path, small odd batch tile (n_tile=3, grid_n=2).
    run_case(6, 128, 7, 7, 96, 1.0, jnp.float32)
    # C: bf16 features (halved HBM traffic when the backbone emits bf16).
    run_case(16, 256, 9, 9, 32, 1.5, jnp.bfloat16)

    print("KERNEL_OK")
</pallas_src>

<mosaic_0001>
module attributes {stable_mosaic.version = 11 : i64} {
  func.func @kernel(%arg0: i32, %arg1: i32, %arg2: memref<8x256x128xf32, #tpu.memory_space<vmem>>, %arg3: memref<256x128xf32, #tpu.memory_space<vmem>>, %arg4: memref<1x128xf32, #tpu.memory_space<vmem>>, %arg5: memref<1x128xf32, #tpu.memory_space<vmem>>, %arg6: memref<1x8x128xf32, #tpu.memory_space<vmem>>, %arg7: memref<8x256x128xf32, #tpu.memory_space<vmem>>) attributes {dimension_semantics = [#tpu.dimension_semantics<parallel>, #tpu.dimension_semantics<arbitrary>], iteration_bounds = array<i64: 2, 2>, scalar_prefetch = 0 : i64, scratch_operands = 1 : i64, tpu.core_type = #tpu.core_type<tc>, window_params = [{transform_indices = @transform_0, window_bounds = array<i64: 8, 256, 128>}, {pipeline_mode = #tpu.pipeline_mode<synchronous>, transform_indices = @transform_1, window_bounds = array<i64: 256, 128>}, {pipeline_mode = #tpu.pipeline_mode<synchronous>, transform_indices = @transform_2, window_bounds = array<i64: 1, 128>}, {pipeline_mode = #tpu.pipeline_mode<synchronous>, transform_indices = @transform_3, window_bounds = array<i64: 1, 128>}, {transform_indices = @transform_4, window_bounds = array<i64: 1, 8, 128>}]} {
    %c0_i32 = arith.constant 0 : i32
    %0 = arith.cmpi eq, %arg1, %c0_i32 : i32
    %1 = arith.extui %0 : i1 to i32
    %c0_i32_0 = arith.constant 0 : i32
    %2 = arith.cmpi ne, %1, %c0_i32_0 : i32
    scf.if %2 {
      %cst = arith.constant 0xFF800000 : f32
      %12 = vector.broadcast %cst : f32 to vector<8x256x128xf32>
      %c0 = arith.constant 0 : index
      %c0_6 = arith.constant 0 : index
      %c0_7 = arith.constant 0 : index
      %13 = vector.load %arg7[%c0, %c0_6, %c0_7] : memref<8x256x128xf32, #tpu.memory_space<vmem>>, vector<8x256x128xf32>
      tpu.vector_store %arg7[%c0, %c0_6, %c0_7], %12 {strides = array<i32>} : memref<8x256x128xf32, #tpu.memory_space<vmem>>, vector<8x256x128xf32>,
    } else {
    }
    %c1_i32 = arith.constant 1 : i32
    %3 = arith.cmpi slt, %arg1, %c1_i32 : i32
    %4 = arith.extui %3 : i1 to i32
    %c0_i32_1 = arith.constant 0 : i32
    %5 = arith.cmpi ne, %4, %c0_i32_1 : i32
    scf.if %5 {
      %c0 = arith.constant 0 : index
      %c0_6 = arith.constant 0 : index
      %c0_7 = arith.constant 0 : index
      %12 = vector.load %arg7[%c0, %c0_6, %c0_7] : memref<8x256x128xf32, #tpu.memory_space<vmem>>, vector<8x256x128xf32>
      %c0_8 = arith.constant 0 : index
      %c0_9 = arith.constant 0 : index
      %c0_10 = arith.constant 0 : index
      %13 = vector.load %arg2[%c0_8, %c0_9, %c0_10] : memref<8x256x128xf32, #tpu.memory_space<vmem>>, vector<8x256x128xf32>
      %14 = arith.maximumf %12, %13 : vector<8x256x128xf32>
      %c0_11 = arith.constant 0 : index
      %c0_12 = arith.constant 0 : index
      %c0_13 = arith.constant 0 : index
      %15 = vector.load %arg7[%c0_11, %c0_12, %c0_13] : memref<8x256x128xf32, #tpu.memory_space<vmem>>, vector<8x256x128xf32>
      tpu.vector_store %arg7[%c0_11, %c0_12, %c0_13], %14 {strides = array<i32>} : memref<8x256x128xf32, #tpu.memory_space<vmem>>, vector<8x256x128xf32>,
    } else {
    }
    %c1_i32_2 = arith.constant 1 : i32
    %6 = arith.cmpi eq, %arg1, %c1_i32_2 : i32
    %7 = arith.extui %6 : i1 to i32
    %c0_i32_3 = arith.constant 0 : i32
    %8 = arith.cmpi ne, %7, %c0_i32_3 : i32
    scf.if %8 {
      %c0 = arith.constant 0 : index
      %c0_6 = arith.constant 0 : index
      %c0_7 = arith.constant 0 : index
      %12 = vector.load %arg7[%c0, %c0_6, %c0_7] : memref<8x256x128xf32, #tpu.memory_space<vmem>>, vector<8x256x128xf32>
      %c0_8 = arith.constant 0 : index
      %c0_9 = arith.constant 0 : index
      %c0_10 = arith.constant 0 : index
      %13 = vector.load %arg2[%c0_8, %c0_9, %c0_10] : memref<8x256x128xf32, #tpu.memory_space<vmem>>, vector<8x256x128xf32>
      %14 = tpu.iota {dimensions = array<i32: 2>} : vector<8x256x128xi32>
      %c128_i32 = arith.constant 128 : i32
      %15 = arith.muli %arg1, %c128_i32 : i32
      %c0_i32_11 = arith.constant 0 : i32
      %16 = arith.addi %15, %c0_i32_11 : i32
      %17 = vector.broadcast %16 : i32 to vector<8x256x128xi32>
      %18 = arith.addi %17, %14 : vector<8x256x128xi32>
      %c144_i32 = arith.constant 144 : i32
      %19 = vector.broadcast %c144_i32 : i32 to vector<8x256x128xi32>
      %20 = arith.cmpi slt, %18, %19 : vector<8x256x128xi32>
      %cst = arith.constant 0xFF800000 : f32
      %21 = vector.broadcast %cst : f32 to vector<8x256x128xf32>
      %22 = arith.select %20, %13, %21 : vector<8x256x128xi1>, vector<8x256x128xf32>
      %23 = arith.maximumf %12, %22 : vector<8x256x128xf32>
      %c0_12 = arith.constant 0 : index
      %c0_13 = arith.constant 0 : index
      %c0_14 = arith.constant 0 : index
      %24 = vector.load %arg7[%c0_12, %c0_13, %c0_14] : memref<8x256x128xf32, #tpu.memory_space<vmem>>, vector<8x256x128xf32>
      tpu.vector_store %arg7[%c0_12, %c0_13, %c0_14], %23 {strides = array<i32>} : memref<8x256x128xf32, #tpu.memory_space<vmem>>, vector<8x256x128xf32>,
    } else {
    }
    %c1_i32_4 = arith.constant 1 : i32
    %9 = arith.cmpi eq, %arg1, %c1_i32_4 : i32
    %10 = arith.extui %9 : i1 to i32
    %c0_i32_5 = arith.constant 0 : i32
    %11 = arith.cmpi ne, %10, %c0_i32_5 : i32
    scf.if %11 {
      %c0 = arith.constant 0 : index
      %c0_6 = arith.constant 0 : index
      %c0_7 = arith.constant 0 : index
      %12 = vector.load %arg7[%c0, %c0_6, %c0_7] : memref<8x256x128xf32, #tpu.memory_space<vmem>>, vector<8x256x128xf32>
      %cst = arith.constant dense<0xFF800000> : vector<8x256xf32>
      %13 = vector.multi_reduction <maximumf>, %12, %cst [2] : vector<8x256x128xf32> to vector<8x256xf32>
      %c0_8 = arith.constant 0 : index
      %c0_9 = arith.constant 0 : index
      %14 = vector.load %arg3[%c0_8, %c0_9] : memref<256x128xf32, #tpu.memory_space<vmem>>, vector<256x128xf32>
      %cst_10 = arith.constant dense<0.000000e+00> : vector<8x128xf32>
      %15 = tpu.matmul %13, %14, %cst_10 {dimension_numbers = #tpu.dot_dimension_numbers<[1], [0], [0], [1], [0, 0, 1, 1], [], []>, precision = #tpu.contract_precision<fp32>} : vector<8x256xf32>, vector<256x128xf32>, vector<8x128xf32> -> vector<8x128xf32>
      %c0_11 = arith.constant 0 : index
      %c0_12 = arith.constant 0 : index
      %16 = vector.load %arg4[%c0_11, %c0_12] : memref<1x128xf32, #tpu.memory_space<vmem>>, vector<1x128xf32>
      %17 = vector.broadcast %16 : vector<1x128xf32> to vector<8x128xf32>
      %18 = arith.addf %15, %17 : vector<8x128xf32>
      %c0_13 = arith.constant 0 : index
      %c0_14 = arith.constant 0 : index
      %19 = vector.load %arg5[%c0_13, %c0_14] : memref<1x128xf32, #tpu.memory_space<vmem>>, vector<1x128xf32>
      %20 = vector.broadcast %19 : vector<1x128xf32> to vector<8x128xf32>
      %21 = arith.mulf %18, %20 : vector<8x128xf32>
      %22 = arith.mulf %21, %21 : vector<8x128xf32>
      %cst_15 = arith.constant dense<0.000000e+00> : vector<8xf32>
      %23 = vector.multi_reduction <add>, %22, %cst_15 [1] : vector<8x128xf32> to vector<8xf32>
      %24 = vector.shape_cast %23 : vector<8xf32> to vector<8x1xf32>
      %cst_16 = arith.constant 1.000000e-24 : f32
      %25 = vector.broadcast %cst_16 : f32 to vector<8x1xf32>
      %26 = arith.maximumf %24, %25 : vector<8x1xf32>
      %27 = math.rsqrt %26 : vector<8x1xf32>
      %28 = vector.broadcast %19 : vector<1x128xf32> to vector<8x128xf32>
      %29 = vector.broadcast %27 : vector<8x1xf32> to vector<8x128xf32>
      %30 = arith.mulf %28, %29 : vector<8x128xf32>
      %cst_17 = arith.constant 1.000000e+00 : f32
      %31 = vector.broadcast %cst_17 : f32 to vector<1x128xf32>
      %32 = arith.subf %31, %19 : vector<1x128xf32>
      %33 = vector.broadcast %32 : vector<1x128xf32> to vector<8x128xf32>
      %34 = arith.addf %30, %33 : vector<8x128xf32>
      %35 = arith.mulf %18, %34 : vector<8x128xf32>
      %c0_18 = arith.constant 0 : index
      %c0_19 = arith.constant 0 : index
      %c0_20 = arith.constant 0 : index
      %36 = vector.load %arg6[%c0_18, %c0_19, %c0_20] : memref<1x8x128xf32, #tpu.memory_space<vmem>>, vector<1x8x128xf32>
      %37 = vector.shape_cast %36 : vector<1x8x128xf32> to vector<8x128xf32>
      %38 = vector.shape_cast %35 : vector<8x128xf32> to vector<1x8x128xf32>
      tpu.vector_store %arg6[%c0_18, %c0_19, %c0_20], %38 {strides = array<i32>} : memref<1x8x128xf32, #tpu.memory_space<vmem>>, vector<1x8x128xf32>,
    } else {
    }
    return
  }
  func.func @transform_0(%arg0: i32, %arg1: i32) -> (i32, i32, i32) {
    %c0_i32 = arith.constant 0 : i32
    %c0_i32_0 = arith.constant 0 : i32
    return %arg0, %c0_i32, %arg1 : i32, i32, i32
  }
  func.func @transform_1(%arg0: i32, %arg1: i32) -> (i32, i32) {
    %c0_i32 = arith.constant 0 : i32
    %c0_i32_0 = arith.constant 0 : i32
    %c0_i32_1 = arith.constant 0 : i32
    return %c0_i32, %c0_i32_0 : i32, i32
  }
  func.func @transform_2(%arg0: i32, %arg1: i32) -> (i32, i32) {
    %c0_i32 = arith.constant 0 : i32
    %c0_i32_0 = arith.constant 0 : i32
    %c0_i32_1 = arith.constant 0 : i32
    return %c0_i32, %c0_i32_0 : i32, i32
  }
  func.func @transform_3(%arg0: i32, %arg1: i32) -> (i32, i32) {
    %c0_i32 = arith.constant 0 : i32
    %c0_i32_0 = arith.constant 0 : i32
    %c0_i32_1 = arith.constant 0 : i32
    return %c0_i32, %c0_i32_0 : i32, i32
  }
  func.func @transform_4(%arg0: i32, %arg1: i32) -> (i32, i32, i32) {
    %c0_i32 = arith.constant 0 : i32
    %c0_i32_0 = arith.constant 0 : i32
    %c0_i32_1 = arith.constant 0 : i32
    return %arg0, %c0_i32, %c0_i32_0 : i32, i32, i32
  }
}

</mosaic_0001>

<bundles_post_ra>
// kernel: tpu_custom_call.1
= control target key start
LH: loop header
LB: loop body
LE: loop exit
PB: predicated region body
PF: predicated region fallthrough
CT: control target
= control target key end

     0   :  { %s12028_s0 = inlined_call_operand.vmem [shape: f32[16,256,144], index: 0, kind: input, shape index: {}]   ;;  %s12029_s1 = inlined_call_operand.vmem [shape: f32[256,128], index: 1, kind: input, shape index: {}]   ;;  %s12030_s2 = inlined_call_operand.vmem [shape: f32[1,128], index: 2, kind: input, shape index: {}]   ;;  %s12031_s3 = inlined_call_operand.vmem [shape: f32[1,128], index: 3, kind: input, shape index: {}]   ;;  %s12032_s4 = inlined_call_operand.hbm [shape: f32[2,8,128], index: 4, kind: output, shape index: {}]  }
   0x1   :  { %12092 = sst [smem:[#allocation68_spill]] %s12028_s0 }
   0x2   :  { %12093 = sst [smem:[#allocation69_spill]] %s12029_s1 }
   0x3   :  { %9 = vsyncpa [#allocation5], 0 }
   0x4   :  { %11 = vsyncpa [#allocation5 + $0x1], 0  ;;  %s7578_s15 = smov 0   ;;  %s7580_s16 = smov 0  }
   0x5   :  { %s7582_s17 = smov 0   ;;  %s7584_s18 = smov 0  }
   0x6   :  { %s7586_s19 = smov 0   ;;  %s7588_s20 = smov 0  }
   0x7   :  { %s7590_s21 = smov 0   ;;  %s7592_s22 = smov 0  }
   0x8   :  { %s7594_s23 = smov 0   ;;  %s7596_s24 = smov 0  }
   0x9 LB: > { %s7328_s25 = sadd.s32 4294967295, %s7550_s24   ;;  %s7329_s26 = sadd.s32 4294967294, %s7550_s24   ;;  %s7550_s24 = sphi %s7596_s24, %s17_s24   ;;  %s7546_s23 = sphi %s7594_s23, %s12333_s23   ;;  %s7542_s22 = sphi %s7592_s22, %s12332_s22   ;;  %s7538_s21 = sphi %s7590_s21, %s12331_s21   ;;  %s7534_s20 = sphi %s7588_s20, %s12330_s20   ;;  %s7530_s19 = sphi %s7586_s19, %s12329_s19   ;;  %s7526_s18 = sphi %s7584_s18, %s12328_s18   ;;  %s7522_s17 = sphi %s7582_s17, %s12327_s17   ;;  %s7518_s16 = sphi %s7580_s16, %s12326_s16   ;;  %s7514_s15 = sphi %s7578_s15, %s12325_s15  }
   0xa   : > { %s26_s27 = sadd.s32 1, %s7542_s22  ;;  %s29_s28 = sadd.s32 1, %s7546_s23 }
   0xb   : > { %p27_p0 = scmp.ge.s32.totalorder %s26_s27, 2  ;;  %s38_s29 = sadd.s32 1, %s7530_s19 }
   0xc   : > { %p45_p1 = scmp.ne.s32.totalorder %s7530_s19, %s7526_s18  ;;  %p46_p2 = scmp.eq.s32.totalorder %s7550_s24, 0 }
   0xd   : > { %s12335_s27 = smov (%p27_p0, %s26_s27), 0  ;;  %s12337_s28 = smov (!%p27_p0, %s29_s28), %s7546_s23 }
   0xe   : > { %s34_s30 = ssub.s32 %s7542_s22, %s12335_s27  ;;  %p7641_p3 = por %p46_p2, %p45_p1 }
   0xf   : > { %p31_p4 = scmp.ge.s32.totalorder %s12337_s28, 2  ;;  %s127_s6 = sadd.s32 1, %s7522_s17 }
  0x10   : > { %p137_p5 = scmp.ne.s32.totalorder %s7522_s17, %s7518_s16  ;;  %p138_p6 = scmp.eq.s32.totalorder %s7328_s25, 3 }
  0x11   : > { %s12339_s28 = smov (%p31_p4, %s12337_s28), 0  ;;  %p143_p8 = scmp.ne.s32.totalorder %s7518_s16, %s7514_s15 }
  0x12   : > { %p7650_p7 = por %p138_p6, %p137_p5  ;;  %s33_s8 = ssub.s32 %s7546_s23, %s12339_s28 }
  0x13   : > { %p144_p9 = scmp.eq.s32.totalorder %s7329_s26, 3  ;;  %s35_s9 = sor.u32 %s34_s30, %s33_s8 }
  0x14   : > { %p125_p10 = scmp.eq.s32.totalorder %s33_s8, 0  ;;  %p36_p11 = scmp.eq.s32.totalorder %s35_s9, 0 }
  0x15   : > { %p7658_p12 = por %p144_p9, %p143_p8  ;;  %p7331_p13 = scmp.ge.s32.totalorder %s7550_s24, 4 }
  0x16   : > { %s7663_s11 = scalar_select %p125_p10, %s7522_s17, %s127_s6  }
  0x17   : > { %s7666_s12 = scalar_select %p36_p11, %s7530_s19, %s38_s29  }
  0x18   : > { %169 = sbr.rel (%p7331_p13) target bundleno = 295 (0x127), region = 28 }
  0x1d   : > { %172 = sbr.rel (!%p7641_p3) target bundleno = 295 (0x127), region = 32  ;;  %s174_s13 = sand.u32 (%p7641_p3), 1, %s7530_s19  }
  0x1e   : > { %s7347_s14 = sshll.u32 (%p7641_p3), %s7546_s23, 9  ;;  %s7332_s25 = sshll.u32 (%p7641_p3), %s174_s13, 11 }
  0x1f   : > { %s179_s26 = sadd.s32 (%p7641_p3), %s7542_s22, %s7347_s14  ;;  %s12097_s0 = sld [smem:[#allocation68_spill]] (%p7641_p3) }
  0x20   : > { %s7335_s30 = sshll.u32 (%p7641_p3), %s179_s26, 3  ;;  %s7682_s29 = scalar_lea.vmem (%p7641_p3), [#allocation3], %s7332_s25 }
  0x25   : > { %s7677_s6 = scalar_lea.vmem %s12097_s0, %s7335_s30 }
  0x26   : > { %v721_v0 = vld [vmem:[%s7677_s6] sm:$0xff]  ;;  %v723_v1 = vld [vmem:[%s7677_s6 + $0x10] sm:$0xff] }
  0x27   : > { %v725_v2 = vld [vmem:[%s7677_s6 + $0x20] sm:$0xff]  ;;  %722 = vst [vmem:[%s7682_s29] sm:$0xff] %v721_v0  ;;  %v727_v3 = vld [vmem:[%s7677_s6 + $0x30] sm:$0xff] }
  0x28   : > { %724 = vst [vmem:[%s7682_s29 + $0x8] sm:$0xff] %v723_v1  ;;  %v729_v4 = vld [vmem:[%s7677_s6 + $0x40] sm:$0xff]  ;;  %v731_v5 = vld [vmem:[%s7677_s6 + $0x50] sm:$0xff] }
  0x29   : > { %726 = vst [vmem:[%s7682_s29 + $0x10] sm:$0xff] %v725_v2  ;;  %v733_v6 = vld [vmem:[%s7677_s6 + $0x60] sm:$0xff]  ;;  %v735_v7 = vld [vmem:[%s7677_s6 + $0x70] sm:$0xff] }
  0x2a   : > { %728 = vst [vmem:[%s7682_s29 + $0x18] sm:$0xff] %v727_v3  ;;  %v737_v8 = vld [vmem:[%s7677_s6 + $0x80] sm:$0xff]  ;;  %v739_v9 = vld [vmem:[%s7677_s6 + $0x90] sm:$0xff] }
  0x2b   : > { %730 = vst [vmem:[%s7682_s29 + $0x20] sm:$0xff] %v729_v4  ;;  %v741_v10 = vld [vmem:[%s7677_s6 + $0xa0] sm:$0xff]  ;;  %v743_v11 = vld [vmem:[%s7677_s6 + $0xb0] sm:$0xff] }
  0x2c   : > { %732 = vst [vmem:[%s7682_s29 + $0x28] sm:$0xff] %v731_v5  ;;  %v745_v12 = vld [vmem:[%s7677_s6 + $0xc0] sm:$0xff]  ;;  %v747_v13 = vld [vmem:[%s7677_s6 + $0xd0] sm:$0xff] }
  0x2d   : > { %734 = vst [vmem:[%s7682_s29 + $0x30] sm:$0xff] %v733_v6  ;;  %v749_v14 = vld [vmem:[%s7677_s6 + $0xe0] sm:$0xff]  ;;  %v751_v15 = vld [vmem:[%s7677_s6 + $0xf0] sm:$0xff] }
  0x2e   : > { %736 = vst [vmem:[%s7682_s29 + $0x38] sm:$0xff] %v735_v7  ;;  %v753_v16 = vld [vmem:[%s7677_s6 + $0x100] sm:$0xff]  ;;  %v755_v17 = vld [vmem:[%s7677_s6 + $0x110] sm:$0xff] }
  0x2f   : > { %738 = vst [vmem:[%s7682_s29 + $0x40] sm:$0xff] %v737_v8  ;;  %v757_v18 = vld [vmem:[%s7677_s6 + $0x120] sm:$0xff]  ;;  %v759_v19 = vld [vmem:[%s7677_s6 + $0x130] sm:$0xff] }
  0x30   : > { %740 = vst [vmem:[%s7682_s29 + $0x48] sm:$0xff] %v739_v9  ;;  %v761_v20 = vld [vmem:[%s7677_s6 + $0x140] sm:$0xff]  ;;  %v763_v21 = vld [vmem:[%s7677_s6 + $0x150] sm:$0xff] }
  0x31   : > { %742 = vst [vmem:[%s7682_s29 + $0x50] sm:$0xff] %v741_v10  ;;  %v765_v22 = vld [vmem:[%s7677_s6 + $0x160] sm:$0xff]  ;;  %v767_v23 = vld [vmem:[%s7677_s6 + $0x170] sm:$0xff] }
  0x32   : > { %744 = vst [vmem:[%s7682_s29 + $0x58] sm:$0xff] %v743_v11  ;;  %v769_v24 = vld [vmem:[%s7677_s6 + $0x180] sm:$0xff]  ;;  %v771_v25 = vld [vmem:[%s7677_s6 + $0x190] sm:$0xff] }
  0x33   : > { %746 = vst [vmem:[%s7682_s29 + $0x60] sm:$0xff] %v745_v12  ;;  %v773_v26 = vld [vmem:[%s7677_s6 + $0x1a0] sm:$0xff]  ;;  %v775_v27 = vld [vmem:[%s7677_s6 + $0x1b0] sm:$0xff] }
  0x34   : > { %748 = vst [vmem:[%s7682_s29 + $0x68] sm:$0xff] %v747_v13  ;;  %v777_v28 = vld [vmem:[%s7677_s6 + $0x1c0] sm:$0xff]  ;;  %v779_v29 = vld [vmem:[%s7677_s6 + $0x1d0] sm:$0xff] }
  0x35   : > { %750 = vst [vmem:[%s7682_s29 + $0x70] sm:$0xff] %v749_v14  ;;  %v781_v30 = vld [vmem:[%s7677_s6 + $0x1e0] sm:$0xff]  ;;  %v783_v31 = vld [vmem:[%s7677_s6 + $0x1f0] sm:$0xff] }
  0x36   : > { %752 = vst [vmem:[%s7682_s29 + $0x78] sm:$0xff] %v751_v15  ;;  %v785_v32 = vld [vmem:[%s7677_s6 + $0x200] sm:$0xff]  ;;  %v787_v33 = vld [vmem:[%s7677_s6 + $0x210] sm:$0xff] }
  0x37   : > { %754 = vst [vmem:[%s7682_s29 + $0x80] sm:$0xff] %v753_v16  ;;  %v789_v34 = vld [vmem:[%s7677_s6 + $0x220] sm:$0xff]  ;;  %v791_v35 = vld [vmem:[%s7677_s6 + $0x230] sm:$0xff] }
  0x38   : > { %756 = vst [vmem:[%s7682_s29 + $0x88] sm:$0xff] %v755_v17  ;;  %v793_v36 = vld [vmem:[%s7677_s6 + $0x240] sm:$0xff]  ;;  %v795_v37 = vld [vmem:[%s7677_s6 + $0x250] sm:$0xff] }
  0x39   : > { %758 = vst [vmem:[%s7682_s29 + $0x90] sm:$0xff] %v757_v18  ;;  %v797_v38 = vld [vmem:[%s7677_s6 + $0x260] sm:$0xff]  ;;  %v799_v39 = vld [vmem:[%s7677_s6 + $0x270] sm:$0xff] }
  0x3a   : > { %760 = vst [vmem:[%s7682_s29 + $0x98] sm:$0xff] %v759_v19  ;;  %v801_v40 = vld [vmem:[%s7677_s6 + $0x280] sm:$0xff]  ;;  %v803_v41 = vld [vmem:[%s7677_s6 + $0x290] sm:$0xff] }
  0x3b   : > { %762 = vst [vmem:[%s7682_s29 + $0xa0] sm:$0xff] %v761_v20  ;;  %v805_v42 = vld [vmem:[%s7677_s6 + $0x2a0] sm:$0xff]  ;;  %v807_v43 = vld [vmem:[%s7677_s6 + $0x2b0] sm:$0xff] }
  0x3c   : > { %764 = vst [vmem:[%s7682_s29 + $0xa8] sm:$0xff] %v763_v21  ;;  %v809_v44 = vld [vmem:[%s7677_s6 + $0x2c0] sm:$0xff]  ;;  %v811_v45 = vld [vmem:[%s7677_s6 + $0x2d0] sm:$0xff] }
  0x3d   : > { %766 = vst [vmem:[%s7682_s29 + $0xb0] sm:$0xff] %v765_v22  ;;  %v813_v46 = vld [vmem:[%s7677_s6 + $0x2e0] sm:$0xff]  ;;  %v815_v47 = vld [vmem:[%s7677_s6 + $0x2f0] sm:$0xff] }
  0x3e   : > { %768 = vst [vmem:[%s7682_s29 + $0xb8] sm:$0xff] %v767_v23  ;;  %v817_v48 = vld [vmem:[%s7677_s6 + $0x300] sm:$0xff]  ;;  %v819_v49 = vld [vmem:[%s7677_s6 + $0x310] sm:$0xff] }
  0x3f   : > { %770 = vst [vmem:[%s7682_s29 + $0xc0] sm:$0xff] %v769_v24  ;;  %v821_v50 = vld [vmem:[%s7677_s6 + $0x320] sm:$0xff]  ;;  %v823_v51 = vld [vmem:[%s7677_s6 + $0x330] sm:$0xff] }
  0x40   : > { %772 = vst [vmem:[%s7682_s29 + $0xc8] sm:$0xff] %v771_v25  ;;  %v825_v52 = vld [vmem:[%s7677_s6 + $0x340] sm:$0xff]  ;;  %v827_v53 = vld [vmem:[%s7677_s6 + $0x350] sm:$0xff] }
  0x41   : > { %774 = vst [vmem:[%s7682_s29 + $0xd0] sm:$0xff] %v773_v26  ;;  %v829_v54 = vld [vmem:[%s7677_s6 + $0x360] sm:$0xff]  ;;  %v831_v55 = vld [vmem:[%s7677_s6 + $0x370] sm:$0xff] }
  0x42   : > { %776 = vst [vmem:[%s7682_s29 + $0xd8] sm:$0xff] %v775_v27  ;;  %v833_v56 = vld [vmem:[%s7677_s6 + $0x380] sm:$0xff]  ;;  %v835_v57 = vld [vmem:[%s7677_s6 + $0x390] sm:$0xff] }
  0x43   : > { %778 = vst [vmem:[%s7682_s29 + $0xe0] sm:$0xff] %v777_v28  ;;  %v837_v58 = vld [vmem:[%s7677_s6 + $0x3a0] sm:$0xff]  ;;  %v839_v59 = vld [vmem:[%s7677_s6 + $0x3b0] sm:$0xff] }
  0x44   : > { %780 = vst [vmem:[%s7682_s29 + $0xe8] sm:$0xff] %v779_v29  ;;  %v841_v60 = vld [vmem:[%s7677_s6 + $0x3c0] sm:$0xff]  ;;  %v843_v61 = vld [vmem:[%s7677_s6 + $0x3d0] sm:$0xff] }
  0x45   : > { %782 = vst [vmem:[%s7682_s29 + $0xf0] sm:$0xff] %v781_v30  ;;  %v845_v62 = vld [vmem:[%s7677_s6 + $0x3e0] sm:$0xff]  ;;  %v847_v63 = vld [vmem:[%s7677_s6 + $0x3f0] sm:$0xff] }
  0x46   : > { %784 = vst [vmem:[%s7682_s29 + $0xf8] sm:$0xff] %v783_v31  ;;  %v849_v0 = vld [vmem:[%s7677_s6 + $0x400] sm:$0xff]  ;;  %v851_v1 = vld [vmem:[%s7677_s6 + $0x410] sm:$0xff] }
  0x47   : > { %786 = vst [vmem:[%s7682_s29 + $0x100] sm:$0xff] %v785_v32  ;;  %v853_v2 = vld [vmem:[%s7677_s6 + $0x420] sm:$0xff]  ;;  %v855_v3 = vld [vmem:[%s7677_s6 + $0x430] sm:$0xff] }
  0x48   : > { %788 = vst [vmem:[%s7682_s29 + $0x108] sm:$0xff] %v787_v33  ;;  %v857_v4 = vld [vmem:[%s7677_s6 + $0x440] sm:$0xff]  ;;  %v859_v5 = vld [vmem:[%s7677_s6 + $0x450] sm:$0xff] }
  0x49   : > { %790 = vst [vmem:[%s7682_s29 + $0x110] sm:$0xff] %v789_v34  ;;  %v861_v6 = vld [vmem:[%s7677_s6 + $0x460] sm:$0xff]  ;;  %v863_v7 = vld [vmem:[%s7677_s6 + $0x470] sm:$0xff] }
  0x4a   : > { %792 = vst [vmem:[%s7682_s29 + $0x118] sm:$0xff] %v791_v35  ;;  %v865_v8 = vld [vmem:[%s7677_s6 + $0x480] sm:$0xff]  ;;  %v867_v9 = vld [vmem:[%s7677_s6 + $0x490] sm:$0xff] }
  0x4b   : > { %794 = vst [vmem:[%s7682_s29 + $0x120] sm:$0xff] %v793_v36  ;;  %v869_v10 = vld [vmem:[%s7677_s6 + $0x4a0] sm:$0xff]  ;;  %v871_v11 = vld [vmem:[%s7677_s6 + $0x4b0] sm:$0xff] }
  0x4c   : > { %796 = vst [vmem:[%s7682_s29 + $0x128] sm:$0xff] %v795_v37  ;;  %v873_v12 = vld [vmem:[%s7677_s6 + $0x4c0] sm:$0xff]  ;;  %v875_v13 = vld [vmem:[%s7677_s6 + $0x4d0] sm:$0xff] }
  0x4d   : > { %798 = vst [vmem:[%s7682_s29 + $0x130] sm:$0xff] %v797_v38  ;;  %v877_v14 = vld [vmem:[%s7677_s6 + $0x4e0] sm:$0xff]  ;;  %v879_v15 = vld [vmem:[%s7677_s6 + $0x4f0] sm:$0xff] }
  0x4e   : > { %800 = vst [vmem:[%s7682_s29 + $0x138] sm:$0xff] %v799_v39  ;;  %v881_v16 = vld [vmem:[%s7677_s6 + $0x500] sm:$0xff]  ;;  %v883_v17 = vld [vmem:[%s7677_s6 + $0x510] sm:$0xff] }
  0x4f   : > { %802 = vst [vmem:[%s7682_s29 + $0x140] sm:$0xff] %v801_v40  ;;  %v885_v18 = vld [vmem:[%s7677_s6 + $0x520] sm:$0xff]  ;;  %v887_v19 = vld [vmem:[%s7677_s6 + $0x530] sm:$0xff] }
  0x50   : > { %804 = vst [vmem:[%s7682_s29 + $0x148] sm:$0xff] %v803_v41  ;;  %v889_v20 = vld [vmem:[%s7677_s6 + $0x540] sm:$0xff]  ;;  %v891_v21 = vld [vmem:[%s7677_s6 + $0x550] sm:$0xff] }
  0x51   : > { %806 = vst [vmem:[%s7682_s29 + $0x150] sm:$0xff] %v805_v42  ;;  %v893_v22 = vld [vmem:[%s7677_s6 + $0x560] sm:$0xff]  ;;  %v895_v23 = vld [vmem:[%s7677_s6 + $0x570] sm:$0xff] }
  0x52   : > { %808 = vst [vmem:[%s7682_s29 + $0x158] sm:$0xff] %v807_v43  ;;  %v897_v24 = vld [vmem:[%s7677_s6 + $0x580] sm:$0xff]  ;;  %v899_v25 = vld [vmem:[%s7677_s6 + $0x590] sm:$0xff] }
  0x53   : > { %810 = vst [vmem:[%s7682_s29 + $0x160] sm:$0xff] %v809_v44  ;;  %v901_v26 = vld [vmem:[%s7677_s6 + $0x5a0] sm:$0xff]  ;;  %v903_v27 = vld [vmem:[%s7677_s6 + $0x5b0] sm:$0xff] }
  0x54   : > { %812 = vst [vmem:[%s7682_s29 + $0x168] sm:$0xff] %v811_v45  ;;  %v905_v28 = vld [vmem:[%s7677_s6 + $0x5c0] sm:$0xff]  ;;  %v907_v29 = vld [vmem:[%s7677_s6 + $0x5d0] sm:$0xff] }
  0x55   : > { %814 = vst [vmem:[%s7682_s29 + $0x170] sm:$0xff] %v813_v46  ;;  %v909_v30 = vld [vmem:[%s7677_s6 + $0x5e0] sm:$0xff]  ;;  %v911_v31 = vld [vmem:[%s7677_s6 + $0x5f0] sm:$0xff] }
  0x56   : > { %816 = vst [vmem:[%s7682_s29 + $0x178] sm:$0xff] %v815_v47  ;;  %v913_v32 = vld [vmem:[%s7677_s6 + $0x600] sm:$0xff]  ;;  %v915_v33 = vld [vmem:[%s7677_s6 + $0x610] sm:$0xff] }
  0x57   : > { %818 = vst [vmem:[%s7682_s29 + $0x180] sm:$0xff] %v817_v48  ;;  %v917_v34 = vld [vmem:[%s7677_s6 + $0x620] sm:$0xff]  ;;  %v919_v35 = vld [vmem:[%s7677_s6 + $0x630] sm:$0xff] }
  0x58   : > { %820 = vst [vmem:[%s7682_s29 + $0x188] sm:$0xff] %v819_v49  ;;  %v921_v36 = vld [vmem:[%s7677_s6 + $0x640] sm:$0xff]  ;;  %v923_v37 = vld [vmem:[%s7677_s6 + $0x650] sm:$0xff] }
  0x59   : > { %822 = vst [vmem:[%s7682_s29 + $0x190] sm:$0xff] %v821_v50  ;;  %v925_v38 = vld [vmem:[%s7677_s6 + $0x660] sm:$0xff]  ;;  %v927_v39 = vld [vmem:[%s7677_s6 + $0x670] sm:$0xff] }
  0x5a   : > { %824 = vst [vmem:[%s7682_s29 + $0x198] sm:$0xff] %v823_v51  ;;  %v929_v40 = vld [vmem:[%s7677_s6 + $0x680] sm:$0xff]  ;;  %v931_v41 = vld [vmem:[%s7677_s6 + $0x690] sm:$0xff] }
  0x5b   : > { %826 = vst [vmem:[%s7682_s29 + $0x1a0] sm:$0xff] %v825_v52  ;;  %v933_v42 = vld [vmem:[%s7677_s6 + $0x6a0] sm:$0xff]  ;;  %v935_v43 = vld [vmem:[%s7677_s6 + $0x6b0] sm:$0xff] }
  0x5c   : > { %828 = vst [vmem:[%s7682_s29 + $0x1a8] sm:$0xff] %v827_v53  ;;  %v937_v44 = vld [vmem:[%s7677_s6 + $0x6c0] sm:$0xff]  ;;  %v939_v45 = vld [vmem:[%s7677_s6 + $0x6d0] sm:$0xff] }
  0x5d   : > { %830 = vst [vmem:[%s7682_s29 + $0x1b0] sm:$0xff] %v829_v54  ;;  %v941_v46 = vld [vmem:[%s7677_s6 + $0x6e0] sm:$0xff]  ;;  %v943_v47 = vld [vmem:[%s7677_s6 + $0x6f0] sm:$0xff] }
  0x5e   : > { %832 = vst [vmem:[%s7682_s29 + $0x1b8] sm:$0xff] %v831_v55  ;;  %v945_v48 = vld [vmem:[%s7677_s6 + $0x700] sm:$0xff]  ;;  %v947_v49 = vld [vmem:[%s7677_s6 + $0x710] sm:$0xff] }
  0x5f   : > { %834 = vst [vmem:[%s7682_s29 + $0x1c0] sm:$0xff] %v833_v56  ;;  %v949_v50 = vld [vmem:[%s7677_s6 + $0x720] sm:$0xff]  ;;  %v951_v51 = vld [vmem:[%s7677_s6 + $0x730] sm:$0xff] }
  0x60   : > { %836 = vst [vmem:[%s7682_s29 + $0x1c8] sm:$0xff] %v835_v57  ;;  %v953_v52 = vld [vmem:[%s7677_s6 + $0x740] sm:$0xff]  ;;  %v955_v53 = vld [vmem:[%s7677_s6 + $0x750] sm:$0xff] }
  0x61   : > { %838 = vst [vmem:[%s7682_s29 + $0x1d0] sm:$0xff] %v837_v58  ;;  %v957_v54 = vld [vmem:[%s7677_s6 + $0x760] sm:$0xff]  ;;  %v959_v55 = vld [vmem:[%s7677_s6 + $0x770] sm:$0xff] }
  0x62   : > { %840 = vst [vmem:[%s7682_s29 + $0x1d8] sm:$0xff] %v839_v59  ;;  %v961_v56 = vld [vmem:[%s7677_s6 + $0x780] sm:$0xff]  ;;  %v963_v57 = vld [vmem:[%s7677_s6 + $0x790] sm:$0xff] }
  0x63   : > { %842 = vst [vmem:[%s7682_s29 + $0x1e0] sm:$0xff] %v841_v60  ;;  %v965_v58 = vld [vmem:[%s7677_s6 + $0x7a0] sm:$0xff]  ;;  %v967_v59 = vld [vmem:[%s7677_s6 + $0x7b0] sm:$0xff] }
  0x64   : > { %844 = vst [vmem:[%s7682_s29 + $0x1e8] sm:$0xff] %v843_v61  ;;  %v969_v60 = vld [vmem:[%s7677_s6 + $0x7c0] sm:$0xff]  ;;  %v971_v61 = vld [vmem:[%s7677_s6 + $0x7d0] sm:$0xff] }
  0x65   : > { %846 = vst [vmem:[%s7682_s29 + $0x1f0] sm:$0xff] %v845_v62  ;;  %v973_v62 = vld [vmem:[%s7677_s6 + $0x7e0] sm:$0xff] }
  0x66   : > { %848 = vst [vmem:[%s7682_s29 + $0x1f8] sm:$0xff] %v847_v63  ;;  %v975_v63 = vld [vmem:[%s7677_s6 + $0x7f0] sm:$0xff] }
  0x67   : > { %850 = vst [vmem:[%s7682_s29 + $0x200] sm:$0xff] %v849_v0  ;;  %v977_v0 = vld [vmem:[%s7677_s6 + $0x800] sm:$0xff] }
  0x68   : > { %852 = vst [vmem:[%s7682_s29 + $0x208] sm:$0xff] %v851_v1  ;;  %v979_v1 = vld [vmem:[%s7677_s6 + $0x810] sm:$0xff] }
  0x69   : > { %854 = vst [vmem:[%s7682_s29 + $0x210] sm:$0xff] %v853_v2  ;;  %v981_v2 = vld [vmem:[%s7677_s6 + $0x820] sm:$0xff] }
  0x6a   : > { %856 = vst [vmem:[%s7682_s29 + $0x218] sm:$0xff] %v855_v3  ;;  %v983_v3 = vld [vmem:[%s7677_s6 + $0x830] sm:$0xff] }
  0x6b   : > { %858 = vst [vmem:[%s7682_s29 + $0x220] sm:$0xff] %v857_v4  ;;  %v985_v4 = vld [vmem:[%s7677_s6 + $0x840] sm:$0xff] }
  0x6c   : > { %860 = vst [vmem:[%s7682_s29 + $0x228] sm:$0xff] %v859_v5  ;;  %v987_v5 = vld [vmem:[%s7677_s6 + $0x850] sm:$0xff] }
  0x6d   : > { %862 = vst [vmem:[%s7682_s29 + $0x230] sm:$0xff] %v861_v6  ;;  %v989_v6 = vld [vmem:[%s7677_s6 + $0x860] sm:$0xff] }
  0x6e   : > { %864 = vst [vmem:[%s7682_s29 + $0x238] sm:$0xff] %v863_v7  ;;  %v991_v7 = vld [vmem:[%s7677_s6 + $0x870] sm:$0xff] }
  0x6f   : > { %866 = vst [vmem:[%s7682_s29 + $0x240] sm:$0xff] %v865_v8  ;;  %v993_v8 = vld [vmem:[%s7677_s6 + $0x880] sm:$0xff] }
  0x70   : > { %868 = vst [vmem:[%s7682_s29 + $0x248] sm:$0xff] %v867_v9  ;;  %v995_v9 = vld [vmem:[%s7677_s6 + $0x890] sm:$0xff] }
  0x71   : > { %870 = vst [vmem:[%s7682_s29 + $0x250] sm:$0xff] %v869_v10  ;;  %v997_v10 = vld [vmem:[%s7677_s6 + $0x8a0] sm:$0xff] }
  0x72   : > { %872 = vst [vmem:[%s7682_s29 + $0x258] sm:$0xff] %v871_v11  ;;  %v999_v11 = vld [vmem:[%s7677_s6 + $0x8b0] sm:$0xff] }
  0x73   : > { %874 = vst [vmem:[%s7682_s29 + $0x260] sm:$0xff] %v873_v12  ;;  %v1001_v12 = vld [vmem:[%s7677_s6 + $0x8c0] sm:$0xff] }
  0x74   : > { %876 = vst [vmem:[%s7682_s29 + $0x268] sm:$0xff] %v875_v13  ;;  %v1003_v13 = vld [vmem:[%s7677_s6 + $0x8d0] sm:$0xff] }
  0x75   : > { %878 = vst [vmem:[%s7682_s29 + $0x270] sm:$0xff] %v877_v14  ;;  %v1005_v14 = vld [vmem:[%s7677_s6 + $0x8e0] sm:$0xff] }
  0x76   : > { %880 = vst [vmem:[%s7682_s29 + $0x278] sm:$0xff] %v879_v15  ;;  %v1007_v15 = vld [vmem:[%s7677_s6 + $0x8f0] sm:$0xff] }
  0x77   : > { %882 = vst [vmem:[%s7682_s29 + $0x280] sm:$0xff] %v881_v16  ;;  %v1009_v16 = vld [vmem:[%s7677_s6 + $0x900] sm:$0xff] }
  0x78   : > { %884 = vst [vmem:[%s7682_s29 + $0x288] sm:$0xff] %v883_v17  ;;  %v1011_v17 = vld [vmem:[%s7677_s6 + $0x910] sm:$0xff] }
  0x79   : > { %886 = vst [vmem:[%s7682_s29 + $0x290] sm:$0xff] %v885_v18  ;;  %v1013_v18 = vld [vmem:[%s7677_s6 + $0x920] sm:$0xff] }
  0x7a   : > { %888 = vst [vmem:[%s7682_s29 + $0x298] sm:$0xff] %v887_v19  ;;  %v1015_v19 = vld [vmem:[%s7677_s6 + $0x930] sm:$0xff] }
  0x7b   : > { %890 = vst [vmem:[%s7682_s29 + $0x2a0] sm:$0xff] %v889_v20  ;;  %v1017_v20 = vld [vmem:[%s7677_s6 + $0x940] sm:$0xff] }
  0x7c   : > { %892 = vst [vmem:[%s7682_s29 + $0x2a8] sm:$0xff] %v891_v21  ;;  %v1019_v21 = vld [vmem:[%s7677_s6 + $0x950] sm:$0xff] }
  0x7d   : > { %894 = vst [vmem:[%s7682_s29 + $0x2b0] sm:$0xff] %v893_v22  ;;  %v1021_v22 = vld [vmem:[%s7677_s6 + $0x960] sm:$0xff] }
  0x7e   : > { %896 = vst [vmem:[%s7682_s29 + $0x2b8] sm:$0xff] %v895_v23  ;;  %v1023_v23 = vld [vmem:[%s7677_s6 + $0x970] sm:$0xff] }
  0x7f   : > { %898 = vst [vmem:[%s7682_s29 + $0x2c0] sm:$0xff] %v897_v24  ;;  %v1025_v24 = vld [vmem:[%s7677_s6 + $0x980] sm:$0xff] }
  0x80   : > { %900 = vst [vmem:[%s7682_s29 + $0x2c8] sm:$0xff] %v899_v25  ;;  %v1027_v25 = vld [vmem:[%s7677_s6 + $0x990] sm:$0xff] }
  0x81   : > { %902 = vst [vmem:[%s7682_s29 + $0x2d0] sm:$0xff] %v901_v26  ;;  %v1029_v26 = vld [vmem:[%s7677_s6 + $0x9a0] sm:$0xff] }
  0x82   : > { %904 = vst [vmem:[%s7682_s29 + $0x2d8] sm:$0xff] %v903_v27  ;;  %v1031_v27 = vld [vmem:[%s7677_s6 + $0x9b0] sm:$0xff] }
  0x83   : > { %906 = vst [vmem:[%s7682_s29 + $0x2e0] sm:$0xff] %v905_v28  ;;  %v1033_v28 = vld [vmem:[%s7677_s6 + $0x9c0] sm:$0xff] }
  0x84   : > { %908 = vst [vmem:[%s7682_s29 + $0x2e8] sm:$0xff] %v907_v29  ;;  %v1035_v29 = vld [vmem:[%s7677_s6 + $0x9d0] sm:$0xff] }
  0x85   : > { %910 = vst [vmem:[%s7682_s29 + $0x2f0] sm:$0xff] %v909_v30  ;;  %v1037_v30 = vld [vmem:[%s7677_s6 + $0x9e0] sm:$0xff] }
  0x86   : > { %912 = vst [vmem:[%s7682_s29 + $0x2f8] sm:$0xff] %v911_v31  ;;  %v1039_v31 = vld [vmem:[%s7677_s6 + $0x9f0] sm:$0xff] }
  0x87   : > { %914 = vst [vmem:[%s7682_s29 + $0x300] sm:$0xff] %v913_v32  ;;  %v1041_v32 = vld [vmem:[%s7677_s6 + $0xa00] sm:$0xff] }
  0x88   : > { %916 = vst [vmem:[%s7682_s29 + $0x308] sm:$0xff] %v915_v33  ;;  %v1043_v33 = vld [vmem:[%s7677_s6 + $0xa10] sm:$0xff] }
  0x89   : > { %918 = vst [vmem:[%s7682_s29 + $0x310] sm:$0xff] %v917_v34  ;;  %v1045_v34 = vld [vmem:[%s7677_s6 + $0xa20] sm:$0xff] }
  0x8a   : > { %920 = vst [vmem:[%s7682_s29 + $0x318] sm:$0xff] %v919_v35  ;;  %v1047_v35 = vld [vmem:[%s7677_s6 + $0xa30] sm:$0xff] }
  0x8b   : > { %922 = vst [vmem:[%s7682_s29 + $0x320] sm:$0xff] %v921_v36  ;;  %v1049_v36 = vld [vmem:[%s7677_s6 + $0xa40] sm:$0xff] }
  0x8c   : > { %924 = vst [vmem:[%s7682_s29 + $0x328] sm:$0xff] %v923_v37  ;;  %v1051_v37 = vld [vmem:[%s7677_s6 + $0xa50] sm:$0xff] }
  0x8d   : > { %926 = vst [vmem:[%s7682_s29 + $0x330] sm:$0xff] %v925_v38  ;;  %v1053_v38 = vld [vmem:[%s7677_s6 + $0xa60] sm:$0xff] }
  0x8e   : > { %928 = vst [vmem:[%s7682_s29 + $0x338] sm:$0xff] %v927_v39  ;;  %v1055_v39 = vld [vmem:[%s7677_s6 + $0xa70] sm:$0xff] }
  0x8f   : > { %930 = vst [vmem:[%s7682_s29 + $0x340] sm:$0xff] %v929_v40  ;;  %v1057_v40 = vld [vmem:[%s7677_s6 + $0xa80] sm:$0xff] }
  0x90   : > { %932 = vst [vmem:[%s7682_s29 + $0x348] sm:$0xff] %v931_v41  ;;  %v1059_v41 = vld [vmem:[%s7677_s6 + $0xa90] sm:$0xff] }
  0x91   : > { %934 = vst [vmem:[%s7682_s29 + $0x350] sm:$0xff] %v933_v42  ;;  %v1061_v42 = vld [vmem:[%s7677_s6 + $0xaa0] sm:$0xff] }
  0x92   : > { %936 = vst [vmem:[%s7682_s29 + $0x358] sm:$0xff] %v935_v43  ;;  %v1063_v43 = vld [vmem:[%s7677_s6 + $0xab0] sm:$0xff] }
  0x93   : > { %938 = vst [vmem:[%s7682_s29 + $0x360] sm:$0xff] %v937_v44  ;;  %v1065_v44 = vld [vmem:[%s7677_s6 + $0xac0] sm:$0xff] }
  0x94   : > { %940 = vst [vmem:[%s7682_s29 + $0x368] sm:$0xff] %v939_v45  ;;  %v1067_v45 = vld [vmem:[%s7677_s6 + $0xad0] sm:$0xff] }
  0x95   : > { %942 = vst [vmem:[%s7682_s29 + $0x370] sm:$0xff] %v941_v46  ;;  %v1069_v46 = vld [vmem:[%s7677_s6 + $0xae0] sm:$0xff] }
  0x96   : > { %944 = vst [vmem:[%s7682_s29 + $0x378] sm:$0xff] %v943_v47  ;;  %v1071_v47 = vld [vmem:[%s7677_s6 + $0xaf0] sm:$0xff] }
  0x97   : > { %946 = vst [vmem:[%s7682_s29 + $0x380] sm:$0xff] %v945_v48  ;;  %v1073_v48 = vld [vmem:[%s7677_s6 + $0xb00] sm:$0xff] }
  0x98   : > { %948 = vst [vmem:[%s7682_s29 + $0x388] sm:$0xff] %v947_v49  ;;  %v1075_v49 = vld [vmem:[%s7677_s6 + $0xb10] sm:$0xff] }
  0x99   : > { %950 = vst [vmem:[%s7682_s29 + $0x390] sm:$0xff] %v949_v50  ;;  %v1077_v50 = vld [vmem:[%s7677_s6 + $0xb20] sm:$0xff] }
  0x9a   : > { %952 = vst [vmem:[%s7682_s29 + $0x398] sm:$0xff] %v951_v51  ;;  %v1079_v51 = vld [vmem:[%s7677_s6 + $0xb30] sm:$0xff] }
  0x9b   : > { %954 = vst [vmem:[%s7682_s29 + $0x3a0] sm:$0xff] %v953_v52  ;;  %v1081_v52 = vld [vmem:[%s7677_s6 + $0xb40] sm:$0xff] }
  0x9c   : > { %956 = vst [vmem:[%s7682_s29 + $0x3a8] sm:$0xff] %v955_v53  ;;  %v1083_v53 = vld [vmem:[%s7677_s6 + $0xb50] sm:$0xff] }
  0x9d   : > { %958 = vst [vmem:[%s7682_s29 + $0x3b0] sm:$0xff] %v957_v54  ;;  %v1085_v54 = vld [vmem:[%s7677_s6 + $0xb60] sm:$0xff] }
  0x9e   : > { %960 = vst [vmem:[%s7682_s29 + $0x3b8] sm:$0xff] %v959_v55  ;;  %v1087_v55 = vld [vmem:[%s7677_s6 + $0xb70] sm:$0xff] }
  0x9f   : > { %962 = vst [vmem:[%s7682_s29 + $0x3c0] sm:$0xff] %v961_v56  ;;  %v1089_v56 = vld [vmem:[%s7677_s6 + $0xb80] sm:$0xff] }
  0xa0   : > { %964 = vst [vmem:[%s7682_s29 + $0x3c8] sm:$0xff] %v963_v57  ;;  %v1091_v57 = vld [vmem:[%s7677_s6 + $0xb90] sm:$0xff] }
  0xa1   : > { %966 = vst [vmem:[%s7682_s29 + $0x3d0] sm:$0xff] %v965_v58  ;;  %v1093_v58 = vld [vmem:[%s7677_s6 + $0xba0] sm:$0xff] }
  0xa2   : > { %968 = vst [vmem:[%s7682_s29 + $0x3d8] sm:$0xff] %v967_v59  ;;  %v1095_v59 = vld [vmem:[%s7677_s6 + $0xbb0] sm:$0xff] }
  0xa3   : > { %970 = vst [vmem:[%s7682_s29 + $0x3e0] sm:$0xff] %v969_v60  ;;  %v1097_v60 = vld [vmem:[%s7677_s6 + $0xbc0] sm:$0xff] }
  0xa4   : > { %972 = vst [vmem:[%s7682_s29 + $0x3e8] sm:$0xff] %v971_v61  ;;  %v1099_v61 = vld [vmem:[%s7677_s6 + $0xbd0] sm:$0xff] }
  0xa5   : > { %974 = vst [vmem:[%s7682_s29 + $0x3f0] sm:$0xff] %v973_v62  ;;  %v1101_v62 = vld [vmem:[%s7677_s6 + $0xbe0] sm:$0xff] }
  0xa6   : > { %976 = vst [vmem:[%s7682_s29 + $0x3f8] sm:$0xff] %v975_v63  ;;  %v1103_v63 = vld [vmem:[%s7677_s6 + $0xbf0] sm:$0xff] }
  0xa7   : > { %978 = vst [vmem:[%s7682_s29 + $0x400] sm:$0xff] %v977_v0  ;;  %v1105_v0 = vld [vmem:[%s7677_s6 + $0xc00] sm:$0xff] }
  0xa8   : > { %980 = vst [vmem:[%s7682_s29 + $0x408] sm:$0xff] %v979_v1  ;;  %v1107_v1 = vld [vmem:[%s7677_s6 + $0xc10] sm:$0xff] }
  0xa9   : > { %982 = vst [vmem:[%s7682_s29 + $0x410] sm:$0xff] %v981_v2  ;;  %v1109_v2 = vld [vmem:[%s7677_s6 + $0xc20] sm:$0xff] }
  0xaa   : > { %984 = vst [vmem:[%s7682_s29 + $0x418] sm:$0xff] %v983_v3  ;;  %v1111_v3 = vld [vmem:[%s7677_s6 + $0xc30] sm:$0xff] }
  0xab   : > { %986 = vst [vmem:[%s7682_s29 + $0x420] sm:$0xff] %v985_v4  ;;  %v1113_v4 = vld [vmem:[%s7677_s6 + $0xc40] sm:$0xff] }
  0xac   : > { %988 = vst [vmem:[%s7682_s29 + $0x428] sm:$0xff] %v987_v5  ;;  %v1115_v5 = vld [vmem:[%s7677_s6 + $0xc50] sm:$0xff] }
  0xad   : > { %990 = vst [vmem:[%s7682_s29 + $0x430] sm:$0xff] %v989_v6  ;;  %v1117_v6 = vld [vmem:[%s7677_s6 + $0xc60] sm:$0xff] }
  0xae   : > { %992 = vst [vmem:[%s7682_s29 + $0x438] sm:$0xff] %v991_v7  ;;  %v1119_v7 = vld [vmem:[%s7677_s6 + $0xc70] sm:$0xff] }
  0xaf   : > { %994 = vst [vmem:[%s7682_s29 + $0x440] sm:$0xff] %v993_v8  ;;  %v1121_v8 = vld [vmem:[%s7677_s6 + $0xc80] sm:$0xff] }
  0xb0   : > { %996 = vst [vmem:[%s7682_s29 + $0x448] sm:$0xff] %v995_v9  ;;  %v1123_v9 = vld [vmem:[%s7677_s6 + $0xc90] sm:$0xff] }
  0xb1   : > { %998 = vst [vmem:[%s7682_s29 + $0x450] sm:$0xff] %v997_v10  ;;  %v1125_v10 = vld [vmem:[%s7677_s6 + $0xca0] sm:$0xff] }
  0xb2   : > { %1000 = vst [vmem:[%s7682_s29 + $0x458] sm:$0xff] %v999_v11  ;;  %v1127_v11 = vld [vmem:[%s7677_s6 + $0xcb0] sm:$0xff] }
  0xb3   : > { %1002 = vst [vmem:[%s7682_s29 + $0x460] sm:$0xff] %v1001_v12  ;;  %v1129_v12 = vld [vmem:[%s7677_s6 + $0xcc0] sm:$0xff] }
  0xb4   : > { %1004 = vst [vmem:[%s7682_s29 + $0x468] sm:$0xff] %v1003_v13  ;;  %v1131_v13 = vld [vmem:[%s7677_s6 + $0xcd0] sm:$0xff] }
  0xb5   : > { %1006 = vst [vmem:[%s7682_s29 + $0x470] sm:$0xff] %v1005_v14  ;;  %v1133_v14 = vld [vmem:[%s7677_s6 + $0xce0] sm:$0xff] }
  0xb6   : > { %1008 = vst [vmem:[%s7682_s29 + $0x478] sm:$0xff] %v1007_v15  ;;  %v1135_v15 = vld [vmem:[%s7677_s6 + $0xcf0] sm:$0xff] }
  0xb7   : > { %1010 = vst [vmem:[%s7682_s29 + $0x480] sm:$0xff] %v1009_v16  ;;  %v1137_v16 = vld [vmem:[%s7677_s6 + $0xd00] sm:$0xff] }
  0xb8   : > { %1012 = vst [vmem:[%s7682_s29 + $0x488] sm:$0xff] %v1011_v17  ;;  %v1139_v17 = vld [vmem:[%s7677_s6 + $0xd10] sm:$0xff] }
  0xb9   : > { %1014 = vst [vmem:[%s7682_s29 + $0x490] sm:$0xff] %v1013_v18  ;;  %v1141_v18 = vld [vmem:[%s7677_s6 + $0xd20] sm:$0xff] }
  0xba   : > { %1016 = vst [vmem:[%s7682_s29 + $0x498] sm:$0xff] %v1015_v19  ;;  %v1143_v19 = vld [vmem:[%s7677_s6 + $0xd30] sm:$0xff] }
  0xbb   : > { %1018 = vst [vmem:[%s7682_s29 + $0x4a0] sm:$0xff] %v1017_v20  ;;  %v1145_v20 = vld [vmem:[%s7677_s6 + $0xd40] sm:$0xff] }
  0xbc   : > { %1020 = vst [vmem:[%s7682_s29 + $0x4a8] sm:$0xff] %v1019_v21  ;;  %v1147_v21 = vld [vmem:[%s7677_s6 + $0xd50] sm:$0xff] }
  0xbd   : > { %1022 = vst [vmem:[%s7682_s29 + $0x4b0] sm:$0xff] %v1021_v22  ;;  %v1149_v22 = vld [vmem:[%s7677_s6 + $0xd60] sm:$0xff] }
  0xbe   : > { %1024 = vst [vmem:[%s7682_s29 + $0x4b8] sm:$0xff] %v1023_v23  ;;  %v1151_v23 = vld [vmem:[%s7677_s6 + $0xd70] sm:$0xff] }
  0xbf   : > { %1026 = vst [vmem:[%s7682_s29 + $0x4c0] sm:$0xff] %v1025_v24  ;;  %v1153_v24 = vld [vmem:[%s7677_s6 + $0xd80] sm:$0xff] }
  0xc0   : > { %1028 = vst [vmem:[%s7682_s29 + $0x4c8] sm:$0xff] %v1027_v25  ;;  %v1155_v25 = vld [vmem:[%s7677_s6 + $0xd90] sm:$0xff] }
  0xc1   : > { %1030 = vst [vmem:[%s7682_s29 + $0x4d0] sm:$0xff] %v1029_v26  ;;  %v1157_v26 = vld [vmem:[%s7677_s6 + $0xda0] sm:$0xff] }
  0xc2   : > { %1032 = vst [vmem:[%s7682_s29 + $0x4d8] sm:$0xff] %v1031_v27  ;;  %v1159_v27 = vld [vmem:[%s7677_s6 + $0xdb0] sm:$0xff] }
  0xc3   : > { %1034 = vst [vmem:[%s7682_s29 + $0x4e0] sm:$0xff] %v1033_v28  ;;  %v1161_v28 = vld [vmem:[%s7677_s6 + $0xdc0] sm:$0xff] }
  0xc4   : > { %1036 = vst [vmem:[%s7682_s29 + $0x4e8] sm:$0xff] %v1035_v29  ;;  %v1163_v29 = vld [vmem:[%s7677_s6 + $0xdd0] sm:$0xff] }
  0xc5   : > { %1038 = vst [vmem:[%s7682_s29 + $0x4f0] sm:$0xff] %v1037_v30  ;;  %v1165_v30 = vld [vmem:[%s7677_s6 + $0xde0] sm:$0xff] }
  0xc6   : > { %1040 = vst [vmem:[%s7682_s29 + $0x4f8] sm:$0xff] %v1039_v31  ;;  %v1167_v31 = vld [vmem:[%s7677_s6 + $0xdf0] sm:$0xff] }
  0xc7   : > { %1042 = vst [vmem:[%s7682_s29 + $0x500] sm:$0xff] %v1041_v32  ;;  %v1169_v32 = vld [vmem:[%s7677_s6 + $0xe00] sm:$0xff] }
  0xc8   : > { %1044 = vst [vmem:[%s7682_s29 + $0x508] sm:$0xff] %v1043_v33  ;;  %v1171_v33 = vld [vmem:[%s7677_s6 + $0xe10] sm:$0xff] }
  0xc9   : > { %1046 = vst [vmem:[%s7682_s29 + $0x510] sm:$0xff] %v1045_v34  ;;  %v1173_v34 = vld [vmem:[%s7677_s6 + $0xe20] sm:$0xff] }
  0xca   : > { %1048 = vst [vmem:[%s7682_s29 + $0x518] sm:$0xff] %v1047_v35  ;;  %v1175_v35 = vld [vmem:[%s7677_s6 + $0xe30] sm:$0xff] }
  0xcb   : > { %1050 = vst [vmem:[%s7682_s29 + $0x520] sm:$0xff] %v1049_v36  ;;  %v1177_v36 = vld [vmem:[%s7677_s6 + $0xe40] sm:$0xff] }
  0xcc   : > { %1052 = vst [vmem:[%s7682_s29 + $0x528] sm:$0xff] %v1051_v37  ;;  %v1179_v37 = vld [vmem:[%s7677_s6 + $0xe50] sm:$0xff] }
  0xcd   : > { %1054 = vst [vmem:[%s7682_s29 + $0x530] sm:$0xff] %v1053_v38  ;;  %v1181_v38 = vld [vmem:[%s7677_s6 + $0xe60] sm:$0xff] }
  0xce   : > { %1056 = vst [vmem:[%s7682_s29 + $0x538] sm:$0xff] %v1055_v39  ;;  %v1183_v39 = vld [vmem:[%s7677_s6 + $0xe70] sm:$0xff] }
  0xcf   : > { %1058 = vst [vmem:[%s7682_s29 + $0x540] sm:$0xff] %v1057_v40  ;;  %v1185_v40 = vld [vmem:[%s7677_s6 + $0xe80] sm:$0xff] }
  0xd0   : > { %1060 = vst [vmem:[%s7682_s29 + $0x548] sm:$0xff] %v1059_v41  ;;  %v1187_v41 = vld [vmem:[%s7677_s6 + $0xe90] sm:$0xff] }
  0xd1   : > { %1062 = vst [vmem:[%s7682_s29 + $0x550] sm:$0xff] %v1061_v42  ;;  %v1189_v42 = vld [vmem:[%s7677_s6 + $0xea0] sm:$0xff] }
  0xd2   : > { %1064 = vst [vmem:[%s7682_s29 + $0x558] sm:$0xff] %v1063_v43  ;;  %v1191_v43 = vld [vmem:[%s7677_s6 + $0xeb0] sm:$0xff] }
  0xd3   : > { %1066 = vst [vmem:[%s7682_s29 + $0x560] sm:$0xff] %v1065_v44  ;;  %v1193_v44 = vld [vmem:[%s7677_s6 + $0xec0] sm:$0xff] }
  0xd4   : > { %1068 = vst [vmem:[%s7682_s29 + $0x568] sm:$0xff] %v1067_v45  ;;  %v1195_v45 = vld [vmem:[%s7677_s6 + $0xed0] sm:$0xff] }
  0xd5   : > { %1070 = vst [vmem:[%s7682_s29 + $0x570] sm:$0xff] %v1069_v46  ;;  %v1197_v46 = vld [vmem:[%s7677_s6 + $0xee0] sm:$0xff] }
  0xd6   : > { %1072 = vst [vmem:[%s7682_s29 + $0x578] sm:$0xff] %v1071_v47  ;;  %v1199_v47 = vld [vmem:[%s7677_s6 + $0xef0] sm:$0xff] }
  0xd7   : > { %1074 = vst [vmem:[%s7682_s29 + $0x580] sm:$0xff] %v1073_v48  ;;  %v1201_v48 = vld [vmem:[%s7677_s6 + $0xf00] sm:$0xff] }
  0xd8   : > { %1076 = vst [vmem:[%s7682_s29 + $0x588] sm:$0xff] %v1075_v49  ;;  %v1203_v49 = vld [vmem:[%s7677_s6 + $0xf10] sm:$0xff] }
  0xd9   : > { %1078 = vst [vmem:[%s7682_s29 + $0x590] sm:$0xff] %v1077_v50  ;;  %v1205_v50 = vld [vmem:[%s7677_s6 + $0xf20] sm:$0xff] }
  0xda   : > { %1080 = vst [vmem:[%s7682_s29 + $0x598] sm:$0xff] %v1079_v51  ;;  %v1207_v51 = vld [vmem:[%s7677_s6 + $0xf30] sm:$0xff] }
  0xdb   : > { %1082 = vst [vmem:[%s7682_s29 + $0x5a0] sm:$0xff] %v1081_v52  ;;  %v1209_v52 = vld [vmem:[%s7677_s6 + $0xf40] sm:$0xff] }
  0xdc   : > { %1084 = vst [vmem:[%s7682_s29 + $0x5a8] sm:$0xff] %v1083_v53  ;;  %v1211_v53 = vld [vmem:[%s7677_s6 + $0xf50] sm:$0xff] }
  0xdd   : > { %1086 = vst [vmem:[%s7682_s29 + $0x5b0] sm:$0xff] %v1085_v54  ;;  %v1213_v54 = vld [vmem:[%s7677_s6 + $0xf60] sm:$0xff] }
  0xde   : > { %1088 = vst [vmem:[%s7682_s29 + $0x5b8] sm:$0xff] %v1087_v55  ;;  %v1215_v55 = vld [vmem:[%s7677_s6 + $0xf70] sm:$0xff] }
  0xdf   : > { %1090 = vst [vmem:[%s7682_s29 + $0x5c0] sm:$0xff] %v1089_v56  ;;  %v1217_v56 = vld [vmem:[%s7677_s6 + $0xf80] sm:$0xff] }
  0xe0   : > { %1092 = vst [vmem:[%s7682_s29 + $0x5c8] sm:$0xff] %v1091_v57  ;;  %v1219_v57 = vld [vmem:[%s7677_s6 + $0xf90] sm:$0xff] }
  0xe1   : > { %1094 = vst [vmem:[%s7682_s29 + $0x5d0] sm:$0xff] %v1093_v58  ;;  %v1221_v58 = vld [vmem:[%s7677_s6 + $0xfa0] sm:$0xff] }
  0xe2   : > { %1096 = vst [vmem:[%s7682_s29 + $0x5d8] sm:$0xff] %v1095_v59  ;;  %v1223_v59 = vld [vmem:[%s7677_s6 + $0xfb0] sm:$0xff] }
  0xe3   : > { %1098 = vst [vmem:[%s7682_s29 + $0x5e0] sm:$0xff] %v1097_v60  ;;  %v1225_v60 = vld [vmem:[%s7677_s6 + $0xfc0] sm:$0xff] }
  0xe4   : > { %1100 = vst [vmem:[%s7682_s29 + $0x5e8] sm:$0xff] %v1099_v61  ;;  %v1227_v61 = vld [vmem:[%s7677_s6 + $0xfd0] sm:$0xff] }
  0xe5   : > { %1102 = vst [vmem:[%s7682_s29 + $0x5f0] sm:$0xff] %v1101_v62  ;;  %v1229_v62 = vld [vmem:[%s7677_s6 + $0xfe0] sm:$0xff] }
  0xe6   : > { %1104 = vst [vmem:[%s7682_s29 + $0x5f8] sm:$0xff] %v1103_v63  ;;  %v1231_v63 = vld [vmem:[%s7677_s6 + $0xff0] sm:$0xff] }
  0xe7   : > { %1106 = vst [vmem:[%s7682_s29 + $0x600] sm:$0xff] %v1105_v0 }
  0xe8   : > { %1108 = vst [vmem:[%s7682_s29 + $0x608] sm:$0xff] %v1107_v1 }
  0xe9   : > { %1110 = vst [vmem:[%s7682_s29 + $0x610] sm:$0xff] %v1109_v2 }
  0xea   : > { %1112 = vst [vmem:[%s7682_s29 + $0x618] sm:$0xff] %v1111_v3 }
  0xeb   : > { %1114 = vst [vmem:[%s7682_s29 + $0x620] sm:$0xff] %v1113_v4 }
  0xec   : > { %1116 = vst [vmem:[%s7682_s29 + $0x628] sm:$0xff] %v1115_v5 }
  0xed   : > { %1118 = vst [vmem:[%s7682_s29 + $0x630] sm:$0xff] %v1117_v6 }
  0xee   : > { %1120 = vst [vmem:[%s7682_s29 + $0x638] sm:$0xff] %v1119_v7 }
  0xef   : > { %1122 = vst [vmem:[%s7682_s29 + $0x640] sm:$0xff] %v1121_v8 }
  0xf0   : > { %1124 = vst [vmem:[%s7682_s29 + $0x648] sm:$0xff] %v1123_v9 }
  0xf1   : > { %1126 = vst [vmem:[%s7682_s29 + $0x650] sm:$0xff] %v1125_v10 }
  0xf2   : > { %1128 = vst [vmem:[%s7682_s29 + $0x658] sm:$0xff] %v1127_v11 }
  0xf3   : > { %1130 = vst [vmem:[%s7682_s29 + $0x660] sm:$0xff] %v1129_v12 }
  0xf4   : > { %1132 = vst [vmem:[%s7682_s29 + $0x668] sm:$0xff] %v1131_v13 }
  0xf5   : > { %1134 = vst [vmem:[%s7682_s29 + $0x670] sm:$0xff] %v1133_v14 }
  0xf6   : > { %1136 = vst [vmem:[%s7682_s29 + $0x678] sm:$0xff] %v1135_v15 }
  0xf7   : > { %1138 = vst [vmem:[%s7682_s29 + $0x680] sm:$0xff] %v1137_v16 }
  0xf8   : > { %1140 = vst [vmem:[%s7682_s29 + $0x688] sm:$0xff] %v1139_v17 }
  0xf9   : > { %1142 = vst [vmem:[%s7682_s29 + $0x690] sm:$0xff] %v1141_v18 }
  0xfa   : > { %1144 = vst [vmem:[%s7682_s29 + $0x698] sm:$0xff] %v1143_v19 }
  0xfb   : > { %1146 = vst [vmem:[%s7682_s29 + $0x6a0] sm:$0xff] %v1145_v20 }
  0xfc   : > { %1148 = vst [vmem:[%s7682_s29 + $0x6a8] sm:$0xff] %v1147_v21 }
  0xfd   : > { %1150 = vst [vmem:[%s7682_s29 + $0x6b0] sm:$0xff] %v1149_v22 }
  0xfe   : > { %1152 = vst [vmem:[%s7682_s29 + $0x6b8] sm:$0xff] %v1151_v23 }
  0xff   : > { %1154 = vst [vmem:[%s7682_s29 + $0x6c0] sm:$0xff] %v1153_v24 }
 0x100   : > { %1156 = vst [vmem:[%s7682_s29 + $0x6c8] sm:$0xff] %v1155_v25 }
 0x101   : > { %1158 = vst [vmem:[%s7682_s29 + $0x6d0] sm:$0xff] %v1157_v26 }
 0x102   : > { %1160 = vst [vmem:[%s7682_s29 + $0x6d8] sm:$0xff] %v1159_v27 }
 0x103   : > { %1162 = vst [vmem:[%s7682_s29 + $0x6e0] sm:$0xff] %v1161_v28 }
 0x104   : > { %1164 = vst [vmem:[%s7682_s29 + $0x6e8] sm:$0xff] %v1163_v29 }
 0x105   : > { %1166 = vst [vmem:[%s7682_s29 + $0x6f0] sm:$0xff] %v1165_v30 }
 0x106   : > { %1168 = vst [vmem:[%s7682_s29 + $0x6f8] sm:$0xff] %v1167_v31 }
 0x107   : > { %1170 = vst [vmem:[%s7682_s29 + $0x700] sm:$0xff] %v1169_v32 }
 0x108   : > { %1172 = vst [vmem:[%s7682_s29 + $0x708] sm:$0xff] %v1171_v33 }
 0x109   : > { %1174 = vst [vmem:[%s7682_s29 + $0x710] sm:$0xff] %v1173_v34 }
 0x10a   : > { %1176 = vst [vmem:[%s7682_s29 + $0x718] sm:$0xff] %v1175_v35 }
 0x10b   : > { %1178 = vst [vmem:[%s7682_s29 + $0x720] sm:$0xff] %v1177_v36 }
 0x10c   : > { %1180 = vst [vmem:[%s7682_s29 + $0x728] sm:$0xff] %v1179_v37 }
 0x10d   : > { %1182 = vst [vmem:[%s7682_s29 + $0x730] sm:$0xff] %v1181_v38 }
 0x10e   : > { %1184 = vst [vmem:[%s7682_s29 + $0x738] sm:$0xff] %v1183_v39 }
 0x10f   : > { %1186 = vst [vmem:[%s7682_s29 + $0x740] sm:$0xff] %v1185_v40 }
 0x110   : > { %1188 = vst [vmem:[%s7682_s29 + $0x748] sm:$0xff] %v1187_v41 }
 0x111   : > { %1190 = vst [vmem:[%s7682_s29 + $0x750] sm:$0xff] %v1189_v42 }
 0x112   : > { %1192 = vst [vmem:[%s7682_s29 + $0x758] sm:$0xff] %v1191_v43 }
 0x113   : > { %1194 = vst [vmem:[%s7682_s29 + $0x760] sm:$0xff] %v1193_v44 }
 0x114   : > { %1196 = vst [vmem:[%s7682_s29 + $0x768] sm:$0xff] %v1195_v45 }
 0x115   : > { %1198 = vst [vmem:[%s7682_s29 + $0x770] sm:$0xff] %v1197_v46 }
 0x116   : > { %1200 = vst [vmem:[%s7682_s29 + $0x778] sm:$0xff] %v1199_v47 }
 0x117   : > { %1202 = vst [vmem:[%s7682_s29 + $0x780] sm:$0xff] %v1201_v48 }
 0x118   : > { %1204 = vst [vmem:[%s7682_s29 + $0x788] sm:$0xff] %v1203_v49 }
 0x119   : > { %1206 = vst [vmem:[%s7682_s29 + $0x790] sm:$0xff] %v1205_v50 }
 0x11a   : > { %1208 = vst [vmem:[%s7682_s29 + $0x798] sm:$0xff] %v1207_v51 }
 0x11b   : > { %1210 = vst [vmem:[%s7682_s29 + $0x7a0] sm:$0xff] %v1209_v52 }
 0x11c   : > { %1212 = vst [vmem:[%s7682_s29 + $0x7a8] sm:$0xff] %v1211_v53 }
 0x11d   : > { %1214 = vst [vmem:[%s7682_s29 + $0x7b0] sm:$0xff] %v1213_v54 }
 0x11e   : > { %1216 = vst [vmem:[%s7682_s29 + $0x7b8] sm:$0xff] %v1215_v55 }
 0x11f   : > { %1218 = vst [vmem:[%s7682_s29 + $0x7c0] sm:$0xff] %v1217_v56 }
 0x120   : > { %1220 = vst [vmem:[%s7682_s29 + $0x7c8] sm:$0xff] %v1219_v57 }
 0x121   : > { %1222 = vst [vmem:[%s7682_s29 + $0x7d0] sm:$0xff] %v1221_v58 }
 0x122   : > { %1224 = vst [vmem:[%s7682_s29 + $0x7d8] sm:$0xff] %v1223_v59 }
 0x123   : > { %1226 = vst [vmem:[%s7682_s29 + $0x7e0] sm:$0xff] %v1225_v60 }
 0x124   : > { %1228 = vst [vmem:[%s7682_s29 + $0x7e8] sm:$0xff] %v1227_v61 }
 0x125   : > { %1230 = vst [vmem:[%s7682_s29 + $0x7f0] sm:$0xff] %v1229_v62 }
 0x126   : > { %1232 = vst [vmem:[%s7682_s29 + $0x7f8] sm:$0xff] %v1231_v63 }
 0x127 PF: > { %p7336_p0 = scmp.ge.s32.totalorder %s7550_s24, 1  ;;  %p2296_p1 = scmp.lt.s32.totalorder %s7550_s24, 5 }
 0x129   : > { %p2297_p2 = pnand %p7336_p0, %p2296_p1 }
 0x12a   : > { %s2303_s5 = sand.u32 (!%p2297_p2), 1, %s7526_s18   ;;  %s2325_s13 = sand.u32 (!%p2297_p2), 1, %s7518_s16  }
 0x12b   : > { %2300 = sbr.rel (%p2297_p2) target bundleno = 1966 (0x7ae), region = 84  ;;  %s7337_s14 = sshll.u32 (!%p2297_p2), %s2303_s5, 11 }
 0x12c   : > { %s8199_s25 = sshll.u32 (!%p2297_p2), %s2325_s13, 3  ;;  %s8201_s26 = scalar_lea.vmem (!%p2297_p2), [#allocation3], %s7337_s14 }
 0x12d   : > { %s2327_s30 = scalar_lea.vmem (!%p2297_p2), [#allocation4], %s8199_s25  ;;  %p7339_p3 = scmp.ne.s32.totalorder (!%p2297_p2), %s7534_s20, 0 }
 0x130   : > { %2332 = sbr.rel (%p7339_p3) target bundleno = 566 (0x236), region = 92 }
 0x135   : > { %v7552_v0 = vmov -inf  }
 0x136   : > { %2333 = vst [vmem:[#allocation2 + $0x2b0] sm:$0xff] %v7552_v0 }
 0x137   : > { %2334 = vst [vmem:[#allocation2 + $0x3b0] sm:$0xff] %v7552_v0 }
 0x138   : > { %2335 = vst [vmem:[#allocation2 + $0x4d8] sm:$0xff] %v7552_v0 }
 0x139   : > { %2336 = vst [vmem:[#allocation2 + $0x18] sm:$0xff] %v7552_v0 }
 0x13a   : > { %2337 = vst [vmem:[#allocation2 + $0x450] sm:$0xff] %v7552_v0 }
 0x13b   : > { %2338 = vst [vmem:[#allocation2 + $0x768] sm:$0xff] %v7552_v0 }
 0x13c   : > { %2339 = vst [vmem:[#allocation2 + $0x330] sm:$0xff] %v7552_v0 }
 0x13d   : > { %2340 = vst [vmem:[#allocation2 + $0x448] sm:$0xff] %v7552_v0 }
 0x13e   : > { %2341 = vst [vmem:[#allocation2 + $0x380] sm:$0xff] %v7552_v0 }
 0x13f   : > { %2342 = vst [vmem:[#allocation2 + $0x110] sm:$0xff] %v7552_v0 }
 0x140   : > { %2343 = vst [vmem:[#allocation2 + $0x518] sm:$0xff] %v7552_v0 }
 0x141   : > { %2344 = vst [vmem:[#allocation2 + $0x498] sm:$0xff] %v7552_v0 }
 0x142   : > { %2345 = vst [vmem:[#allocation2 + $0x320] sm:$0xff] %v7552_v0 }
 0x143   : > { %2346 = vst [vmem:[#allocation2 + $0x550] sm:$0xff] %v7552_v0 }
 0x144   : > { %2347 = vst [vmem:[#allocation2 + $0x508] sm:$0xff] %v7552_v0 }
 0x145   : > { %2348 = vst [vmem:[#allocation2 + $0x720] sm:$0xff] %v7552_v0 }
 0x146   : > { %2349 = vst [vmem:[#allocation2 + $0x6e0] sm:$0xff] %v7552_v0 }
 0x147   : > { %2350 = vst [vmem:[#allocation2 + $0x788] sm:$0xff] %v7552_v0 }
 0x148   : > { %2351 = vst [vmem:[#allocation2 + $0x338] sm:$0xff] %v7552_v0 }
 0x149   : > { %2352 = vst [vmem:[#allocation2 + $0x740] sm:$0xff] %v7552_v0 }
 0x14a   : > { %2353 = vst [vmem:[#allocation2 + $0x2e0] sm:$0xff] %v7552_v0 }
 0x14b   : > { %2354 = vst [vmem:[#allocation2 + $0x5a8] sm:$0xff] %v7552_v0 }
 0x14c   : > { %2355 = vst [vmem:[#allocation2 + $0x5b8] sm:$0xff] %v7552_v0 }
 0x14d   : > { %2356 = vst [vmem:[#allocation2 + $0x568] sm:$0xff] %v7552_v0 }
 0x14e   : > { %2357 = vst [vmem:[#allocation2 + $0x3e8] sm:$0xff] %v7552_v0 }
 0x14f   : > { %2358 = vst [vmem:[#allocation2 + $0x6f8] sm:$0xff] %v7552_v0 }
 0x150   : > { %2359 = vst [vmem:[#allocation2 + $0x690] sm:$0xff] %v7552_v0 }
 0x151   : > { %2360 = vst [vmem:[#allocation2 + $0x368] sm:$0xff] %v7552_v0 }
 0x152   : > { %2361 = vst [vmem:[#allocation2 + $0x138] sm:$0xff] %v7552_v0 }
 0x153   : > { %2362 = vst [vmem:[#allocation2 + $0xc0] sm:$0xff] %v7552_v0 }
 0x154   : > { %2363 = vst [vmem:[#allocation2 + $0x1c0] sm:$0xff] %v7552_v0 }
 0x155   : > { %2364 = vst [vmem:[#allocation2 + $0x280] sm:$0xff] %v7552_v0 }
 0x156   : > { %2365 = vst [vmem:[#allocation2 + $0x100] sm:$0xff] %v7552_v0 }
 0x157   : > { %2366 = vst [vmem:[#allocation2 + $0x3c0] sm:$0xff] %v7552_v0 }
 0x158   : > { %2367 = vst [vmem:[#allocation2 + $0x558] sm:$0xff] %v7552_v0 }
 0x159   : > { %2368 = vst [vmem:[#allocation2 + $0x3e0] sm:$0xff] %v7552_v0 }
 0x15a   : > { %2369 = vst [vmem:[#allocation2 + $0x618] sm:$0xff] %v7552_v0 }
 0x15b   : > { %2370 = vst [vmem:[#allocation2 + $0x4c0] sm:$0xff] %v7552_v0 }
 0x15c   : > { %2371 = vst [vmem:[#allocation2 + $0x70] sm:$0xff] %v7552_v0 }
 0x15d   : > { %2372 = vst [vmem:[#allocation2 + $0x7b8] sm:$0xff] %v7552_v0 }
 0x15e   : > { %2373 = vst [vmem:[#allocation2 + $0x400] sm:$0xff] %v7552_v0 }
 0x15f   : > { %2374 = vst [vmem:[#allocation2 + $0x6a8] sm:$0xff] %v7552_v0 }
 0x160   : > { %2375 = vst [vmem:[#allocation2 + $0x3f8] sm:$0xff] %v7552_v0 }
 0x161   : > { %2376 = vst [vmem:[#allocation2 + $0x2e8] sm:$0xff] %v7552_v0 }
 0x162   : > { %2377 = vst [vmem:[#allocation2 + $0x6c8] sm:$0xff] %v7552_v0 }
 0x163   : > { %2378 = vst [vmem:[#allocation2 + $0x5c0] sm:$0xff] %v7552_v0 }
 0x164   : > { %2379 = vst [vmem:[#allocation2 + $0x5e8] sm:$0xff] %v7552_v0 }
 0x165   : > { %2380 = vst [vmem:[#allocation2 + $0x5f8] sm:$0xff] %v7552_v0 }
 0x166   : > { %2381 = vst [vmem:[#allocation2 + $0x770] sm:$0xff] %v7552_v0 }
 0x167   : > { %2382 = vst [vmem:[#allocation2 + $0x520] sm:$0xff] %v7552_v0 }
 0x168   : > { %2383 = vst [vmem:[#allocation2 + $0x640] sm:$0xff] %v7552_v0 }
 0x169   : > { %2384 = vst [vmem:[#allocation2 + $0x250] sm:$0xff] %v7552_v0 }
 0x16a   : > { %2385 = vst [vmem:[#allocation2 + $0x348] sm:$0xff] %v7552_v0 }
 0x16b   : > { %2386 = vst [vmem:[#allocation2 + $0x420] sm:$0xff] %v7552_v0 }
 0x16c   : > { %2387 = vst [vmem:[#allocation2 + $0xe0] sm:$0xff] %v7552_v0 }
 0x16d   : > { %2388 = vst [vmem:[#allocation2 + $0x620] sm:$0xff] %v7552_v0 }
 0x16e   : > { %2389 = vst [vmem:[#allocation2 + $0x148] sm:$0xff] %v7552_v0 }
 0x16f   : > { %2390 = vst [vmem:[#allocation2 + $0x3a0] sm:$0xff] %v7552_v0 }
 0x170   : > { %2391 = vst [vmem:[#allocation2 + $0x4e8] sm:$0xff] %v7552_v0 }
 0x171   : > { %2392 = vst [vmem:[#allocation2 + $0x310] sm:$0xff] %v7552_v0 }
 0x172   : > { %2393 = vst [vmem:[#allocation2 + $0x38] sm:$0xff] %v7552_v0 }
 0x173   : > { %2394 = vst [vmem:[#allocation2 + $0x440] sm:$0xff] %v7552_v0 }
 0x174   : > { %2395 = vst [vmem:[#allocation2 + $0x50] sm:$0xff] %v7552_v0 }
 0x175   : > { %2396 = vst [vmem:[#allocation2 + $0x390] sm:$0xff] %v7552_v0 }
 0x176   : > { %2397 = vst [vmem:[#allocation2 + $0x538] sm:$0xff] %v7552_v0 }
 0x177   : > { %2398 = vst [vmem:[#allocation2 + $0xf0] sm:$0xff] %v7552_v0 }
 0x178   : > { %2399 = vst [vmem:[#allocation2 + $0x790] sm:$0xff] %v7552_v0 }
 0x179   : > { %2400 = vst [vmem:[#allocation2 + $0x680] sm:$0xff] %v7552_v0 }
 0x17a   : > { %2401 = vst [vmem:[#allocation2 + $0xb8] sm:$0xff] %v7552_v0 }
 0x17b   : > { %2402 = vst [vmem:[#allocation2 + $0x120] sm:$0xff] %v7552_v0 }
 0x17c   : > { %2403 = vst [vmem:[#allocation2 + $0xd0] sm:$0xff] %v7552_v0 }
 0x17d   : > { %2404 = vst [vmem:[#allocation2 + $0x40] sm:$0xff] %v7552_v0 }
 0x17e   : > { %2405 = vst [vmem:[#allocation2 + $0x6f0] sm:$0xff] %v7552_v0 }
 0x17f   : > { %2406 = vst [vmem:[#allocation2 + $0x2f8] sm:$0xff] %v7552_v0 }
 0x180   : > { %2407 = vst [vmem:[#allocation2 + $0x758] sm:$0xff] %v7552_v0 }
 0x181   : > { %2408 = vst [vmem:[#allocation2 + $0x178] sm:$0xff] %v7552_v0 }
 0x182   : > { %2409 = vst [vmem:[#allocation2 + $0x738] sm:$0xff] %v7552_v0 }
 0x183   : > { %2410 = vst [vmem:[#allocation2 + $0x598] sm:$0xff] %v7552_v0 }
 0x184   : > { %2411 = vst [vmem:[#allocation2 + $0x7d8] sm:$0xff] %v7552_v0 }
 0x185   : > { %2412 = vst [vmem:[#allocation2 + $0x6d8] sm:$0xff] %v7552_v0 }
 0x186   : > { %2413 = vst [vmem:[#allocation2 + $0x398] sm:$0xff] %v7552_v0 }
 0x187   : > { %2414 = vst [vmem:[#allocation2 + $0x1a8] sm:$0xff] %v7552_v0 }
 0x188   : > { %2415 = vst [vmem:[#allocation2 + $0x698] sm:$0xff] %v7552_v0 }
 0x189   : > { %2416 = vst [vmem:[#allocation2 + $0x3b8] sm:$0xff] %v7552_v0 }
 0x18a   : > { %2417 = vst [vmem:[#allocation2 + $0x5d8] sm:$0xff] %v7552_v0 }
 0x18b   : > { %2418 = vst [vmem:[#allocation2 + $0x610] sm:$0xff] %v7552_v0 }
 0x18c   : > { %2419 = vst [vmem:[#allocation2 + $0x218] sm:$0xff] %v7552_v0 }
 0x18d   : > { %2420 = vst [vmem:[#allocation2 + $0x1d8] sm:$0xff] %v7552_v0 }
 0x18e   : > { %2421 = vst [vmem:[#allocation2 + $0x628] sm:$0xff] %v7552_v0 }
 0x18f   : > { %2422 = vst [vmem:[#allocation2 + $0x1f8] sm:$0xff] %v7552_v0 }
 0x190   : > { %2423 = vst [vmem:[#allocation2 + $0x388] sm:$0xff] %v7552_v0 }
 0x191   : > { %2424 = vst [vmem:[#allocation2 + $0x278] sm:$0xff] %v7552_v0 }
 0x192   : > { %2425 = vst [vmem:[#allocation2 + $0x478] sm:$0xff] %v7552_v0 }
 0x193   : > { %2426 = vst [vmem:[#allocation2 + $0x2c0] sm:$0xff] %v7552_v0 }
 0x194   : > { %2427 = vst [vmem:[#allocation2 + $0x1c8] sm:$0xff] %v7552_v0 }
 0x195   : > { %2428 = vst [vmem:[#allocation2 + $0x7c0] sm:$0xff] %v7552_v0 }
 0x196   : > { %2429 = vst [vmem:[#allocation2 + $0x418] sm:$0xff] %v7552_v0 }
 0x197   : > { %2430 = vst [vmem:[#allocation2 + $0x7f0] sm:$0xff] %v7552_v0 }
 0x198   : > { %2431 = vst [vmem:[#allocation2 + $0x4b0] sm:$0xff] %v7552_v0 }
 0x199   : > { %2432 = vst [vmem:[#allocation2 + $0x318] sm:$0xff] %v7552_v0 }
 0x19a   : > { %2433 = vst [vmem:[#allocation2 + $0x90] sm:$0xff] %v7552_v0 }
 0x19b   : > { %2434 = vst [vmem:[#allocation2 + $0x540] sm:$0xff] %v7552_v0 }
 0x19c   : > { %2435 = vst [vmem:[#allocation2 + $0x588] sm:$0xff] %v7552_v0 }
 0x19d   : > { %2436 = vst [vmem:[#allocation2 + $0x648] sm:$0xff] %v7552_v0 }
 0x19e   : > { %2437 = vst [vmem:[#allocation2 + $0x58] sm:$0xff] %v7552_v0 }
 0x19f   : > { %2438 = vst [vmem:[#allocation2 + $0x198] sm:$0xff] %v7552_v0 }
 0x1a0   : > { %2439 = vst [vmem:[#allocation2 + $0x68] sm:$0xff] %v7552_v0 }
 0x1a1   : > { %2440 = vst [vmem:[#allocation2 + $0x600] sm:$0xff] %v7552_v0 }
 0x1a2   : > { %2441 = vst [vmem:[#allocation2 + $0x3a8] sm:$0xff] %v7552_v0 }
 0x1a3   : > { %2442 = vst [vmem:[#allocation2 + $0xb0] sm:$0xff] %v7552_v0 }
 0x1a4   : > { %2443 = vst [vmem:[#allocation2 + $0x630] sm:$0xff] %v7552_v0 }
 0x1a5   : > { %2444 = vst [vmem:[#allocation2 + $0x158] sm:$0xff] %v7552_v0 }
 0x1a6   : > { %2445 = vst [vmem:[#allocation2 + $0x370] sm:$0xff] %v7552_v0 }
 0x1a7   : > { %2446 = vst [vmem:[#allocation2 + $0x1e0] sm:$0xff] %v7552_v0 }
 0x1a8   : > { %2447 = vst [vmem:[#allocation2 + $0x7b0] sm:$0xff] %v7552_v0 }
 0x1a9   : > { %2448 = vst [vmem:[#allocation2 + $0x6c0] sm:$0xff] %v7552_v0 }
 0x1aa   : > { %2449 = vst [vmem:[#allocation2 + $0xd8] sm:$0xff] %v7552_v0 }
 0x1ab   : > { %2450 = vst [vmem:[#allocation2 + $0x6b8] sm:$0xff] %v7552_v0 }
 0x1ac   : > { %2451 = vst [vmem:[#allocation2 + $0x140] sm:$0xff] %v7552_v0 }
 0x1ad   : > { %2452 = vst [vmem:[#allocation2 + $0x5b0] sm:$0xff] %v7552_v0 }
 0x1ae   : > { %2453 = vst [vmem:[#allocation2 + $0x30] sm:$0xff] %v7552_v0 }
 0x1af   : > { %2454 = vst [vmem:[#allocation2 + $0x128] sm:$0xff] %v7552_v0 }
 0x1b0   : > { %2455 = vst [vmem:[#allocation2 + $0x1a0] sm:$0xff] %v7552_v0 }
 0x1b1   : > { %2456 = vst [vmem:[#allocation2 + $0x5f0] sm:$0xff] %v7552_v0 }
 0x1b2   : > { %2457 = vst [vmem:[#allocation2 + $0x670] sm:$0xff] %v7552_v0 }
 0x1b3   : > { %2458 = vst [vmem:[#allocation2 + $0x240] sm:$0xff] %v7552_v0 }
 0x1b4   : > { %2459 = vst [vmem:[#allocation2 + $0x118] sm:$0xff] %v7552_v0 }
 0x1b5   : > { %2460 = vst [vmem:[#allocation2 + $0x268] sm:$0xff] %v7552_v0 }
 0x1b6   : > { %2461 = vst [vmem:[#allocation2 + $0x4a8] sm:$0xff] %v7552_v0 }
 0x1b7   : > { %2462 = vst [vmem:[#allocation2 + $0x5c8] sm:$0xff] %v7552_v0 }
 0x1b8   : > { %2463 = vst [vmem:[#allocation2 + $0x438] sm:$0xff] %v7552_v0 }
 0x1b9   : > { %2464 = vst [vmem:[#allocation2 + $0x350] sm:$0xff] %v7552_v0 }
 0x1ba   : > { %2465 = vst [vmem:[#allocation2 + $0x2c8] sm:$0xff] %v7552_v0 }
 0x1bb   : > { %2466 = vst [vmem:[#allocation2 + $0xf8] sm:$0xff] %v7552_v0 }
 0x1bc   : > { %2467 = vst [vmem:[#allocation2 + $0x488] sm:$0xff] %v7552_v0 }
 0x1bd   : > { %2468 = vst [vmem:[#allocation2 + $0x6a0] sm:$0xff] %v7552_v0 }
 0x1be   : > { %2469 = vst [vmem:[#allocation2 + $0x3c8] sm:$0xff] %v7552_v0 }
 0x1bf   : > { %2470 = vst [vmem:[#allocation2 + $0x1e8] sm:$0xff] %v7552_v0 }
 0x1c0   : > { %2471 = vst [vmem:[#allocation2 + $0x6d0] sm:$0xff] %v7552_v0 }
 0x1c1   : > { %2472 = vst [vmem:[#allocation2 + $0x688] sm:$0xff] %v7552_v0 }
 0x1c2   : > { %2473 = vst [vmem:[#allocation2 + $0x730] sm:$0xff] %v7552_v0 }
 0x1c3   : > { %2474 = vst [vmem:[#allocation2 + $0x658] sm:$0xff] %v7552_v0 }
 0x1c4   : > { %2475 = vst [vmem:[#allocation2 + $0x458] sm:$0xff] %v7552_v0 }
 0x1c5   : > { %2476 = vst [vmem:[#allocation2 + $0x1b8] sm:$0xff] %v7552_v0 }
 0x1c6   : > { %2477 = vst [vmem:[#allocation2 + $0x460] sm:$0xff] %v7552_v0 }
 0x1c7   : > { %2478 = vst [vmem:[#allocation2 + $0x4f0] sm:$0xff] %v7552_v0 }
 0x1c8   : > { %2479 = vst [vmem:[#allocation2 + $0x528] sm:$0xff] %v7552_v0 }
 0x1c9   : > { %2480 = vst [vmem:[#allocation2 + $0x258] sm:$0xff] %v7552_v0 }
 0x1ca   : > { %2481 = vst [vmem:[#allocation2 + $0x4d0] sm:$0xff] %v7552_v0 }
 0x1cb   : > { %2482 = vst [vmem:[#allocation2 + $0x4f8] sm:$0xff] %v7552_v0 }
 0x1cc   : > { %2483 = vst [vmem:[#allocation2 + $0x78] sm:$0xff] %v7552_v0 }
 0x1cd   : > { %2484 = vst [vmem:[#allocation2 + $0x2a0] sm:$0xff] %v7552_v0 }
 0x1ce   : > { %2485 = vst [vmem:[#allocation2 + $0x10] sm:$0xff] %v7552_v0 }
 0x1cf   : > { %2486 = vst [vmem:[#allocation2 + $0x778] sm:$0xff] %v7552_v0 }
 0x1d0   : > { %2487 = vst [vmem:[#allocation2 + $0x7a8] sm:$0xff] %v7552_v0 }
 0x1d1   : > { %2488 = vst [vmem:[#allocation2 + $0x530] sm:$0xff] %v7552_v0 }
 0x1d2   : > { %2489 = vst [vmem:[#allocation2 + $0x590] sm:$0xff] %v7552_v0 }
 0x1d3   : > { %2490 = vst [vmem:[#allocation2 + $0x660] sm:$0xff] %v7552_v0 }
 0x1d4   : > { %2491 = vst [vmem:[#allocation2 + $0x358] sm:$0xff] %v7552_v0 }
 0x1d5   : > { %2492 = vst [vmem:[#allocation2 + $0x700] sm:$0xff] %v7552_v0 }
 0x1d6   : > { %2493 = vst [vmem:[#allocation2 + $0x340] sm:$0xff] %v7552_v0 }
 0x1d7   : > { %2494 = vst [vmem:[#allocation2 + $0x5a0] sm:$0xff] %v7552_v0 }
 0x1d8   : > { %2495 = vst [vmem:[#allocation2 + $0x3d0] sm:$0xff] %v7552_v0 }
 0x1d9   : > { %2496 = vst [vmem:[#allocation2 + $0x230] sm:$0xff] %v7552_v0 }
 0x1da   : > { %2497 = vst [vmem:[#allocation2 + $0x560] sm:$0xff] %v7552_v0 }
 0x1db   : > { %2498 = vst [vmem:[#allocation2 + $0x7f8] sm:$0xff] %v7552_v0 }
 0x1dc   : > { %2499 = vst [vmem:[#allocation2 + $0x4e0] sm:$0xff] %v7552_v0 }
 0x1dd   : > { %2500 = vst [vmem:[#allocation2 + $0x200] sm:$0xff] %v7552_v0 }
 0x1de   : > { %2501 = vst [vmem:[#allocation2 + $0x468] sm:$0xff] %v7552_v0 }
 0x1df   : > { %2502 = vst [vmem:[#allocation2 + $0x2a8] sm:$0xff] %v7552_v0 }
 0x1e0   : > { %2503 = vst [vmem:[#allocation2 + $0x1d0] sm:$0xff] %v7552_v0 }
 0x1e1   : > { %2504 = vst [vmem:[#allocation2 + $0x510] sm:$0xff] %v7552_v0 }
 0x1e2   : > { %2505 = vst [vmem:[#allocation2 + $0x750] sm:$0xff] %v7552_v0 }
 0x1e3   : > { %2506 = vst [vmem:[#allocation2 + $0x130] sm:$0xff] %v7552_v0 }
 0x1e4   : > { %2507 = vst [vmem:[#allocation2 + $0x28] sm:$0xff] %v7552_v0 }
 0x1e5   : > { %2508 = vst [vmem:[#allocation2 + $0x760] sm:$0xff] %v7552_v0 }
 0x1e6   : > { %2509 = vst [vmem:[#allocation2 + $0x5d0] sm:$0xff] %v7552_v0 }
 0x1e7   : > { %2510 = vst [vmem:[#allocation2 + $0x228] sm:$0xff] %v7552_v0 }
 0x1e8   : > { %2511 = vst [vmem:[#allocation2 + $0x208] sm:$0xff] %v7552_v0 }
 0x1e9   : > { %2512 = vst [vmem:[#allocation2 + $0x290] sm:$0xff] %v7552_v0 }
 0x1ea   : > { %2513 = vst [vmem:[#allocation2 + $0x7a0] sm:$0xff] %v7552_v0 }
 0x1eb   : > { %2514 = vst [vmem:[#allocation2 + $0x80] sm:$0xff] %v7552_v0 }
 0x1ec   : > { %2515 = vst [vmem:[#allocation2 + $0x4c8] sm:$0xff] %v7552_v0 }
 0x1ed   : > { %2516 = vst [vmem:[#allocation2 + $0x3f0] sm:$0xff] %v7552_v0 }
 0x1ee   : > { %2517 = vst [vmem:[#allocation2 + $0x798] sm:$0xff] %v7552_v0 }
 0x1ef   : > { %2518 = vst [vmem:[#allocation2 + $0x378] sm:$0xff] %v7552_v0 }
 0x1f0   : > { %2519 = vst [vmem:[#allocation2 + $0x160] sm:$0xff] %v7552_v0 }
 0x1f1   : > { %2520 = vst [vmem:[#allocation2 + $0x260] sm:$0xff] %v7552_v0 }
 0x1f2   : > { %2521 = vst [vmem:[#allocation2 + $0x728] sm:$0xff] %v7552_v0 }
 0x1f3   : > { %2522 = vst [vmem:[#allocation2 + $0x288] sm:$0xff] %v7552_v0 }
 0x1f4   : > { %2523 = vst [vmem:[#allocation2 + $0x188] sm:$0xff] %v7552_v0 }
 0x1f5   : > { %2524 = vst [vmem:[#allocation2 + $0x408] sm:$0xff] %v7552_v0 }
 0x1f6   : > { %2525 = vst [vmem:[#allocation2 + $0x678] sm:$0xff] %v7552_v0 }
 0x1f7   : > { %2526 = vst [vmem:[#allocation2 + $0x98] sm:$0xff] %v7552_v0 }
 0x1f8   : > { %2527 = vst [vmem:[#allocation2 + $0x470] sm:$0xff] %v7552_v0 }
 0x1f9   : > { %2528 = vst [vmem:[#allocation2 + $0x410] sm:$0xff] %v7552_v0 }
 0x1fa   : > { %2529 = vst [vmem:[#allocation2 + $0x248] sm:$0xff] %v7552_v0 }
 0x1fb   : > { %2530 = vst [vmem:[#allocation2 + $0x548] sm:$0xff] %v7552_v0 }
 0x1fc   : > { %2531 = vst [vmem:[#allocation2 + $0x220] sm:$0xff] %v7552_v0 }
 0x1fd   : > { %2532 = vst [vmem:[#allocation2 + $0x780] sm:$0xff] %v7552_v0 }
 0x1fe   : > { %2533 = vst [vmem:[#allocation2 + $0x708] sm:$0xff] %v7552_v0 }
 0x1ff   : > { %2534 = vst [vmem:[#allocation2 + $0x8] sm:$0xff] %v7552_v0 }
 0x200   : > { %2535 = vst [vmem:[#allocation2 + $0x428] sm:$0xff] %v7552_v0 }
 0x201   : > { %2536 = vst [vmem:[#allocation2 + $0x170] sm:$0xff] %v7552_v0 }
 0x202   : > { %2537 = vst [vmem:[#allocation2 + $0x7e0] sm:$0xff] %v7552_v0 }
 0x203   : > { %2538 = vst [vmem:[#allocation2 + $0x20] sm:$0xff] %v7552_v0 }
 0x204   : > { %2539 = vst [vmem:[#allocation2 + $0x308] sm:$0xff] %v7552_v0 }
 0x205   : > { %2540 = vst [vmem:[#allocation2 + $0x88] sm:$0xff] %v7552_v0 }
 0x206   : > { %2541 = vst [vmem:[#allocation2 + $0x6e8] sm:$0xff] %v7552_v0 }
 0x207   : > { %2542 = vst [vmem:[#allocation2 + $0x6b0] sm:$0xff] %v7552_v0 }
 0x208   : > { %2543 = vst [vmem:[#allocation2 + $0x300] sm:$0xff] %v7552_v0 }
 0x209   : > { %2544 = vst [vmem:[#allocation2 + $0x108] sm:$0xff] %v7552_v0 }
 0x20a   : > { %2545 = vst [vmem:[#allocation2 + $0x180] sm:$0xff] %v7552_v0 }
 0x20b   : > { %2546 = vst [vmem:[#allocation2 + $0x490] sm:$0xff] %v7552_v0 }
 0x20c   : > { %2547 = vst [vmem:[#allocation2 + $0x570] sm:$0xff] %v7552_v0 }
 0x20d   : > { %2548 = vst [vmem:[#allocation2 + $0x500] sm:$0xff] %v7552_v0 }
 0x20e   : > { %2549 = vst [vmem:[#allocation2 + $0xe8] sm:$0xff] %v7552_v0 }
 0x20f   : > { %2550 = vst [vmem:[#allocation2 + $0x2f0] sm:$0xff] %v7552_v0 }
 0x210   : > { %2551 = vst [vmem:[#allocation2 + $0x7e8] sm:$0xff] %v7552_v0 }
 0x211   : > { %2552 = vst [vmem:[#allocation2 + $0x360] sm:$0xff] %v7552_v0 }
 0x212   : > { %2553 = vst [vmem:[#allocation2 + $0x60] sm:$0xff] %v7552_v0 }
 0x213   : > { %2554 = vst [vmem:[#allocation2 + $0x210] sm:$0xff] %v7552_v0 }
 0x214   : > { %2555 = vst [vmem:[#allocation2 + $0x4a0] sm:$0xff] %v7552_v0 }
 0x215   : > { %2556 = vst [vmem:[#allocation2 + $0x748] sm:$0xff] %v7552_v0 }
 0x216   : > { %2557 = vst [vmem:[#allocation2 + $0x168] sm:$0xff] %v7552_v0 }
 0x217   : > { %2558 = vst [vmem:[#allocation2 + $0x668] sm:$0xff] %v7552_v0 }
 0x218   : > { %2559 = vst [vmem:[#allocation2 + $0x270] sm:$0xff] %v7552_v0 }
 0x219   : > { %2560 = vst [vmem:[#allocation2 + $0x2d8] sm:$0xff] %v7552_v0 }
 0x21a   : > { %2561 = vst [vmem:[#allocation2 + $0xc8] sm:$0xff] %v7552_v0 }
 0x21b   : > { %2562 = vst [vmem:[#allocation2 + $0xa0] sm:$0xff] %v7552_v0 }
 0x21c   : > { %2563 = vst [vmem:[#allocation2 + $0x48] sm:$0xff] %v7552_v0 }
 0x21d   : > { %2564 = vst [vmem:[#allocation2 + $0x328] sm:$0xff] %v7552_v0 }
 0x21e   : > { %2565 = vst [vmem:[#allocation2 + $0x7c8] sm:$0xff] %v7552_v0 }
 0x21f   : > { %2566 = vst [vmem:[#allocation2 + $0x430] sm:$0xff] %v7552_v0 }
 0x220   : > { %2567 = vst [vmem:[#allocation2 + $0x578] sm:$0xff] %v7552_v0 }
 0x221   : > { %2568 = vst [vmem:[#allocation2 + $0x608] sm:$0xff] %v7552_v0 }
 0x222   : > { %2569 = vst [vmem:[#allocation2 + $0x638] sm:$0xff] %v7552_v0 }
 0x223   : > { %2570 = vst [vmem:[#allocation2 + $0x4b8] sm:$0xff] %v7552_v0 }
 0x224   : > { %2571 = vst [vmem:[#allocation2 + $0x298] sm:$0xff] %v7552_v0 }
 0x225   : > { %2572 = vst [vmem:[#allocation2 + $0x1f0] sm:$0xff] %v7552_v0 }
 0x226   : > { %2573 = vst [vmem:[#allocation2] sm:$0xff] %v7552_v0 }
 0x227   : > { %2574 = vst [vmem:[#allocation2 + $0x2d0] sm:$0xff] %v7552_v0 }
 0x228   : > { %2575 = vst [vmem:[#allocation2 + $0x650] sm:$0xff] %v7552_v0 }
 0x229   : > { %2576 = vst [vmem:[#allocation2 + $0x480] sm:$0xff] %v7552_v0 }
 0x22a   : > { %2577 = vst [vmem:[#allocation2 + $0x3d8] sm:$0xff] %v7552_v0 }
 0x22b   : > { %2578 = vst [vmem:[#allocation2 + $0x718] sm:$0xff] %v7552_v0 }
 0x22c   : > { %2579 = vst [vmem:[#allocation2 + $0x7d0] sm:$0xff] %v7552_v0 }
 0x22d   : > { %2580 = vst [vmem:[#allocation2 + $0x190] sm:$0xff] %v7552_v0 }
 0x22e   : > { %2581 = vst [vmem:[#allocation2 + $0x710] sm:$0xff] %v7552_v0 }
 0x22f   : > { %2582 = vst [vmem:[#allocation2 + $0xa8] sm:$0xff] %v7552_v0 }
 0x230   : > { %2583 = vst [vmem:[#allocation2 + $0x2b8] sm:$0xff] %v7552_v0 }
 0x231   : > { %2584 = vst [vmem:[#allocation2 + $0x238] sm:$0xff] %v7552_v0 }
 0x232   : > { %2585 = vst [vmem:[#allocation2 + $0x1b0] sm:$0xff] %v7552_v0 }
 0x233   : > { %2586 = vst [vmem:[#allocation2 + $0x5e0] sm:$0xff] %v7552_v0 }
 0x234   : > { %2587 = vst [vmem:[#allocation2 + $0x580] sm:$0xff] %v7552_v0 }
 0x235   : > { %2588 = vst [vmem:[#allocation2 + $0x150] sm:$0xff] %v7552_v0 }
 0x236 PF: > { %p7340_p4 = scmp.ge.s32.totalorder %s7534_s20, 1 }
 0x238   : > { %2592 = sbr.rel (%p7340_p4) target bundleno = 832 (0x340), region = 96 }
 0x23d   : > { %v2593_v1 = vld [vmem:[#allocation2 + $0x2b0] sm:$0xff]  ;;  %v2849_v2 = vld [vmem:[%s8201_s26] sm:$0xff]  ;;  %v2850_v5 = vld [vmem:[%s8201_s26 + $0x8] sm:$0xff] }
 0x23e   : > { %v2594_v3 = vld [vmem:[#allocation2 + $0x3b0] sm:$0xff]  ;;  %v3105_v4 = vmax.f32 %v2593_v1, %v2849_v2  ;;  %v2595_v6 = vld [vmem:[#allocation2 + $0x4d8] sm:$0xff]  ;;  %v2853_v14 = vld [vmem:[%s8201_s26 + $0x20] sm:$0xff] }
 0x23f   : > { %v2851_v7 = vld [vmem:[%s8201_s26 + $0x10] sm:$0xff]  ;;  %v3106_v8 = vmax.f32 %v2594_v3, %v2850_v5  ;;  %v2596_v10 = vld [vmem:[#allocation2 + $0x18] sm:$0xff]  ;;  %v2598_v15 = vld [vmem:[#allocation2 + $0x768] sm:$0xff] }
 0x240   : > { %v3107_v9 = vmax.f32 %v2595_v6, %v2851_v7  ;;  %v2852_v11 = vld [vmem:[%s8201_s26 + $0x18] sm:$0xff]  ;;  %v2597_v12 = vld [vmem:[#allocation2 + $0x450] sm:$0xff]  ;;  %3361 = vst [vmem:[#allocation2 + $0x2b0] sm:$0xff] %v3105_v4  ;;  %v2854_v16 = vld [vmem:[%s8201_s26 + $0x28] sm:$0xff] }
 0x241   : > { %v3108_v13 = vmax.f32 %v2596_v10, %v2852_v11  ;;  %3362 = vst [vmem:[#allocation2 + $0x3b0] sm:$0xff] %v3106_v8  ;;  %v3109_v17 = vmax.f32 %v2597_v12, %v2853_v14  ;;  %v3110_v18 = vmax.f32 %v2598_v15, %v2854_v16  ;;  %v2599_v19 = vld [vmem:[#allocation2 + $0x330] sm:$0xff]  ;;  %v2600_v21 = vld [vmem:[#allocation2 + $0x448] sm:$0xff]  ;;  %v2856_v23 = vld [vmem:[%s8201_s26 + $0x38] sm:$0xff] }
 0x242   : > { %v2855_v20 = vld [vmem:[%s8201_s26 + $0x30] sm:$0xff]  ;;  %3363 = vst [vmem:[#allocation2 + $0x4d8] sm:$0xff] %v3107_v9  ;;  %v2601_v24 = vld [vmem:[#allocation2 + $0x380] sm:$0xff]  ;;  %v3112_v26 = vmax.f32 %v2600_v21, %v2856_v23  ;;  %v2858_v28 = vld [vmem:[%s8201_s26 + $0x48] sm:$0xff] }
 0x243   : > { %v3111_v22 = vmax.f32 %v2599_v19, %v2855_v20  ;;  %v2857_v25 = vld [vmem:[%s8201_s26 + $0x40] sm:$0xff]  ;;  %3364 = vst [vmem:[#allocation2 + $0x18] sm:$0xff] %v3108_v13  ;;  %v2602_v27 = vld [vmem:[#allocation2 + $0x110] sm:$0xff]  ;;  %v2603_v29 = vld [vmem:[#allocation2 + $0x518] sm:$0xff] }
 0x244   : > { %3365 = vst [vmem:[#allocation2 + $0x450] sm:$0xff] %v3109_v17  ;;  %v3113_v30 = vmax.f32 %v2601_v24, %v2857_v25  ;;  %v2859_v31 = vld [vmem:[%s8201_s26 + $0x50] sm:$0xff]  ;;  %v2604_v32 = vld [vmem:[#allocation2 + $0x498] sm:$0xff]  ;;  %v3114_v34 = vmax.f32 %v2602_v27, %v2858_v28  ;;  %v2605_v35 = vld [vmem:[#allocation2 + $0x320] sm:$0xff] }
 0x245   : > { %v2860_v33 = vld [vmem:[%s8201_s26 + $0x58] sm:$0xff]  ;;  %3366 = vst [vmem:[#allocation2 + $0x768] sm:$0xff] %v3110_v18  ;;  %v2861_v36 = vld [vmem:[%s8201_s26 + $0x60] sm:$0xff]  ;;  %v3115_v37 = vmax.f32 %v2603_v29, %v2859_v31  ;;  %v2606_v38 = vld [vmem:[#allocation2 + $0x550] sm:$0xff] }
 0x246   : > { %3367 = vst [vmem:[#allocation2 + $0x330] sm:$0xff] %v3111_v22  ;;  %v2862_v39 = vld [vmem:[%s8201_s26 + $0x68] sm:$0xff]  ;;  %v3116_v40 = vmax.f32 %v2604_v32, %v2860_v33  ;;  %v2863_v42 = vld [vmem:[%s8201_s26 + $0x70] sm:$0xff]  ;;  %v3117_v43 = vmax.f32 %v2605_v35, %v2861_v36  ;;  %v2608_v44 = vld [vmem:[#allocation2 + $0x720] sm:$0xff] }
 0x247   : > { %3368 = vst [vmem:[#allocation2 + $0x448] sm:$0xff] %v3112_v26  ;;  %v2607_v41 = vld [vmem:[#allocation2 + $0x508] sm:$0xff]  ;;  %v2864_v45 = vld [vmem:[%s8201_s26 + $0x78] sm:$0xff]  ;;  %v3118_v46 = vmax.f32 %v2606_v38, %v2862_v39  ;;  %v2609_v47 = vld [vmem:[#allocation2 + $0x6e0] sm:$0xff] }
 0x248   : > { %3369 = vst [vmem:[#allocation2 + $0x380] sm:$0xff] %v3113_v30  ;;  %v2865_v48 = vld [vmem:[%s8201_s26 + $0x80] sm:$0xff]  ;;  %v3119_v49 = vmax.f32 %v2607_v41, %v2863_v42  ;;  %v2610_v50 = vld [vmem:[#allocation2 + $0x788] sm:$0xff]  ;;  %v3120_v52 = vmax.f32 %v2608_v44, %v2864_v45  ;;  %v2611_v53 = vld [vmem:[#allocation2 + $0x338] sm:$0xff] }
 0x249   : > { %3370 = vst [vmem:[#allocation2 + $0x110] sm:$0xff] %v3114_v34  ;;  %v2866_v51 = vld [vmem:[%s8201_s26 + $0x88] sm:$0xff]  ;;  %v2867_v54 = vld [vmem:[%s8201_s26 + $0x90] sm:$0xff]  ;;  %v3121_v55 = vmax.f32 %v2609_v47, %v2865_v48  ;;  %v2612_v56 = vld [vmem:[#allocation2 + $0x740] sm:$0xff] }
 0x24a   : > { %3371 = vst [vmem:[#allocation2 + $0x518] sm:$0xff] %v3115_v37  ;;  %v2868_v57 = vld [vmem:[%s8201_s26 + $0x98] sm:$0xff]  ;;  %v3122_v58 = vmax.f32 %v2610_v50, %v2866_v51  ;;  %v2613_v59 = vld [vmem:[#allocation2 + $0x2e0] sm:$0xff]  ;;  %v3123_v61 = vmax.f32 %v2611_v53, %v2867_v54  ;;  %v2614_v62 = vld [vmem:[#allocation2 + $0x5a8] sm:$0xff] }
 0x24b   : > { %3372 = vst [vmem:[#allocation2 + $0x498] sm:$0xff] %v3116_v40  ;;  %v2869_v60 = vld [vmem:[%s8201_s26 + $0xa0] sm:$0xff]  ;;  %v2870_v63 = vld [vmem:[%s8201_s26 + $0xa8] sm:$0xff]  ;;  %v3124_v0 = vmax.f32 %v2612_v56, %v2868_v57  ;;  %v2615_v1 = vld [vmem:[#allocation2 + $0x5b8] sm:$0xff] }
 0x24c   : > { %3373 = vst [vmem:[#allocation2 + $0x320] sm:$0xff] %v3117_v43  ;;  %v2871_v2 = vld [vmem:[%s8201_s26 + $0xb0] sm:$0xff]  ;;  %v3125_v3 = vmax.f32 %v2613_v59, %v2869_v60  ;;  %v2616_v4 = vld [vmem:[#allocation2 + $0x568] sm:$0xff]  ;;  %v2872_v5 = vld [vmem:[%s8201_s26 + $0xb8] sm:$0xff]  ;;  %v3126_v6 = vmax.f32 %v2614_v62, %v2870_v63 }
 0x24d   : > { %3374 = vst [vmem:[#allocation2 + $0x550] sm:$0xff] %v3118_v46  ;;  %v2617_v7 = vld [vmem:[#allocation2 + $0x3e8] sm:$0xff]  ;;  %v2873_v8 = vld [vmem:[%s8201_s26 + $0xc0] sm:$0xff]  ;;  %v3127_v9 = vmax.f32 %v2615_v1, %v2871_v2  ;;  %v2618_v10 = vld [vmem:[#allocation2 + $0x6f8] sm:$0xff]  ;;  %v3128_v12 = vmax.f32 %v2616_v4, %v2872_v5 }
 0x24e   : > { %3375 = vst [vmem:[#allocation2 + $0x508] sm:$0xff] %v3119_v49  ;;  %v2874_v11 = vld [vmem:[%s8201_s26 + $0xc8] sm:$0xff]  ;;  %v2619_v13 = vld [vmem:[#allocation2 + $0x690] sm:$0xff]  ;;  %v3129_v15 = vmax.f32 %v2617_v7, %v2873_v8  ;;  %v2876_v17 = vld [vmem:[%s8201_s26 + $0xd8] sm:$0xff] }
 0x24f   : > { %3376 = vst [vmem:[#allocation2 + $0x720] sm:$0xff] %v3120_v52  ;;  %v2875_v14 = vld [vmem:[%s8201_s26 + $0xd0] sm:$0xff]  ;;  %v2620_v16 = vld [vmem:[#allocation2 + $0x368] sm:$0xff]  ;;  %v3130_v18 = vmax.f32 %v2618_v10, %v2874_v11  ;;  %v2621_v19 = vld [vmem:[#allocation2 + $0x138] sm:$0xff] }
 0x250   : > { %3377 = vst [vmem:[#allocation2 + $0x6e0] sm:$0xff] %v3121_v55  ;;  %v2877_v20 = vld [vmem:[%s8201_s26 + $0xe0] sm:$0xff]  ;;  %v3131_v21 = vmax.f32 %v2619_v13, %v2875_v14  ;;  %v2878_v23 = vld [vmem:[%s8201_s26 + $0xe8] sm:$0xff]  ;;  %v3132_v24 = vmax.f32 %v2620_v16, %v2876_v17  ;;  %v2879_v26 = vld [vmem:[%s8201_s26 + $0xf0] sm:$0xff] }
 0x251   : > { %3378 = vst [vmem:[#allocation2 + $0x788] sm:$0xff] %v3122_v58  ;;  %v2622_v22 = vld [vmem:[#allocation2 + $0xc0] sm:$0xff]  ;;  %v3133_v27 = vmax.f32 %v2621_v19, %v2877_v20  ;;  %v2880_v29 = vld [vmem:[%s8201_s26 + $0xf8] sm:$0xff]  ;;  %v2882_v35 = vld [vmem:[%s8201_s26 + $0x108] sm:$0xff] }
 0x252   : > { %3379 = vst [vmem:[#allocation2 + $0x338] sm:$0xff] %v3123_v61  ;;  %v2623_v25 = vld [vmem:[#allocation2 + $0x1c0] sm:$0xff]  ;;  %v3134_v30 = vmax.f32 %v2622_v22, %v2878_v23  ;;  %v2627_v37 = vld [vmem:[#allocation2 + $0x558] sm:$0xff]  ;;  %v2883_v38 = vld [vmem:[%s8201_s26 + $0x110] sm:$0xff] }
 0x253   : > { %3380 = vst [vmem:[#allocation2 + $0x740] sm:$0xff] %v3124_v0  ;;  %v2624_v28 = vld [vmem:[#allocation2 + $0x280] sm:$0xff]  ;;  %v3135_v33 = vmax.f32 %v2623_v25, %v2879_v26  ;;  %v2884_v41 = vld [vmem:[%s8201_s26 + $0x118] sm:$0xff]  ;;  %v3139_v45 = vmax.f32 %v2627_v37, %v2883_v38  ;;  %v2886_v47 = vld [vmem:[%s8201_s26 + $0x128] sm:$0xff] }
 0x254   : > { %3381 = vst [vmem:[#allocation2 + $0x2e0] sm:$0xff] %v3125_v3  ;;  %v2625_v31 = vld [vmem:[#allocation2 + $0x100] sm:$0xff]  ;;  %v3136_v36 = vmax.f32 %v2624_v28, %v2880_v29  ;;  %v2629_v43 = vld [vmem:[#allocation2 + $0x618] sm:$0xff]  ;;  %v2631_v49 = vld [vmem:[#allocation2 + $0x70] sm:$0xff] }
 0x255   : > { %3382 = vst [vmem:[#allocation2 + $0x5a8] sm:$0xff] %v3126_v6  ;;  %v2881_v32 = vld [vmem:[%s8201_s26 + $0x100] sm:$0xff]  ;;  %v2887_v50 = vld [vmem:[%s8201_s26 + $0x130] sm:$0xff]  ;;  %v2632_v52 = vld [vmem:[#allocation2 + $0x7b8] sm:$0xff] }
 0x256   : > { %3383 = vst [vmem:[#allocation2 + $0x5b8] sm:$0xff] %v3127_v9  ;;  %v2626_v34 = vld [vmem:[#allocation2 + $0x3c0] sm:$0xff]  ;;  %v3137_v39 = vmax.f32 %v2625_v31, %v2881_v32  ;;  %v2888_v53 = vld [vmem:[%s8201_s26 + $0x138] sm:$0xff]  ;;  %v3143_v57 = vmax.f32 %v2631_v49, %v2887_v50  ;;  %v2634_v58 = vld [vmem:[#allocation2 + $0x6a8] sm:$0xff] }
 0x257   : > { %3384 = vst [vmem:[#allocation2 + $0x568] sm:$0xff] %v3128_v12  ;;  %v2628_v40 = vld [vmem:[#allocation2 + $0x3e0] sm:$0xff]  ;;  %v3138_v42 = vmax.f32 %v2626_v34, %v2882_v35  ;;  %v2890_v59 = vld [vmem:[%s8201_s26 + $0x148] sm:$0xff]  ;;  %v3144_v60 = vmax.f32 %v2632_v52, %v2888_v53  ;;  %v2635_v61 = vld [vmem:[#allocation2 + $0x3f8] sm:$0xff] }
 0x258   : > { %3385 = vst [vmem:[#allocation2 + $0x3e8] sm:$0xff] %v3129_v15  ;;  %v2885_v44 = vld [vmem:[%s8201_s26 + $0x120] sm:$0xff]  ;;  %v3140_v48 = vmax.f32 %v2628_v40, %v2884_v41  ;;  %v2891_v62 = vld [vmem:[%s8201_s26 + $0x150] sm:$0xff]  ;;  %v2636_v0 = vld [vmem:[#allocation2 + $0x2e8] sm:$0xff]  ;;  %v3146_v2 = vmax.f32 %v2634_v58, %v2890_v59 }
 0x259   : > { %3386 = vst [vmem:[#allocation2 + $0x6f8] sm:$0xff] %v3130_v18  ;;  %v2630_v46 = vld [vmem:[#allocation2 + $0x4c0] sm:$0xff]  ;;  %v3141_v51 = vmax.f32 %v2629_v43, %v2885_v44  ;;  %v2892_v1 = vld [vmem:[%s8201_s26 + $0x158] sm:$0xff]  ;;  %v2637_v3 = vld [vmem:[#allocation2 + $0x6c8] sm:$0xff]  ;;  %v3147_v5 = vmax.f32 %v2635_v61, %v2891_v62 }
 0x25a   : > { %3387 = vst [vmem:[#allocation2 + $0x690] sm:$0xff] %v3131_v21  ;;  %v3142_v54 = vmax.f32 %v2630_v46, %v2886_v47  ;;  %v2633_v55 = vld [vmem:[#allocation2 + $0x400] sm:$0xff]  ;;  %v2894_v7 = vld [vmem:[%s8201_s26 + $0x168] sm:$0xff]  ;;  %v3148_v8 = vmax.f32 %v2636_v0, %v2892_v1  ;;  %v2895_v10 = vld [vmem:[%s8201_s26 + $0x170] sm:$0xff] }
 0x25b   : > { %3388 = vst [vmem:[#allocation2 + $0x368] sm:$0xff] %v3132_v24  ;;  %v2889_v56 = vld [vmem:[%s8201_s26 + $0x140] sm:$0xff]  ;;  %v2639_v9 = vld [vmem:[#allocation2 + $0x5e8] sm:$0xff]  ;;  %v2640_v12 = vld [vmem:[#allocation2 + $0x5f8] sm:$0xff] }
 0x25c   : > { %3389 = vst [vmem:[#allocation2 + $0x138] sm:$0xff] %v3133_v27  ;;  %v3145_v63 = vmax.f32 %v2633_v55, %v2889_v56  ;;  %v2893_v4 = vld [vmem:[%s8201_s26 + $0x160] sm:$0xff]  ;;  %v2896_v13 = vld [vmem:[%s8201_s26 + $0x178] sm:$0xff]  ;;  %v2641_v15 = vld [vmem:[#allocation2 + $0x770] sm:$0xff]  ;;  %v3151_v17 = vmax.f32 %v2639_v9, %v2895_v10 }
 0x25d   : > { %3390 = vst [vmem:[#allocation2 + $0xc0] sm:$0xff] %v3134_v30  ;;  %v2638_v6 = vld [vmem:[#allocation2 + $0x5c0] sm:$0xff]  ;;  %v3149_v11 = vmax.f32 %v2637_v3, %v2893_v4  ;;  %v2898_v19 = vld [vmem:[%s8201_s26 + $0x188] sm:$0xff]  ;;  %v3152_v20 = vmax.f32 %v2640_v12, %v2896_v13  ;;  %v2899_v22 = vld [vmem:[%s8201_s26 + $0x190] sm:$0xff] }
 0x25e   : > { %3391 = vst [vmem:[#allocation2 + $0x1c0] sm:$0xff] %v3135_v33  ;;  %v3150_v14 = vmax.f32 %v2638_v6, %v2894_v7  ;;  %v2897_v16 = vld [vmem:[%s8201_s26 + $0x180] sm:$0xff]  ;;  %v2644_v24 = vld [vmem:[#allocation2 + $0x250] sm:$0xff]  ;;  %v2900_v25 = vld [vmem:[%s8201_s26 + $0x198] sm:$0xff] }
 0x25f   : > { %3392 = vst [vmem:[#allocation2 + $0x280] sm:$0xff] %v3136_v36  ;;  %v2642_v18 = vld [vmem:[#allocation2 + $0x520] sm:$0xff]  ;;  %v3153_v23 = vmax.f32 %v2641_v15, %v2897_v16  ;;  %v2645_v27 = vld [vmem:[#allocation2 + $0x348] sm:$0xff]  ;;  %v3156_v32 = vmax.f32 %v2644_v24, %v2900_v25  ;;  %v2903_v34 = vld [vmem:[%s8201_s26 + $0x1b0] sm:$0xff] }
 0x260   : > { %3393 = vst [vmem:[#allocation2 + $0x100] sm:$0xff] %v3137_v39  ;;  %v2643_v21 = vld [vmem:[#allocation2 + $0x640] sm:$0xff]  ;;  %v3154_v26 = vmax.f32 %v2642_v18, %v2898_v19  ;;  %v2902_v31 = vld [vmem:[%s8201_s26 + $0x1a8] sm:$0xff]  ;;  %v2904_v37 = vld [vmem:[%s8201_s26 + $0x1b8] sm:$0xff] }
 0x261   : > { %3394 = vst [vmem:[#allocation2 + $0x3c0] sm:$0xff] %v3138_v42  ;;  %v2901_v28 = vld [vmem:[%s8201_s26 + $0x1a0] sm:$0xff]  ;;  %v3155_v29 = vmax.f32 %v2643_v21, %v2899_v22  ;;  %v2649_v39 = vld [vmem:[#allocation2 + $0x148] sm:$0xff]  ;;  %v2907_v46 = vld [vmem:[%s8201_s26 + $0x1d0] sm:$0xff] }
 0x262   : > { %3395 = vst [vmem:[#allocation2 + $0x558] sm:$0xff] %v3139_v45  ;;  %v2646_v30 = vld [vmem:[#allocation2 + $0x420] sm:$0xff]  ;;  %v3157_v35 = vmax.f32 %v2645_v27, %v2901_v28  ;;  %v2906_v43 = vld [vmem:[%s8201_s26 + $0x1c8] sm:$0xff]  ;;  %v2908_v49 = vld [vmem:[%s8201_s26 + $0x1d8] sm:$0xff] }
 0x263   : > { %3396 = vst [vmem:[#allocation2 + $0x3e0] sm:$0xff] %v3140_v48  ;;  %v2647_v33 = vld [vmem:[#allocation2 + $0xe0] sm:$0xff]  ;;  %v3158_v38 = vmax.f32 %v2646_v30, %v2902_v31  ;;  %v2651_v45 = vld [vmem:[#allocation2 + $0x4e8] sm:$0xff]  ;;  %v2652_v48 = vld [vmem:[#allocation2 + $0x310] sm:$0xff] }
 0x264   : > { %3397 = vst [vmem:[#allocation2 + $0x618] sm:$0xff] %v3141_v51  ;;  %v2648_v36 = vld [vmem:[#allocation2 + $0x620] sm:$0xff]  ;;  %v3159_v41 = vmax.f32 %v2647_v33, %v2903_v34  ;;  %v2653_v51 = vld [vmem:[#allocation2 + $0x38] sm:$0xff]  ;;  %v3163_v53 = vmax.f32 %v2651_v45, %v2907_v46  ;;  %v2910_v55 = vld [vmem:[%s8201_s26 + $0x1e8] sm:$0xff]  ;;  %v3164_v56 = vmax.f32 %v2652_v48, %v2908_v49 }
 0x265   : > { %3398 = vst [vmem:[#allocation2 + $0x4c0] sm:$0xff] %v3142_v54  ;;  %v2905_v40 = vld [vmem:[%s8201_s26 + $0x1c0] sm:$0xff]  ;;  %v3160_v44 = vmax.f32 %v2648_v36, %v2904_v37  ;;  %v2911_v58 = vld [vmem:[%s8201_s26 + $0x1f0] sm:$0xff]  ;;  %v2912_v61 = vld [vmem:[%s8201_s26 + $0x1f8] sm:$0xff] }
 0x266   : > { %3399 = vst [vmem:[#allocation2 + $0x70] sm:$0xff] %v3143_v57  ;;  %v2650_v42 = vld [vmem:[#allocation2 + $0x3a0] sm:$0xff]  ;;  %v3161_v47 = vmax.f32 %v2649_v39, %v2905_v40  ;;  %v2655_v57 = vld [vmem:[#allocation2 + $0x50] sm:$0xff]  ;;  %v2914_v3 = vld [vmem:[%s8201_s26 + $0x208] sm:$0xff] }
 0x267   : > { %3400 = vst [vmem:[#allocation2 + $0x7b8] sm:$0xff] %v3144_v60  ;;  %v3162_v50 = vmax.f32 %v2650_v42, %v2906_v43  ;;  %v2909_v52 = vld [vmem:[%s8201_s26 + $0x1e0] sm:$0xff]  ;;  %v2656_v60 = vld [vmem:[#allocation2 + $0x390] sm:$0xff]  ;;  %v3167_v1 = vmax.f32 %v2655_v57, %v2911_v58  ;;  %v2916_v9 = vld [vmem:[%s8201_s26 + $0x218] sm:$0xff] }
 0x268   : > { %3401 = vst [vmem:[#allocation2 + $0x400] sm:$0xff] %v3145_v63  ;;  %v2654_v54 = vld [vmem:[#allocation2 + $0x440] sm:$0xff]  ;;  %v3165_v59 = vmax.f32 %v2653_v51, %v2909_v52  ;;  %v2657_v63 = vld [vmem:[#allocation2 + $0x538] sm:$0xff]  ;;  %v3168_v4 = vmax.f32 %v2656_v60, %v2912_v61  ;;  %v2915_v6 = vld [vmem:[%s8201_s26 + $0x210] sm:$0xff] }
 0x269   : > { %3402 = vst [vmem:[#allocation2 + $0x6a8] sm:$0xff] %v3146_v2  ;;  %v3166_v62 = vmax.f32 %v2654_v54, %v2910_v55  ;;  %v2913_v0 = vld [vmem:[%s8201_s26 + $0x200] sm:$0xff]  ;;  %v2658_v2 = vld [vmem:[#allocation2 + $0xf0] sm:$0xff]  ;;  %v2918_v15 = vld [vmem:[%s8201_s26 + $0x228] sm:$0xff] }
 0x26a   : > { %3403 = vst [vmem:[#allocation2 + $0x3f8] sm:$0xff] %v3147_v5  ;;  %v2659_v5 = vld [vmem:[#allocation2 + $0x790] sm:$0xff]  ;;  %v3169_v7 = vmax.f32 %v2657_v63, %v2913_v0  ;;  %v3170_v10 = vmax.f32 %v2658_v2, %v2914_v3  ;;  %v2917_v12 = vld [vmem:[%s8201_s26 + $0x220] sm:$0xff]  ;;  %v2920_v21 = vld [vmem:[%s8201_s26 + $0x238] sm:$0xff] }
 0x26b   : > { %3404 = vst [vmem:[#allocation2 + $0x2e8] sm:$0xff] %v3148_v8  ;;  %v2660_v8 = vld [vmem:[#allocation2 + $0x680] sm:$0xff]  ;;  %v3171_v13 = vmax.f32 %v2659_v5, %v2915_v6  ;;  %v2919_v18 = vld [vmem:[%s8201_s26 + $0x230] sm:$0xff]  ;;  %v2922_v27 = vld [vmem:[%s8201_s26 + $0x248] sm:$0xff] }
 0x26c   : > { %3405 = vst [vmem:[#allocation2 + $0x6c8] sm:$0xff] %v3149_v11  ;;  %v2661_v11 = vld [vmem:[#allocation2 + $0xb8] sm:$0xff]  ;;  %v3172_v16 = vmax.f32 %v2660_v8, %v2916_v9  ;;  %v2921_v24 = vld [vmem:[%s8201_s26 + $0x240] sm:$0xff]  ;;  %v2923_v30 = vld [vmem:[%s8201_s26 + $0x250] sm:$0xff] }
 0x26d   : > { %3406 = vst [vmem:[#allocation2 + $0x5c0] sm:$0xff] %v3150_v14  ;;  %v2662_v14 = vld [vmem:[#allocation2 + $0x120] sm:$0xff]  ;;  %v3173_v19 = vmax.f32 %v2661_v11, %v2917_v12  ;;  %v2924_v33 = vld [vmem:[%s8201_s26 + $0x258] sm:$0xff]  ;;  %v2926_v39 = vld [vmem:[%s8201_s26 + $0x268] sm:$0xff] }
 0x26e   : > { %3407 = vst [vmem:[#allocation2 + $0x5e8] sm:$0xff] %v3151_v17  ;;  %v2663_v17 = vld [vmem:[#allocation2 + $0xd0] sm:$0xff]  ;;  %v3174_v22 = vmax.f32 %v2662_v14, %v2918_v15  ;;  %v2925_v36 = vld [vmem:[%s8201_s26 + $0x260] sm:$0xff]  ;;  %v2928_v45 = vld [vmem:[%s8201_s26 + $0x278] sm:$0xff] }
 0x26f   : > { %3408 = vst [vmem:[#allocation2 + $0x5f8] sm:$0xff] %v3152_v20  ;;  %v2664_v20 = vld [vmem:[#allocation2 + $0x40] sm:$0xff]  ;;  %v3175_v25 = vmax.f32 %v2663_v17, %v2919_v18  ;;  %v2927_v42 = vld [vmem:[%s8201_s26 + $0x270] sm:$0xff]  ;;  %v2930_v51 = vld [vmem:[%s8201_s26 + $0x288] sm:$0xff] }
 0x270   : > { %3409 = vst [vmem:[#allocation2 + $0x770] sm:$0xff] %v3153_v23  ;;  %v2665_v23 = vld [vmem:[#allocation2 + $0x6f0] sm:$0xff]  ;;  %v3176_v28 = vmax.f32 %v2664_v20, %v2920_v21  ;;  %v2929_v48 = vld [vmem:[%s8201_s26 + $0x280] sm:$0xff]  ;;  %v2932_v57 = vld [vmem:[%s8201_s26 + $0x298] sm:$0xff] }
 0x271   : > { %3410 = vst [vmem:[#allocation2 + $0x520] sm:$0xff] %v3154_v26  ;;  %v2666_v26 = vld [vmem:[#allocation2 + $0x2f8] sm:$0xff]  ;;  %v3177_v31 = vmax.f32 %v2665_v23, %v2921_v24  ;;  %v2931_v54 = vld [vmem:[%s8201_s26 + $0x290] sm:$0xff]  ;;  %v2933_v60 = vld [vmem:[%s8201_s26 + $0x2a0] sm:$0xff] }
 0x272   : > { %3411 = vst [vmem:[#allocation2 + $0x640] sm:$0xff] %v3155_v29  ;;  %v2667_v29 = vld [vmem:[#allocation2 + $0x758] sm:$0xff]  ;;  %v3178_v34 = vmax.f32 %v2666_v26, %v2922_v27  ;;  %v2934_v63 = vld [vmem:[%s8201_s26 + $0x2a8] sm:$0xff]  ;;  %v2935_v2 = vld [vmem:[%s8201_s26 + $0x2b0] sm:$0xff] }
 0x273   : > { %3412 = vst [vmem:[#allocation2 + $0x250] sm:$0xff] %v3156_v32  ;;  %v2668_v32 = vld [vmem:[#allocation2 + $0x178] sm:$0xff]  ;;  %v3179_v37 = vmax.f32 %v2667_v29, %v2923_v30  ;;  %v2937_v8 = vld [vmem:[%s8201_s26 + $0x2c0] sm:$0xff]  ;;  %v2938_v11 = vld [vmem:[%s8201_s26 + $0x2c8] sm:$0xff] }
 0x274   : > { %3413 = vst [vmem:[#allocation2 + $0x348] sm:$0xff] %v3157_v35  ;;  %v2669_v35 = vld [vmem:[#allocation2 + $0x738] sm:$0xff]  ;;  %v3180_v40 = vmax.f32 %v2668_v32, %v2924_v33  ;;  %v2939_v14 = vld [vmem:[%s8201_s26 + $0x2d0] sm:$0xff]  ;;  %v2941_v20 = vld [vmem:[%s8201_s26 + $0x2e0] sm:$0xff] }
 0x275   : > { %3414 = vst [vmem:[#allocation2 + $0x420] sm:$0xff] %v3158_v38  ;;  %v2670_v38 = vld [vmem:[#allocation2 + $0x598] sm:$0xff]  ;;  %v3181_v43 = vmax.f32 %v2669_v35, %v2925_v36  ;;  %v2942_v23 = vld [vmem:[%s8201_s26 + $0x2e8] sm:$0xff]  ;;  %v2943_v26 = vld [vmem:[%s8201_s26 + $0x2f0] sm:$0xff] }
 0x276   : > { %3415 = vst [vmem:[#allocation2 + $0xe0] sm:$0xff] %v3159_v41  ;;  %v2671_v41 = vld [vmem:[#allocation2 + $0x7d8] sm:$0xff]  ;;  %v3182_v46 = vmax.f32 %v2670_v38, %v2926_v39  ;;  %v2945_v32 = vld [vmem:[%s8201_s26 + $0x300] sm:$0xff]  ;;  %v2946_v35 = vld [vmem:[%s8201_s26 + $0x308] sm:$0xff] }
 0x277   : > { %3416 = vst [vmem:[#allocation2 + $0x620] sm:$0xff] %v3160_v44  ;;  %v2672_v44 = vld [vmem:[#allocation2 + $0x6d8] sm:$0xff]  ;;  %v3183_v49 = vmax.f32 %v2671_v41, %v2927_v42  ;;  %v2947_v38 = vld [vmem:[%s8201_s26 + $0x310] sm:$0xff] }
 0x278   : > { %3417 = vst [vmem:[#allocation2 + $0x148] sm:$0xff] %v3161_v47  ;;  %v2673_v47 = vld [vmem:[#allocation2 + $0x398] sm:$0xff]  ;;  %v3184_v52 = vmax.f32 %v2672_v44, %v2928_v45  ;;  %v2949_v44 = vld [vmem:[%s8201_s26 + $0x320] sm:$0xff] }
 0x279   : > { %3418 = vst [vmem:[#allocation2 + $0x3a0] sm:$0xff] %v3162_v50  ;;  %v2674_v50 = vld [vmem:[#allocation2 + $0x1a8] sm:$0xff]  ;;  %v3185_v55 = vmax.f32 %v2673_v47, %v2929_v48  ;;  %v2936_v5 = vld [vmem:[%s8201_s26 + $0x2b8] sm:$0xff] }
 0x27a   : > { %3419 = vst [vmem:[#allocation2 + $0x4e8] sm:$0xff] %v3163_v53  ;;  %v2675_v53 = vld [vmem:[#allocation2 + $0x698] sm:$0xff]  ;;  %v3186_v58 = vmax.f32 %v2674_v50, %v2930_v51  ;;  %v2950_v47 = vld [vmem:[%s8201_s26 + $0x328] sm:$0xff]  ;;  %v2951_v50 = vld [vmem:[%s8201_s26 + $0x330] sm:$0xff] }
 0x27b   : > { %3420 = vst [vmem:[#allocation2 + $0x310] sm:$0xff] %v3164_v56  ;;  %v2676_v56 = vld [vmem:[#allocation2 + $0x3b8] sm:$0xff]  ;;  %v3187_v61 = vmax.f32 %v2675_v53, %v2931_v54 }
 0x27c   : > { %3421 = vst [vmem:[#allocation2 + $0x38] sm:$0xff] %v3165_v59  ;;  %v2677_v59 = vld [vmem:[#allocation2 + $0x5d8] sm:$0xff]  ;;  %v3188_v0 = vmax.f32 %v2676_v56, %v2932_v57  ;;  %v2953_v56 = vld [vmem:[%s8201_s26 + $0x340] sm:$0xff] }
 0x27d   : > { %3422 = vst [vmem:[#allocation2 + $0x440] sm:$0xff] %v3166_v62  ;;  %v2678_v62 = vld [vmem:[#allocation2 + $0x610] sm:$0xff]  ;;  %v3189_v3 = vmax.f32 %v2677_v59, %v2933_v60  ;;  %v2940_v17 = vld [vmem:[%s8201_s26 + $0x2d8] sm:$0xff]  ;;  %v2954_v59 = vld [vmem:[%s8201_s26 + $0x348] sm:$0xff] }
 0x27e   : > { %3423 = vst [vmem:[#allocation2 + $0x50] sm:$0xff] %v3167_v1  ;;  %v2679_v1 = vld [vmem:[#allocation2 + $0x218] sm:$0xff]  ;;  %v3190_v6 = vmax.f32 %v2678_v62, %v2934_v63  ;;  %v2955_v62 = vld [vmem:[%s8201_s26 + $0x350] sm:$0xff] }
 0x27f   : > { %3424 = vst [vmem:[#allocation2 + $0x390] sm:$0xff] %v3168_v4  ;;  %v2680_v4 = vld [vmem:[#allocation2 + $0x1d8] sm:$0xff]  ;;  %v3191_v9 = vmax.f32 %v2679_v1, %v2935_v2 }
 0x280   : > { %3425 = vst [vmem:[#allocation2 + $0x538] sm:$0xff] %v3169_v7  ;;  %v2681_v7 = vld [vmem:[#allocation2 + $0x628] sm:$0xff]  ;;  %v3192_v12 = vmax.f32 %v2680_v4, %v2936_v5  ;;  %v2944_v29 = vld [vmem:[%s8201_s26 + $0x2f8] sm:$0xff]  ;;  %v2957_v4 = vld [vmem:[%s8201_s26 + $0x360] sm:$0xff] }
 0x281   : > { %3426 = vst [vmem:[#allocation2 + $0xf0] sm:$0xff] %v3170_v10  ;;  %v2682_v10 = vld [vmem:[#allocation2 + $0x1f8] sm:$0xff]  ;;  %v3193_v15 = vmax.f32 %v2681_v7, %v2937_v8  ;;  %v2958_v7 = vld [vmem:[%s8201_s26 + $0x368] sm:$0xff] }
 0x282   : > { %3427 = vst [vmem:[#allocation2 + $0x790] sm:$0xff] %v3171_v13  ;;  %v2683_v13 = vld [vmem:[#allocation2 + $0x388] sm:$0xff]  ;;  %v3194_v18 = vmax.f32 %v2682_v10, %v2938_v11  ;;  %v2948_v41 = vld [vmem:[%s8201_s26 + $0x318] sm:$0xff]  ;;  %v2959_v10 = vld [vmem:[%s8201_s26 + $0x370] sm:$0xff] }
 0x283   : > { %3428 = vst [vmem:[#allocation2 + $0x680] sm:$0xff] %v3172_v16  ;;  %v2684_v16 = vld [vmem:[#allocation2 + $0x278] sm:$0xff]  ;;  %v3195_v21 = vmax.f32 %v2683_v13, %v2939_v14 }
 0x284   : > { %3429 = vst [vmem:[#allocation2 + $0xb8] sm:$0xff] %v3173_v19  ;;  %v2685_v19 = vld [vmem:[#allocation2 + $0x478] sm:$0xff]  ;;  %v3196_v24 = vmax.f32 %v2684_v16, %v2940_v17  ;;  %v2961_v16 = vld [vmem:[%s8201_s26 + $0x380] sm:$0xff] }
 0x285   : > { %3430 = vst [vmem:[#allocation2 + $0x120] sm:$0xff] %v3174_v22  ;;  %v2686_v22 = vld [vmem:[#allocation2 + $0x2c0] sm:$0xff]  ;;  %v3197_v27 = vmax.f32 %v2685_v19, %v2941_v20  ;;  %v2952_v53 = vld [vmem:[%s8201_s26 + $0x338] sm:$0xff]  ;;  %v2962_v19 = vld [vmem:[%s8201_s26 + $0x388] sm:$0xff] }
 0x286   : > { %3431 = vst [vmem:[#allocation2 + $0xd0] sm:$0xff] %v3175_v25  ;;  %v2687_v25 = vld [vmem:[#allocation2 + $0x1c8] sm:$0xff]  ;;  %v3198_v30 = vmax.f32 %v2686_v22, %v2942_v23  ;;  %v2956_v1 = vld [vmem:[%s8201_s26 + $0x358] sm:$0xff]  ;;  %v2963_v22 = vld [vmem:[%s8201_s26 + $0x390] sm:$0xff] }
 0x287   : > { %3432 = vst [vmem:[#allocation2 + $0x40] sm:$0xff] %v3176_v28  ;;  %v2688_v28 = vld [vmem:[#allocation2 + $0x7c0] sm:$0xff]  ;;  %v3199_v33 = vmax.f32 %v2687_v25, %v2943_v26  ;;  %v2960_v13 = vld [vmem:[%s8201_s26 + $0x378] sm:$0xff] }
 0x288   : > { %3433 = vst [vmem:[#allocation2 + $0x6f0] sm:$0xff] %v3177_v31  ;;  %v2689_v31 = vld [vmem:[#allocation2 + $0x418] sm:$0xff]  ;;  %v3200_v36 = vmax.f32 %v2688_v28, %v2944_v29  ;;  %v2965_v28 = vld [vmem:[%s8201_s26 + $0x3a0] sm:$0xff] }
 0x289   : > { %3434 = vst [vmem:[#allocation2 + $0x2f8] sm:$0xff] %v3178_v34  ;;  %v2690_v34 = vld [vmem:[#allocation2 + $0x7f0] sm:$0xff]  ;;  %v3201_v39 = vmax.f32 %v2689_v31, %v2945_v32  ;;  %v2964_v25 = vld [vmem:[%s8201_s26 + $0x398] sm:$0xff]  ;;  %v2966_v31 = vld [vmem:[%s8201_s26 + $0x3a8] sm:$0xff] }
 0x28a   : > { %3435 = vst [vmem:[#allocation2 + $0x758] sm:$0xff] %v3179_v37  ;;  %v2691_v37 = vld [vmem:[#allocation2 + $0x4b0] sm:$0xff]  ;;  %v3202_v42 = vmax.f32 %v2690_v34, %v2946_v35 }
 0x28b   : > { %3436 = vst [vmem:[#allocation2 + $0x178] sm:$0xff] %v3180_v40  ;;  %v2692_v40 = vld [vmem:[#allocation2 + $0x318] sm:$0xff]  ;;  %v3203_v45 = vmax.f32 %v2691_v37, %v2947_v38  ;;  %v2967_v34 = vld [vmem:[%s8201_s26 + $0x3b0] sm:$0xff] }
 0x28c   : > { %3437 = vst [vmem:[#allocation2 + $0x738] sm:$0xff] %v3181_v43  ;;  %v2693_v43 = vld [vmem:[#allocation2 + $0x90] sm:$0xff]  ;;  %v3204_v48 = vmax.f32 %v2692_v40, %v2948_v41  ;;  %v2968_v37 = vld [vmem:[%s8201_s26 + $0x3b8] sm:$0xff]  ;;  %v2969_v40 = vld [vmem:[%s8201_s26 + $0x3c0] sm:$0xff] }
 0x28d   : > { %3438 = vst [vmem:[#allocation2 + $0x598] sm:$0xff] %v3182_v46  ;;  %v2694_v46 = vld [vmem:[#allocation2 + $0x540] sm:$0xff]  ;;  %v3205_v51 = vmax.f32 %v2693_v43, %v2949_v44  ;;  %v2970_v43 = vld [vmem:[%s8201_s26 + $0x3c8] sm:$0xff] }
 0x28e   : > { %3439 = vst [vmem:[#allocation2 + $0x7d8] sm:$0xff] %v3183_v49  ;;  %v2695_v49 = vld [vmem:[#allocation2 + $0x588] sm:$0xff]  ;;  %v3206_v54 = vmax.f32 %v2694_v46, %v2950_v47  ;;  %v2971_v46 = vld [vmem:[%s8201_s26 + $0x3d0] sm:$0xff] }
 0x28f   : > { %3440 = vst [vmem:[#allocation2 + $0x6d8] sm:$0xff] %v3184_v52  ;;  %v2696_v52 = vld [vmem:[#allocation2 + $0x648] sm:$0xff]  ;;  %v3207_v57 = vmax.f32 %v2695_v49, %v2951_v50  ;;  %v2972_v49 = vld [vmem:[%s8201_s26 + $0x3d8] sm:$0xff] }
 0x290   : > { %3441 = vst [vmem:[#allocation2 + $0x398] sm:$0xff] %v3185_v55  ;;  %v2697_v55 = vld [vmem:[#allocation2 + $0x58] sm:$0xff]  ;;  %v3208_v60 = vmax.f32 %v2696_v52, %v2952_v53  ;;  %v2973_v52 = vld [vmem:[%s8201_s26 + $0x3e0] sm:$0xff] }
 0x291   : > { %3442 = vst [vmem:[#allocation2 + $0x1a8] sm:$0xff] %v3186_v58  ;;  %v2698_v58 = vld [vmem:[#allocation2 + $0x198] sm:$0xff]  ;;  %v3209_v63 = vmax.f32 %v2697_v55, %v2953_v56  ;;  %v2974_v55 = vld [vmem:[%s8201_s26 + $0x3e8] sm:$0xff] }
 0x292   : > { %3443 = vst [vmem:[#allocation2 + $0x698] sm:$0xff] %v3187_v61  ;;  %v2699_v61 = vld [vmem:[#allocation2 + $0x68] sm:$0xff]  ;;  %v3210_v2 = vmax.f32 %v2698_v58, %v2954_v59  ;;  %v2975_v58 = vld [vmem:[%s8201_s26 + $0x3f0] sm:$0xff] }
 0x293   : > { %3444 = vst [vmem:[#allocation2 + $0x3b8] sm:$0xff] %v3188_v0  ;;  %v2700_v0 = vld [vmem:[#allocation2 + $0x600] sm:$0xff]  ;;  %v3211_v5 = vmax.f32 %v2699_v61, %v2955_v62  ;;  %v2976_v61 = vld [vmem:[%s8201_s26 + $0x3f8] sm:$0xff] }
 0x294   : > { %3445 = vst [vmem:[#allocation2 + $0x5d8] sm:$0xff] %v3189_v3  ;;  %v2701_v3 = vld [vmem:[#allocation2 + $0x3a8] sm:$0xff]  ;;  %v3212_v8 = vmax.f32 %v2700_v0, %v2956_v1  ;;  %v2977_v0 = vld [vmem:[%s8201_s26 + $0x400] sm:$0xff] }
 0x295   : > { %3446 = vst [vmem:[#allocation2 + $0x610] sm:$0xff] %v3190_v6  ;;  %v2702_v6 = vld [vmem:[#allocation2 + $0xb0] sm:$0xff]  ;;  %v3213_v11 = vmax.f32 %v2701_v3, %v2957_v4  ;;  %v2978_v3 = vld [vmem:[%s8201_s26 + $0x408] sm:$0xff] }
 0x296   : > { %3447 = vst [vmem:[#allocation2 + $0x218] sm:$0xff] %v3191_v9  ;;  %v2703_v9 = vld [vmem:[#allocation2 + $0x630] sm:$0xff]  ;;  %v3214_v14 = vmax.f32 %v2702_v6, %v2958_v7 }
 0x297   : > { %3448 = vst [vmem:[#allocation2 + $0x1d8] sm:$0xff] %v3192_v12  ;;  %v2704_v12 = vld [vmem:[#allocation2 + $0x158] sm:$0xff]  ;;  %v3215_v17 = vmax.f32 %v2703_v9, %v2959_v10  ;;  %v2979_v6 = vld [vmem:[%s8201_s26 + $0x410] sm:$0xff] }
 0x298   : > { %3449 = vst [vmem:[#allocation2 + $0x628] sm:$0xff] %v3193_v15  ;;  %v2705_v15 = vld [vmem:[#allocation2 + $0x370] sm:$0xff]  ;;  %v3216_v20 = vmax.f32 %v2704_v12, %v2960_v13  ;;  %v2980_v9 = vld [vmem:[%s8201_s26 + $0x418] sm:$0xff]  ;;  %v2981_v12 = vld [vmem:[%s8201_s26 + $0x420] sm:$0xff] }
 0x299   : > { %3450 = vst [vmem:[#allocation2 + $0x1f8] sm:$0xff] %v3194_v18  ;;  %v2706_v18 = vld [vmem:[#allocation2 + $0x1e0] sm:$0xff]  ;;  %v3217_v23 = vmax.f32 %v2705_v15, %v2961_v16  ;;  %v2982_v15 = vld [vmem:[%s8201_s26 + $0x428] sm:$0xff] }
 0x29a   : > { %3451 = vst [vmem:[#allocation2 + $0x388] sm:$0xff] %v3195_v21  ;;  %v2707_v21 = vld [vmem:[#allocation2 + $0x7b0] sm:$0xff]  ;;  %v3218_v26 = vmax.f32 %v2706_v18, %v2962_v19 }
 0x29b   : > { %3452 = vst [vmem:[#allocation2 + $0x278] sm:$0xff] %v3196_v24  ;;  %v2708_v24 = vld [vmem:[#allocation2 + $0x6c0] sm:$0xff]  ;;  %v3219_v29 = vmax.f32 %v2707_v21, %v2963_v22  ;;  %v2983_v18 = vld [vmem:[%s8201_s26 + $0x430] sm:$0xff]  ;;  %v2984_v21 = vld [vmem:[%s8201_s26 + $0x438] sm:$0xff] }
 0x29c   : > { %3453 = vst [vmem:[#allocation2 + $0x478] sm:$0xff] %v3197_v27  ;;  %v2709_v27 = vld [vmem:[#allocation2 + $0xd8] sm:$0xff]  ;;  %v3220_v32 = vmax.f32 %v2708_v24, %v2964_v25  ;;  %v2985_v24 = vld [vmem:[%s8201_s26 + $0x440] sm:$0xff] }
 0x29d   : > { %3454 = vst [vmem:[#allocation2 + $0x2c0] sm:$0xff] %v3198_v30  ;;  %v2710_v30 = vld [vmem:[#allocation2 + $0x6b8] sm:$0xff]  ;;  %v3221_v35 = vmax.f32 %v2709_v27, %v2965_v28  ;;  %v2986_v27 = vld [vmem:[%s8201_s26 + $0x448] sm:$0xff] }
 0x29e   : > { %3455 = vst [vmem:[#allocation2 + $0x1c8] sm:$0xff] %v3199_v33  ;;  %v2711_v33 = vld [vmem:[#allocation2 + $0x140] sm:$0xff]  ;;  %v3222_v38 = vmax.f32 %v2710_v30, %v2966_v31  ;;  %v2987_v30 = vld [vmem:[%s8201_s26 + $0x450] sm:$0xff] }
 0x29f   : > { %3456 = vst [vmem:[#allocation2 + $0x7c0] sm:$0xff] %v3200_v36  ;;  %v2712_v36 = vld [vmem:[#allocation2 + $0x5b0] sm:$0xff]  ;;  %v3223_v41 = vmax.f32 %v2711_v33, %v2967_v34  ;;  %v2988_v33 = vld [vmem:[%s8201_s26 + $0x458] sm:$0xff] }
 0x2a0   : > { %3457 = vst [vmem:[#allocation2 + $0x418] sm:$0xff] %v3201_v39  ;;  %v2713_v39 = vld [vmem:[#allocation2 + $0x30] sm:$0xff]  ;;  %v3224_v44 = vmax.f32 %v2712_v36, %v2968_v37  ;;  %v2989_v36 = vld [vmem:[%s8201_s26 + $0x460] sm:$0xff] }
 0x2a1   : > { %3458 = vst [vmem:[#allocation2 + $0x7f0] sm:$0xff] %v3202_v42  ;;  %v2714_v42 = vld [vmem:[#allocation2 + $0x128] sm:$0xff]  ;;  %v3225_v47 = vmax.f32 %v2713_v39, %v2969_v40 }
 0x2a2   : > { %3459 = vst [vmem:[#allocation2 + $0x4b0] sm:$0xff] %v3203_v45  ;;  %v2715_v45 = vld [vmem:[#allocation2 + $0x1a0] sm:$0xff]  ;;  %v3226_v50 = vmax.f32 %v2714_v42, %v2970_v43  ;;  %v2990_v39 = vld [vmem:[%s8201_s26 + $0x468] sm:$0xff]  ;;  %v2991_v42 = vld [vmem:[%s8201_s26 + $0x470] sm:$0xff] }
 0x2a3   : > { %3460 = vst [vmem:[#allocation2 + $0x318] sm:$0xff] %v3204_v48  ;;  %v2716_v48 = vld [vmem:[#allocation2 + $0x5f0] sm:$0xff]  ;;  %v3227_v53 = vmax.f32 %v2715_v45, %v2971_v46  ;;  %v2992_v45 = vld [vmem:[%s8201_s26 + $0x478] sm:$0xff] }
 0x2a4   : > { %3461 = vst [vmem:[#allocation2 + $0x90] sm:$0xff] %v3205_v51  ;;  %v2717_v51 = vld [vmem:[#allocation2 + $0x670] sm:$0xff]  ;;  %v3228_v56 = vmax.f32 %v2716_v48, %v2972_v49  ;;  %v2993_v48 = vld [vmem:[%s8201_s26 + $0x480] sm:$0xff] }
 0x2a5   : > { %3462 = vst [vmem:[#allocation2 + $0x540] sm:$0xff] %v3206_v54  ;;  %v2718_v54 = vld [vmem:[#allocation2 + $0x240] sm:$0xff]  ;;  %v3229_v59 = vmax.f32 %v2717_v51, %v2973_v52  ;;  %v2994_v51 = vld [vmem:[%s8201_s26 + $0x488] sm:$0xff] }
 0x2a6   : > { %3463 = vst [vmem:[#allocation2 + $0x588] sm:$0xff] %v3207_v57  ;;  %v2719_v57 = vld [vmem:[#allocation2 + $0x118] sm:$0xff]  ;;  %v3230_v62 = vmax.f32 %v2718_v54, %v2974_v55  ;;  %v2995_v54 = vld [vmem:[%s8201_s26 + $0x490] sm:$0xff] }
 0x2a7   : > { %3464 = vst [vmem:[#allocation2 + $0x648] sm:$0xff] %v3208_v60  ;;  %v2720_v60 = vld [vmem:[#allocation2 + $0x268] sm:$0xff]  ;;  %v3231_v1 = vmax.f32 %v2719_v57, %v2975_v58  ;;  %v2996_v57 = vld [vmem:[%s8201_s26 + $0x498] sm:$0xff] }
 0x2a8   : > { %3465 = vst [vmem:[#allocation2 + $0x58] sm:$0xff] %v3209_v63  ;;  %v2721_v63 = vld [vmem:[#allocation2 + $0x4a8] sm:$0xff]  ;;  %v3232_v4 = vmax.f32 %v2720_v60, %v2976_v61  ;;  %v2997_v60 = vld [vmem:[%s8201_s26 + $0x4a0] sm:$0xff] }
 0x2a9   : > { %3466 = vst [vmem:[#allocation2 + $0x198] sm:$0xff] %v3210_v2  ;;  %v2722_v2 = vld [vmem:[#allocation2 + $0x5c8] sm:$0xff]  ;;  %v3233_v7 = vmax.f32 %v2721_v63, %v2977_v0 }
 0x2aa   : > { %3467 = vst [vmem:[#allocation2 + $0x68] sm:$0xff] %v3211_v5  ;;  %v2723_v5 = vld [vmem:[#allocation2 + $0x438] sm:$0xff]  ;;  %v3234_v10 = vmax.f32 %v2722_v2, %v2978_v3  ;;  %v2998_v63 = vld [vmem:[%s8201_s26 + $0x4a8] sm:$0xff]  ;;  %v2999_v2 = vld [vmem:[%s8201_s26 + $0x4b0] sm:$0xff] }
 0x2ab   : > { %3468 = vst [vmem:[#allocation2 + $0x600] sm:$0xff] %v3212_v8  ;;  %v2724_v8 = vld [vmem:[#allocation2 + $0x350] sm:$0xff]  ;;  %v3235_v13 = vmax.f32 %v2723_v5, %v2979_v6  ;;  %v3000_v5 = vld [vmem:[%s8201_s26 + $0x4b8] sm:$0xff] }
 0x2ac   : > { %3469 = vst [vmem:[#allocation2 + $0x3a8] sm:$0xff] %v3213_v11  ;;  %v2725_v11 = vld [vmem:[#allocation2 + $0x2c8] sm:$0xff]  ;;  %v3236_v16 = vmax.f32 %v2724_v8, %v2980_v9  ;;  %v3001_v8 = vld [vmem:[%s8201_s26 + $0x4c0] sm:$0xff] }
 0x2ad   : > { %3470 = vst [vmem:[#allocation2 + $0xb0] sm:$0xff] %v3214_v14  ;;  %v2726_v14 = vld [vmem:[#allocation2 + $0xf8] sm:$0xff]  ;;  %v3237_v19 = vmax.f32 %v2725_v11, %v2981_v12  ;;  %v3002_v11 = vld [vmem:[%s8201_s26 + $0x4c8] sm:$0xff] }
 0x2ae   : > { %3471 = vst [vmem:[#allocation2 + $0x630] sm:$0xff] %v3215_v17  ;;  %v2727_v17 = vld [vmem:[#allocation2 + $0x488] sm:$0xff]  ;;  %v3238_v22 = vmax.f32 %v2726_v14, %v2982_v15  ;;  %v3003_v14 = vld [vmem:[%s8201_s26 + $0x4d0] sm:$0xff] }
 0x2af   : > { %3472 = vst [vmem:[#allocation2 + $0x158] sm:$0xff] %v3216_v20  ;;  %v2728_v20 = vld [vmem:[#allocation2 + $0x6a0] sm:$0xff]  ;;  %v3239_v25 = vmax.f32 %v2727_v17, %v2983_v18  ;;  %v3004_v17 = vld [vmem:[%s8201_s26 + $0x4d8] sm:$0xff] }
 0x2b0   : > { %3473 = vst [vmem:[#allocation2 + $0x370] sm:$0xff] %v3217_v23  ;;  %v2729_v23 = vld [vmem:[#allocation2 + $0x3c8] sm:$0xff]  ;;  %v3240_v28 = vmax.f32 %v2728_v20, %v2984_v21  ;;  %v3005_v20 = vld [vmem:[%s8201_s26 + $0x4e0] sm:$0xff] }
 0x2b1   : > { %3474 = vst [vmem:[#allocation2 + $0x1e0] sm:$0xff] %v3218_v26  ;;  %v2730_v26 = vld [vmem:[#allocation2 + $0x1e8] sm:$0xff]  ;;  %v3241_v31 = vmax.f32 %v2729_v23, %v2985_v24 }
 0x2b2   : > { %3475 = vst [vmem:[#allocation2 + $0x7b0] sm:$0xff] %v3219_v29  ;;  %v2731_v29 = vld [vmem:[#allocation2 + $0x6d0] sm:$0xff]  ;;  %v3242_v34 = vmax.f32 %v2730_v26, %v2986_v27  ;;  %v3006_v23 = vld [vmem:[%s8201_s26 + $0x4e8] sm:$0xff] }
 0x2b3   : > { %3476 = vst [vmem:[#allocation2 + $0x6c0] sm:$0xff] %v3220_v32  ;;  %v2732_v32 = vld [vmem:[#allocation2 + $0x688] sm:$0xff]  ;;  %v3243_v37 = vmax.f32 %v2731_v29, %v2987_v30  ;;  %v3007_v26 = vld [vmem:[%s8201_s26 + $0x4f0] sm:$0xff]  ;;  %v3008_v29 = vld [vmem:[%s8201_s26 + $0x4f8] sm:$0xff] }
 0x2b4   : > { %3477 = vst [vmem:[#allocation2 + $0xd8] sm:$0xff] %v3221_v35  ;;  %v2733_v35 = vld [vmem:[#allocation2 + $0x730] sm:$0xff]  ;;  %v3244_v40 = vmax.f32 %v2732_v32, %v2988_v33  ;;  %v3009_v32 = vld [vmem:[%s8201_s26 + $0x500] sm:$0xff] }
 0x2b5   : > { %3478 = vst [vmem:[#allocation2 + $0x6b8] sm:$0xff] %v3222_v38  ;;  %v2734_v38 = vld [vmem:[#allocation2 + $0x658] sm:$0xff]  ;;  %v3245_v43 = vmax.f32 %v2733_v35, %v2989_v36  ;;  %v3010_v35 = vld [vmem:[%s8201_s26 + $0x508] sm:$0xff] }
 0x2b6   : > { %3479 = vst [vmem:[#allocation2 + $0x140] sm:$0xff] %v3223_v41  ;;  %v2735_v41 = vld [vmem:[#allocation2 + $0x458] sm:$0xff]  ;;  %v3246_v46 = vmax.f32 %v2734_v38, %v2990_v39  ;;  %v3011_v38 = vld [vmem:[%s8201_s26 + $0x510] sm:$0xff] }
 0x2b7   : > { %3480 = vst [vmem:[#allocation2 + $0x5b0] sm:$0xff] %v3224_v44  ;;  %v2736_v44 = vld [vmem:[#allocation2 + $0x1b8] sm:$0xff]  ;;  %v3247_v49 = vmax.f32 %v2735_v41, %v2991_v42 }
 0x2b8   : > { %3481 = vst [vmem:[#allocation2 + $0x30] sm:$0xff] %v3225_v47  ;;  %v2737_v47 = vld [vmem:[#allocation2 + $0x460] sm:$0xff]  ;;  %v3248_v52 = vmax.f32 %v2736_v44, %v2992_v45  ;;  %v3012_v41 = vld [vmem:[%s8201_s26 + $0x518] sm:$0xff] }
 0x2b9   : > { %3482 = vst [vmem:[#allocation2 + $0x128] sm:$0xff] %v3226_v50  ;;  %v2738_v50 = vld [vmem:[#allocation2 + $0x4f0] sm:$0xff]  ;;  %v3249_v55 = vmax.f32 %v2737_v47, %v2993_v48  ;;  %v3013_v44 = vld [vmem:[%s8201_s26 + $0x520] sm:$0xff]  ;;  %v3014_v47 = vld [vmem:[%s8201_s26 + $0x528] sm:$0xff] }
 0x2ba   : > { %3483 = vst [vmem:[#allocation2 + $0x1a0] sm:$0xff] %v3227_v53  ;;  %v2739_v53 = vld [vmem:[#allocation2 + $0x528] sm:$0xff]  ;;  %v3250_v58 = vmax.f32 %v2738_v50, %v2994_v51  ;;  %v3015_v50 = vld [vmem:[%s8201_s26 + $0x530] sm:$0xff] }
 0x2bb   : > { %3484 = vst [vmem:[#allocation2 + $0x5f0] sm:$0xff] %v3228_v56  ;;  %v2740_v56 = vld [vmem:[#allocation2 + $0x258] sm:$0xff]  ;;  %v3251_v61 = vmax.f32 %v2739_v53, %v2995_v54 }
 0x2bc   : > { %3485 = vst [vmem:[#allocation2 + $0x670] sm:$0xff] %v3229_v59  ;;  %v2741_v59 = vld [vmem:[#allocation2 + $0x4d0] sm:$0xff]  ;;  %v3252_v0 = vmax.f32 %v2740_v56, %v2996_v57  ;;  %v3016_v53 = vld [vmem:[%s8201_s26 + $0x538] sm:$0xff]  ;;  %v3017_v56 = vld [vmem:[%s8201_s26 + $0x540] sm:$0xff] }
 0x2bd   : > { %3486 = vst [vmem:[#allocation2 + $0x240] sm:$0xff] %v3230_v62  ;;  %v2742_v62 = vld [vmem:[#allocation2 + $0x4f8] sm:$0xff]  ;;  %v3253_v3 = vmax.f32 %v2741_v59, %v2997_v60  ;;  %v3018_v59 = vld [vmem:[%s8201_s26 + $0x548] sm:$0xff] }
 0x2be   : > { %3487 = vst [vmem:[#allocation2 + $0x118] sm:$0xff] %v3231_v1  ;;  %v2743_v1 = vld [vmem:[#allocation2 + $0x78] sm:$0xff]  ;;  %v3254_v6 = vmax.f32 %v2742_v62, %v2998_v63  ;;  %v3019_v62 = vld [vmem:[%s8201_s26 + $0x550] sm:$0xff] }
 0x2bf   : > { %3488 = vst [vmem:[#allocation2 + $0x268] sm:$0xff] %v3232_v4  ;;  %v2744_v4 = vld [vmem:[#allocation2 + $0x2a0] sm:$0xff]  ;;  %v3255_v9 = vmax.f32 %v2743_v1, %v2999_v2  ;;  %v3020_v1 = vld [vmem:[%s8201_s26 + $0x558] sm:$0xff] }
 0x2c0   : > { %3489 = vst [vmem:[#allocation2 + $0x4a8] sm:$0xff] %v3233_v7  ;;  %v2745_v7 = vld [vmem:[#allocation2 + $0x10] sm:$0xff]  ;;  %v3256_v12 = vmax.f32 %v2744_v4, %v3000_v5  ;;  %v3021_v4 = vld [vmem:[%s8201_s26 + $0x560] sm:$0xff] }
 0x2c1   : > { %3490 = vst [vmem:[#allocation2 + $0x5c8] sm:$0xff] %v3234_v10  ;;  %v2746_v10 = vld [vmem:[#allocation2 + $0x778] sm:$0xff]  ;;  %v3257_v15 = vmax.f32 %v2745_v7, %v3001_v8  ;;  %v3022_v7 = vld [vmem:[%s8201_s26 + $0x568] sm:$0xff] }
 0x2c2   : > { %3491 = vst [vmem:[#allocation2 + $0x438] sm:$0xff] %v3235_v13  ;;  %v2747_v13 = vld [vmem:[#allocation2 + $0x7a8] sm:$0xff]  ;;  %v3258_v18 = vmax.f32 %v2746_v10, %v3002_v11  ;;  %v3023_v10 = vld [vmem:[%s8201_s26 + $0x570] sm:$0xff] }
 0x2c3   : > { %3492 = vst [vmem:[#allocation2 + $0x350] sm:$0xff] %v3236_v16  ;;  %v2748_v16 = vld [vmem:[#allocation2 + $0x530] sm:$0xff]  ;;  %v3259_v21 = vmax.f32 %v2747_v13, %v3003_v14  ;;  %v3024_v13 = vld [vmem:[%s8201_s26 + $0x578] sm:$0xff] }
 0x2c4   : > { %3493 = vst [vmem:[#allocation2 + $0x2c8] sm:$0xff] %v3237_v19  ;;  %v2749_v19 = vld [vmem:[#allocation2 + $0x590] sm:$0xff]  ;;  %v3260_v24 = vmax.f32 %v2748_v16, %v3004_v17  ;;  %v3025_v16 = vld [vmem:[%s8201_s26 + $0x580] sm:$0xff] }
 0x2c5   : > { %3494 = vst [vmem:[#allocation2 + $0xf8] sm:$0xff] %v3238_v22  ;;  %v2750_v22 = vld [vmem:[#allocation2 + $0x660] sm:$0xff]  ;;  %v3261_v27 = vmax.f32 %v2749_v19, %v3005_v20  ;;  %v3026_v19 = vld [vmem:[%s8201_s26 + $0x588] sm:$0xff] }
 0x2c6   : > { %3495 = vst [vmem:[#allocation2 + $0x488] sm:$0xff] %v3239_v25  ;;  %v2751_v25 = vld [vmem:[#allocation2 + $0x358] sm:$0xff]  ;;  %v3262_v30 = vmax.f32 %v2750_v22, %v3006_v23  ;;  %v3027_v22 = vld [vmem:[%s8201_s26 + $0x590] sm:$0xff] }
 0x2c7   : > { %3496 = vst [vmem:[#allocation2 + $0x6a0] sm:$0xff] %v3240_v28  ;;  %v2752_v28 = vld [vmem:[#allocation2 + $0x700] sm:$0xff]  ;;  %v3263_v33 = vmax.f32 %v2751_v25, %v3007_v26  ;;  %v3028_v25 = vld [vmem:[%s8201_s26 + $0x598] sm:$0xff] }
 0x2c8   : > { %3497 = vst [vmem:[#allocation2 + $0x3c8] sm:$0xff] %v3241_v31  ;;  %v2753_v31 = vld [vmem:[#allocation2 + $0x340] sm:$0xff]  ;;  %v3264_v36 = vmax.f32 %v2752_v28, %v3008_v29 }
 0x2c9   : > { %3498 = vst [vmem:[#allocation2 + $0x1e8] sm:$0xff] %v3242_v34  ;;  %v2754_v34 = vld [vmem:[#allocation2 + $0x5a0] sm:$0xff]  ;;  %v3265_v39 = vmax.f32 %v2753_v31, %v3009_v32  ;;  %v3030_v31 = vld [vmem:[%s8201_s26 + $0x5a8] sm:$0xff] }
 0x2ca   : > { %3499 = vst [vmem:[#allocation2 + $0x6d0] sm:$0xff] %v3243_v37  ;;  %v2755_v37 = vld [vmem:[#allocation2 + $0x3d0] sm:$0xff]  ;;  %v3266_v42 = vmax.f32 %v2754_v34, %v3010_v35  ;;  %v3029_v28 = vld [vmem:[%s8201_s26 + $0x5a0] sm:$0xff] }
 0x2cb   : > { %3500 = vst [vmem:[#allocation2 + $0x688] sm:$0xff] %v3244_v40  ;;  %v2756_v40 = vld [vmem:[#allocation2 + $0x230] sm:$0xff]  ;;  %v3267_v45 = vmax.f32 %v2755_v37, %v3011_v38  ;;  %v3032_v37 = vld [vmem:[%s8201_s26 + $0x5b8] sm:$0xff] }
 0x2cc   : > { %3501 = vst [vmem:[#allocation2 + $0x730] sm:$0xff] %v3245_v43  ;;  %v2757_v43 = vld [vmem:[#allocation2 + $0x560] sm:$0xff]  ;;  %v3268_v48 = vmax.f32 %v2756_v40, %v3012_v41  ;;  %v3031_v34 = vld [vmem:[%s8201_s26 + $0x5b0] sm:$0xff] }
 0x2cd   : > { %3502 = vst [vmem:[#allocation2 + $0x658] sm:$0xff] %v3246_v46  ;;  %v2758_v46 = vld [vmem:[#allocation2 + $0x7f8] sm:$0xff]  ;;  %v3269_v51 = vmax.f32 %v2757_v43, %v3013_v44  ;;  %v3033_v40 = vld [vmem:[%s8201_s26 + $0x5c0] sm:$0xff]  ;;  %v3034_v43 = vld [vmem:[%s8201_s26 + $0x5c8] sm:$0xff] }
 0x2ce   : > { %3503 = vst [vmem:[#allocation2 + $0x458] sm:$0xff] %v3247_v49  ;;  %v2759_v49 = vld [vmem:[#allocation2 + $0x4e0] sm:$0xff]  ;;  %v3270_v54 = vmax.f32 %v2758_v46, %v3014_v47  ;;  %v3035_v46 = vld [vmem:[%s8201_s26 + $0x5d0] sm:$0xff] }
 0x2cf   : > { %3504 = vst [vmem:[#allocation2 + $0x1b8] sm:$0xff] %v3248_v52  ;;  %v2760_v52 = vld [vmem:[#allocation2 + $0x200] sm:$0xff]  ;;  %v3271_v57 = vmax.f32 %v2759_v49, %v3015_v50  ;;  %v3036_v49 = vld [vmem:[%s8201_s26 + $0x5d8] sm:$0xff] }
 0x2d0   : > { %3505 = vst [vmem:[#allocation2 + $0x460] sm:$0xff] %v3249_v55  ;;  %v2761_v55 = vld [vmem:[#allocation2 + $0x468] sm:$0xff]  ;;  %v3272_v60 = vmax.f32 %v2760_v52, %v3016_v53  ;;  %v3037_v52 = vld [vmem:[%s8201_s26 + $0x5e0] sm:$0xff] }
 0x2d1   : > { %3506 = vst [vmem:[#allocation2 + $0x4f0] sm:$0xff] %v3250_v58  ;;  %v2762_v58 = vld [vmem:[#allocation2 + $0x2a8] sm:$0xff]  ;;  %v3273_v63 = vmax.f32 %v2761_v55, %v3017_v56 }
 0x2d2   : > { %3507 = vst [vmem:[#allocation2 + $0x528] sm:$0xff] %v3251_v61  ;;  %v2763_v61 = vld [vmem:[#allocation2 + $0x1d0] sm:$0xff]  ;;  %v3274_v2 = vmax.f32 %v2762_v58, %v3018_v59  ;;  %v3038_v55 = vld [vmem:[%s8201_s26 + $0x5e8] sm:$0xff] }
 0x2d3   : > { %3508 = vst [vmem:[#allocation2 + $0x258] sm:$0xff] %v3252_v0  ;;  %v2764_v0 = vld [vmem:[#allocation2 + $0x510] sm:$0xff]  ;;  %v3275_v5 = vmax.f32 %v2763_v61, %v3019_v62  ;;  %v3040_v61 = vld [vmem:[%s8201_s26 + $0x5f8] sm:$0xff] }
 0x2d4   : > { %3509 = vst [vmem:[#allocation2 + $0x4d0] sm:$0xff] %v3253_v3  ;;  %v2765_v3 = vld [vmem:[#allocation2 + $0x750] sm:$0xff]  ;;  %v3276_v8 = vmax.f32 %v2764_v0, %v3020_v1  ;;  %v3041_v0 = vld [vmem:[%s8201_s26 + $0x600] sm:$0xff] }
 0x2d5   : > { %3510 = vst [vmem:[#allocation2 + $0x4f8] sm:$0xff] %v3254_v6  ;;  %v2766_v6 = vld [vmem:[#allocation2 + $0x130] sm:$0xff]  ;;  %v3277_v11 = vmax.f32 %v2765_v3, %v3021_v4  ;;  %v3042_v3 = vld [vmem:[%s8201_s26 + $0x608] sm:$0xff] }
 0x2d6   : > { %3511 = vst [vmem:[#allocation2 + $0x78] sm:$0xff] %v3255_v9  ;;  %v2767_v9 = vld [vmem:[#allocation2 + $0x28] sm:$0xff]  ;;  %v3278_v14 = vmax.f32 %v2766_v6, %v3022_v7  ;;  %v3039_v58 = vld [vmem:[%s8201_s26 + $0x5f0] sm:$0xff] }
 0x2d7   : > { %3512 = vst [vmem:[#allocation2 + $0x2a0] sm:$0xff] %v3256_v12  ;;  %v2768_v12 = vld [vmem:[#allocation2 + $0x760] sm:$0xff]  ;;  %v3279_v17 = vmax.f32 %v2767_v9, %v3023_v10  ;;  %v3043_v6 = vld [vmem:[%s8201_s26 + $0x610] sm:$0xff]  ;;  %v3044_v9 = vld [vmem:[%s8201_s26 + $0x618] sm:$0xff] }
 0x2d8   : > { %3513 = vst [vmem:[#allocation2 + $0x10] sm:$0xff] %v3257_v15  ;;  %v2769_v15 = vld [vmem:[#allocation2 + $0x5d0] sm:$0xff]  ;;  %v3280_v20 = vmax.f32 %v2768_v12, %v3024_v13  ;;  %v3045_v12 = vld [vmem:[%s8201_s26 + $0x620] sm:$0xff] }
 0x2d9   : > { %3514 = vst [vmem:[#allocation2 + $0x778] sm:$0xff] %v3258_v18  ;;  %v2770_v18 = vld [vmem:[#allocation2 + $0x228] sm:$0xff]  ;;  %v3281_v23 = vmax.f32 %v2769_v15, %v3025_v16 }
 0x2da   : > { %3515 = vst [vmem:[#allocation2 + $0x7a8] sm:$0xff] %v3259_v21  ;;  %v2771_v21 = vld [vmem:[#allocation2 + $0x208] sm:$0xff]  ;;  %v3282_v26 = vmax.f32 %v2770_v18, %v3026_v19  ;;  %v3047_v18 = vld [vmem:[%s8201_s26 + $0x630] sm:$0xff] }
 0x2db   : > { %3516 = vst [vmem:[#allocation2 + $0x530] sm:$0xff] %v3260_v24  ;;  %v2772_v24 = vld [vmem:[#allocation2 + $0x290] sm:$0xff]  ;;  %v3283_v29 = vmax.f32 %v2771_v21, %v3027_v22  ;;  %v3046_v15 = vld [vmem:[%s8201_s26 + $0x628] sm:$0xff]  ;;  %v3048_v21 = vld [vmem:[%s8201_s26 + $0x638] sm:$0xff] }
 0x2dc   : > { %3517 = vst [vmem:[#allocation2 + $0x590] sm:$0xff] %v3261_v27  ;;  %v2773_v27 = vld [vmem:[#allocation2 + $0x7a0] sm:$0xff]  ;;  %v3284_v32 = vmax.f32 %v2772_v24, %v3028_v25 }
 0x2dd   : > { %3518 = vst [vmem:[#allocation2 + $0x660] sm:$0xff] %v3262_v30  ;;  %v2774_v30 = vld [vmem:[#allocation2 + $0x80] sm:$0xff]  ;;  %v3285_v35 = vmax.f32 %v2773_v27, %v3029_v28  ;;  %v3050_v27 = vld [vmem:[%s8201_s26 + $0x648] sm:$0xff] }
 0x2de   : > { %3519 = vst [vmem:[#allocation2 + $0x358] sm:$0xff] %v3263_v33  ;;  %v2775_v33 = vld [vmem:[#allocation2 + $0x4c8] sm:$0xff]  ;;  %v3286_v38 = vmax.f32 %v2774_v30, %v3030_v31  ;;  %v3049_v24 = vld [vmem:[%s8201_s26 + $0x640] sm:$0xff]  ;;  %v3051_v30 = vld [vmem:[%s8201_s26 + $0x650] sm:$0xff] }
 0x2df   : > { %3520 = vst [vmem:[#allocation2 + $0x700] sm:$0xff] %v3264_v36  ;;  %v2776_v36 = vld [vmem:[#allocation2 + $0x3f0] sm:$0xff]  ;;  %v3287_v41 = vmax.f32 %v2775_v33, %v3031_v34  ;;  %v3052_v33 = vld [vmem:[%s8201_s26 + $0x658] sm:$0xff] }
 0x2e0   : > { %3521 = vst [vmem:[#allocation2 + $0x340] sm:$0xff] %v3265_v39  ;;  %v2777_v39 = vld [vmem:[#allocation2 + $0x798] sm:$0xff]  ;;  %v3288_v44 = vmax.f32 %v2776_v36, %v3032_v37  ;;  %v3053_v36 = vld [vmem:[%s8201_s26 + $0x660] sm:$0xff] }
 0x2e1   : > { %3522 = vst [vmem:[#allocation2 + $0x5a0] sm:$0xff] %v3266_v42  ;;  %v2778_v42 = vld [vmem:[#allocation2 + $0x378] sm:$0xff]  ;;  %v3289_v47 = vmax.f32 %v2777_v39, %v3033_v40  ;;  %v3054_v39 = vld [vmem:[%s8201_s26 + $0x668] sm:$0xff] }
 0x2e2   : > { %3523 = vst [vmem:[#allocation2 + $0x3d0] sm:$0xff] %v3267_v45  ;;  %v2779_v45 = vld [vmem:[#allocation2 + $0x160] sm:$0xff]  ;;  %v3290_v50 = vmax.f32 %v2778_v42, %v3034_v43  ;;  %v3055_v42 = vld [vmem:[%s8201_s26 + $0x670] sm:$0xff] }
 0x2e3   : > { %3524 = vst [vmem:[#allocation2 + $0x230] sm:$0xff] %v3268_v48  ;;  %v2780_v48 = vld [vmem:[#allocation2 + $0x260] sm:$0xff]  ;;  %v3291_v53 = vmax.f32 %v2779_v45, %v3035_v46  ;;  %v3056_v45 = vld [vmem:[%s8201_s26 + $0x678] sm:$0xff] }
 0x2e4   : > { %3525 = vst [vmem:[#allocation2 + $0x560] sm:$0xff] %v3269_v51  ;;  %v2781_v51 = vld [vmem:[#allocation2 + $0x728] sm:$0xff]  ;;  %v3292_v56 = vmax.f32 %v2780_v48, %v3036_v49  ;;  %v3057_v48 = vld [vmem:[%s8201_s26 + $0x680] sm:$0xff] }
 0x2e5   : > { %3526 = vst [vmem:[#allocation2 + $0x7f8] sm:$0xff] %v3270_v54  ;;  %v2782_v54 = vld [vmem:[#allocation2 + $0x288] sm:$0xff]  ;;  %v3293_v59 = vmax.f32 %v2781_v51, %v3037_v52 }
 0x2e6   : > { %3527 = vst [vmem:[#allocation2 + $0x4e0] sm:$0xff] %v3271_v57  ;;  %v2783_v57 = vld [vmem:[#allocation2 + $0x188] sm:$0xff]  ;;  %v3294_v62 = vmax.f32 %v2782_v54, %v3038_v55  ;;  %v3059_v54 = vld [vmem:[%s8201_s26 + $0x690] sm:$0xff] }
 0x2e7   : > { %3528 = vst [vmem:[#allocation2 + $0x200] sm:$0xff] %v3272_v60  ;;  %v2784_v60 = vld [vmem:[#allocation2 + $0x408] sm:$0xff]  ;;  %v3295_v1 = vmax.f32 %v2783_v57, %v3039_v58  ;;  %v3060_v57 = vld [vmem:[%s8201_s26 + $0x698] sm:$0xff] }
 0x2e8   : > { %3529 = vst [vmem:[#allocation2 + $0x468] sm:$0xff] %v3273_v63  ;;  %v2785_v63 = vld [vmem:[#allocation2 + $0x678] sm:$0xff]  ;;  %v3296_v4 = vmax.f32 %v2784_v60, %v3040_v61  ;;  %v3058_v51 = vld [vmem:[%s8201_s26 + $0x688] sm:$0xff]  ;;  %v3061_v60 = vld [vmem:[%s8201_s26 + $0x6a0] sm:$0xff] }
 0x2e9   : > { %3530 = vst [vmem:[#allocation2 + $0x2a8] sm:$0xff] %v3274_v2  ;;  %v2786_v2 = vld [vmem:[#allocation2 + $0x98] sm:$0xff]  ;;  %v3297_v7 = vmax.f32 %v2785_v63, %v3041_v0  ;;  %v3062_v63 = vld [vmem:[%s8201_s26 + $0x6a8] sm:$0xff] }
 0x2ea   : > { %3531 = vst [vmem:[#allocation2 + $0x1d0] sm:$0xff] %v3275_v5  ;;  %v2787_v5 = vld [vmem:[#allocation2 + $0x470] sm:$0xff]  ;;  %v3298_v10 = vmax.f32 %v2786_v2, %v3042_v3 }
 0x2eb   : > { %3532 = vst [vmem:[#allocation2 + $0x510] sm:$0xff] %v3276_v8  ;;  %v2788_v8 = vld [vmem:[#allocation2 + $0x410] sm:$0xff]  ;;  %v3299_v13 = vmax.f32 %v2787_v5, %v3043_v6  ;;  %v3064_v5 = vld [vmem:[%s8201_s26 + $0x6b8] sm:$0xff] }
 0x2ec   : > { %3533 = vst [vmem:[#allocation2 + $0x750] sm:$0xff] %v3277_v11  ;;  %v2789_v11 = vld [vmem:[#allocation2 + $0x248] sm:$0xff]  ;;  %v3300_v16 = vmax.f32 %v2788_v8, %v3044_v9  ;;  %v3063_v2 = vld [vmem:[%s8201_s26 + $0x6b0] sm:$0xff]  ;;  %v3065_v8 = vld [vmem:[%s8201_s26 + $0x6c0] sm:$0xff] }
 0x2ed   : > { %3534 = vst [vmem:[#allocation2 + $0x130] sm:$0xff] %v3278_v14  ;;  %v2790_v14 = vld [vmem:[#allocation2 + $0x548] sm:$0xff]  ;;  %v3301_v19 = vmax.f32 %v2789_v11, %v3045_v12 }
 0x2ee   : > { %3535 = vst [vmem:[#allocation2 + $0x28] sm:$0xff] %v3279_v17  ;;  %v2791_v17 = vld [vmem:[#allocation2 + $0x220] sm:$0xff]  ;;  %v3302_v22 = vmax.f32 %v2790_v14, %v3046_v15  ;;  %v3066_v11 = vld [vmem:[%s8201_s26 + $0x6c8] sm:$0xff]  ;;  %v3067_v14 = vld [vmem:[%s8201_s26 + $0x6d0] sm:$0xff] }
 0x2ef   : > { %3536 = vst [vmem:[#allocation2 + $0x760] sm:$0xff] %v3280_v20  ;;  %v2792_v20 = vld [vmem:[#allocation2 + $0x780] sm:$0xff]  ;;  %v3303_v25 = vmax.f32 %v2791_v17, %v3047_v18  ;;  %v3068_v17 = vld [vmem:[%s8201_s26 + $0x6d8] sm:$0xff] }
 0x2f0   : > { %3537 = vst [vmem:[#allocation2 + $0x5d0] sm:$0xff] %v3281_v23  ;;  %v2793_v23 = vld [vmem:[#allocation2 + $0x708] sm:$0xff]  ;;  %v3304_v28 = vmax.f32 %v2792_v20, %v3048_v21  ;;  %v3069_v20 = vld [vmem:[%s8201_s26 + $0x6e0] sm:$0xff] }
 0x2f1   : > { %3538 = vst [vmem:[#allocation2 + $0x228] sm:$0xff] %v3282_v26  ;;  %v2794_v26 = vld [vmem:[#allocation2 + $0x8] sm:$0xff]  ;;  %v3305_v31 = vmax.f32 %v2793_v23, %v3049_v24 }
 0x2f2   : > { %3539 = vst [vmem:[#allocation2 + $0x208] sm:$0xff] %v3283_v29  ;;  %v2795_v29 = vld [vmem:[#allocation2 + $0x428] sm:$0xff]  ;;  %v3306_v34 = vmax.f32 %v2794_v26, %v3050_v27  ;;  %v3071_v26 = vld [vmem:[%s8201_s26 + $0x6f0] sm:$0xff] }
 0x2f3   : > { %3540 = vst [vmem:[#allocation2 + $0x290] sm:$0xff] %v3284_v32  ;;  %v2796_v32 = vld [vmem:[#allocation2 + $0x170] sm:$0xff]  ;;  %v3307_v37 = vmax.f32 %v2795_v29, %v3051_v30  ;;  %v3070_v23 = vld [vmem:[%s8201_s26 + $0x6e8] sm:$0xff]  ;;  %v3072_v29 = vld [vmem:[%s8201_s26 + $0x6f8] sm:$0xff] }
 0x2f4   : > { %3541 = vst [vmem:[#allocation2 + $0x7a0] sm:$0xff] %v3285_v35  ;;  %v2797_v35 = vld [vmem:[#allocation2 + $0x7e0] sm:$0xff]  ;;  %v3308_v40 = vmax.f32 %v2796_v32, %v3052_v33 }
 0x2f5   : > { %3542 = vst [vmem:[#allocation2 + $0x80] sm:$0xff] %v3286_v38  ;;  %v2798_v38 = vld [vmem:[#allocation2 + $0x20] sm:$0xff]  ;;  %v3309_v43 = vmax.f32 %v2797_v35, %v3053_v36  ;;  %v3074_v35 = vld [vmem:[%s8201_s26 + $0x708] sm:$0xff] }
 0x2f6   : > { %3543 = vst [vmem:[#allocation2 + $0x4c8] sm:$0xff] %v3287_v41  ;;  %v2799_v41 = vld [vmem:[#allocation2 + $0x308] sm:$0xff]  ;;  %v3310_v46 = vmax.f32 %v2798_v38, %v3054_v39  ;;  %v3073_v32 = vld [vmem:[%s8201_s26 + $0x700] sm:$0xff]  ;;  %v3075_v38 = vld [vmem:[%s8201_s26 + $0x710] sm:$0xff] }
 0x2f7   : > { %3544 = vst [vmem:[#allocation2 + $0x3f0] sm:$0xff] %v3288_v44  ;;  %v2800_v44 = vld [vmem:[#allocation2 + $0x88] sm:$0xff]  ;;  %v3311_v49 = vmax.f32 %v2799_v41, %v3055_v42  ;;  %v3076_v41 = vld [vmem:[%s8201_s26 + $0x718] sm:$0xff] }
 0x2f8   : > { %3545 = vst [vmem:[#allocation2 + $0x798] sm:$0xff] %v3289_v47  ;;  %v2801_v47 = vld [vmem:[#allocation2 + $0x6e8] sm:$0xff]  ;;  %v3312_v52 = vmax.f32 %v2800_v44, %v3056_v45  ;;  %v3077_v44 = vld [vmem:[%s8201_s26 + $0x720] sm:$0xff] }
 0x2f9   : > { %3546 = vst [vmem:[#allocation2 + $0x378] sm:$0xff] %v3290_v50  ;;  %v2802_v50 = vld [vmem:[#allocation2 + $0x6b0] sm:$0xff]  ;;  %v3313_v55 = vmax.f32 %v2801_v47, %v3057_v48  ;;  %v3078_v47 = vld [vmem:[%s8201_s26 + $0x728] sm:$0xff] }
 0x2fa   : > { %3547 = vst [vmem:[#allocation2 + $0x160] sm:$0xff] %v3291_v53  ;;  %v2803_v53 = vld [vmem:[#allocation2 + $0x300] sm:$0xff]  ;;  %v3314_v58 = vmax.f32 %v2802_v50, %v3058_v51  ;;  %v3079_v50 = vld [vmem:[%s8201_s26 + $0x730] sm:$0xff] }
 0x2fb   : > { %3548 = vst [vmem:[#allocation2 + $0x260] sm:$0xff] %v3292_v56  ;;  %v2804_v56 = vld [vmem:[#allocation2 + $0x108] sm:$0xff]  ;;  %v3315_v61 = vmax.f32 %v2803_v53, %v3059_v54  ;;  %v3080_v53 = vld [vmem:[%s8201_s26 + $0x738] sm:$0xff] }
 0x2fc   : > { %3549 = vst [vmem:[#allocation2 + $0x728] sm:$0xff] %v3293_v59  ;;  %v2805_v59 = vld [vmem:[#allocation2 + $0x180] sm:$0xff]  ;;  %v3316_v0 = vmax.f32 %v2804_v56, %v3060_v57 }
 0x2fd   : > { %3550 = vst [vmem:[#allocation2 + $0x288] sm:$0xff] %v3294_v62  ;;  %v2806_v62 = vld [vmem:[#allocation2 + $0x490] sm:$0xff]  ;;  %v3317_v3 = vmax.f32 %v2805_v59, %v3061_v60  ;;  %v3081_v56 = vld [vmem:[%s8201_s26 + $0x740] sm:$0xff]  ;;  %v3082_v59 = vld [vmem:[%s8201_s26 + $0x748] sm:$0xff] }
 0x2fe   : > { %3551 = vst [vmem:[#allocation2 + $0x188] sm:$0xff] %v3295_v1  ;;  %v2807_v1 = vld [vmem:[#allocation2 + $0x570] sm:$0xff]  ;;  %v3318_v6 = vmax.f32 %v2806_v62, %v3062_v63 }
 0x2ff   : > { %3552 = vst [vmem:[#allocation2 + $0x408] sm:$0xff] %v3296_v4  ;;  %v2808_v4 = vld [vmem:[#allocation2 + $0x500] sm:$0xff]  ;;  %v3319_v9 = vmax.f32 %v2807_v1, %v3063_v2  ;;  %v3083_v62 = vld [vmem:[%s8201_s26 + $0x750] sm:$0xff]  ;;  %v3084_v1 = vld [vmem:[%s8201_s26 + $0x758] sm:$0xff] }
 0x300   : > { %3553 = vst [vmem:[#allocation2 + $0x678] sm:$0xff] %v3297_v7  ;;  %v2809_v7 = vld [vmem:[#allocation2 + $0xe8] sm:$0xff]  ;;  %v3320_v12 = vmax.f32 %v2808_v4, %v3064_v5  ;;  %v3085_v4 = vld [vmem:[%s8201_s26 + $0x760] sm:$0xff] }
 0x301   : > { %3554 = vst [vmem:[#allocation2 + $0x98] sm:$0xff] %v3298_v10  ;;  %v2810_v10 = vld [vmem:[#allocation2 + $0x2f0] sm:$0xff]  ;;  %v3321_v15 = vmax.f32 %v2809_v7, %v3065_v8  ;;  %v3086_v7 = vld [vmem:[%s8201_s26 + $0x768] sm:$0xff] }
 0x302   : > { %3555 = vst [vmem:[#allocation2 + $0x470] sm:$0xff] %v3299_v13  ;;  %v2811_v13 = vld [vmem:[#allocation2 + $0x7e8] sm:$0xff]  ;;  %v3322_v18 = vmax.f32 %v2810_v10, %v3066_v11  ;;  %v3087_v10 = vld [vmem:[%s8201_s26 + $0x770] sm:$0xff] }
 0x303   : > { %3556 = vst [vmem:[#allocation2 + $0x410] sm:$0xff] %v3300_v16  ;;  %v2812_v16 = vld [vmem:[#allocation2 + $0x360] sm:$0xff]  ;;  %v3323_v21 = vmax.f32 %v2811_v13, %v3067_v14  ;;  %v3088_v13 = vld [vmem:[%s8201_s26 + $0x778] sm:$0xff] }
 0x304   : > { %3557 = vst [vmem:[#allocation2 + $0x248] sm:$0xff] %v3301_v19  ;;  %v2813_v19 = vld [vmem:[#allocation2 + $0x60] sm:$0xff]  ;;  %v3324_v24 = vmax.f32 %v2812_v16, %v3068_v17 }
 0x305   : > { %3558 = vst [vmem:[#allocation2 + $0x548] sm:$0xff] %v3302_v22  ;;  %v2814_v22 = vld [vmem:[#allocation2 + $0x210] sm:$0xff]  ;;  %v3325_v27 = vmax.f32 %v2813_v19, %v3069_v20  ;;  %v3089_v16 = vld [vmem:[%s8201_s26 + $0x780] sm:$0xff]  ;;  %v3090_v19 = vld [vmem:[%s8201_s26 + $0x788] sm:$0xff] }
 0x306   : > { %3559 = vst [vmem:[#allocation2 + $0x220] sm:$0xff] %v3303_v25  ;;  %v2815_v25 = vld [vmem:[#allocation2 + $0x4a0] sm:$0xff]  ;;  %v3326_v30 = vmax.f32 %v2814_v22, %v3070_v23  ;;  %v3091_v22 = vld [vmem:[%s8201_s26 + $0x790] sm:$0xff] }
 0x307   : > { %3560 = vst [vmem:[#allocation2 + $0x780] sm:$0xff] %v3304_v28  ;;  %v2816_v28 = vld [vmem:[#allocation2 + $0x748] sm:$0xff]  ;;  %v3327_v33 = vmax.f32 %v2815_v25, %v3071_v26  ;;  %v3092_v25 = vld [vmem:[%s8201_s26 + $0x798] sm:$0xff] }
 0x308   : > { %3561 = vst [vmem:[#allocation2 + $0x708] sm:$0xff] %v3305_v31  ;;  %v2817_v31 = vld [vmem:[#allocation2 + $0x168] sm:$0xff]  ;;  %v3328_v36 = vmax.f32 %v2816_v28, %v3072_v29  ;;  %v3093_v28 = vld [vmem:[%s8201_s26 + $0x7a0] sm:$0xff] }
 0x309   : > { %3562 = vst [vmem:[#allocation2 + $0x8] sm:$0xff] %v3306_v34  ;;  %v2818_v34 = vld [vmem:[#allocation2 + $0x668] sm:$0xff]  ;;  %v3329_v39 = vmax.f32 %v2817_v31, %v3073_v32 }
 0x30a   : > { %3563 = vst [vmem:[#allocation2 + $0x428] sm:$0xff] %v3307_v37  ;;  %v2819_v37 = vld [vmem:[#allocation2 + $0x270] sm:$0xff]  ;;  %v3330_v42 = vmax.f32 %v2818_v34, %v3074_v35  ;;  %v3094_v31 = vld [vmem:[%s8201_s26 + $0x7a8] sm:$0xff] }
 0x30b   : > { %3564 = vst [vmem:[#allocation2 + $0x170] sm:$0xff] %v3308_v40  ;;  %v2820_v40 = vld [vmem:[#allocation2 + $0x2d8] sm:$0xff]  ;;  %v3331_v45 = vmax.f32 %v2819_v37, %v3075_v38  ;;  %v3095_v34 = vld [vmem:[%s8201_s26 + $0x7b0] sm:$0xff] }
 0x30c   : > { %3565 = vst [vmem:[#allocation2 + $0x7e0] sm:$0xff] %v3309_v43  ;;  %v2821_v43 = vld [vmem:[#allocation2 + $0xc8] sm:$0xff]  ;;  %v3332_v48 = vmax.f32 %v2820_v40, %v3076_v41  ;;  %v3096_v37 = vld [vmem:[%s8201_s26 + $0x7b8] sm:$0xff]  ;;  %v3097_v40 = vld [vmem:[%s8201_s26 + $0x7c0] sm:$0xff] }
 0x30d   : > { %3566 = vst [vmem:[#allocation2 + $0x20] sm:$0xff] %v3310_v46  ;;  %v2822_v46 = vld [vmem:[#allocation2 + $0xa0] sm:$0xff]  ;;  %v3333_v51 = vmax.f32 %v2821_v43, %v3077_v44  ;;  %v3098_v43 = vld [vmem:[%s8201_s26 + $0x7c8] sm:$0xff] }
 0x30e   : > { %3567 = vst [vmem:[#allocation2 + $0x308] sm:$0xff] %v3311_v49  ;;  %v2823_v49 = vld [vmem:[#allocation2 + $0x48] sm:$0xff]  ;;  %v3334_v54 = vmax.f32 %v2822_v46, %v3078_v47  ;;  %v3099_v46 = vld [vmem:[%s8201_s26 + $0x7d0] sm:$0xff] }
 0x30f   : > { %3568 = vst [vmem:[#allocation2 + $0x88] sm:$0xff] %v3312_v52  ;;  %v2824_v52 = vld [vmem:[#allocation2 + $0x328] sm:$0xff]  ;;  %v3335_v57 = vmax.f32 %v2823_v49, %v3079_v50  ;;  %v3100_v49 = vld [vmem:[%s8201_s26 + $0x7d8] sm:$0xff] }
 0x310   : > { %3569 = vst [vmem:[#allocation2 + $0x6e8] sm:$0xff] %v3313_v55  ;;  %v2825_v55 = vld [vmem:[#allocation2 + $0x7c8] sm:$0xff]  ;;  %v3336_v60 = vmax.f32 %v2824_v52, %v3080_v53  ;;  %v3101_v52 = vld [vmem:[%s8201_s26 + $0x7e0] sm:$0xff] }
 0x311   : > { %3570 = vst [vmem:[#allocation2 + $0x6b0] sm:$0xff] %v3314_v58  ;;  %v2826_v58 = vld [vmem:[#allocation2 + $0x430] sm:$0xff]  ;;  %v3337_v63 = vmax.f32 %v2825_v55, %v3081_v56  ;;  %v3102_v55 = vld [vmem:[%s8201_s26 + $0x7e8] sm:$0xff] }
 0x312   : > { %3571 = vst [vmem:[#allocation2 + $0x300] sm:$0xff] %v3315_v61  ;;  %v2827_v61 = vld [vmem:[#allocation2 + $0x578] sm:$0xff]  ;;  %v3338_v2 = vmax.f32 %v2826_v58, %v3082_v59  ;;  %v3103_v58 = vld [vmem:[%s8201_s26 + $0x7f0] sm:$0xff] }
 0x313   : > { %3572 = vst [vmem:[#allocation2 + $0x108] sm:$0xff] %v3316_v0  ;;  %v2828_v0 = vld [vmem:[#allocation2 + $0x608] sm:$0xff]  ;;  %v3339_v5 = vmax.f32 %v2827_v61, %v3083_v62  ;;  %v3104_v61 = vld [vmem:[%s8201_s26 + $0x7f8] sm:$0xff] }
 0x314   : > { %3573 = vst [vmem:[#allocation2 + $0x180] sm:$0xff] %v3317_v3  ;;  %v2829_v3 = vld [vmem:[#allocation2 + $0x638] sm:$0xff]  ;;  %v3340_v8 = vmax.f32 %v2828_v0, %v3084_v1 }
 0x315   : > { %3574 = vst [vmem:[#allocation2 + $0x490] sm:$0xff] %v3318_v6  ;;  %v2830_v6 = vld [vmem:[#allocation2 + $0x4b8] sm:$0xff]  ;;  %v3341_v11 = vmax.f32 %v2829_v3, %v3085_v4 }
 0x316   : > { %3575 = vst [vmem:[#allocation2 + $0x570] sm:$0xff] %v3319_v9  ;;  %v2831_v9 = vld [vmem:[#allocation2 + $0x298] sm:$0xff]  ;;  %v3342_v14 = vmax.f32 %v2830_v6, %v3086_v7 }
 0x317   : > { %3576 = vst [vmem:[#allocation2 + $0x500] sm:$0xff] %v3320_v12  ;;  %v2832_v12 = vld [vmem:[#allocation2 + $0x1f0] sm:$0xff]  ;;  %v3343_v17 = vmax.f32 %v2831_v9, %v3087_v10 }
 0x318   : > { %3577 = vst [vmem:[#allocation2 + $0xe8] sm:$0xff] %v3321_v15  ;;  %v2833_v15 = vld [vmem:[#allocation2] sm:$0xff]  ;;  %v3344_v20 = vmax.f32 %v2832_v12, %v3088_v13 }
 0x319   : > { %3578 = vst [vmem:[#allocation2 + $0x2f0] sm:$0xff] %v3322_v18  ;;  %v2834_v18 = vld [vmem:[#allocation2 + $0x2d0] sm:$0xff]  ;;  %v3345_v23 = vmax.f32 %v2833_v15, %v3089_v16 }
 0x31a   : > { %3579 = vst [vmem:[#allocation2 + $0x7e8] sm:$0xff] %v3323_v21  ;;  %v2835_v21 = vld [vmem:[#allocation2 + $0x650] sm:$0xff]  ;;  %v3346_v26 = vmax.f32 %v2834_v18, %v3090_v19 }
 0x31b   : > { %3580 = vst [vmem:[#allocation2 + $0x360] sm:$0xff] %v3324_v24  ;;  %v2836_v24 = vld [vmem:[#allocation2 + $0x480] sm:$0xff]  ;;  %v3347_v29 = vmax.f32 %v2835_v21, %v3091_v22 }
 0x31c   : > { %3581 = vst [vmem:[#allocation2 + $0x60] sm:$0xff] %v3325_v27  ;;  %v2837_v27 = vld [vmem:[#allocation2 + $0x3d8] sm:$0xff]  ;;  %v3348_v32 = vmax.f32 %v2836_v24, %v3092_v25 }
 0x31d   : > { %3582 = vst [vmem:[#allocation2 + $0x210] sm:$0xff] %v3326_v30  ;;  %v2838_v30 = vld [vmem:[#allocation2 + $0x718] sm:$0xff]  ;;  %v3349_v35 = vmax.f32 %v2837_v27, %v3093_v28 }
 0x31e   : > { %3583 = vst [vmem:[#allocation2 + $0x4a0] sm:$0xff] %v3327_v33  ;;  %v2839_v33 = vld [vmem:[#allocation2 + $0x7d0] sm:$0xff]  ;;  %v3350_v38 = vmax.f32 %v2838_v30, %v3094_v31 }
 0x31f   : > { %3584 = vst [vmem:[#allocation2 + $0x748] sm:$0xff] %v3328_v36  ;;  %v2840_v36 = vld [vmem:[#allocation2 + $0x190] sm:$0xff]  ;;  %v3351_v41 = vmax.f32 %v2839_v33, %v3095_v34 }
 0x320   : > { %3585 = vst [vmem:[#allocation2 + $0x168] sm:$0xff] %v3329_v39  ;;  %v2841_v39 = vld [vmem:[#allocation2 + $0x710] sm:$0xff]  ;;  %v3352_v44 = vmax.f32 %v2840_v36, %v3096_v37 }
 0x321   : > { %3586 = vst [vmem:[#allocation2 + $0x668] sm:$0xff] %v3330_v42  ;;  %v2842_v42 = vld [vmem:[#allocation2 + $0xa8] sm:$0xff]  ;;  %v3353_v47 = vmax.f32 %v2841_v39, %v3097_v40 }
 0x322   : > { %3587 = vst [vmem:[#allocation2 + $0x270] sm:$0xff] %v3331_v45  ;;  %v2843_v45 = vld [vmem:[#allocation2 + $0x2b8] sm:$0xff]  ;;  %v3354_v50 = vmax.f32 %v2842_v42, %v3098_v43 }
 0x323   : > { %3588 = vst [vmem:[#allocation2 + $0x2d8] sm:$0xff] %v3332_v48  ;;  %v2844_v48 = vld [vmem:[#allocation2 + $0x238] sm:$0xff]  ;;  %v3355_v53 = vmax.f32 %v2843_v45, %v3099_v46 }
 0x324   : > { %3589 = vst [vmem:[#allocation2 + $0xc8] sm:$0xff] %v3333_v51  ;;  %v2845_v51 = vld [vmem:[#allocation2 + $0x1b0] sm:$0xff]  ;;  %v3356_v56 = vmax.f32 %v2844_v48, %v3100_v49 }
 0x325   : > { %3590 = vst [vmem:[#allocation2 + $0xa0] sm:$0xff] %v3334_v54  ;;  %v2846_v54 = vld [vmem:[#allocation2 + $0x5e0] sm:$0xff]  ;;  %v3357_v59 = vmax.f32 %v2845_v51, %v3101_v52 }
 0x326   : > { %3591 = vst [vmem:[#allocation2 + $0x48] sm:$0xff] %v3335_v57  ;;  %v2847_v57 = vld [vmem:[#allocation2 + $0x580] sm:$0xff]  ;;  %v3358_v62 = vmax.f32 %v2846_v54, %v3102_v55 }
 0x327   : > { %3592 = vst [vmem:[#allocation2 + $0x328] sm:$0xff] %v3336_v60  ;;  %v2848_v60 = vld [vmem:[#allocation2 + $0x150] sm:$0xff] }
 0x328   : > { %3593 = vst [vmem:[#allocation2 + $0x7c8] sm:$0xff] %v3337_v63  ;;  %v3359_v63 = vmax.f32 %v2847_v57, %v3103_v58  ;;  %v3360_v0 = vmax.f32 %v2848_v60, %v3104_v61 }
 0x329   : > { %3594 = vst [vmem:[#allocation2 + $0x430] sm:$0xff] %v3338_v2 }
 0x32a   : > { %3595 = vst [vmem:[#allocation2 + $0x578] sm:$0xff] %v3339_v5 }
 0x32b   : > { %3596 = vst [vmem:[#allocation2 + $0x608] sm:$0xff] %v3340_v8 }
 0x32c   : > { %3597 = vst [vmem:[#allocation2 + $0x638] sm:$0xff] %v3341_v11 }
 0x32d   : > { %3598 = vst [vmem:[#allocation2 + $0x4b8] sm:$0xff] %v3342_v14 }
 0x32e   : > { %3599 = vst [vmem:[#allocation2 + $0x298] sm:$0xff] %v3343_v17 }
 0x32f   : > { %3600 = vst [vmem:[#allocation2 + $0x1f0] sm:$0xff] %v3344_v20 }
 0x330   : > { %3601 = vst [vmem:[#allocation2] sm:$0xff] %v3345_v23 }
 0x331   : > { %3602 = vst [vmem:[#allocation2 + $0x2d0] sm:$0xff] %v3346_v26 }
 0x332   : > { %3603 = vst [vmem:[#allocation2 + $0x650] sm:$0xff] %v3347_v29 }
 0x333   : > { %3604 = vst [vmem:[#allocation2 + $0x480] sm:$0xff] %v3348_v32 }
 0x334   : > { %3605 = vst [vmem:[#allocation2 + $0x3d8] sm:$0xff] %v3349_v35 }
 0x335   : > { %3606 = vst [vmem:[#allocation2 + $0x718] sm:$0xff] %v3350_v38 }
 0x336   : > { %3607 = vst [vmem:[#allocation2 + $0x7d0] sm:$0xff] %v3351_v41 }
 0x337   : > { %3608 = vst [vmem:[#allocation2 + $0x190] sm:$0xff] %v3352_v44 }
 0x338   : > { %3609 = vst [vmem:[#allocation2 + $0x710] sm:$0xff] %v3353_v47 }
 0x339   : > { %3610 = vst [vmem:[#allocation2 + $0xa8] sm:$0xff] %v3354_v50 }
 0x33a   : > { %3611 = vst [vmem:[#allocation2 + $0x2b8] sm:$0xff] %v3355_v53 }
 0x33b   : > { %3612 = vst [vmem:[#allocation2 + $0x238] sm:$0xff] %v3356_v56 }
 0x33c   : > { %3613 = vst [vmem:[#allocation2 + $0x1b0] sm:$0xff] %v3357_v59 }
 0x33d   : > { %3614 = vst [vmem:[#allocation2 + $0x5e0] sm:$0xff] %v3358_v62 }
 0x33e   : > { %3615 = vst [vmem:[#allocation2 + $0x580] sm:$0xff] %v3359_v63 }
 0x33f   : > { %3616 = vst [vmem:[#allocation2 + $0x150] sm:$0xff] %v3360_v0 }
 0x340 PF: > { %p7341_p5 = scmp.ne.s32.totalorder %s7534_s20, 1 }
 0x342   : > { %3620 = sbr.rel (%p7341_p5) target bundleno = 1951 (0x79f), region = 100 }
 0x347   : > { %v4133_v1 = vlaneseq  ;;  %s7342_s18 = sshll.u32 %s7534_s20, 7  ;;  %v3625_v4 = vld [vmem:[#allocation2 + $0x450] sm:$0xff]  ;;  %v3881_v5 = vld [vmem:[%s8201_s26 + $0x20] sm:$0xff]  ;;  %v3623_v9 = vld [vmem:[#allocation2 + $0x4d8] sm:$0xff]  ;;  %vm5970_vm1 = vcmask 130112   ;;  %vm5974_vm2 = vcmask 195712  }
 0x348   : > { %v4136_v2 = vstv %s7342_s18  ;;  %v3879_v7 = vld [vmem:[%s8201_s26 + $0x10] sm:$0xff]  ;;  %v3877_v8 = vld [vmem:[%s8201_s26] sm:$0xff]  ;;  %v3882_v11 = vld [vmem:[%s8201_s26 + $0x28] sm:$0xff]  ;;  %vm5978_vm3 = vcmask 261312   ;;  %vm5982_vm4 = vcmask 326912   ;;  %vm5986_vm5 = vcmask 392512  }
 0x349   : > { %v8720_v3 = vand.u32 127, %v4133_v1  ;;  %v3621_v10 = vld [vmem:[#allocation2 + $0x2b0] sm:$0xff]  ;;  %v3880_v12 = vld [vmem:[%s8201_s26 + $0x18] sm:$0xff]  ;;  %v3878_v16 = vld [vmem:[%s8201_s26 + $0x8] sm:$0xff]  ;;  %vm5990_vm6 = vcmask 458112   ;;  %vm5994_vm7 = vcmask 523712  }
 0x34a   : > { %v3626_v20 = vld [vmem:[#allocation2 + $0x768] sm:$0xff]  ;;  %v3885_v22 = vld [vmem:[%s8201_s26 + $0x40] sm:$0xff]  ;;  %v3624_v23 = vld [vmem:[#allocation2 + $0x18] sm:$0xff]  ;;  %vm12037_vm8 = vcmask 589312   ;;  %vm6002_vm9 = vcmask 654912   ;;  %vm12039_vm10 = vcmask 720512  }
 0x34b   : > { %12098 = vst [vmem:[#allocation7_spill] sm:$0xff] %v8720_v3  ;;  %v8724_v6 = vadd.s32 %v4136_v2, %v8720_v3  ;;  %v3884_v25 = vld [vmem:[%s8201_s26 + $0x38] sm:$0xff]  ;;  %v3622_v26 = vld [vmem:[#allocation2 + $0x3b0] sm:$0xff]  ;;  %v3629_v30 = vld [vmem:[#allocation2 + $0x380] sm:$0xff]  ;;  %vm12033_vm11 = vcmask 786112   ;;  %vm12038_vm12 = vcmask 851712  }
 0x34c   : > { %v3883_v28 = vld [vmem:[%s8201_s26 + $0x30] sm:$0xff]  ;;  %v3888_v32 = vld [vmem:[%s8201_s26 + $0x58] sm:$0xff]  ;;  %v3628_v34 = vld [vmem:[#allocation2 + $0x448] sm:$0xff]  ;;  %vm6018_vm13 = vcmask 917312   ;;  %vm12034_vm14 = vcmask 982912   ;;  %vm6026_vm15 = vcmask 1048512  }
 0x34d   : > { %vm4138_vm0 = vcmp.lt.s32.totalorder %v8724_v6, 144  ;;  %v3887_v36 = vld [vmem:[%s8201_s26 + $0x50] sm:$0xff]  ;;  %v3886_v40 = vld [vmem:[%s8201_s26 + $0x48] sm:$0xff]  ;;  %v3632_v42 = vld [vmem:[#allocation2 + $0x498] sm:$0xff]  ;;  %s12224_s1 = sld [smem:[#allocation69_spill]] }
 0x34e   : > { %v4143_v13 = vsel %vm4138_vm0, %v3881_v5, -inf  ;;  %v4141_v14 = vsel %vm4138_vm0, %v3879_v7, -inf  ;;  %v4139_v15 = vsel %vm4138_vm0, %v3877_v8, -inf  ;;  %v4144_v21 = vsel %vm4138_vm0, %v3882_v11, -inf  ;;  %v3627_v38 = vld [vmem:[#allocation2 + $0x330] sm:$0xff]  ;;  %v3631_v46 = vld [vmem:[#allocation2 + $0x518] sm:$0xff] }
 0x34f   : > { %v4399_v17 = vmax.f32 %v3625_v4, %v4143_v13  ;;  %v4397_v18 = vmax.f32 %v3623_v9, %v4141_v14  ;;  %v4395_v19 = vmax.f32 %v3621_v10, %v4139_v15  ;;  %v4142_v24 = vsel %vm4138_vm0, %v3880_v12, -inf  ;;  %v3891_v44 = vld [vmem:[%s8201_s26 + $0x70] sm:$0xff]  ;;  %v3890_v48 = vld [vmem:[%s8201_s26 + $0x68] sm:$0xff]  ;;  %v3889_v52 = vld [vmem:[%s8201_s26 + $0x60] sm:$0xff] }
 0x350   : > { %v4140_v27 = vsel %vm4138_vm0, %v3878_v16, -inf  ;;  %v4400_v29 = vmax.f32 %v3626_v20, %v4144_v21  ;;  %v4147_v31 = vsel %vm4138_vm0, %v3885_v22, -inf  ;;  %v4398_v33 = vmax.f32 %v3624_v23, %v4142_v24  ;;  %v3630_v50 = vld [vmem:[#allocation2 + $0x110] sm:$0xff]  ;;  %v3635_v54 = vld [vmem:[#allocation2 + $0x508] sm:$0xff]  ;;  %v3893_v60 = vld [vmem:[%s8201_s26 + $0x80] sm:$0xff] }
 0x351   : > { %4655 = vst [vmem:[#allocation2 + $0x450] sm:$0xff] %v4399_v17  ;;  %5171 = vmax.xlane.f32.xlu2 %v4399_v17  ;;  %5167 = vmax.xlane.f32.xlu1 %v4397_v18  ;;  %v4146_v35 = vsel %vm4138_vm0, %v3884_v25, -inf  ;;  %v4396_v37 = vmax.f32 %v3622_v26, %v4140_v27  ;;  %v4145_v39 = vsel %vm4138_vm0, %v3883_v28, -inf  ;;  %v4403_v41 = vmax.f32 %v3629_v30, %v4147_v31  ;;  %v3894_v56 = vld [vmem:[%s8201_s26 + $0x88] sm:$0xff]  ;;  %v3634_v58 = vld [vmem:[#allocation2 + $0x550] sm:$0xff]  ;;  %v3633_v62 = vld [vmem:[#allocation2 + $0x320] sm:$0xff] }
 0x352   : > { %4653 = vst [vmem:[#allocation2 + $0x4d8] sm:$0xff] %v4397_v18  ;;  %5163 = vmax.xlane.f32.xlu0 %v4395_v19  ;;  %v4150_v43 = vsel %vm4138_vm0, %v3888_v32, -inf  ;;  %v4402_v45 = vmax.f32 %v3628_v34, %v4146_v35  ;;  %v4149_v47 = vsel %vm4138_vm0, %v3887_v36, -inf  ;;  %v4401_v49 = vmax.f32 %v3627_v38, %v4145_v39  ;;  %v3892_v0 = vld [vmem:[%s8201_s26 + $0x78] sm:$0xff]  ;;  %v3638_v2 = vld [vmem:[#allocation2 + $0x788] sm:$0xff]  ;;  %v3897_v5 = vld [vmem:[%s8201_s26 + $0xa0] sm:$0xff] }
 0x353   : > { %4651 = vst [vmem:[#allocation2 + $0x2b0] sm:$0xff] %v4395_v19  ;;  %v4148_v51 = vsel %vm4138_vm0, %v3886_v40, -inf  ;;  %v8765_v53 = vmax.f32 %v3632_v42, %v4150_v43  ;;  %v4153_v55 = vsel %vm4138_vm0, %v3891_v44, -inf  ;;  %v4405_v57 = vmax.f32 %v3631_v46, %v4149_v47  ;;  %v3637_v8 = vld [vmem:[#allocation2 + $0x6e0] sm:$0xff]  ;;  %v3896_v16 = vld [vmem:[%s8201_s26 + $0x98] sm:$0xff]  ;;  %v3895_v17 = vld [vmem:[%s8201_s26 + $0x90] sm:$0xff] }
 0x354   : > { %4656 = vst [vmem:[#allocation2 + $0x768] sm:$0xff] %v4400_v29  ;;  %v4152_v59 = vsel %vm4138_vm0, %v3890_v48, -inf  ;;  %v4404_v61 = vmax.f32 %v3630_v50, %v4148_v51  ;;  %v4151_v63 = vsel %vm4138_vm0, %v3889_v52, -inf  ;;  %v8777_v1 = vmax.f32 %v3635_v54, %v4153_v55  ;;  %v3636_v11 = vld [vmem:[#allocation2 + $0x720] sm:$0xff]  ;;  %v3639_v22 = vld [vmem:[#allocation2 + $0x338] sm:$0xff]  ;;  %v3644_v26 = vld [vmem:[#allocation2 + $0x568] sm:$0xff] }
 0x355   : > { %4654 = vst [vmem:[#allocation2 + $0x18] sm:$0xff] %v4398_v33  ;;  %v4156_v4 = vsel %vm4138_vm0, %v3894_v56, -inf  ;;  %v4408_v7 = vmax.f32 %v3634_v58, %v4152_v59  ;;  %v4155_v9 = vsel %vm4138_vm0, %v3893_v60, -inf  ;;  %v4407_v10 = vmax.f32 %v3633_v62, %v4151_v63  ;;  %v3641_v14 = vld [vmem:[#allocation2 + $0x2e0] sm:$0xff]  ;;  %v3900_v27 = vld [vmem:[%s8201_s26 + $0xb8] sm:$0xff]  ;;  %v3899_v31 = vld [vmem:[%s8201_s26 + $0xb0] sm:$0xff] }
 0x356   : > { %4652 = vst [vmem:[#allocation2 + $0x3b0] sm:$0xff] %v4396_v37  ;;  %v4154_v12 = vsel %vm4138_vm0, %v3892_v0, -inf  ;;  %v8787_v13 = vmax.f32 %v3638_v2, %v4156_v4  ;;  %v4159_v15 = vsel %vm4138_vm0, %v3897_v5, -inf  ;;  %v8793_v18 = vmax.f32 %v3637_v8, %v4155_v9  ;;  %v3640_v19 = vld [vmem:[#allocation2 + $0x740] sm:$0xff]  ;;  %v3898_v32 = vld [vmem:[%s8201_s26 + $0xa8] sm:$0xff]  ;;  %v3647_v39 = vld [vmem:[#allocation2 + $0x690] sm:$0xff] }
 0x357   : > { %4659 = vst [vmem:[#allocation2 + $0x380] sm:$0xff] %v4403_v41  ;;  %v4158_v20 = vsel %vm4138_vm0, %v3896_v16, -inf  ;;  %v8798_v21 = vmax.f32 %v3636_v11, %v4154_v12  ;;  %v4157_v23 = vsel %vm4138_vm0, %v3895_v17, -inf  ;;  %v8803_v24 = vmax.f32 %v3641_v14, %v4159_v15  ;;  %v3642_v35 = vld [vmem:[#allocation2 + $0x5a8] sm:$0xff]  ;;  %v3903_v40 = vld [vmem:[%s8201_s26 + $0xd0] sm:$0xff]  ;;  %v3901_v44 = vld [vmem:[%s8201_s26 + $0xc0] sm:$0xff] }
 0x358   : > { %4658 = vst [vmem:[#allocation2 + $0x448] sm:$0xff] %v4402_v45  ;;  %v8806_v25 = vmax.f32 %v3640_v19, %v4158_v20  ;;  %v8810_v28 = vmax.f32 %v3639_v22, %v4157_v23  ;;  %v4161_v34 = vsel %vm4138_vm0, %v3899_v31, -inf  ;;  %v4160_v36 = vsel %vm4138_vm0, %v3898_v32, -inf  ;;  %v3902_v43 = vld [vmem:[%s8201_s26 + $0xc8] sm:$0xff]  ;;  %v3650_v51 = vld [vmem:[#allocation2 + $0xc0] sm:$0xff]  ;;  %v3904_v56 = vld [vmem:[%s8201_s26 + $0xd8] sm:$0xff] }
 0x359   : > { %5173 = vmax.xlane.f32.xlu2 %v4400_v29  ;;  %5169 = vmax.xlane.f32.xlu1 %v4398_v33  ;;  %4657 = vst [vmem:[#allocation2 + $0x330] sm:$0xff] %v4401_v49  ;;  %v4162_v29 = vsel %vm4138_vm0, %v3900_v27, -inf  ;;  %v3643_v33 = vld [vmem:[#allocation2 + $0x5b8] sm:$0xff]  ;;  %v8828_v38 = vmax.f32 %v3642_v35, %v4160_v36  ;;  %v4164_v46 = vsel %vm4138_vm0, %v3902_v43, -inf  ;;  %v3645_v47 = vld [vmem:[#allocation2 + $0x3e8] sm:$0xff]  ;;  %v4163_v48 = vsel %vm4138_vm0, %v3901_v44, -inf }
 0x35a   : > { %5165 = vmax.xlane.f32.xlu0 %v4396_v37  ;;  %4662 = vst [vmem:[#allocation2 + $0x498] sm:$0xff] %v8765_v53  ;;  %v8815_v30 = vmax.f32 %v3644_v26, %v4162_v29  ;;  %v8825_v37 = vmax.f32 %v3643_v33, %v4161_v34  ;;  %v8847_v50 = vmax.f32 %v3645_v47, %v4163_v48  ;;  %v3906_v52 = vld [vmem:[%s8201_s26 + $0xe8] sm:$0xff]  ;;  %v3905_v55 = vld [vmem:[%s8201_s26 + $0xe0] sm:$0xff]  ;;  %v4166_v60 = vsel %vm4138_vm0, %v3904_v56, -inf  ;;  %v3908_v4 = vld [vmem:[%s8201_s26 + $0xf8] sm:$0xff] }
 0x35b   : > { %4661 = vst [vmem:[#allocation2 + $0x518] sm:$0xff] %v4405_v57  ;;  %v4167_v58 = vsel %vm4138_vm0, %v3905_v55, -inf  ;;  %v3648_v59 = vld [vmem:[#allocation2 + $0x368] sm:$0xff]  ;;  %v3653_v63 = vld [vmem:[#allocation2 + $0x100] sm:$0xff]  ;;  %v3907_v5 = vld [vmem:[%s8201_s26 + $0xf0] sm:$0xff]  ;;  %v4170_v8 = vsel %vm4138_vm0, %v3908_v4, -inf }
 0x35c   : > { %4660 = vst [vmem:[#allocation2 + $0x110] sm:$0xff] %v4404_v61  ;;  %v8867_v62 = vmax.f32 %v3648_v59, %v4166_v60  ;;  %v3909_v0 = vld [vmem:[%s8201_s26 + $0x100] sm:$0xff]  ;;  %v3912_v14 = vld [vmem:[%s8201_s26 + $0x118] sm:$0xff]  ;;  %v3911_v17 = vld [vmem:[%s8201_s26 + $0x110] sm:$0xff] }
 0x35d   : > { %4665 = vst [vmem:[#allocation2 + $0x508] sm:$0xff] %v8777_v1  ;;  %v3651_v9 = vld [vmem:[#allocation2 + $0x1c0] sm:$0xff]  ;;  %v4174_v15 = vsel %vm4138_vm0, %v3912_v14, -inf  ;;  %v3655_v19 = vld [vmem:[#allocation2 + $0x558] sm:$0xff]  ;;  %v4173_v20 = vsel %vm4138_vm0, %v3911_v17, -inf  ;;  %v3915_v26 = vld [vmem:[%s8201_s26 + $0x130] sm:$0xff] }
 0x35e   : > { %4664 = vst [vmem:[#allocation2 + $0x550] sm:$0xff] %v4408_v7  ;;  %v8905_v23 = vmax.f32 %v3655_v19, %v4173_v20  ;;  %v4177_v27 = vsel %vm4138_vm0, %v3915_v26, -inf  ;;  %v3914_v29 = vld [vmem:[%s8201_s26 + $0x128] sm:$0xff]  ;;  %v3658_v31 = vld [vmem:[#allocation2 + $0x4c0] sm:$0xff]  ;;  %v3657_v33 = vld [vmem:[#allocation2 + $0x618] sm:$0xff] }
 0x35f   : > { %4663 = vst [vmem:[#allocation2 + $0x320] sm:$0xff] %v4407_v10  ;;  %v4176_v32 = vsel %vm4138_vm0, %v3914_v29, -inf  ;;  %v3661_v43 = vld [vmem:[#allocation2 + $0x400] sm:$0xff]  ;;  %v3664_v55 = vld [vmem:[#allocation2 + $0x2e8] sm:$0xff] }
 0x360   : > { %4668 = vst [vmem:[#allocation2 + $0x788] sm:$0xff] %v8787_v13  ;;  %v8926_v35 = vmax.f32 %v3658_v31, %v4176_v32  ;;  %v3666_v4 = vld [vmem:[#allocation2 + $0x5c0] sm:$0xff] }
 0x361   : > { %5179 = vmax.xlane.f32.xlu2 %v4403_v41  ;;  %5177 = vmax.xlane.f32.xlu1 %v4402_v45  ;;  %4667 = vst [vmem:[#allocation2 + $0x6e0] sm:$0xff] %v8793_v18  ;;  %v4165_v41 = vsel %vm4138_vm0, %v3903_v40, -inf  ;;  %v3646_v45 = vld [vmem:[#allocation2 + $0x6f8] sm:$0xff]  ;;  %v3671_v14 = vld [vmem:[#allocation2 + $0x640] sm:$0xff] }
 0x362   : > { %5175 = vmax.xlane.f32.xlu0 %v4401_v49  ;;  %4666 = vst [vmem:[#allocation2 + $0x720] sm:$0xff] %v8798_v21  ;;  %v8835_v42 = vmax.f32 %v3647_v39, %v4165_v41  ;;  %v8844_v49 = vmax.f32 %v3646_v45, %v4164_v46  ;;  %v3917_v41 = vld [vmem:[%s8201_s26 + $0x140] sm:$0xff]  ;;  %v3660_v45 = vld [vmem:[#allocation2 + $0x7b8] sm:$0xff] }
 0x363   : > { %4671 = vst [vmem:[#allocation2 + $0x2e0] sm:$0xff] %v8803_v24  ;;  %v4179_v44 = vsel %vm4138_vm0, %v3917_v41, -inf  ;;  %v3674_v26 = vld [vmem:[#allocation2 + $0x420] sm:$0xff] }
 0x364   : > { %4670 = vst [vmem:[#allocation2 + $0x740] sm:$0xff] %v8806_v25  ;;  %v8947_v47 = vmax.f32 %v3661_v43, %v4179_v44 }
 0x365   : > { %4669 = vst [vmem:[#allocation2 + $0x338] sm:$0xff] %v8810_v28 }
 0x366   : > { %4674 = vst [vmem:[#allocation2 + $0x568] sm:$0xff] %v8815_v30 }
 0x367   : > { %4673 = vst [vmem:[#allocation2 + $0x5b8] sm:$0xff] %v8825_v37 }
 0x368   : > { %4672 = vst [vmem:[#allocation2 + $0x5a8] sm:$0xff] %v8828_v38 }
 0x369   : > { %5185 = vmax.xlane.f32.xlu2 %v8765_v53  ;;  %5183 = vmax.xlane.f32.xlu1 %v4405_v57  ;;  %4677 = vst [vmem:[#allocation2 + $0x690] sm:$0xff] %v8835_v42  ;;  %v4168_v53 = vsel %vm4138_vm0, %v3906_v52, -inf  ;;  %v3649_v57 = vld [vmem:[#allocation2 + $0x138] sm:$0xff] }
 0x36a   : > { %5181 = vmax.xlane.f32.xlu0 %v4404_v61  ;;  %4676 = vst [vmem:[#allocation2 + $0x6f8] sm:$0xff] %v8844_v49  ;;  %v8854_v54 = vmax.f32 %v3650_v51, %v4168_v53  ;;  %v8863_v61 = vmax.f32 %v3649_v57, %v4167_v58  ;;  %v3920_v53 = vld [vmem:[%s8201_s26 + $0x158] sm:$0xff] }
 0x36b   : > { %4675 = vst [vmem:[#allocation2 + $0x3e8] sm:$0xff] %v8847_v50  ;;  %v4182_v56 = vsel %vm4138_vm0, %v3920_v53, -inf  ;;  %v3663_v57 = vld [vmem:[#allocation2 + $0x3f8] sm:$0xff]  ;;  %v3680_v53 = vld [vmem:[#allocation2 + $0x310] sm:$0xff] }
 0x36c   : > { %4680 = vst [vmem:[#allocation2 + $0xc0] sm:$0xff] %v8854_v54  ;;  %v8968_v59 = vmax.f32 %v3664_v55, %v4182_v56  ;;  %v3679_v55 = vld [vmem:[#allocation2 + $0x4e8] sm:$0xff] }
 0x36d   : > { %4679 = vst [vmem:[#allocation2 + $0x138] sm:$0xff] %v8863_v61 }
 0x36e   : > { %4678 = vst [vmem:[#allocation2 + $0x368] sm:$0xff] %v8867_v62 }
 0x36f   : > { %4685 = vst [vmem:[#allocation2 + $0x558] sm:$0xff] %v8905_v23 }
 0x370   : > { %4688 = vst [vmem:[#allocation2 + $0x4c0] sm:$0xff] %v8926_v35 }
 0x371   : > { %5191 = vmax.xlane.f32.xlu2 %v8777_v1  ;;  %5189 = vmax.xlane.f32.xlu1 %v4408_v7  ;;  %v4171_v1 = vsel %vm4138_vm0, %v3909_v0, -inf  ;;  %v3652_v7 = vld [vmem:[#allocation2 + $0x280] sm:$0xff]  ;;  %4691 = vst [vmem:[#allocation2 + $0x400] sm:$0xff] %v8947_v47 }
 0x372   : > { %5187 = vmax.xlane.f32.xlu0 %v4407_v10  ;;  %v8875_v2 = vmax.f32 %v3653_v63, %v4171_v1  ;;  %v4169_v10 = vsel %vm4138_vm0, %v3907_v5, -inf  ;;  %v8884_v11 = vmax.f32 %v3652_v7, %v4170_v8  ;;  %4694 = vst [vmem:[#allocation2 + $0x2e8] sm:$0xff] %v8968_v59  ;;  %v3923_v63 = vld [vmem:[%s8201_s26 + $0x170] sm:$0xff]  ;;  %v3667_v1 = vld [vmem:[#allocation2 + $0x5e8] sm:$0xff] }
 0x373   : > { %v8888_v12 = vmax.f32 %v3651_v9, %v4169_v10  ;;  %v3922_v5 = vld [vmem:[%s8201_s26 + $0x168] sm:$0xff] }
 0x374   : > { %4683 = vst [vmem:[#allocation2 + $0x100] sm:$0xff] %v8875_v2  ;;  %v4184_v8 = vsel %vm4138_vm0, %v3922_v5, -inf  ;;  %v3683_v5 = vld [vmem:[#allocation2 + $0x50] sm:$0xff] }
 0x375   : > { %4682 = vst [vmem:[#allocation2 + $0x280] sm:$0xff] %v8884_v11  ;;  %v8994_v10 = vmax.f32 %v3666_v4, %v4184_v8  ;;  %v3937_v4 = vld [vmem:[%s8201_s26 + $0x1e0] sm:$0xff] }
 0x376   : > { %4681 = vst [vmem:[#allocation2 + $0x1c0] sm:$0xff] %v8888_v12  ;;  %v3682_v8 = vld [vmem:[#allocation2 + $0x440] sm:$0xff] }
 0x377   : > { %4696 = vst [vmem:[#allocation2 + $0x5c0] sm:$0xff] %v8994_v10 }
 0x379   : > { %5197 = vmax.xlane.f32.xlu2 %v8787_v13  ;;  %5195 = vmax.xlane.f32.xlu1 %v8793_v18  ;;  %v3656_v13 = vld [vmem:[#allocation2 + $0x3e0] sm:$0xff]  ;;  %v3910_v18 = vld [vmem:[%s8201_s26 + $0x108] sm:$0xff] }
 0x37a   : > { %5193 = vmax.xlane.f32.xlu0 %v8798_v21  ;;  %v8896_v16 = vmax.f32 %v3656_v13, %v4174_v15  ;;  %v3654_v21 = vld [vmem:[#allocation2 + $0x3c0] sm:$0xff]  ;;  %v4172_v22 = vsel %vm4138_vm0, %v3910_v18, -inf  ;;  %v3669_v18 = vld [vmem:[#allocation2 + $0x770] sm:$0xff] }
 0x37b   : > { %v3925_v13 = vld [vmem:[%s8201_s26 + $0x180] sm:$0xff] }
 0x37c   : > { %4686 = vst [vmem:[#allocation2 + $0x3e0] sm:$0xff] %v8896_v16  ;;  %v4187_v19 = vsel %vm4138_vm0, %v3925_v13, -inf }
 0x381   : > { %5203 = vmax.xlane.f32.xlu2 %v8803_v24  ;;  %5201 = vmax.xlane.f32.xlu1 %v8806_v25  ;;  %v8909_v24 = vmax.f32 %v3654_v21, %v4172_v22  ;;  %v3659_v25 = vld [vmem:[#allocation2 + $0x70] sm:$0xff]  ;;  %v9015_v22 = vmax.f32 %v3669_v18, %v4187_v19  ;;  %v3942_v18 = vld [vmem:[%s8201_s26 + $0x208] sm:$0xff]  ;;  %v3941_v19 = vld [vmem:[%s8201_s26 + $0x200] sm:$0xff] }
 0x382   : > { %5199 = vmax.xlane.f32.xlu0 %v8810_v28  ;;  %v8917_v28 = vmax.f32 %v3659_v25, %v4177_v27  ;;  %v3928_v25 = vld [vmem:[%s8201_s26 + $0x198] sm:$0xff] }
 0x383   : > { %4684 = vst [vmem:[#allocation2 + $0x3c0] sm:$0xff] %v8909_v24  ;;  %v4190_v31 = vsel %vm4138_vm0, %v3928_v25, -inf  ;;  %v3684_v25 = vld [vmem:[#allocation2 + $0x390] sm:$0xff] }
 0x384   : > { %4689 = vst [vmem:[#allocation2 + $0x70] sm:$0xff] %v8917_v28 }
 0x385   : > { %4699 = vst [vmem:[#allocation2 + $0x770] sm:$0xff] %v9015_v22 }
 0x389   : > { %5209 = vmax.xlane.f32.xlu2 %v8815_v30  ;;  %5207 = vmax.xlane.f32.xlu1 %v8825_v37  ;;  %v3913_v30 = vld [vmem:[%s8201_s26 + $0x120] sm:$0xff]  ;;  %v3662_v37 = vld [vmem:[#allocation2 + $0x6a8] sm:$0xff] }
 0x38a   : > { %5205 = vmax.xlane.f32.xlu0 %v8828_v38  ;;  %v4175_v34 = vsel %vm4138_vm0, %v3913_v30, -inf  ;;  %v3918_v38 = vld [vmem:[%s8201_s26 + $0x148] sm:$0xff]  ;;  %v3672_v30 = vld [vmem:[#allocation2 + $0x250] sm:$0xff] }
 0x38b   : > { %v8930_v36 = vmax.f32 %v3657_v33, %v4175_v34  ;;  %v4180_v39 = vsel %vm4138_vm0, %v3918_v38, -inf  ;;  %v9036_v34 = vmax.f32 %v3672_v30, %v4190_v31  ;;  %v3677_v38 = vld [vmem:[#allocation2 + $0x148] sm:$0xff] }
 0x38c   : > { %v8938_v40 = vmax.f32 %v3662_v37, %v4180_v39  ;;  %v3931_v37 = vld [vmem:[%s8201_s26 + $0x1b0] sm:$0xff] }
 0x38d   : > { %4687 = vst [vmem:[#allocation2 + $0x618] sm:$0xff] %v8930_v36  ;;  %v4193_v43 = vsel %vm4138_vm0, %v3931_v37, -inf  ;;  %v3689_v37 = vld [vmem:[#allocation2 + $0xb8] sm:$0xff] }
 0x38e   : > { %4692 = vst [vmem:[#allocation2 + $0x6a8] sm:$0xff] %v8938_v40 }
 0x38f   : > { %4702 = vst [vmem:[#allocation2 + $0x250] sm:$0xff] %v9036_v34 }
 0x391   : > { %5215 = vmax.xlane.f32.xlu2 %v8835_v42  ;;  %5213 = vmax.xlane.f32.xlu1 %v8844_v49  ;;  %v3916_v42 = vld [vmem:[%s8201_s26 + $0x138] sm:$0xff]  ;;  %v3665_v49 = vld [vmem:[#allocation2 + $0x6c8] sm:$0xff] }
 0x392   : > { %5211 = vmax.xlane.f32.xlu0 %v8847_v50  ;;  %v4178_v46 = vsel %vm4138_vm0, %v3916_v42, -inf  ;;  %v3921_v50 = vld [vmem:[%s8201_s26 + $0x160] sm:$0xff] }
 0x393   : > { %v8951_v48 = vmax.f32 %v3660_v45, %v4178_v46  ;;  %v4183_v51 = vsel %vm4138_vm0, %v3921_v50, -inf  ;;  %v3675_v42 = vld [vmem:[#allocation2 + $0xe0] sm:$0xff]  ;;  %v3936_v50 = vld [vmem:[%s8201_s26 + $0x1d8] sm:$0xff] }
 0x394   : > { %v8959_v52 = vmax.f32 %v3665_v49, %v4183_v51  ;;  %v9057_v46 = vmax.f32 %v3675_v42, %v4193_v43  ;;  %v3935_v51 = vld [vmem:[%s8201_s26 + $0x1d0] sm:$0xff] }
 0x395   : > { %4690 = vst [vmem:[#allocation2 + $0x7b8] sm:$0xff] %v8951_v48  ;;  %v4197_v56 = vsel %vm4138_vm0, %v3935_v51, -inf }
 0x396   : > { %4695 = vst [vmem:[#allocation2 + $0x6c8] sm:$0xff] %v8959_v52 }
 0x397   : > { %4705 = vst [vmem:[#allocation2 + $0xe0] sm:$0xff] %v9057_v46 }
 0x399   : > { %5221 = vmax.xlane.f32.xlu2 %v8854_v54  ;;  %5219 = vmax.xlane.f32.xlu1 %v8863_v61  ;;  %v3919_v54 = vld [vmem:[%s8201_s26 + $0x150] sm:$0xff]  ;;  %v3668_v61 = vld [vmem:[#allocation2 + $0x5f8] sm:$0xff] }
 0x39a   : > { %5217 = vmax.xlane.f32.xlu0 %v8867_v62  ;;  %v4181_v58 = vsel %vm4138_vm0, %v3919_v54, -inf  ;;  %v3924_v62 = vld [vmem:[%s8201_s26 + $0x178] sm:$0xff]  ;;  %v4198_v54 = vsel %vm4138_vm0, %v3936_v50, -inf }
 0x39b   : > { %v8972_v60 = vmax.f32 %v3663_v57, %v4181_v58  ;;  %v4186_v0 = vsel %vm4138_vm0, %v3924_v62, -inf  ;;  %v3678_v57 = vld [vmem:[#allocation2 + $0x3a0] sm:$0xff] }
 0x39c   : > { %v8984_v7 = vmax.f32 %v3668_v61, %v4186_v0 }
 0x39d   : > { %4693 = vst [vmem:[#allocation2 + $0x3f8] sm:$0xff] %v8972_v60 }
 0x39e   : > { %4698 = vst [vmem:[#allocation2 + $0x5f8] sm:$0xff] %v8984_v7 }
 0x3a1   : > { %5227 = vmax.xlane.f32.xlu2 %v8875_v2  ;;  %5225 = vmax.xlane.f32.xlu1 %v8884_v11  ;;  %v4185_v2 = vsel %vm4138_vm0, %v3923_v63, -inf  ;;  %v3927_v11 = vld [vmem:[%s8201_s26 + $0x190] sm:$0xff] }
 0x3a2   : > { %5223 = vmax.xlane.f32.xlu0 %v8888_v12  ;;  %v8990_v9 = vmax.f32 %v3667_v1, %v4185_v2  ;;  %v3926_v12 = vld [vmem:[%s8201_s26 + $0x188] sm:$0xff]  ;;  %v4189_v15 = vsel %vm4138_vm0, %v3927_v11, -inf  ;;  %v3939_v1 = vld [vmem:[%s8201_s26 + $0x1f0] sm:$0xff] }
 0x3a3   : > { %v4188_v17 = vsel %vm4138_vm0, %v3926_v12, -inf  ;;  %v9007_v20 = vmax.f32 %v3671_v14, %v4189_v15  ;;  %v3938_v2 = vld [vmem:[%s8201_s26 + $0x1e8] sm:$0xff]  ;;  %v4199_v12 = vsel %vm4138_vm0, %v3937_v4, -inf }
 0x3a4   : > { %4697 = vst [vmem:[#allocation2 + $0x5e8] sm:$0xff] %v8990_v9 }
 0x3a5   : > { %4701 = vst [vmem:[#allocation2 + $0x640] sm:$0xff] %v9007_v20 }
 0x3a9   : > { %5233 = vmax.xlane.f32.xlu2 %v8896_v16  ;;  %5231 = vmax.xlane.f32.xlu1 %v8905_v23  ;;  %v3670_v16 = vld [vmem:[#allocation2 + $0x520] sm:$0xff]  ;;  %v3930_v23 = vld [vmem:[%s8201_s26 + $0x1a8] sm:$0xff] }
 0x3aa   : > { %5229 = vmax.xlane.f32.xlu0 %v8909_v24  ;;  %v9011_v21 = vmax.f32 %v3670_v16, %v4188_v17  ;;  %v3929_v24 = vld [vmem:[%s8201_s26 + $0x1a0] sm:$0xff]  ;;  %v4192_v27 = vsel %vm4138_vm0, %v3930_v23, -inf  ;;  %v3685_v23 = vld [vmem:[#allocation2 + $0x538] sm:$0xff] }
 0x3ab   : > { %v4191_v29 = vsel %vm4138_vm0, %v3929_v24, -inf  ;;  %v9028_v32 = vmax.f32 %v3674_v26, %v4192_v27  ;;  %v4203_v24 = vsel %vm4138_vm0, %v3941_v19, -inf }
 0x3ac   : > { %4700 = vst [vmem:[#allocation2 + $0x520] sm:$0xff] %v9011_v21 }
 0x3ad   : > { %4704 = vst [vmem:[#allocation2 + $0x420] sm:$0xff] %v9028_v32 }
 0x3b1   : > { %5239 = vmax.xlane.f32.xlu2 %v8917_v28  ;;  %5237 = vmax.xlane.f32.xlu1 %v8926_v35  ;;  %v3673_v28 = vld [vmem:[#allocation2 + $0x348] sm:$0xff]  ;;  %v3933_v35 = vld [vmem:[%s8201_s26 + $0x1c0] sm:$0xff] }
 0x3b2   : > { %5235 = vmax.xlane.f32.xlu0 %v8930_v36  ;;  %v9032_v33 = vmax.f32 %v3673_v28, %v4191_v29  ;;  %v3932_v36 = vld [vmem:[%s8201_s26 + $0x1b8] sm:$0xff]  ;;  %v4195_v39 = vsel %vm4138_vm0, %v3933_v35, -inf  ;;  %v9134_v28 = vmax.f32 %v3685_v23, %v4203_v24 }
 0x3b3   : > { %v4194_v41 = vsel %vm4138_vm0, %v3932_v36, -inf  ;;  %v9049_v44 = vmax.f32 %v3677_v38, %v4195_v39  ;;  %v3943_v36 = vld [vmem:[%s8201_s26 + $0x210] sm:$0xff]  ;;  %v3688_v38 = vld [vmem:[#allocation2 + $0x680] sm:$0xff] }
 0x3b4   : > { %4703 = vst [vmem:[#allocation2 + $0x348] sm:$0xff] %v9032_v33 }
 0x3b5   : > { %4707 = vst [vmem:[#allocation2 + $0x148] sm:$0xff] %v9049_v44 }
 0x3b6   : > { %4715 = vst [vmem:[#allocation2 + $0x538] sm:$0xff] %v9134_v28 }
 0x3b9   : > { %5245 = vmax.xlane.f32.xlu2 %v8938_v40  ;;  %5243 = vmax.xlane.f32.xlu1 %v8947_v47  ;;  %v3676_v40 = vld [vmem:[#allocation2 + $0x620] sm:$0xff] }
 0x3ba   : > { %5241 = vmax.xlane.f32.xlu0 %v8951_v48  ;;  %v9053_v45 = vmax.f32 %v3676_v40, %v4194_v41  ;;  %v3687_v40 = vld [vmem:[#allocation2 + $0x790] sm:$0xff]  ;;  %v4205_v41 = vsel %vm4138_vm0, %v3943_v36, -inf  ;;  %v3698_v36 = vld [vmem:[#allocation2 + $0x598] sm:$0xff] }
 0x3bb   : > { %v9165_v50 = vmax.f32 %v3687_v40, %v4205_v41 }
 0x3bc   : > { %4706 = vst [vmem:[#allocation2 + $0x620] sm:$0xff] %v9053_v45 }
 0x3bd   : > { %4717 = vst [vmem:[#allocation2 + $0x790] sm:$0xff] %v9165_v50 }
 0x3c1   : > { %5251 = vmax.xlane.f32.xlu2 %v8959_v52  ;;  %5249 = vmax.xlane.f32.xlu1 %v8968_v59  ;;  %v3934_v52 = vld [vmem:[%s8201_s26 + $0x1c8] sm:$0xff]  ;;  %v9076_v59 = vmax.f32 %v3680_v53, %v4198_v54 }
 0x3c2   : > { %5247 = vmax.xlane.f32.xlu0 %v8972_v60  ;;  %v4196_v58 = vsel %vm4138_vm0, %v3934_v52, -inf  ;;  %v9080_v60 = vmax.f32 %v3679_v55, %v4197_v56  ;;  %v3946_v54 = vld [vmem:[%s8201_s26 + $0x228] sm:$0xff]  ;;  %v3692_v55 = vld [vmem:[#allocation2 + $0x40] sm:$0xff]  ;;  %v3691_v56 = vld [vmem:[#allocation2 + $0xd0] sm:$0xff] }
 0x3c3   : > { %4710 = vst [vmem:[#allocation2 + $0x310] sm:$0xff] %v9076_v59  ;;  %v9084_v61 = vmax.f32 %v3678_v57, %v4196_v58  ;;  %v3690_v58 = vld [vmem:[#allocation2 + $0x120] sm:$0xff] }
 0x3c4   : > { %v9060_v47 = vpop.xlane.xlu2 %5171  ;;  %v9062_v48 = vpop.xlane.xlu1 %5167  ;;  %4709 = vst [vmem:[#allocation2 + $0x4e8] sm:$0xff] %v9080_v60 }
 0x3c5   : > { %12099 = vst [vmem:[#allocation8_spill] sm:$0xff] %v9060_v47  ;;  %v9065_v49 = vpop.xlane.xlu0 %5163  ;;  %v3757_v47 = vld [vmem:[#allocation2 + $0x3c8] sm:$0xff] }
 0x3c6   : > { %12100 = vst [vmem:[#allocation9_spill] sm:$0xff] %v9062_v48  ;;  %v3760_v48 = vld [vmem:[#allocation2 + $0x688] sm:$0xff] }
 0x3c7   : > { %12101 = vst [vmem:[#allocation10_spill] sm:$0xff] %v9065_v49 }
 0x3c8   : > { %4708 = vst [vmem:[#allocation2 + $0x3a0] sm:$0xff] %v9084_v61 }
 0x3c9   : > { %5257 = vmax.xlane.f32.xlu2 %v8984_v7  ;;  %5255 = vmax.xlane.f32.xlu1 %v8990_v9  ;;  %v4201_v7 = vsel %vm4138_vm0, %v3939_v1, -inf  ;;  %v4200_v9 = vsel %vm4138_vm0, %v3938_v2, -inf  ;;  %v4208_v1 = vsel %vm4138_vm0, %v3946_v54, -inf }
 0x3ca   : > { %5253 = vmax.xlane.f32.xlu0 %v8994_v10  ;;  %v3681_v10 = vld [vmem:[#allocation2 + $0x38] sm:$0xff]  ;;  %v9101_v11 = vmax.f32 %v3683_v5, %v4201_v7  ;;  %v9107_v13 = vmax.f32 %v3682_v8, %v4200_v9  ;;  %v9192_v5 = vmax.f32 %v3690_v58, %v4208_v1 }
 0x3cb   : > { %v9111_v14 = vmax.f32 %v3681_v10, %v4199_v12  ;;  %v3949_v10 = vld [vmem:[%s8201_s26 + $0x240] sm:$0xff]  ;;  %v3695_v12 = vld [vmem:[#allocation2 + $0x758] sm:$0xff] }
 0x3cc   : > { %v9087_v62 = vpop.xlane.xlu2 %5173  ;;  %v9089_v63 = vpop.xlane.xlu1 %5169  ;;  %4713 = vst [vmem:[#allocation2 + $0x50] sm:$0xff] %v9101_v11  ;;  %v3699_v1 = vld [vmem:[#allocation2 + $0x7d8] sm:$0xff] }
 0x3cd   : > { %12102 = vst [vmem:[#allocation11_spill] sm:$0xff] %v9087_v62  ;;  %v9092_v0 = vpop.xlane.xlu0 %5165  ;;  %v3758_v62 = vld [vmem:[#allocation2 + $0x1e8] sm:$0xff] }
 0x3ce   : > { %12103 = vst [vmem:[#allocation12_spill] sm:$0xff] %v9089_v63 }
 0x3cf   : > { %12104 = vst [vmem:[#allocation13_spill] sm:$0xff] %v9092_v0  ;;  %v3759_v0 = vld [vmem:[#allocation2 + $0x6d0] sm:$0xff] }
 0x3d0   : > { %4712 = vst [vmem:[#allocation2 + $0x440] sm:$0xff] %v9107_v13 }
 0x3d1   : > { %5263 = vmax.xlane.f32.xlu2 %v9007_v20  ;;  %5261 = vmax.xlane.f32.xlu1 %v9011_v21  ;;  %4711 = vst [vmem:[#allocation2 + $0x38] sm:$0xff] %v9111_v14  ;;  %v3940_v20 = vld [vmem:[%s8201_s26 + $0x1f8] sm:$0xff]  ;;  %v3686_v21 = vld [vmem:[#allocation2 + $0xf0] sm:$0xff] }
 0x3d2   : > { %5259 = vmax.xlane.f32.xlu0 %v9015_v22  ;;  %v4204_v22 = vsel %vm4138_vm0, %v3942_v18, -inf  ;;  %v4202_v26 = vsel %vm4138_vm0, %v3940_v20, -inf  ;;  %4720 = vst [vmem:[#allocation2 + $0x120] sm:$0xff] %v9192_v5  ;;  %v3694_v18 = vld [vmem:[#allocation2 + $0x2f8] sm:$0xff]  ;;  %v3693_v20 = vld [vmem:[#allocation2 + $0x6f0] sm:$0xff] }
 0x3d3   : > { %v9130_v27 = vmax.f32 %v3686_v21, %v4204_v22  ;;  %v9138_v29 = vmax.f32 %v3684_v25, %v4202_v26  ;;  %v4211_v21 = vsel %vm4138_vm0, %v3949_v10, -inf }
 0x3d4   : > { %v9114_v15 = vpop.xlane.xlu2 %5179  ;;  %v9116_v16 = vpop.xlane.xlu1 %5177  ;;  %v9219_v24 = vmax.f32 %v3693_v20, %v4211_v21  ;;  %v3958_v20 = vld [vmem:[%s8201_s26 + $0x288] sm:$0xff]  ;;  %v3704_v21 = vld [vmem:[#allocation2 + $0x3b8] sm:$0xff] }
 0x3d5   : > { %12105 = vst [vmem:[#allocation14_spill] sm:$0xff] %v9114_v15  ;;  %v9119_v17 = vpop.xlane.xlu0 %5175 }
 0x3d6   : > { %12106 = vst [vmem:[#allocation15_spill] sm:$0xff] %v9116_v16 }
 0x3d7   : > { %12107 = vst [vmem:[#allocation16_spill] sm:$0xff] %v9119_v17 }
 0x3d8   : > { %4716 = vst [vmem:[#allocation2 + $0xf0] sm:$0xff] %v9130_v27 }
 0x3d9   : > { %5269 = vmax.xlane.f32.xlu2 %v9028_v32  ;;  %5267 = vmax.xlane.f32.xlu1 %v9032_v33  ;;  %4714 = vst [vmem:[#allocation2 + $0x390] sm:$0xff] %v9138_v29  ;;  %v3945_v32 = vld [vmem:[%s8201_s26 + $0x220] sm:$0xff]  ;;  %v3944_v33 = vld [vmem:[%s8201_s26 + $0x218] sm:$0xff] }
 0x3da   : > { %5265 = vmax.xlane.f32.xlu0 %v9036_v34  ;;  %v4207_v34 = vsel %vm4138_vm0, %v3945_v32, -inf  ;;  %v4206_v39 = vsel %vm4138_vm0, %v3944_v33, -inf  ;;  %4723 = vst [vmem:[#allocation2 + $0x6f0] sm:$0xff] %v9219_v24  ;;  %v3952_v33 = vld [vmem:[%s8201_s26 + $0x258] sm:$0xff] }
 0x3db   : > { %v9157_v42 = vmax.f32 %v3689_v37, %v4207_v34  ;;  %v9161_v43 = vmax.f32 %v3688_v38, %v4206_v39  ;;  %v3697_v37 = vld [vmem:[#allocation2 + $0x738] sm:$0xff]  ;;  %v4214_v39 = vsel %vm4138_vm0, %v3952_v33, -inf  ;;  %v3702_v33 = vld [vmem:[#allocation2 + $0x1a8] sm:$0xff] }
 0x3dc   : > { %v9141_v30 = vpop.xlane.xlu2 %5185  ;;  %v9143_v31 = vpop.xlane.xlu1 %5183  ;;  %v3696_v38 = vld [vmem:[#allocation2 + $0x178] sm:$0xff] }
 0x3dd   : > { %12108 = vst [vmem:[#allocation17_spill] sm:$0xff] %v9141_v30  ;;  %v9146_v35 = vpop.xlane.xlu0 %5181 }
 0x3de   : > { %12109 = vst [vmem:[#allocation18_spill] sm:$0xff] %v9143_v31 }
 0x3df   : > { %12110 = vst [vmem:[#allocation19_spill] sm:$0xff] %v9146_v35 }
 0x3e0   : > { %4719 = vst [vmem:[#allocation2 + $0xb8] sm:$0xff] %v9157_v42 }
 0x3e1   : > { %5275 = vmax.xlane.f32.xlu2 %v9049_v44  ;;  %5273 = vmax.xlane.f32.xlu1 %v9053_v45  ;;  %4718 = vst [vmem:[#allocation2 + $0x680] sm:$0xff] %v9161_v43  ;;  %v3948_v44 = vld [vmem:[%s8201_s26 + $0x238] sm:$0xff]  ;;  %v3947_v45 = vld [vmem:[%s8201_s26 + $0x230] sm:$0xff] }
 0x3e2   : > { %5271 = vmax.xlane.f32.xlu0 %v9057_v46  ;;  %v4210_v46 = vsel %vm4138_vm0, %v3948_v44, -inf  ;;  %v4209_v57 = vsel %vm4138_vm0, %v3947_v45, -inf  ;;  %v9246_v44 = vmax.f32 %v3696_v38, %v4214_v39 }
 0x3e3   : > { %v9184_v2 = vmax.f32 %v3692_v55, %v4210_v46  ;;  %v9188_v4 = vmax.f32 %v3691_v56, %v4209_v57  ;;  %v3955_v46 = vld [vmem:[%s8201_s26 + $0x270] sm:$0xff]  ;;  %v3701_v56 = vld [vmem:[#allocation2 + $0x398] sm:$0xff] }
 0x3e4   : > { %v9168_v51 = vpop.xlane.xlu2 %5191  ;;  %v9170_v52 = vpop.xlane.xlu1 %5189  ;;  %4726 = vst [vmem:[#allocation2 + $0x178] sm:$0xff] %v9246_v44  ;;  %v3700_v57 = vld [vmem:[#allocation2 + $0x6d8] sm:$0xff] }
 0x3e5   : > { %12111 = vst [vmem:[#allocation20_spill] sm:$0xff] %v9168_v51  ;;  %v9173_v53 = vpop.xlane.xlu0 %5187 }
 0x3e6   : > { %12112 = vst [vmem:[#allocation21_spill] sm:$0xff] %v9170_v52 }
 0x3e7   : > { %12113 = vst [vmem:[#allocation22_spill] sm:$0xff] %v9173_v53 }
 0x3e8   : > { %4722 = vst [vmem:[#allocation2 + $0x40] sm:$0xff] %v9184_v2 }
 0x3e9   : > { %5281 = vmax.xlane.f32.xlu2 %v9076_v59  ;;  %5279 = vmax.xlane.f32.xlu1 %v9080_v60  ;;  %4721 = vst [vmem:[#allocation2 + $0xd0] sm:$0xff] %v9188_v4  ;;  %v3951_v59 = vld [vmem:[%s8201_s26 + $0x250] sm:$0xff]  ;;  %v3950_v60 = vld [vmem:[%s8201_s26 + $0x248] sm:$0xff] }
 0x3ea   : > { %5277 = vmax.xlane.f32.xlu0 %v9084_v61  ;;  %v4213_v61 = vsel %vm4138_vm0, %v3951_v59, -inf  ;;  %v4212_v19 = vsel %vm4138_vm0, %v3950_v60, -inf  ;;  %v4217_v59 = vsel %vm4138_vm0, %v3955_v46, -inf  ;;  %v3707_v46 = vld [vmem:[#allocation2 + $0x218] sm:$0xff] }
 0x3eb   : > { %v9211_v22 = vmax.f32 %v3695_v12, %v4213_v61  ;;  %v9215_v23 = vmax.f32 %v3694_v18, %v4212_v19  ;;  %v9273_v12 = vmax.f32 %v3699_v1, %v4217_v59 }
 0x3ec   : > { %v9195_v7 = vpop.xlane.xlu2 %5197  ;;  %v9197_v8 = vpop.xlane.xlu1 %5195 }
 0x3ed   : > { %v9200_v9 = vpop.xlane.xlu0 %5193  ;;  %4725 = vst [vmem:[#allocation2 + $0x758] sm:$0xff] %v9211_v22 }
 0x3ee   : > { %12114 = vst [vmem:[#allocation23_spill] sm:$0xff] %v9200_v9 }
 0x3ef   : > { %4724 = vst [vmem:[#allocation2 + $0x2f8] sm:$0xff] %v9215_v23 }
 0x3f0   : > { %4729 = vst [vmem:[#allocation2 + $0x7d8] sm:$0xff] %v9273_v12 }
 0x3f1   : > { %5287 = vmax.xlane.f32.xlu2 %v9101_v11  ;;  %5285 = vmax.xlane.f32.xlu1 %v9107_v13  ;;  %v3954_v11 = vld [vmem:[%s8201_s26 + $0x268] sm:$0xff]  ;;  %v3953_v13 = vld [vmem:[%s8201_s26 + $0x260] sm:$0xff] }
 0x3f2   : > { %5283 = vmax.xlane.f32.xlu0 %v9111_v14  ;;  %v4216_v14 = vsel %vm4138_vm0, %v3954_v11, -inf  ;;  %v4215_v34 = vsel %vm4138_vm0, %v3953_v13, -inf  ;;  %v3703_v11 = vld [vmem:[#allocation2 + $0x698] sm:$0xff] }
 0x3f3   : > { %v9238_v40 = vmax.f32 %v3698_v36, %v4216_v14  ;;  %v9242_v41 = vmax.f32 %v3697_v37, %v4215_v34  ;;  %v4220_v36 = vsel %vm4138_vm0, %v3958_v20, -inf }
 0x3f4   : > { %v9222_v25 = vpop.xlane.xlu2 %5203  ;;  %v9224_v26 = vpop.xlane.xlu1 %5201  ;;  %v9300_v34 = vmax.f32 %v3702_v33, %v4220_v36  ;;  %v3708_v36 = vld [vmem:[#allocation2 + $0x1d8] sm:$0xff] }
 0x3f5   : > { %v9227_v32 = vpop.xlane.xlu0 %5199  ;;  %4728 = vst [vmem:[#allocation2 + $0x598] sm:$0xff] %v9238_v40 }
 0x3f6   : > { %4727 = vst [vmem:[#allocation2 + $0x738] sm:$0xff] %v9242_v41 }
 0x3f7   : > { %4732 = vst [vmem:[#allocation2 + $0x1a8] sm:$0xff] %v9300_v34 }
 0x3f9   : > { %5293 = vmax.xlane.f32.xlu2 %v9130_v27  ;;  %5291 = vmax.xlane.f32.xlu1 %v9134_v28  ;;  %v3957_v27 = vld [vmem:[%s8201_s26 + $0x280] sm:$0xff]  ;;  %v3956_v28 = vld [vmem:[%s8201_s26 + $0x278] sm:$0xff] }
 0x3fa   : > { %5289 = vmax.xlane.f32.xlu0 %v9138_v29  ;;  %v4219_v29 = vsel %vm4138_vm0, %v3957_v27, -inf  ;;  %v4218_v58 = vsel %vm4138_vm0, %v3956_v28, -inf  ;;  %v3961_v28 = vld [vmem:[%s8201_s26 + $0x2a0] sm:$0xff] }
 0x3fb   : > { %v9265_v60 = vmax.f32 %v3701_v56, %v4219_v29  ;;  %v9269_v10 = vmax.f32 %v3700_v57, %v4218_v58  ;;  %v3706_v56 = vld [vmem:[#allocation2 + $0x610] sm:$0xff]  ;;  %v3705_v57 = vld [vmem:[#allocation2 + $0x5d8] sm:$0xff]  ;;  %v4223_v58 = vsel %vm4138_vm0, %v3961_v28, -inf }
 0x3fc   : > { %v9249_v45 = vpop.xlane.xlu2 %5209  ;;  %v9251_v54 = vpop.xlane.xlu1 %5207 }
 0x3fd   : > { %v9254_v55 = vpop.xlane.xlu0 %5205  ;;  %4731 = vst [vmem:[#allocation2 + $0x398] sm:$0xff] %v9265_v60 }
 0x3fe   : > { %4730 = vst [vmem:[#allocation2 + $0x6d8] sm:$0xff] %v9269_v10 }
 0x401   : > { %5299 = vmax.xlane.f32.xlu2 %v9157_v42  ;;  %5297 = vmax.xlane.f32.xlu1 %v9161_v43  ;;  %v3960_v42 = vld [vmem:[%s8201_s26 + $0x298] sm:$0xff]  ;;  %v3959_v43 = vld [vmem:[%s8201_s26 + $0x290] sm:$0xff] }
 0x402   : > { %5295 = vmax.xlane.f32.xlu0 %v9165_v50  ;;  %v4222_v50 = vsel %vm4138_vm0, %v3960_v42, -inf  ;;  %v4221_v13 = vsel %vm4138_vm0, %v3959_v43, -inf  ;;  %v9327_v42 = vmax.f32 %v3705_v57, %v4223_v58  ;;  %v3967_v57 = vld [vmem:[%s8201_s26 + $0x2d0] sm:$0xff]  ;;  %v3713_v58 = vld [vmem:[#allocation2 + $0x478] sm:$0xff] }
 0x403   : > { %v9292_v14 = vmax.f32 %v3704_v21, %v4222_v50  ;;  %v9296_v37 = vmax.f32 %v3703_v11, %v4221_v13  ;;  %v3964_v50 = vld [vmem:[%s8201_s26 + $0x2b8] sm:$0xff]  ;;  %v3709_v13 = vld [vmem:[#allocation2 + $0x628] sm:$0xff] }
 0x404   : > { %v9276_v61 = vpop.xlane.xlu2 %5215  ;;  %v9278_v18 = vpop.xlane.xlu1 %5213  ;;  %4735 = vst [vmem:[#allocation2 + $0x5d8] sm:$0xff] %v9327_v42  ;;  %v3710_v11 = vld [vmem:[#allocation2 + $0x1f8] sm:$0xff] }
 0x405   : > { %v9281_v19 = vpop.xlane.xlu0 %5211  ;;  %4734 = vst [vmem:[#allocation2 + $0x3b8] sm:$0xff] %v9292_v14 }
 0x406   : > { %4733 = vst [vmem:[#allocation2 + $0x698] sm:$0xff] %v9296_v37 }
 0x409   : > { %5305 = vmax.xlane.f32.xlu2 %v9184_v2  ;;  %5303 = vmax.xlane.f32.xlu1 %v9188_v4  ;;  %v3963_v2 = vld [vmem:[%s8201_s26 + $0x2b0] sm:$0xff]  ;;  %v3962_v4 = vld [vmem:[%s8201_s26 + $0x2a8] sm:$0xff] }
 0x40a   : > { %5301 = vmax.xlane.f32.xlu0 %v9192_v5  ;;  %v4225_v5 = vsel %vm4138_vm0, %v3963_v2, -inf  ;;  %v4224_v29 = vsel %vm4138_vm0, %v3962_v4, -inf  ;;  %v4226_v2 = vsel %vm4138_vm0, %v3964_v50, -inf  ;;  %v3711_v50 = vld [vmem:[#allocation2 + $0x388] sm:$0xff] }
 0x40b   : > { %v9319_v1 = vmax.f32 %v3707_v46, %v4225_v5  ;;  %v9323_v59 = vmax.f32 %v3706_v56, %v4224_v29  ;;  %v9354_v46 = vmax.f32 %v3708_v36, %v4226_v2 }
 0x40c   : > { %v9303_v38 = vpop.xlane.xlu2 %5221  ;;  %v9305_v39 = vpop.xlane.xlu1 %5219 }
 0x40d   : > { %v9308_v27 = vpop.xlane.xlu0 %5217  ;;  %4737 = vst [vmem:[#allocation2 + $0x218] sm:$0xff] %v9319_v1 }
 0x40e   : > { %4736 = vst [vmem:[#allocation2 + $0x610] sm:$0xff] %v9323_v59 }
 0x40f   : > { %4738 = vst [vmem:[#allocation2 + $0x1d8] sm:$0xff] %v9354_v46 }
 0x411   : > { %5311 = vmax.xlane.f32.xlu2 %v9211_v22  ;;  %5309 = vmax.xlane.f32.xlu1 %v9215_v23  ;;  %v3966_v22 = vld [vmem:[%s8201_s26 + $0x2c8] sm:$0xff]  ;;  %v3965_v23 = vld [vmem:[%s8201_s26 + $0x2c0] sm:$0xff] }
 0x412   : > { %5307 = vmax.xlane.f32.xlu0 %v9219_v24  ;;  %v4228_v24 = vsel %vm4138_vm0, %v3966_v22, -inf  ;;  %v4227_v33 = vsel %vm4138_vm0, %v3965_v23, -inf  ;;  %v3712_v22 = vld [vmem:[#allocation2 + $0x278] sm:$0xff] }
 0x413   : > { %v9346_v4 = vmax.f32 %v3710_v11, %v4228_v24  ;;  %v9350_v28 = vmax.f32 %v3709_v13, %v4227_v33  ;;  %v4229_v11 = vsel %vm4138_vm0, %v3967_v57, -inf  ;;  %v3716_v57 = vld [vmem:[#allocation2 + $0x7c0] sm:$0xff] }
 0x414   : > { %v9330_v43 = vpop.xlane.xlu2 %5227  ;;  %v9332_v20 = vpop.xlane.xlu1 %5225  ;;  %v9381_v33 = vmax.f32 %v3711_v50, %v4229_v11 }
 0x415   : > { %12115 = vst [vmem:[#allocation24_spill] sm:$0xff] %v9330_v43  ;;  %v9335_v21 = vpop.xlane.xlu0 %5223 }
 0x416   : > { %4740 = vst [vmem:[#allocation2 + $0x1f8] sm:$0xff] %v9346_v4 }
 0x417   : > { %4739 = vst [vmem:[#allocation2 + $0x628] sm:$0xff] %v9350_v28 }
 0x418   : > { %4741 = vst [vmem:[#allocation2 + $0x388] sm:$0xff] %v9381_v33 }
 0x419   : > { %5317 = vmax.xlane.f32.xlu2 %v9238_v40  ;;  %5315 = vmax.xlane.f32.xlu1 %v9242_v41  ;;  %v3969_v40 = vld [vmem:[%s8201_s26 + $0x2e0] sm:$0xff]  ;;  %v3968_v41 = vld [vmem:[%s8201_s26 + $0x2d8] sm:$0xff] }
 0x41a   : > { %5313 = vmax.xlane.f32.xlu0 %v9246_v44  ;;  %v4231_v44 = vsel %vm4138_vm0, %v3969_v40, -inf  ;;  %v4230_v23 = vsel %vm4138_vm0, %v3968_v41, -inf  ;;  %v3970_v41 = vld [vmem:[%s8201_s26 + $0x2e8] sm:$0xff] }
 0x41b   : > { %v9373_v24 = vmax.f32 %v3713_v58, %v4231_v44  ;;  %v9377_v13 = vmax.f32 %v3712_v22, %v4230_v23  ;;  %v3715_v58 = vld [vmem:[#allocation2 + $0x1c8] sm:$0xff]  ;;  %v3714_v22 = vld [vmem:[#allocation2 + $0x2c0] sm:$0xff]  ;;  %v4232_v23 = vsel %vm4138_vm0, %v3970_v41, -inf }
 0x41c   : > { %v9357_v5 = vpop.xlane.xlu2 %5233  ;;  %v9359_v56 = vpop.xlane.xlu1 %5231 }
 0x41d   : > { %12116 = vst [vmem:[#allocation25_spill] sm:$0xff] %v9357_v5  ;;  %v9362_v29 = vpop.xlane.xlu0 %5229 }
 0x41e   : > { %12117 = vst [vmem:[#allocation26_spill] sm:$0xff] %v9359_v56 }
 0x41f   : > { %12118 = vst [vmem:[#allocation27_spill] sm:$0xff] %v9362_v29 }
 0x420   : > { %4743 = vst [vmem:[#allocation2 + $0x478] sm:$0xff] %v9373_v24 }
 0x421   : > { %5323 = vmax.xlane.f32.xlu2 %v9265_v60  ;;  %5321 = vmax.xlane.f32.xlu1 %v9269_v10  ;;  %4742 = vst [vmem:[#allocation2 + $0x278] sm:$0xff] %v9377_v13  ;;  %v3972_v60 = vld [vmem:[%s8201_s26 + $0x2f8] sm:$0xff]  ;;  %v3971_v10 = vld [vmem:[%s8201_s26 + $0x2f0] sm:$0xff] }
 0x422   : > { %5319 = vmax.xlane.f32.xlu0 %v9273_v12  ;;  %v4234_v12 = vsel %vm4138_vm0, %v3972_v60, -inf  ;;  %v4233_v44 = vsel %vm4138_vm0, %v3971_v10, -inf  ;;  %v9408_v60 = vmax.f32 %v3714_v22, %v4232_v23  ;;  %v3717_v22 = vld [vmem:[#allocation2 + $0x418] sm:$0xff] }
 0x423   : > { %v9400_v50 = vmax.f32 %v3716_v57, %v4234_v12  ;;  %v9404_v11 = vmax.f32 %v3715_v58, %v4233_v44  ;;  %v3973_v57 = vld [vmem:[%s8201_s26 + $0x300] sm:$0xff]  ;;  %v3719_v12 = vld [vmem:[#allocation2 + $0x4b0] sm:$0xff] }
 0x424   : > { %v9384_v36 = vpop.xlane.xlu2 %5239  ;;  %v9386_v2 = vpop.xlane.xlu1 %5237  ;;  %4744 = vst [vmem:[#allocation2 + $0x2c0] sm:$0xff] %v9408_v60  ;;  %v3718_v58 = vld [vmem:[#allocation2 + $0x7f0] sm:$0xff]  ;;  %v4235_v23 = vsel %vm4138_vm0, %v3973_v57, -inf }
 0x425   : > { %12119 = vst [vmem:[#allocation28_spill] sm:$0xff] %v9384_v36  ;;  %v9389_v40 = vpop.xlane.xlu0 %5235 }
 0x426   : > { %12120 = vst [vmem:[#allocation29_spill] sm:$0xff] %v9386_v2 }
 0x427   : > { %12121 = vst [vmem:[#allocation30_spill] sm:$0xff] %v9389_v40 }
 0x428   : > { %4746 = vst [vmem:[#allocation2 + $0x7c0] sm:$0xff] %v9400_v50 }
 0x429   : > { %5329 = vmax.xlane.f32.xlu2 %v9292_v14  ;;  %5327 = vmax.xlane.f32.xlu1 %v9296_v37  ;;  %4745 = vst [vmem:[#allocation2 + $0x1c8] sm:$0xff] %v9404_v11  ;;  %v3975_v14 = vld [vmem:[%s8201_s26 + $0x310] sm:$0xff]  ;;  %v3974_v37 = vld [vmem:[%s8201_s26 + $0x308] sm:$0xff] }
 0x42a   : > { %5325 = vmax.xlane.f32.xlu0 %v9300_v34  ;;  %v4237_v34 = vsel %vm4138_vm0, %v3975_v14, -inf  ;;  %v4236_v44 = vsel %vm4138_vm0, %v3974_v37, -inf  ;;  %v9435_v14 = vmax.f32 %v3717_v22, %v4235_v23  ;;  %v3720_v22 = vld [vmem:[#allocation2 + $0x318] sm:$0xff] }
 0x42b   : > { %v9427_v52 = vmax.f32 %v3719_v12, %v4237_v34  ;;  %v9431_v51 = vmax.f32 %v3718_v58, %v4236_v44  ;;  %v3976_v12 = vld [vmem:[%s8201_s26 + $0x318] sm:$0xff]  ;;  %v3722_v34 = vld [vmem:[#allocation2 + $0x540] sm:$0xff]  ;;  %v3721_v58 = vld [vmem:[#allocation2 + $0x90] sm:$0xff] }
 0x42c   : > { %v9411_v10 = vpop.xlane.xlu2 %5245  ;;  %v9413_v9 = vpop.xlane.xlu1 %5243  ;;  %4747 = vst [vmem:[#allocation2 + $0x418] sm:$0xff] %v9435_v14  ;;  %v4238_v23 = vsel %vm4138_vm0, %v3976_v12, -inf }
 0x42d   : > { %12122 = vst [vmem:[#allocation31_spill] sm:$0xff] %v9411_v10  ;;  %v9416_v41 = vpop.xlane.xlu0 %5241 }
 0x42e   : > { %12123 = vst [vmem:[#allocation32_spill] sm:$0xff] %v9413_v9 }
 0x42f   : > { %12124 = vst [vmem:[#allocation33_spill] sm:$0xff] %v9416_v41 }
 0x430   : > { %4749 = vst [vmem:[#allocation2 + $0x4b0] sm:$0xff] %v9427_v52 }
 0x431   : > { %5335 = vmax.xlane.f32.xlu2 %v9319_v1  ;;  %5333 = vmax.xlane.f32.xlu1 %v9323_v59  ;;  %4748 = vst [vmem:[#allocation2 + $0x7f0] sm:$0xff] %v9431_v51  ;;  %v3978_v1 = vld [vmem:[%s8201_s26 + $0x328] sm:$0xff]  ;;  %v3977_v59 = vld [vmem:[%s8201_s26 + $0x320] sm:$0xff] }
 0x432   : > { %5331 = vmax.xlane.f32.xlu0 %v9327_v42  ;;  %v4240_v42 = vsel %vm4138_vm0, %v3978_v1, -inf  ;;  %v4239_v44 = vsel %vm4138_vm0, %v3977_v59, -inf  ;;  %v9462_v1 = vmax.f32 %v3720_v22, %v4238_v23  ;;  %v3723_v22 = vld [vmem:[#allocation2 + $0x588] sm:$0xff] }
 0x434   : > { %v9438_v37 = vpop.xlane.xlu2 %5251  ;;  %v9440_v53 = vpop.xlane.xlu1 %5249  ;;  %4750 = vst [vmem:[#allocation2 + $0x318] sm:$0xff] %v9462_v1 }
 0x435   : > { %12125 = vst [vmem:[#allocation34_spill] sm:$0xff] %v9438_v37  ;;  %v9443_v57 = vpop.xlane.xlu0 %5247  ;;  %v9454_v37 = vmax.f32 %v3722_v34, %v4240_v42  ;;  %v3979_v34 = vld [vmem:[%s8201_s26 + $0x330] sm:$0xff]  ;;  %v3725_v42 = vld [vmem:[#allocation2 + $0x58] sm:$0xff] }
 0x436   : > { %12126 = vst [vmem:[#allocation35_spill] sm:$0xff] %v9440_v53  ;;  %v9458_v53 = vmax.f32 %v3721_v58, %v4239_v44  ;;  %v3724_v58 = vld [vmem:[#allocation2 + $0x648] sm:$0xff]  ;;  %v4241_v23 = vsel %vm4138_vm0, %v3979_v34, -inf }
 0x437   : > { %12127 = vst [vmem:[#allocation36_spill] sm:$0xff] %v9443_v57 }
 0x438   : > { %4752 = vst [vmem:[#allocation2 + $0x540] sm:$0xff] %v9454_v37 }
 0x439   : > { %5341 = vmax.xlane.f32.xlu2 %v9346_v4  ;;  %5339 = vmax.xlane.f32.xlu1 %v9350_v28  ;;  %4751 = vst [vmem:[#allocation2 + $0x90] sm:$0xff] %v9458_v53  ;;  %v3981_v4 = vld [vmem:[%s8201_s26 + $0x340] sm:$0xff]  ;;  %v3980_v28 = vld [vmem:[%s8201_s26 + $0x338] sm:$0xff] }
 0x43a   : > { %5337 = vmax.xlane.f32.xlu0 %v9354_v46  ;;  %v4243_v46 = vsel %vm4138_vm0, %v3981_v4, -inf  ;;  %v4242_v44 = vsel %vm4138_vm0, %v3980_v28, -inf  ;;  %v9489_v4 = vmax.f32 %v3723_v22, %v4241_v23  ;;  %v3726_v22 = vld [vmem:[#allocation2 + $0x198] sm:$0xff] }
 0x43c   : > { %v9465_v59 = vpop.xlane.xlu2 %5257  ;;  %v9467_v30 = vpop.xlane.xlu1 %5255  ;;  %4753 = vst [vmem:[#allocation2 + $0x588] sm:$0xff] %v9489_v4 }
 0x43d   : > { %12128 = vst [vmem:[#allocation37_spill] sm:$0xff] %v9465_v59  ;;  %v9470_v12 = vpop.xlane.xlu0 %5253  ;;  %v9481_v59 = vmax.f32 %v3725_v42, %v4243_v46  ;;  %v3982_v42 = vld [vmem:[%s8201_s26 + $0x348] sm:$0xff]  ;;  %v3728_v46 = vld [vmem:[#allocation2 + $0x600] sm:$0xff] }
 0x43e   : > { %12129 = vst [vmem:[#allocation38_spill] sm:$0xff] %v9467_v30  ;;  %v9485_v30 = vmax.f32 %v3724_v58, %v4242_v44  ;;  %v3727_v58 = vld [vmem:[#allocation2 + $0x68] sm:$0xff]  ;;  %v4244_v23 = vsel %vm4138_vm0, %v3982_v42, -inf }
 0x43f   : > { %12130 = vst [vmem:[#allocation39_spill] sm:$0xff] %v9470_v12 }
 0x440   : > { %4755 = vst [vmem:[#allocation2 + $0x58] sm:$0xff] %v9481_v59 }
 0x441   : > { %5347 = vmax.xlane.f32.xlu2 %v9373_v24  ;;  %5345 = vmax.xlane.f32.xlu1 %v9377_v13  ;;  %4754 = vst [vmem:[#allocation2 + $0x648] sm:$0xff] %v9485_v30  ;;  %v3984_v24 = vld [vmem:[%s8201_s26 + $0x358] sm:$0xff]  ;;  %v3983_v13 = vld [vmem:[%s8201_s26 + $0x350] sm:$0xff] }
 0x442   : > { %5343 = vmax.xlane.f32.xlu0 %v9381_v33  ;;  %v4246_v33 = vsel %vm4138_vm0, %v3984_v24, -inf  ;;  %v4245_v44 = vsel %vm4138_vm0, %v3983_v13, -inf  ;;  %v9516_v24 = vmax.f32 %v3726_v22, %v4244_v23  ;;  %v3729_v22 = vld [vmem:[#allocation2 + $0x3a8] sm:$0xff] }
 0x443   : > { %v9508_v57 = vmax.f32 %v3728_v46, %v4246_v33  ;;  %v9512_v10 = vmax.f32 %v3727_v58, %v4245_v44  ;;  %v3985_v46 = vld [vmem:[%s8201_s26 + $0x360] sm:$0xff]  ;;  %v3731_v33 = vld [vmem:[#allocation2 + $0x630] sm:$0xff] }
 0x444   : > { %v9492_v28 = vpop.xlane.xlu2 %5263  ;;  %v9494_v12 = vpop.xlane.xlu1 %5261  ;;  %4756 = vst [vmem:[#allocation2 + $0x198] sm:$0xff] %v9516_v24  ;;  %v3730_v58 = vld [vmem:[#allocation2 + $0xb0] sm:$0xff]  ;;  %v4247_v23 = vsel %vm4138_vm0, %v3985_v46, -inf }
 0x445   : > { %v9497_v34 = vpop.xlane.xlu0 %5259  ;;  %4758 = vst [vmem:[#allocation2 + $0x600] sm:$0xff] %v9508_v57 }
 0x446   : > { %4757 = vst [vmem:[#allocation2 + $0x68] sm:$0xff] %v9512_v10 }
 0x449   : > { %5353 = vmax.xlane.f32.xlu2 %v9400_v50  ;;  %5351 = vmax.xlane.f32.xlu1 %v9404_v11  ;;  %v3987_v50 = vld [vmem:[%s8201_s26 + $0x370] sm:$0xff]  ;;  %v3986_v11 = vld [vmem:[%s8201_s26 + $0x368] sm:$0xff] }
 0x44a   : > { %5349 = vmax.xlane.f32.xlu0 %v9408_v60  ;;  %v4249_v60 = vsel %vm4138_vm0, %v3987_v50, -inf  ;;  %v4248_v44 = vsel %vm4138_vm0, %v3986_v11, -inf  ;;  %v9543_v50 = vmax.f32 %v3729_v22, %v4247_v23  ;;  %v3732_v22 = vld [vmem:[#allocation2 + $0x158] sm:$0xff] }
 0x44b   : > { %v9535_v31 = vmax.f32 %v3731_v33, %v4249_v60  ;;  %v9539_v41 = vmax.f32 %v3730_v58, %v4248_v44  ;;  %v3988_v33 = vld [vmem:[%s8201_s26 + $0x378] sm:$0xff]  ;;  %v3734_v60 = vld [vmem:[#allocation2 + $0x1e0] sm:$0xff]  ;;  %v3733_v58 = vld [vmem:[#allocation2 + $0x370] sm:$0xff] }
 0x44c   : > { %v9519_v13 = vpop.xlane.xlu2 %5269  ;;  %v9521_v9 = vpop.xlane.xlu1 %5267  ;;  %4759 = vst [vmem:[#allocation2 + $0x3a8] sm:$0xff] %v9543_v50  ;;  %v4250_v23 = vsel %vm4138_vm0, %v3988_v33, -inf }
 0x44d   : > { %v9524_v42 = vpop.xlane.xlu0 %5265  ;;  %4761 = vst [vmem:[#allocation2 + $0x630] sm:$0xff] %v9535_v31 }
 0x44e   : > { %4760 = vst [vmem:[#allocation2 + $0xb0] sm:$0xff] %v9539_v41 }
 0x451   : > { %5359 = vmax.xlane.f32.xlu2 %v9427_v52  ;;  %5357 = vmax.xlane.f32.xlu1 %v9431_v51  ;;  %v3990_v52 = vld [vmem:[%s8201_s26 + $0x388] sm:$0xff]  ;;  %v3989_v51 = vld [vmem:[%s8201_s26 + $0x380] sm:$0xff] }
 0x452   : > { %5355 = vmax.xlane.f32.xlu0 %v9435_v14  ;;  %v4252_v14 = vsel %vm4138_vm0, %v3990_v52, -inf  ;;  %v4251_v44 = vsel %vm4138_vm0, %v3989_v51, -inf  ;;  %v9570_v52 = vmax.f32 %v3732_v22, %v4250_v23  ;;  %v3735_v22 = vld [vmem:[#allocation2 + $0x7b0] sm:$0xff] }
 0x453   : > { %v9562_v35 = vmax.f32 %v3734_v60, %v4252_v14  ;;  %v9566_v2 = vmax.f32 %v3733_v58, %v4251_v44  ;;  %v3991_v60 = vld [vmem:[%s8201_s26 + $0x390] sm:$0xff]  ;;  %v3737_v14 = vld [vmem:[#allocation2 + $0xd8] sm:$0xff]  ;;  %v3736_v58 = vld [vmem:[#allocation2 + $0x6c0] sm:$0xff] }
 0x454   : > { %v9546_v11 = vpop.xlane.xlu2 %5275  ;;  %v9548_v36 = vpop.xlane.xlu1 %5273  ;;  %4762 = vst [vmem:[#allocation2 + $0x158] sm:$0xff] %v9570_v52  ;;  %v4253_v23 = vsel %vm4138_vm0, %v3991_v60, -inf }
 0x455   : > { %v9551_v46 = vpop.xlane.xlu0 %5271  ;;  %4764 = vst [vmem:[#allocation2 + $0x1e0] sm:$0xff] %v9562_v35 }
 0x456   : > { %4763 = vst [vmem:[#allocation2 + $0x370] sm:$0xff] %v9566_v2 }
 0x459   : > { %5365 = vmax.xlane.f32.xlu2 %v9454_v37  ;;  %5363 = vmax.xlane.f32.xlu1 %v9458_v53  ;;  %v3993_v37 = vld [vmem:[%s8201_s26 + $0x3a0] sm:$0xff]  ;;  %v3992_v53 = vld [vmem:[%s8201_s26 + $0x398] sm:$0xff] }
 0x45a   : > { %5361 = vmax.xlane.f32.xlu0 %v9462_v1  ;;  %v4255_v1 = vsel %vm4138_vm0, %v3993_v37, -inf  ;;  %v4254_v44 = vsel %vm4138_vm0, %v3992_v53, -inf  ;;  %v9597_v37 = vmax.f32 %v3735_v22, %v4253_v23  ;;  %v3738_v22 = vld [vmem:[#allocation2 + $0x6b8] sm:$0xff] }
 0x45b   : > { %v9589_v40 = vmax.f32 %v3737_v14, %v4255_v1  ;;  %v9593_v5 = vmax.f32 %v3736_v58, %v4254_v44  ;;  %v3994_v14 = vld [vmem:[%s8201_s26 + $0x3a8] sm:$0xff]  ;;  %v3740_v1 = vld [vmem:[#allocation2 + $0x5b0] sm:$0xff]  ;;  %v3739_v58 = vld [vmem:[#allocation2 + $0x140] sm:$0xff] }
 0x45c   : > { %v9573_v51 = vpop.xlane.xlu2 %5281  ;;  %v9575_v15 = vpop.xlane.xlu1 %5279  ;;  %4765 = vst [vmem:[#allocation2 + $0x7b0] sm:$0xff] %v9597_v37  ;;  %v4256_v23 = vsel %vm4138_vm0, %v3994_v14, -inf }
 0x45d   : > { %v9578_v33 = vpop.xlane.xlu0 %5277  ;;  %4767 = vst [vmem:[#allocation2 + $0xd8] sm:$0xff] %v9589_v40 }
 0x45e   : > { %4766 = vst [vmem:[#allocation2 + $0x6c0] sm:$0xff] %v9593_v5 }
 0x461   : > { %5371 = vmax.xlane.f32.xlu2 %v9481_v59  ;;  %5369 = vmax.xlane.f32.xlu1 %v9485_v30  ;;  %v3996_v59 = vld [vmem:[%s8201_s26 + $0x3b8] sm:$0xff]  ;;  %v3995_v30 = vld [vmem:[%s8201_s26 + $0x3b0] sm:$0xff] }
 0x462   : > { %5367 = vmax.xlane.f32.xlu0 %v9489_v4  ;;  %v4258_v4 = vsel %vm4138_vm0, %v3996_v59, -inf  ;;  %v4257_v44 = vsel %vm4138_vm0, %v3995_v30, -inf  ;;  %v9624_v59 = vmax.f32 %v3738_v22, %v4256_v23  ;;  %v3741_v22 = vld [vmem:[#allocation2 + $0x30] sm:$0xff] }
 0x463   : > { %v9616_v56 = vmax.f32 %v3740_v1, %v4258_v4  ;;  %v9620_v17 = vmax.f32 %v3739_v58, %v4257_v44  ;;  %v3997_v1 = vld [vmem:[%s8201_s26 + $0x3c0] sm:$0xff]  ;;  %v3742_v58 = vld [vmem:[#allocation2 + $0x128] sm:$0xff] }
 0x464   : > { %v9600_v53 = vpop.xlane.xlu2 %5287  ;;  %v9602_v16 = vpop.xlane.xlu1 %5285  ;;  %4768 = vst [vmem:[#allocation2 + $0x6b8] sm:$0xff] %v9624_v59  ;;  %v3743_v4 = vld [vmem:[#allocation2 + $0x1a0] sm:$0xff]  ;;  %v4259_v23 = vsel %vm4138_vm0, %v3997_v1, -inf }
 0x465   : > { %v9605_v60 = vpop.xlane.xlu0 %5283  ;;  %4770 = vst [vmem:[#allocation2 + $0x5b0] sm:$0xff] %v9616_v56 }
 0x466   : > { %4769 = vst [vmem:[#allocation2 + $0x140] sm:$0xff] %v9620_v17 }
 0x469   : > { %5377 = vmax.xlane.f32.xlu2 %v9508_v57  ;;  %5375 = vmax.xlane.f32.xlu1 %v9512_v10  ;;  %v3999_v57 = vld [vmem:[%s8201_s26 + $0x3d0] sm:$0xff]  ;;  %v3998_v10 = vld [vmem:[%s8201_s26 + $0x3c8] sm:$0xff] }
 0x46a   : > { %5373 = vmax.xlane.f32.xlu0 %v9516_v24  ;;  %v4261_v24 = vsel %vm4138_vm0, %v3999_v57, -inf  ;;  %v4260_v44 = vsel %vm4138_vm0, %v3998_v10, -inf  ;;  %v9651_v57 = vmax.f32 %v3741_v22, %v4259_v23  ;;  %v3744_v22 = vld [vmem:[#allocation2 + $0x5f0] sm:$0xff] }
 0x46c   : > { %v9627_v30 = vpop.xlane.xlu2 %5293  ;;  %v9629_v29 = vpop.xlane.xlu1 %5291  ;;  %4771 = vst [vmem:[#allocation2 + $0x30] sm:$0xff] %v9651_v57 }
 0x46d   : > { %12131 = vst [vmem:[#allocation40_spill] sm:$0xff] %v9627_v30  ;;  %v9632_v14 = vpop.xlane.xlu0 %5289  ;;  %v9647_v30 = vmax.f32 %v3742_v58, %v4260_v44  ;;  %v3745_v58 = vld [vmem:[#allocation2 + $0x670] sm:$0xff] }
 0x46e   : > { %12132 = vst [vmem:[#allocation41_spill] sm:$0xff] %v9629_v29  ;;  %v9643_v29 = vmax.f32 %v3743_v4, %v4261_v24  ;;  %v4000_v4 = vld [vmem:[%s8201_s26 + $0x3d8] sm:$0xff]  ;;  %v3746_v24 = vld [vmem:[#allocation2 + $0x240] sm:$0xff] }
 0x46f   : > { %4772 = vst [vmem:[#allocation2 + $0x128] sm:$0xff] %v9647_v30  ;;  %v4262_v23 = vsel %vm4138_vm0, %v4000_v4, -inf }
 0x470   : > { %4773 = vst [vmem:[#allocation2 + $0x1a0] sm:$0xff] %v9643_v29 }
 0x471   : > { %5383 = vmax.xlane.f32.xlu2 %v9535_v31  ;;  %5381 = vmax.xlane.f32.xlu1 %v9539_v41  ;;  %v4002_v31 = vld [vmem:[%s8201_s26 + $0x3e8] sm:$0xff]  ;;  %v4001_v41 = vld [vmem:[%s8201_s26 + $0x3e0] sm:$0xff] }
 0x472   : > { %5379 = vmax.xlane.f32.xlu0 %v9543_v50  ;;  %v4264_v50 = vsel %vm4138_vm0, %v4002_v31, -inf  ;;  %v4263_v44 = vsel %vm4138_vm0, %v4001_v41, -inf  ;;  %v9678_v31 = vmax.f32 %v3744_v22, %v4262_v23  ;;  %v3747_v22 = vld [vmem:[#allocation2 + $0x118] sm:$0xff] }
 0x474   : > { %v9654_v10 = vpop.xlane.xlu2 %5299  ;;  %v9656_v43 = vpop.xlane.xlu1 %5297  ;;  %4774 = vst [vmem:[#allocation2 + $0x5f0] sm:$0xff] %v9678_v31 }
 0x475   : > { %12133 = vst [vmem:[#allocation42_spill] sm:$0xff] %v9654_v10  ;;  %v9659_v1 = vpop.xlane.xlu0 %5295  ;;  %v9670_v10 = vmax.f32 %v3746_v24, %v4264_v50  ;;  %v4003_v24 = vld [vmem:[%s8201_s26 + $0x3f0] sm:$0xff]  ;;  %v3749_v50 = vld [vmem:[#allocation2 + $0x4a8] sm:$0xff] }
 0x476   : > { %12134 = vst [vmem:[#allocation43_spill] sm:$0xff] %v9656_v43  ;;  %v9674_v43 = vmax.f32 %v3745_v58, %v4263_v44  ;;  %v3748_v58 = vld [vmem:[#allocation2 + $0x268] sm:$0xff]  ;;  %v4265_v23 = vsel %vm4138_vm0, %v4003_v24, -inf }
 0x477   : > { %12135 = vst [vmem:[#allocation44_spill] sm:$0xff] %v9659_v1 }
 0x478   : > { %4776 = vst [vmem:[#allocation2 + $0x240] sm:$0xff] %v9670_v10 }
 0x479   : > { %5389 = vmax.xlane.f32.xlu2 %v9562_v35  ;;  %5387 = vmax.xlane.f32.xlu1 %v9566_v2  ;;  %4775 = vst [vmem:[#allocation2 + $0x670] sm:$0xff] %v9674_v43  ;;  %v4005_v35 = vld [vmem:[%s8201_s26 + $0x400] sm:$0xff]  ;;  %v4004_v2 = vld [vmem:[%s8201_s26 + $0x3f8] sm:$0xff] }
 0x47a   : > { %5385 = vmax.xlane.f32.xlu0 %v9570_v52  ;;  %v4267_v52 = vsel %vm4138_vm0, %v4005_v35, -inf  ;;  %v4266_v44 = vsel %vm4138_vm0, %v4004_v2, -inf  ;;  %v9705_v35 = vmax.f32 %v3747_v22, %v4265_v23  ;;  %v3750_v22 = vld [vmem:[#allocation2 + $0x5c8] sm:$0xff] }
 0x47c   : > { %v9681_v41 = vpop.xlane.xlu2 %5305  ;;  %v9683_v1 = vpop.xlane.xlu1 %5303  ;;  %4777 = vst [vmem:[#allocation2 + $0x118] sm:$0xff] %v9705_v35 }
 0x47d   : > { %12136 = vst [vmem:[#allocation45_spill] sm:$0xff] %v9681_v41  ;;  %v9686_v4 = vpop.xlane.xlu0 %5301  ;;  %v9697_v41 = vmax.f32 %v3749_v50, %v4267_v52  ;;  %v4006_v50 = vld [vmem:[%s8201_s26 + $0x408] sm:$0xff]  ;;  %v3752_v52 = vld [vmem:[#allocation2 + $0x350] sm:$0xff] }
 0x47e   : > { %12137 = vst [vmem:[#allocation46_spill] sm:$0xff] %v9683_v1  ;;  %v9701_v1 = vmax.f32 %v3748_v58, %v4266_v44  ;;  %v3751_v58 = vld [vmem:[#allocation2 + $0x438] sm:$0xff]  ;;  %v4268_v23 = vsel %vm4138_vm0, %v4006_v50, -inf }
 0x47f   : > { %12138 = vst [vmem:[#allocation47_spill] sm:$0xff] %v9686_v4 }
 0x480   : > { %4779 = vst [vmem:[#allocation2 + $0x4a8] sm:$0xff] %v9697_v41 }
 0x481   : > { %5395 = vmax.xlane.f32.xlu2 %v9589_v40  ;;  %5393 = vmax.xlane.f32.xlu1 %v9593_v5  ;;  %4778 = vst [vmem:[#allocation2 + $0x268] sm:$0xff] %v9701_v1  ;;  %v4008_v40 = vld [vmem:[%s8201_s26 + $0x418] sm:$0xff]  ;;  %v4007_v5 = vld [vmem:[%s8201_s26 + $0x410] sm:$0xff] }
 0x482   : > { %5391 = vmax.xlane.f32.xlu0 %v9597_v37  ;;  %v4270_v37 = vsel %vm4138_vm0, %v4008_v40, -inf  ;;  %v4269_v44 = vsel %vm4138_vm0, %v4007_v5, -inf  ;;  %v9732_v40 = vmax.f32 %v3750_v22, %v4268_v23  ;;  %v3753_v22 = vld [vmem:[#allocation2 + $0x2c8] sm:$0xff] }
 0x484   : > { %v9708_v2 = vpop.xlane.xlu2 %5311  ;;  %v9710_v4 = vpop.xlane.xlu1 %5309  ;;  %4780 = vst [vmem:[#allocation2 + $0x5c8] sm:$0xff] %v9732_v40 }
 0x485   : > { %12139 = vst [vmem:[#allocation48_spill] sm:$0xff] %v9708_v2  ;;  %v9713_v24 = vpop.xlane.xlu0 %5307  ;;  %v9724_v2 = vmax.f32 %v3752_v52, %v4270_v37  ;;  %v4009_v52 = vld [vmem:[%s8201_s26 + $0x420] sm:$0xff]  ;;  %v3755_v37 = vld [vmem:[#allocation2 + $0x488] sm:$0xff] }
 0x486   : > { %12140 = vst [vmem:[#allocation49_spill] sm:$0xff] %v9710_v4  ;;  %v9728_v4 = vmax.f32 %v3751_v58, %v4269_v44  ;;  %v3754_v58 = vld [vmem:[#allocation2 + $0xf8] sm:$0xff]  ;;  %v4271_v23 = vsel %vm4138_vm0, %v4009_v52, -inf }
 0x487   : > { %12141 = vst [vmem:[#allocation50_spill] sm:$0xff] %v9713_v24  ;;  %v9766_v52 = vmax.f32 %v3753_v22, %v4271_v23  ;;  %v4013_v22 = vld [vmem:[%s8201_s26 + $0x440] sm:$0xff]  ;;  %v4012_v23 = vld [vmem:[%s8201_s26 + $0x438] sm:$0xff] }
 0x488   : > { %4782 = vst [vmem:[#allocation2 + $0x350] sm:$0xff] %v9724_v2 }
 0x489   : > { %5401 = vmax.xlane.f32.xlu2 %v9616_v56  ;;  %5399 = vmax.xlane.f32.xlu1 %v9620_v17  ;;  %4781 = vst [vmem:[#allocation2 + $0x438] sm:$0xff] %v9728_v4  ;;  %v4011_v56 = vld [vmem:[%s8201_s26 + $0x430] sm:$0xff]  ;;  %v4010_v17 = vld [vmem:[%s8201_s26 + $0x428] sm:$0xff] }
 0x48a   : > { %5397 = vmax.xlane.f32.xlu0 %v9624_v59  ;;  %v4273_v59 = vsel %vm4138_vm0, %v4011_v56, -inf  ;;  %v4272_v44 = vsel %vm4138_vm0, %v4010_v17, -inf  ;;  %v6028_v17 = vperm.slane %v9197_v8, %v8720_v3  ;;  %4783 = vst [vmem:[#allocation2 + $0x2c8] sm:$0xff] %v9766_v52 }
 0x48c   : > { %v9735_v5 = vpop.xlane.xlu2 %5317  ;;  %v9737_v24 = vpop.xlane.xlu1 %5315 }
 0x48d   : > { %12142 = vst [vmem:[#allocation51_spill] sm:$0xff] %v9735_v5  ;;  %v9740_v50 = vpop.xlane.xlu0 %5313  ;;  %v9752_v5 = vadd.s32 4294967288, %v8720_v3 }
 0x48e   : > { %12143 = vst [vmem:[#allocation52_spill] sm:$0xff] %v9737_v24  ;;  %v9754_v24 = vmax.f32 %v3755_v37, %v4273_v59 }
 0x48f   : > { %12144 = vst [vmem:[#allocation53_spill] sm:$0xff] %v9740_v50  ;;  %v9758_v50 = vmax.f32 %v3754_v58, %v4272_v44  ;;  %v6029_v56 = vperm.slane %v9195_v7, %v9752_v5  ;;  %v6091_v58 = vperm.slane %v9494_v12, %v9752_v5  ;;  %v4014_v44 = vld [vmem:[%s8201_s26 + $0x448] sm:$0xff] }
 0x490   : > { %12145 = vst [vmem:[#allocation54_spill] sm:$0xff] %v9752_v5 }
 0x491   : > { %5407 = vmax.xlane.f32.xlu2 %v9643_v29  ;;  %5405 = vmax.xlane.f32.xlu1 %v9647_v30  ;;  %4785 = vst [vmem:[#allocation2 + $0x488] sm:$0xff] %v9754_v24  ;;  %v9770_v29 = vadd.s32 4294967280, %v8720_v3  ;;  %v6030_v37 = vsel %vm5970_vm1, %v6029_v56, %v6028_v17  ;;  %v4275_v56 = vsel %vm4138_vm0, %v4013_v22, -inf  ;;  %v3756_v17 = vld [vmem:[#allocation2 + $0x6a0] sm:$0xff] }
 0x492   : > { %5403 = vmax.xlane.f32.xlu0 %v9651_v57  ;;  %4784 = vst [vmem:[#allocation2 + $0xf8] sm:$0xff] %v9758_v50  ;;  %v9780_v57 = vadd.s32 4294967272, %v8720_v3 }
 0x493   : > { %12146 = vst [vmem:[#allocation55_spill] sm:$0xff] %v9770_v29  ;;  %v6031_v59 = vperm.slane %v9227_v32, %v9770_v29  ;;  %v4274_v32 = vsel %vm4138_vm0, %v4012_v23, -inf  ;;  %v6093_v23 = vperm.slane %v9492_v28, %v9770_v29 }
 0x494   : > { %v9772_v30 = vpop.xlane.xlu2 %5323  ;;  %v9774_v7 = vpop.xlane.xlu1 %5321  ;;  %12149 = vst [vmem:[#allocation58_spill] sm:$0xff] %v9780_v57  ;;  %v6033_v12 = vperm.slane %v9224_v26, %v9780_v57  ;;  %v9817_v26 = vadd.s32 4294967256, %v8720_v3  ;;  %v6095_v28 = vperm.slane %v9524_v42, %v9780_v57 }
 0x495   : > { %12147 = vst [vmem:[#allocation56_spill] sm:$0xff] %v9774_v7  ;;  %v9777_v8 = vpop.xlane.xlu0 %5319  ;;  %v6090_v7 = vperm.slane %v9497_v34, %v8720_v3  ;;  %v9804_v34 = vmax.f32 %v3757_v47, %v4275_v56  ;;  %v6032_v22 = vsel %vm5974_vm2, %v6031_v59, %v6030_v37  ;;  %v9832_v59 = vadd.s32 4294967248, %v8720_v3  ;;  %v4017_v56 = vld [vmem:[%s8201_s26 + $0x460] sm:$0xff] }
 0x496   : > { %12148 = vst [vmem:[#allocation57_spill] sm:$0xff] %v9777_v8  ;;  %v4276_v8 = vsel %vm4138_vm0, %v4014_v44, -inf  ;;  %v9807_v44 = vadd.s32 4294967264, %v8720_v3 }
 0x497   : > { %v9798_v63 = vmax.f32 %v3758_v62, %v4276_v8  ;;  %v9814_v62 = vmax.f32 %v3756_v17, %v4274_v32  ;;  %v6092_v47 = vsel %vm5970_vm1, %v6091_v58, %v6090_v7  ;;  %4787 = vst [vmem:[#allocation2 + $0x3c8] sm:$0xff] %v9804_v34  ;;  %v6034_v7 = vsel %vm5978_vm3, %v6033_v12, %v6032_v22  ;;  %v4016_v17 = vld [vmem:[%s8201_s26 + $0x458] sm:$0xff]  ;;  %v4015_v32 = vld [vmem:[%s8201_s26 + $0x450] sm:$0xff] }
 0x498   : > { %12150 = vst [vmem:[#allocation59_spill] sm:$0xff] %v9807_v44  ;;  %v6037_v8 = vperm.slane %v9254_v55, %v9817_v26  ;;  %v6094_v42 = vsel %vm5974_vm2, %v6093_v23, %v6092_v47  ;;  %v6152_v58 = vperm.slane %v9772_v30, %v8720_v3  ;;  %v3761_v22 = vld [vmem:[#allocation2 + $0x730] sm:$0xff]  ;;  %v4279_v55 = vsel %vm4138_vm0, %v4017_v56, -inf }
 0x499   : > { %5413 = vmax.xlane.f32.xlu2 %v9670_v10  ;;  %5411 = vmax.xlane.f32.xlu1 %v9674_v43  ;;  %4788 = vst [vmem:[#allocation2 + $0x1e8] sm:$0xff] %v9798_v63  ;;  %v6035_v43 = vperm.slane %v9222_v25, %v9807_v44  ;;  %v6097_v25 = vperm.slane %v9521_v9, %v9807_v44  ;;  %v4278_v49 = vsel %vm4138_vm0, %v4016_v17, -inf  ;;  %v4277_v9 = vsel %vm4138_vm0, %v4015_v32, -inf }
 0x49a   : > { %5409 = vmax.xlane.f32.xlu0 %v9678_v31  ;;  %4786 = vst [vmem:[#allocation2 + $0x6a0] sm:$0xff] %v9814_v62  ;;  %v6096_v23 = vsel %vm5978_vm3, %v6095_v28, %v6094_v42  ;;  %v9851_v47 = vmax.f32 %v3761_v22, %v4279_v55  ;;  %v9858_v17 = vmax.f32 %v3760_v48, %v4278_v49  ;;  %v9861_v32 = vadd.s32 4294967240, %v8720_v3  ;;  %v4019_v22 = vld [vmem:[%s8201_s26 + $0x470] sm:$0xff]  ;;  %v4018_v55 = vld [vmem:[%s8201_s26 + $0x468] sm:$0xff] }
 0x49b   : > { %v6036_v30 = vsel %vm5982_vm4, %v6035_v43, %v6034_v7  ;;  %v6099_v43 = vperm.slane %v9519_v13, %v9817_v26  ;;  %v6098_v48 = vsel %vm5982_vm4, %v6097_v25, %v6096_v23  ;;  %v3763_v23 = vld [vmem:[#allocation2 + $0x458] sm:$0xff] }
 0x49c   : > { %v9825_v10 = vpop.xlane.xlu2 %5329  ;;  %v5328_v31 = vpop.xlane.xlu1 %5327  ;;  %v6038_v56 = vsel %vm5986_vm5, %v6037_v8, %v6036_v30  ;;  %4791 = vst [vmem:[#allocation2 + $0x730] sm:$0xff] %v9851_v47  ;;  %v6041_v13 = vperm.slane %v9249_v45, %v9861_v32  ;;  %v6103_v45 = vperm.slane %v9548_v36, %v9861_v32  ;;  %v3764_v30 = vld [vmem:[#allocation2 + $0x1b8] sm:$0xff]  ;;  %v4281_v36 = vsel %vm4138_vm0, %v4019_v22, -inf }
 0x49d   : > { %v5326_v37 = vpop.xlane.xlu0 %5325  ;;  %v6155_v28 = vperm.slane %v5328_v31, %v9770_v29  ;;  %4790 = vst [vmem:[#allocation2 + $0x688] sm:$0xff] %v9858_v17  ;;  %v9884_v31 = vadd.s32 4294967224, %v8720_v3  ;;  %v6157_v42 = vperm.slane %v9825_v10, %v9780_v57  ;;  %v9919_v22 = vadd.s32 4294967216, %v8720_v3 }
 0x49e   : > { %v6153_v12 = vperm.slane %v5326_v37, %v9752_v5  ;;  %v6039_v37 = vperm.slane %v9251_v54, %v9832_v59  ;;  %v9868_v54 = vmax.f32 %v3759_v0, %v4277_v9  ;;  %v6101_v0 = vperm.slane %v9551_v46, %v9832_v59 }
 0x49f   : > { %12152 = vst [vmem:[#allocation61_spill] sm:$0xff] %v9884_v31  ;;  %v6100_v46 = vsel %vm5986_vm5, %v6099_v43, %v6098_v48  ;;  %v6045_v10 = vperm.slane %v9278_v18, %v9884_v31 }
 0x4a0   : > { %v6154_v49 = vsel %vm5970_vm1, %v6153_v12, %v6152_v58  ;;  %4789 = vst [vmem:[#allocation2 + $0x6d0] sm:$0xff] %v9868_v54  ;;  %v6040_v7 = vsel %vm5990_vm6, %v6039_v37, %v6038_v56  ;;  %v4020_v12 = vld [vmem:[%s8201_s26 + $0x478] sm:$0xff]  ;;  %v4280_v56 = vsel %vm4138_vm0, %v4018_v55, -inf }
 0x4a1   : > { %5419 = vmax.xlane.f32.xlu2 %v9697_v41  ;;  %5417 = vmax.xlane.f32.xlu1 %v9701_v1  ;;  %v9871_v41 = vadd.s32 4294967232, %v8720_v3  ;;  %v6156_v58 = vsel %vm5974_vm2, %v6155_v28, %v6154_v49  ;;  %v3762_v37 = vld [vmem:[#allocation2 + $0x658] sm:$0xff]  ;;  %v6042_v43 = vsel %vm5994_vm7, %v6041_v13, %v6040_v7  ;;  %v6102_v28 = vsel %vm5990_vm6, %v6101_v0, %v6100_v46 }
 0x4a2   : > { %5415 = vmax.xlane.f32.xlu0 %v9705_v35  ;;  %12153 = vst [vmem:[#allocation62_spill] sm:$0xff] %v9919_v22  ;;  %v6158_v13 = vsel %vm5978_vm3, %v6157_v42, %v6156_v58  ;;  %v9925_v0 = vmax.f32 %v3762_v37, %v4280_v56  ;;  %v3767_v37 = vld [vmem:[#allocation2 + $0x528] sm:$0xff]  ;;  %v3766_v56 = vld [vmem:[#allocation2 + $0x4f0] sm:$0xff] }
 0x4a3   : > { %12151 = vst [vmem:[#allocation60_spill] sm:$0xff] %v9871_v41  ;;  %v6043_v8 = vperm.slane %v9281_v19, %v9871_v41  ;;  %v4282_v19 = vsel %vm4138_vm0, %v4020_v12, -inf  ;;  %v9916_v12 = vmax.f32 %v3763_v23, %v4281_v36  ;;  %v4021_v23 = vld [vmem:[%s8201_s26 + $0x480] sm:$0xff]  ;;  %v6109_v36 = vperm.slane %v9575_v15, %v9919_v22 }
 0x4a4   : > { %v9880_v1 = vpop.xlane.xlu2 %5335  ;;  %v5334_v35 = vpop.xlane.xlu1 %5333  ;;  %v9909_v48 = vmax.f32 %v3764_v30, %v4282_v19  ;;  %4792 = vst [vmem:[#allocation2 + $0x658] sm:$0xff] %v9925_v0  ;;  %v4023_v30 = vld [vmem:[%s8201_s26 + $0x490] sm:$0xff]  ;;  %v4022_v19 = vld [vmem:[%s8201_s26 + $0x488] sm:$0xff] }
 0x4a5   : > { %v5332_v25 = vpop.xlane.xlu0 %5331  ;;  %v6044_v49 = vsel %vm12037_vm8, %v6043_v8, %v6042_v43  ;;  %v6161_v18 = vperm.slane %v5334_v35, %v9817_v26  ;;  %4793 = vst [vmem:[#allocation2 + $0x458] sm:$0xff] %v9916_v12  ;;  %v6047_v35 = vperm.slane %v9276_v61, %v9919_v22  ;;  %v6163_v42 = vperm.slane %v9880_v1, %v9832_v59 }
 0x4a6   : > { %v6159_v9 = vperm.slane %v5332_v25, %v9807_v44  ;;  %v6105_v25 = vperm.slane %v9546_v11, %v9871_v41  ;;  %4794 = vst [vmem:[#allocation2 + $0x1b8] sm:$0xff] %v9909_v48  ;;  %v6104_v11 = vsel %vm5994_vm7, %v6103_v45, %v6102_v28  ;;  %v9941_v45 = vadd.s32 4294967200, %v8720_v3 }
 0x4a7   : > { %v6046_v46 = vsel %vm6002_vm9, %v6045_v10, %v6044_v49  ;;  %v4285_v1 = vsel %vm4138_vm0, %v4023_v30, -inf  ;;  %v3765_v10 = vld [vmem:[#allocation2 + $0x460] sm:$0xff]  ;;  %v4283_v43 = vsel %vm4138_vm0, %v4021_v23, -inf }
 0x4a8   : > { %12155 = vst [vmem:[#allocation64_spill] sm:$0xff] %v9941_v45  ;;  %v6051_v28 = vperm.slane %v9305_v39, %v9941_v45  ;;  %v6048_v49 = vsel %vm12039_vm10, %v6047_v35, %v6046_v46  ;;  %v9966_v15 = vmax.f32 %v3767_v37, %v4285_v1  ;;  %v9979_v35 = vmax.f32 %v3765_v10, %v4283_v43  ;;  %v4025_v23 = vld [vmem:[%s8201_s26 + $0x4a0] sm:$0xff]  ;;  %v3770_v1 = vld [vmem:[#allocation2 + $0x4f8] sm:$0xff] }
 0x4a9   : > { %5425 = vmax.xlane.f32.xlu2 %v9724_v2  ;;  %5423 = vmax.xlane.f32.xlu1 %v9728_v4  ;;  %v6160_v2 = vsel %vm5982_vm4, %v6159_v9, %v6158_v13  ;;  %v9931_v4 = vadd.s32 4294967208, %v8720_v3  ;;  %v3768_v10 = vld [vmem:[#allocation2 + $0x258] sm:$0xff] }
 0x4aa   : > { %5421 = vmax.xlane.f32.xlu0 %v9732_v40  ;;  %v6107_v40 = vperm.slane %v9578_v33, %v9884_v31  ;;  %v6106_v33 = vsel %vm12037_vm8, %v6105_v25, %v6104_v11  ;;  %v6162_v55 = vsel %vm5986_vm5, %v6161_v18, %v6160_v2  ;;  %4797 = vst [vmem:[#allocation2 + $0x528] sm:$0xff] %v9966_v15 }
 0x4ab   : > { %12154 = vst [vmem:[#allocation63_spill] sm:$0xff] %v9931_v4  ;;  %v6049_v61 = vperm.slane %v9308_v27, %v9931_v4  ;;  %v4284_v27 = vsel %vm4138_vm0, %v4022_v19, -inf  ;;  %v6164_v13 = vsel %vm5990_vm6, %v6163_v42, %v6162_v55  ;;  %v6111_v39 = vperm.slane %v9573_v51, %v9931_v4  ;;  %v4026_v19 = vld [vmem:[%s8201_s26 + $0x4a8] sm:$0xff] }
 0x4ac   : > { %v9937_v7 = vpop.xlane.xlu2 %5341  ;;  %v5340_v8 = vpop.xlane.xlu1 %5339  ;;  %v6108_v25 = vsel %vm6002_vm9, %v6107_v40, %v6106_v33  ;;  %v9972_v11 = vmax.f32 %v3766_v56, %v4284_v27  ;;  %v9982_v40 = vadd.s32 4294967192, %v8720_v3  ;;  %v9990_v51 = vadd.s32 4294967184, %v8720_v3  ;;  %4795 = vst [vmem:[#allocation2 + $0x460] sm:$0xff] %v9979_v35  ;;  %v3769_v56 = vld [vmem:[#allocation2 + $0x4d0] sm:$0xff] }
 0x4ad   : > { %v5338_v58 = vpop.xlane.xlu0 %5337  ;;  %v6167_v18 = vperm.slane %v5340_v8, %v9871_v41  ;;  %v6113_v8 = vperm.slane %v9605_v60, %v9941_v45  ;;  %v4287_v27 = vsel %vm4138_vm0, %v4025_v23, -inf  ;;  %v3773_v23 = vld [vmem:[#allocation2 + $0x10] sm:$0xff] }
 0x4ae   : > { %v6165_v9 = vperm.slane %v5338_v58, %v9861_v32  ;;  %12156 = vst [vmem:[#allocation65_spill] sm:$0xff] %v9982_v40  ;;  %v9996_v58 = vadd.s32 4294967176, %v8720_v3  ;;  %v6053_v60 = vperm.slane %v9303_v38, %v9982_v40  ;;  %v4288_v38 = vsel %vm4138_vm0, %v4026_v19, -inf  ;;  %v4027_v19 = vld [vmem:[%s8201_s26 + $0x4b0] sm:$0xff] }
 0x4af   : > { %4796 = vst [vmem:[#allocation2 + $0x4f0] sm:$0xff] %v9972_v11  ;;  %v6055_v43 = vperm.slane %v9335_v21, %v9990_v51 }
 0x4b0   : > { %v6166_v2 = vsel %vm5994_vm7, %v6165_v9, %v6164_v13  ;;  %12157 = vst [vmem:[#allocation66_spill] sm:$0xff] %v9990_v51  ;;  %v6115_v9 = vperm.slane %v9602_v16, %v9982_v40 }
 0x4b1   : > { %5431 = vmax.xlane.f32.xlu2 %v9754_v24  ;;  %5429 = vmax.xlane.f32.xlu1 %v9758_v50  ;;  %v6050_v24 = vsel %vm12033_vm11, %v6049_v61, %v6048_v49  ;;  %v6110_v50 = vsel %vm12039_vm10, %v6109_v36, %v6108_v25  ;;  %12158 = vst [vmem:[#allocation67_spill] sm:$0xff] %v9996_v58  ;;  %v4024_v36 = vld [vmem:[%s8201_s26 + $0x498] sm:$0xff] }
 0x4b2   : > { %5427 = vmax.xlane.f32.xlu0 %v9766_v52  ;;  %v6169_v52 = vperm.slane %v9937_v7, %v9884_v31  ;;  %v6168_v61 = vsel %vm12037_vm8, %v6167_v18, %v6166_v2  ;;  %v6052_v55 = vsel %vm12038_vm12, %v6051_v28, %v6050_v24  ;;  %v6112_v7 = vsel %vm12033_vm11, %v6111_v39, %v6110_v50 }
 0x4b3   : > { %v6114_v37 = vsel %vm12038_vm12, %v6113_v8, %v6112_v7  ;;  %v4286_v16 = vsel %vm4138_vm0, %v4024_v36, -inf  ;;  %v10020_v25 = vmax.f32 %v3770_v1, %v4288_v38  ;;  %v6117_v18 = vperm.slane %v9600_v53, %v9990_v51  ;;  %v4029_v7 = vld [vmem:[%s8201_s26 + $0x4c0] sm:$0xff] }
 0x4b4   : > { %v5348_v46 = vpop.xlane.xlu2 %5347  ;;  %v5346_v42 = vpop.xlane.xlu1 %5345  ;;  %v6170_v49 = vsel %vm6002_vm9, %v6169_v52, %v6168_v61  ;;  %v10027_v39 = vmax.f32 %v3769_v56, %v4287_v27  ;;  %v6116_v21 = vsel %vm6018_vm13, %v6115_v9, %v6114_v37  ;;  %v6119_v2 = vperm.slane %v9632_v14, %v9996_v58  ;;  %v3771_v37 = vld [vmem:[#allocation2 + $0x78] sm:$0xff] }
 0x4b5   : > { %v5344_v33 = vpop.xlane.xlu0 %5343  ;;  %v6173_v28 = vperm.slane %v5346_v42, %v9931_v4  ;;  %4800 = vst [vmem:[#allocation2 + $0x4f8] sm:$0xff] %v10020_v25  ;;  %v10034_v24 = vmax.f32 %v3768_v10, %v4286_v16  ;;  %v6175_v53 = vperm.slane %v5348_v46, %v9941_v45  ;;  %v6057_v14 = vperm.slane %v9332_v20, %v9996_v58 }
 0x4b6   : > { %v6171_v30 = vperm.slane %v5344_v33, %v9919_v22  ;;  %4799 = vst [vmem:[#allocation2 + $0x4d0] sm:$0xff] %v10027_v39  ;;  %v6118_v8 = vsel %vm12034_vm14, %v6117_v18, %v6116_v21  ;;  %v4289_v1 = vsel %vm4138_vm0, %v4027_v19, -inf  ;;  %v4032_v21 = vld [vmem:[%s8201_s26 + $0x4d8] sm:$0xff]  ;;  %v4039_v19 = vld [vmem:[%s8201_s26 + $0x510] sm:$0xff] }
 0x4b7   : > { %4798 = vst [vmem:[#allocation2 + $0x258] sm:$0xff] %v10034_v24  ;;  %v6120_v61 = vsel %vm6026_vm15, %v6119_v2, %v6118_v8  ;;  %v4031_v2 = vld [vmem:[%s8201_s26 + $0x4d0] sm:$0xff] }
 0x4b8   : > { %v6172_v13 = vsel %vm12039_vm10, %v6171_v30, %v6170_v49  ;;  %v4028_v30 = vld [vmem:[%s8201_s26 + $0x4b8] sm:$0xff]  ;;  %v10072_v49 = vmax.f32 %v3771_v37, %v4289_v1  ;;  %v3782_v37 = vld [vmem:[#allocation2 + $0x5a0] sm:$0xff] }
 0x4b9   : > { %5437 = vmax.xlane.f32.xlu2 %v9798_v63  ;;  %5435 = vmax.xlane.f32.xlu1 %v9804_v34  ;;  %v6174_v63 = vsel %vm12033_vm11, %v6173_v28, %v6172_v13  ;;  %v4290_v36 = vsel %vm4138_vm0, %v4028_v30, -inf  ;;  %vm12036_vm11 = vcmask 1041409  }
 0x4ba   : > { %5433 = vmax.xlane.f32.xlu0 %v9814_v62  ;;  %v6054_v62 = vsel %vm6018_vm13, %v6053_v60, %v6052_v55  ;;  %v6176_v20 = vsel %vm12038_vm12, %v6175_v53, %v6174_v63  ;;  %v4291_v60 = vsel %vm4138_vm0, %v4029_v7, -inf  ;;  %v3772_v55 = vld [vmem:[#allocation2 + $0x2a0] sm:$0xff]  ;;  %4801 = vst [vmem:[#allocation2 + $0x78] sm:$0xff] %v10072_v49  ;;  %v4030_v53 = vld [vmem:[%s8201_s26 + $0x4c8] sm:$0xff]  ;;  %v3776_v63 = vld [vmem:[#allocation2 + $0x530] sm:$0xff] }
 0x4bb   : > { %v6056_v42 = vsel %vm12034_vm14, %v6055_v43, %v6054_v62  ;;  %v10060_v56 = vmax.f32 %v3773_v23, %v4291_v60  ;;  %v10066_v16 = vmax.f32 %v3772_v55, %v4290_v36  ;;  %v4292_v62 = vsel %vm4138_vm0, %v4030_v53, -inf  ;;  %v3783_v55 = vld [vmem:[#allocation2 + $0x3d0] sm:$0xff] }
 0x4bc   : > { %v5354_v34 = vpop.xlane.xlu2 %5353  ;;  %v5352_v50 = vpop.xlane.xlu1 %5351  ;;  %v6058_v27 = vsel %vm6026_vm15, %v6057_v14, %v6056_v42  ;;  %v3774_v14 = vld [vmem:[#allocation2 + $0x778] sm:$0xff]  ;;  %v4301_v36 = vsel %vm4138_vm0, %v4039_v19, -inf }
 0x4bd   : > { %v6179_v52 = vperm.slane %v5352_v50, %v9990_v51  ;;  %v5350_v46 = vpop.xlane.xlu0 %5349  ;;  %v6181_v33 = vperm.slane %v5354_v34, %v9996_v58  ;;  %v6507_v43 = vsel %vm12036_vm11, %v6120_v61, %v6058_v27  ;;  %4803 = vst [vmem:[#allocation2 + $0x10] sm:$0xff] %v10060_v56  ;;  %v3775_v34 = vld [vmem:[#allocation2 + $0x7a8] sm:$0xff]  ;;  %v4293_v50 = vsel %vm4138_vm0, %v4031_v2, -inf }
 0x4be   : > { %v6177_v9 = vperm.slane %v5350_v46, %v9982_v40  ;;  %4802 = vst [vmem:[#allocation2 + $0x2a0] sm:$0xff] %v10066_v16  ;;  %v10094_v42 = vmax.f32 %v3775_v34, %v4293_v50  ;;  %v10098_v61 = vmax.f32 %v3774_v14, %v4292_v62  ;;  %v3784_v50 = vld [vmem:[#allocation2 + $0x230] sm:$0xff]  ;;  %v3814_v62 = vld [vmem:[#allocation2 + $0x98] sm:$0xff]  ;;  %vm6497_vm11 = vcmask 1043459  }
 0x4c0   : > { %v6178_v38 = vsel %vm6018_vm13, %v6177_v9, %v6176_v20  ;;  %4805 = vst [vmem:[#allocation2 + $0x7a8] sm:$0xff] %v10094_v42  ;;  %v4038_v20 = vld [vmem:[%s8201_s26 + $0x508] sm:$0xff] }
 0x4c1   : > { %v6180_v10 = vsel %vm12034_vm14, %v6179_v52, %v6178_v38  ;;  %5443 = vmax.xlane.f32.xlu2 %v9851_v47  ;;  %5441 = vmax.xlane.f32.xlu1 %v9858_v17  ;;  %vm12035_vm14 = vcmask 1042434   ;;  %4804 = vst [vmem:[#allocation2 + $0x778] sm:$0xff] %v10098_v61  ;;  %v4300_v1 = vsel %vm4138_vm0, %v4038_v20, -inf  ;;  %v3781_v38 = vld [vmem:[#allocation2 + $0x340] sm:$0xff] }
 0x4c2   : > { %v6182_v28 = vsel %vm6026_vm15, %v6181_v33, %v6180_v10  ;;  %5439 = vmax.xlane.f32.xlu0 %v9868_v54  ;;  %v4294_v54 = vsel %vm4138_vm0, %v4032_v21, -inf  ;;  %v10115_v10 = vmax.f32 %v3783_v55, %v4301_v36  ;;  %v4101_v55 = vld [vmem:[%s8201_s26 + $0x700] sm:$0xff] }
 0x4c3   : > { %v10076_v47 = vsel %vm12035_vm14, %v6182_v28, %v6507_v43  ;;  %v10090_v46 = vmax.f32 %v3776_v63, %v4294_v54  ;;  %v10121_v28 = vmax.f32 %v3782_v37, %v4300_v1  ;;  %v4040_v63 = vld [vmem:[%s8201_s26 + $0x518] sm:$0xff]  ;;  %v4070_v54 = vld [vmem:[%s8201_s26 + $0x608] sm:$0xff]  ;;  %vm12159_vm14 = vcmask 786112  }
 0x4c4   : > { %v5360_v17 = vpop.xlane.xlu2 %5359  ;;  %v5358_v18 = vpop.xlane.xlu1 %5357  ;;  %4813 = vst [vmem:[#allocation2 + $0x3d0] sm:$0xff] %v10115_v10  ;;  %v4302_v14 = vsel %vm4138_vm0, %v4040_v63, -inf  ;;  %v3846_v37 = vld [vmem:[#allocation2 + $0x668] sm:$0xff] }
 0x4c5   : > { %v5356_v13 = vpop.xlane.xlu0 %5355  ;;  %v6184_v8 = vperm.slane %v5358_v18, %v9752_v5  ;;  %4806 = vst [vmem:[#allocation2 + $0x530] sm:$0xff] %v10090_v46  ;;  %v6186_v33 = vperm.slane %v5360_v17, %v9770_v29 }
 0x4c6   : > { %v6183_v52 = vperm.slane %v5356_v13, %v8720_v3  ;;  %4812 = vst [vmem:[#allocation2 + $0x5a0] sm:$0xff] %v10121_v28 }
 0x4c8   : > { %v6185_v9 = vsel %vm5970_vm1, %v6184_v8, %v6183_v52  ;;  %v4332_v8 = vsel %vm4138_vm0, %v4070_v54, -inf  ;;  %v3813_v52 = vld [vmem:[#allocation2 + $0x678] sm:$0xff] }
 0x4c9   : > { %5449 = vmax.xlane.f32.xlu2 %v9909_v48  ;;  %5447 = vmax.xlane.f32.xlu1 %v9916_v12  ;;  %v6187_v60 = vsel %vm5974_vm2, %v6186_v33, %v6185_v9 }
 0x4ca   : > { %5445 = vmax.xlane.f32.xlu0 %v9925_v0  ;;  %v4037_v0 = vld [vmem:[%s8201_s26 + $0x500] sm:$0xff] }
 0x4cb   : > { %v4299_v43 = vsel %vm4138_vm0, %v4037_v0, -inf }
 0x4cc   : > { %v5366_v7 = vpop.xlane.xlu2 %5365  ;;  %v5364_v30 = vpop.xlane.xlu1 %5363  ;;  %v10126_v18 = vmax.f32 %v3781_v38, %v4299_v43  ;;  %v3845_v38 = vld [vmem:[#allocation2 + $0x168] sm:$0xff]  ;;  %v3815_v43 = vld [vmem:[#allocation2 + $0x470] sm:$0xff] }
 0x4cd   : > { %v5362_v48 = vpop.xlane.xlu0 %5361  ;;  %v6190_v23 = vperm.slane %v5364_v30, %v9807_v44  ;;  %v6192_v17 = vperm.slane %v5366_v7, %v9817_v26  ;;  %v10144_v7 = vmax.f32 %v3784_v50, %v4302_v14  ;;  %v10148_v30 = vmax.f32 %v3814_v62, %v4332_v8  ;;  %v4072_v50 = vld [vmem:[%s8201_s26 + $0x618] sm:$0xff]  ;;  %v3847_v62 = vld [vmem:[#allocation2 + $0x270] sm:$0xff] }
 0x4ce   : > { %v6188_v12 = vperm.slane %v5362_v48, %v9780_v57  ;;  %4811 = vst [vmem:[#allocation2 + $0x340] sm:$0xff] %v10126_v18 }
 0x4cf   : > { %4814 = vst [vmem:[#allocation2 + $0x230] sm:$0xff] %v10144_v7 }
 0x4d0   : > { %v6189_v27 = vsel %vm5978_vm3, %v6188_v12, %v6187_v60  ;;  %4844 = vst [vmem:[#allocation2 + $0x98] sm:$0xff] %v10148_v30  ;;  %v4102_v60 = vld [vmem:[%s8201_s26 + $0x708] sm:$0xff] }
 0x4d1   : > { %5455 = vmax.xlane.f32.xlu2 %v9966_v15  ;;  %5453 = vmax.xlane.f32.xlu1 %v9972_v11  ;;  %v6191_v13 = vsel %vm5982_vm4, %v6190_v23, %v6189_v27  ;;  %v4364_v1 = vsel %vm4138_vm0, %v4102_v60, -inf  ;;  %v4363_v27 = vsel %vm4138_vm0, %v4101_v55, -inf }
 0x4d2   : > { %5451 = vmax.xlane.f32.xlu0 %v9979_v35  ;;  %v6193_v2 = vsel %vm5986_vm5, %v6192_v17, %v6191_v13  ;;  %v4069_v35 = vld [vmem:[%s8201_s26 + $0x600] sm:$0xff] }
 0x4d3   : > { %v4331_v33 = vsel %vm4138_vm0, %v4069_v35, -inf }
 0x4d4   : > { %v5372_v21 = vpop.xlane.xlu2 %5371  ;;  %v5370_v15 = vpop.xlane.xlu1 %5369  ;;  %v10153_v12 = vmax.f32 %v3813_v52, %v4331_v33  ;;  %v3816_v52 = vld [vmem:[#allocation2 + $0x410] sm:$0xff]  ;;  %v4334_v33 = vsel %vm4138_vm0, %v4072_v50, -inf }
 0x4d5   : > { %v5368_v11 = vpop.xlane.xlu0 %5367  ;;  %v6196_v34 = vperm.slane %v5370_v15, %v9861_v32  ;;  %v6198_v48 = vperm.slane %v5372_v21, %v9871_v41  ;;  %v10171_v21 = vmax.f32 %v3846_v37, %v4364_v1  ;;  %v10175_v15 = vmax.f32 %v3845_v38, %v4363_v27  ;;  %v4104_v37 = vld [vmem:[%s8201_s26 + $0x718] sm:$0xff]  ;;  %v4073_v1 = vld [vmem:[%s8201_s26 + $0x620] sm:$0xff]  ;;  %v4042_v38 = vld [vmem:[%s8201_s26 + $0x528] sm:$0xff] }
 0x4d6   : > { %v6194_v53 = vperm.slane %v5368_v11, %v9832_v59  ;;  %4843 = vst [vmem:[#allocation2 + $0x678] sm:$0xff] %v10153_v12 }
 0x4d7   : > { %4876 = vst [vmem:[#allocation2 + $0x668] sm:$0xff] %v10171_v21 }
 0x4d8   : > { %v6195_v9 = vsel %vm5990_vm6, %v6194_v53, %v6193_v2  ;;  %4875 = vst [vmem:[#allocation2 + $0x168] sm:$0xff] %v10175_v15 }
 0x4d9   : > { %5461 = vmax.xlane.f32.xlu2 %v10020_v25  ;;  %5459 = vmax.xlane.f32.xlu1 %v10027_v39  ;;  %v6197_v19 = vsel %vm5994_vm7, %v6196_v34, %v6195_v9  ;;  %v4103_v34 = vld [vmem:[%s8201_s26 + $0x710] sm:$0xff]  ;;  %v3785_v9 = vld [vmem:[#allocation2 + $0x560] sm:$0xff] }
 0x4da   : > { %5457 = vmax.xlane.f32.xlu0 %v10034_v24  ;;  %v6199_v0 = vsel %vm12037_vm8, %v6198_v48, %v6197_v19  ;;  %v4071_v24 = vld [vmem:[%s8201_s26 + $0x610] sm:$0xff]  ;;  %v4365_v8 = vsel %vm4138_vm0, %v4103_v34, -inf }
 0x4db   : > { %v4333_v17 = vsel %vm4138_vm0, %v4071_v24, -inf }
 0x4dc   : > { %v5378_v20 = vpop.xlane.xlu2 %5377  ;;  %v5376_v25 = vpop.xlane.xlu1 %5375  ;;  %v10180_v2 = vmax.f32 %v3815_v43, %v4333_v17  ;;  %v3848_v43 = vld [vmem:[#allocation2 + $0x2d8] sm:$0xff]  ;;  %v4366_v17 = vsel %vm4138_vm0, %v4104_v37, -inf }
 0x4dd   : > { %v5374_v39 = vpop.xlane.xlu0 %5373  ;;  %v6202_v36 = vperm.slane %v5376_v25, %v9919_v22  ;;  %v6204_v11 = vperm.slane %v5378_v20, %v9931_v4  ;;  %v10198_v20 = vmax.f32 %v3847_v62, %v4365_v8  ;;  %v10202_v25 = vmax.f32 %v3816_v52, %v4334_v33  ;;  %v4105_v62 = vld [vmem:[%s8201_s26 + $0x720] sm:$0xff]  ;;  %v4074_v8 = vld [vmem:[%s8201_s26 + $0x628] sm:$0xff] }
 0x4de   : > { %v6200_v23 = vperm.slane %v5374_v39, %v9884_v31  ;;  %4845 = vst [vmem:[#allocation2 + $0x470] sm:$0xff] %v10180_v2  ;;  %v3849_v52 = vld [vmem:[#allocation2 + $0xc8] sm:$0xff]  ;;  %v4367_v33 = vsel %vm4138_vm0, %v4105_v62, -inf  ;;  %v12161_v62 = vld [vmem:[#allocation13_spill] sm:$0xff] }
 0x4df   : > { %4877 = vst [vmem:[#allocation2 + $0x270] sm:$0xff] %v10198_v20 }
 0x4e0   : > { %v6201_v13 = vsel %vm6002_vm9, %v6200_v23, %v6199_v0  ;;  %4846 = vst [vmem:[#allocation2 + $0x410] sm:$0xff] %v10202_v25 }
 0x4e1   : > { %5467 = vmax.xlane.f32.xlu2 %v10060_v56  ;;  %5465 = vmax.xlane.f32.xlu1 %v10066_v16  ;;  %v6203_v53 = vsel %vm12039_vm10, %v6202_v36, %v6201_v13  ;;  %v3817_v13 = vld [vmem:[#allocation2 + $0x248] sm:$0xff] }
 0x4e2   : > { %5463 = vmax.xlane.f32.xlu0 %v10072_v49  ;;  %v6205_v54 = vsel %vm12159_vm14, %v6204_v11, %v6203_v53  ;;  %v4041_v49 = vld [vmem:[%s8201_s26 + $0x520] sm:$0xff]  ;;  %vm12160_vm14 = vcmask 982912   ;;  %v4335_v11 = vsel %vm4138_vm0, %v4073_v1, -inf  ;;  %v3786_v53 = vld [vmem:[#allocation2 + $0x7f8] sm:$0xff] }
 0x4e3   : > { %v4303_v48 = vsel %vm4138_vm0, %v4041_v49, -inf }
 0x4e4   : > { %v5384_v63 = vpop.xlane.xlu2 %5383  ;;  %v5382_v56 = vpop.xlane.xlu1 %5381  ;;  %v10207_v0 = vmax.f32 %v3785_v9, %v4303_v48  ;;  %v3818_v9 = vld [vmem:[#allocation2 + $0x548] sm:$0xff]  ;;  %v4336_v48 = vsel %vm4138_vm0, %v4074_v8, -inf  ;;  %v5969_v8 = vperm.slane %v12161_v62, %v9752_v5 }
 0x4e5   : > { %v5380_v16 = vpop.xlane.xlu0 %5379  ;;  %v6208_v14 = vperm.slane %v5382_v56, %v9982_v40  ;;  %v6210_v39 = vperm.slane %v5384_v63, %v9990_v51  ;;  %v4304_v63 = vsel %vm4138_vm0, %v4042_v38, -inf  ;;  %v4075_v38 = vld [vmem:[%s8201_s26 + $0x630] sm:$0xff] }
 0x4e6   : > { %v6206_v35 = vperm.slane %v5380_v16, %v9941_v45  ;;  %4815 = vst [vmem:[#allocation2 + $0x560] sm:$0xff] %v10207_v0  ;;  %v10229_v16 = vmax.f32 %v3848_v43, %v4366_v17  ;;  %v3850_v43 = vld [vmem:[#allocation2 + $0xa0] sm:$0xff] }
 0x4e8   : > { %v6207_v19 = vsel %vm12038_vm12, %v6206_v35, %v6205_v54  ;;  %v10233_v54 = vmax.f32 %v3817_v13, %v4335_v11  ;;  %4878 = vst [vmem:[#allocation2 + $0x2d8] sm:$0xff] %v10229_v16  ;;  %v10237_v35 = vmax.f32 %v3786_v53, %v4304_v63  ;;  %v3819_v13 = vld [vmem:[#allocation2 + $0x220] sm:$0xff]  ;;  %v4337_v11 = vsel %vm4138_vm0, %v4075_v38, -inf }
 0x4e9   : > { %5473 = vmax.xlane.f32.xlu2 %v10090_v46  ;;  %5471 = vmax.xlane.f32.xlu1 %v10094_v42  ;;  %v6209_v23 = vsel %vm6018_vm13, %v6208_v14, %v6207_v19  ;;  %v3787_v19 = vld [vmem:[#allocation2 + $0x4e0] sm:$0xff] }
 0x4ea   : > { %5469 = vmax.xlane.f32.xlu0 %v10098_v61  ;;  %v6211_v36 = vsel %vm12160_vm14, %v6210_v39, %v6209_v23  ;;  %4847 = vst [vmem:[#allocation2 + $0x248] sm:$0xff] %v10233_v54  ;;  %v3788_v53 = vld [vmem:[#allocation2 + $0x200] sm:$0xff]  ;;  %vm12168_vm14 = vcmask 786112  }
 0x4eb   : > { %4816 = vst [vmem:[#allocation2 + $0x7f8] sm:$0xff] %v10237_v35 }
 0x4ec   : > { %v5390_v46 = vpop.xlane.xlu2 %5389  ;;  %v5388_v60 = vpop.xlane.xlu1 %5387 }
 0x4ed   : > { %v6215_v42 = vperm.slane %v5390_v46, %v9752_v5  ;;  %v6214_v55 = vperm.slane %v5388_v60, %v8720_v3  ;;  %v5386_v24 = vpop.xlane.xlu0 %5385  ;;  %v10254_v46 = vmax.f32 %v3849_v52, %v4367_v33 }
 0x4ee   : > { %v6212_v61 = vperm.slane %v5386_v24, %v9996_v58 }
 0x4ef   : > { %v6216_v27 = vsel %vm5970_vm1, %v6215_v42, %v6214_v55  ;;  %v10259_v42 = vmax.f32 %v3818_v9, %v4336_v48  ;;  %4879 = vst [vmem:[#allocation2 + $0xc8] sm:$0xff] %v10254_v46 }
 0x4f0   : > { %v10227_v56 = vsel %vm6026_vm15, %v6212_v61, %v6211_v36 }
 0x4f1   : > { %5487 = vmax.xlane.f32.xlu2 %v10115_v10  ;;  %5485 = vmax.xlane.f32.xlu1 %v10121_v28  ;;  %4848 = vst [vmem:[#allocation2 + $0x548] sm:$0xff] %v10259_v42 }
 0x4f2   : > { %5483 = vmax.xlane.f32.xlu0 %v10126_v18  ;;  %v4043_v18 = vld [vmem:[%s8201_s26 + $0x530] sm:$0xff] }
 0x4f3   : > { %v4305_v39 = vsel %vm4138_vm0, %v4043_v18, -inf  ;;  %v12162_v18 = vld [vmem:[#allocation10_spill] sm:$0xff] }
 0x4f4   : > { %v5396_v34 = vpop.xlane.xlu2 %5395  ;;  %v5394_v50 = vpop.xlane.xlu1 %5393  ;;  %v10264_v24 = vmax.f32 %v3787_v19, %v4305_v39  ;;  %v5967_v52 = vperm.slane %v12162_v18, %v8720_v3  ;;  %v4107_v19 = vld [vmem:[%s8201_s26 + $0x730] sm:$0xff]  ;;  %v4076_v39 = vld [vmem:[%s8201_s26 + $0x638] sm:$0xff] }
 0x4f5   : > { %v6219_v49 = vperm.slane %v5394_v50, %v9780_v57  ;;  %v5392_v10 = vpop.xlane.xlu0 %5391  ;;  %v6221_v14 = vperm.slane %v5396_v34, %v9807_v44  ;;  %v4108_v18 = vld [vmem:[%s8201_s26 + $0x738] sm:$0xff] }
 0x4f6   : > { %v6217_v28 = vperm.slane %v5392_v10, %v9770_v29  ;;  %4817 = vst [vmem:[#allocation2 + $0x4e0] sm:$0xff] %v10264_v24  ;;  %v10286_v10 = vmax.f32 %v3819_v13, %v4337_v11 }
 0x4f8   : > { %v6218_v23 = vsel %vm5974_vm2, %v6217_v28, %v6216_v27  ;;  %v4044_v27 = vld [vmem:[%s8201_s26 + $0x538] sm:$0xff]  ;;  %4849 = vst [vmem:[#allocation2 + $0x220] sm:$0xff] %v10286_v10 }
 0x4f9   : > { %v6220_v60 = vsel %vm5978_vm3, %v6219_v49, %v6218_v23  ;;  %5489 = vmax.xlane.f32.xlu2 %v10144_v7  ;;  %5549 = vmax.xlane.f32.xlu1 %v10148_v30  ;;  %v4306_v63 = vsel %vm4138_vm0, %v4044_v27, -inf  ;;  %v4045_v23 = vld [vmem:[%s8201_s26 + $0x540] sm:$0xff] }
 0x4fa   : > { %5547 = vmax.xlane.f32.xlu0 %v10153_v12  ;;  %v6222_v55 = vsel %vm5982_vm4, %v6221_v14, %v6220_v60  ;;  %v4106_v12 = vld [vmem:[%s8201_s26 + $0x728] sm:$0xff]  ;;  %v10291_v28 = vmax.f32 %v3788_v53, %v4306_v63  ;;  %v5971_v60 = vsel %vm5970_vm1, %v5969_v8, %v5967_v52  ;;  %v4077_v52 = vld [vmem:[%s8201_s26 + $0x640] sm:$0xff] }
 0x4fb   : > { %v4368_v17 = vsel %vm4138_vm0, %v4106_v12, -inf }
 0x4fc   : > { %v5402_v36 = vpop.xlane.xlu2 %5401  ;;  %v5400_v61 = vpop.xlane.xlu1 %5399  ;;  %v10281_v50 = vmax.f32 %v3850_v43, %v4368_v17  ;;  %4818 = vst [vmem:[#allocation2 + $0x200] sm:$0xff] %v10291_v28  ;;  %v12164_v43 = vld [vmem:[#allocation12_spill] sm:$0xff] }
 0x4fd   : > { %v6225_v7 = vperm.slane %v5400_v61, %v9832_v59  ;;  %v5398_v30 = vpop.xlane.xlu0 %5397  ;;  %v6227_v37 = vperm.slane %v5402_v36, %v9861_v32  ;;  %v4369_v36 = vsel %vm4138_vm0, %v4107_v19, -inf  ;;  %v3820_v61 = vld [vmem:[#allocation2 + $0x780] sm:$0xff]  ;;  %v5977_v17 = vperm.slane %v12164_v43, %v9780_v57 }
 0x4fe   : > { %v6223_v1 = vperm.slane %v5398_v30, %v9817_v26  ;;  %4880 = vst [vmem:[#allocation2 + $0xa0] sm:$0xff] %v10281_v50  ;;  %v3789_v30 = vld [vmem:[#allocation2 + $0x468] sm:$0xff]  ;;  %v4370_v19 = vsel %vm4138_vm0, %v4108_v18, -inf  ;;  %v12174_v18 = vld [vmem:[#allocation15_spill] sm:$0xff] }
 0x500   : > { %v6224_v34 = vsel %vm5986_vm5, %v6223_v1, %v6222_v55  ;;  %v3851_v55 = vld [vmem:[#allocation2 + $0x48] sm:$0xff]  ;;  %v12163_v1 = vld [vmem:[#allocation9_spill] sm:$0xff] }
 0x501   : > { %v6226_v49 = vsel %vm5990_vm6, %v6225_v7, %v6224_v34  ;;  %5613 = vmax.xlane.f32.xlu2 %v10171_v21  ;;  %5611 = vmax.xlane.f32.xlu1 %v10175_v15  ;;  %v4338_v7 = vsel %vm4138_vm0, %v4076_v39, -inf  ;;  %v5973_v12 = vperm.slane %v12163_v1, %v9770_v29  ;;  %v10315_v27 = vmax.f32 %v3851_v55, %v4369_v36  ;;  %v3821_v39 = vld [vmem:[#allocation2 + $0x708] sm:$0xff]  ;;  %v12169_v1 = vld [vmem:[#allocation27_spill] sm:$0xff] }
 0x502   : > { %5551 = vmax.xlane.f32.xlu0 %v10180_v2  ;;  %v6228_v14 = vsel %vm5994_vm7, %v6227_v37, %v6226_v49  ;;  %v4307_v37 = vsel %vm4138_vm0, %v4045_v23, -inf  ;;  %v10322_v11 = vmax.f32 %v3820_v61, %v4338_v7  ;;  %v4339_v23 = vsel %vm4138_vm0, %v4077_v52, -inf  ;;  %v12167_v61 = vld [vmem:[#allocation24_spill] sm:$0xff] }
 0x503   : > { %v5975_v53 = vsel %vm5974_vm2, %v5973_v12, %v5971_v60  ;;  %4881 = vst [vmem:[#allocation2 + $0x48] sm:$0xff] %v10315_v27  ;;  %v10328_v34 = vmax.f32 %v3789_v30, %v4307_v37  ;;  %v3790_v60 = vld [vmem:[#allocation2 + $0x2a8] sm:$0xff]  ;;  %v6059_v7 = vperm.slane %v12167_v61, %v8720_v3  ;;  %v6060_v12 = vperm.slane %v12169_v1, %v9752_v5  ;;  %v3791_v1 = vld [vmem:[#allocation2 + $0x1d0] sm:$0xff] }
 0x504   : > { %v5408_v21 = vpop.xlane.xlu2 %5407  ;;  %v5406_v15 = vpop.xlane.xlu1 %5405  ;;  %4850 = vst [vmem:[#allocation2 + $0x780] sm:$0xff] %v10322_v11  ;;  %v10360_v43 = vmax.f32 %v3821_v39, %v4339_v23  ;;  %v5993_v52 = vperm.slane %v12174_v18, %v9861_v32  ;;  %v4109_v39 = vld [vmem:[%s8201_s26 + $0x740] sm:$0xff]  ;;  %v4078_v23 = vld [vmem:[%s8201_s26 + $0x648] sm:$0xff] }
 0x505   : > { %v6231_v2 = vperm.slane %v5406_v15, %v9884_v31  ;;  %v5404_v33 = vpop.xlane.xlu0 %5403  ;;  %v6233_v9 = vperm.slane %v5408_v21, %v9919_v22  ;;  %4819 = vst [vmem:[#allocation2 + $0x468] sm:$0xff] %v10328_v34  ;;  %v4371_v61 = vsel %vm4138_vm0, %v4109_v39, -inf  ;;  %v12183_v39 = vld [vmem:[#allocation19_spill] sm:$0xff] }
 0x506   : > { %v6229_v48 = vperm.slane %v5404_v33, %v9871_v41  ;;  %v12166_v33 = vld [vmem:[#allocation11_spill] sm:$0xff]  ;;  %4851 = vst [vmem:[#allocation2 + $0x708] sm:$0xff] %v10360_v43 }
 0x508   : > { %v6230_v38 = vsel %vm12037_vm8, %v6229_v48, %v6228_v14  ;;  %v3852_v48 = vld [vmem:[#allocation2 + $0x328] sm:$0xff] }
 0x509   : > { %v6232_v13 = vsel %vm6002_vm9, %v6231_v2, %v6230_v38  ;;  %5615 = vmax.xlane.f32.xlu2 %v10198_v20  ;;  %5553 = vmax.xlane.f32.xlu1 %v10202_v25  ;;  %v5979_v25 = vsel %vm5978_vm3, %v5977_v17, %v5975_v53  ;;  %v4046_v2 = vld [vmem:[%s8201_s26 + $0x548] sm:$0xff]  ;;  %v10353_v37 = vmax.f32 %v3852_v48, %v4370_v19  ;;  %v12170_v17 = vld [vmem:[#allocation16_spill] sm:$0xff] }
 0x50a   : > { %5491 = vmax.xlane.f32.xlu0 %v10207_v0  ;;  %v6234_v63 = vsel %vm12039_vm10, %v6233_v9, %v6232_v13  ;;  %v12165_v0 = vld [vmem:[#allocation8_spill] sm:$0xff]  ;;  %v5985_v9 = vperm.slane %v12166_v33, %v9817_v26  ;;  %v4308_v55 = vsel %vm4138_vm0, %v4046_v2, -inf  ;;  %v5989_v13 = vperm.slane %v12170_v17, %v9832_v59  ;;  %v12175_v33 = vld [vmem:[#allocation25_spill] sm:$0xff] }
 0x50b   : > { %v5981_v8 = vperm.slane %v12165_v0, %v9807_v44  ;;  %4882 = vst [vmem:[#allocation2 + $0x328] sm:$0xff] %v10353_v37  ;;  %v6064_v48 = vperm.slane %v12175_v33, %v9780_v57 }
 0x50c   : > { %v5414_v20 = vpop.xlane.xlu2 %5413  ;;  %v5412_v49 = vpop.xlane.xlu1 %5411 }
 0x50d   : > { %v6237_v14 = vperm.slane %v5412_v49, %v9941_v45  ;;  %v5410_v62 = vpop.xlane.xlu0 %5409  ;;  %v6239_v21 = vperm.slane %v5414_v20, %v9982_v40  ;;  %v5983_v36 = vsel %vm5982_vm4, %v5981_v8, %v5979_v25  ;;  %v12172_v20 = vld [vmem:[#allocation40_spill] sm:$0xff]  ;;  %v12173_v25 = vld [vmem:[#allocation41_spill] sm:$0xff]  ;;  %v6061_v8 = vsel %vm5970_vm1, %v6060_v12, %v6059_v7  ;;  %v3822_v7 = vld [vmem:[#allocation2 + $0x8] sm:$0xff] }
 0x50e   : > { %v6235_v15 = vperm.slane %v5410_v62, %v9931_v4  ;;  %v6122_v49 = vperm.slane %v12172_v20, %v9752_v5  ;;  %v5987_v0 = vsel %vm5986_vm5, %v5985_v9, %v5983_v36  ;;  %v12176_v9 = vld [vmem:[#allocation44_spill] sm:$0xff]  ;;  %v3853_v36 = vld [vmem:[#allocation2 + $0x7c8] sm:$0xff] }
 0x50f   : > { %v5991_v2 = vsel %vm5990_vm6, %v5989_v13, %v5987_v0  ;;  %v12178_v20 = vld [vmem:[#allocation30_spill] sm:$0xff] }
 0x510   : > { %v6236_v30 = vsel %vm12168_vm14, %v6235_v15, %v6234_v63  ;;  %v10367_v63 = vmax.f32 %v3790_v60, %v4308_v55  ;;  %v4047_v60 = vld [vmem:[%s8201_s26 + $0x550] sm:$0xff]  ;;  %v6124_v55 = vperm.slane %v12176_v9, %v9770_v29  ;;  %vm12177_vm14 = vcmask 982912  }
 0x511   : > { %v6238_v38 = vsel %vm12038_vm12, %v6237_v14, %v6236_v30  ;;  %5617 = vmax.xlane.f32.xlu2 %v10229_v16  ;;  %5555 = vmax.xlane.f32.xlu1 %v10233_v54  ;;  %v12171_v16 = vld [vmem:[#allocation26_spill] sm:$0xff]  ;;  %v4340_v30 = vsel %vm4138_vm0, %v4078_v23, -inf  ;;  %v4309_v12 = vsel %vm4138_vm0, %v4047_v60, -inf  ;;  %v6001_v23 = vperm.slane %v12183_v39, %v9884_v31 }
 0x512   : > { %5493 = vmax.xlane.f32.xlu0 %v10237_v35  ;;  %v6240_v53 = vsel %vm6018_vm13, %v6239_v21, %v6238_v38  ;;  %v6062_v54 = vperm.slane %v12171_v16, %v9770_v29  ;;  %v6121_v35 = vperm.slane %v12173_v25, %v8720_v3  ;;  %4820 = vst [vmem:[#allocation2 + $0x2a8] sm:$0xff] %v10367_v63 }
 0x513   : > { %v10402_v16 = vmax.f32 %v3853_v36, %v4371_v61  ;;  %v6066_v25 = vperm.slane %v12178_v20, %v9807_v44  ;;  %v10409_v0 = vmax.f32 %v3822_v7, %v4340_v30  ;;  %v4110_v30 = vld [vmem:[%s8201_s26 + $0x748] sm:$0xff] }
 0x514   : > { %v10376_v14 = vpop.xlane.xlu2 %5419  ;;  %v5418_v62 = vpop.xlane.xlu1 %5417  ;;  %v6063_v38 = vsel %vm5974_vm2, %v6062_v54, %v6061_v8  ;;  %v6123_v17 = vsel %vm5970_vm1, %v6122_v49, %v6121_v35  ;;  %v12179_v54 = vld [vmem:[#allocation43_spill] sm:$0xff]  ;;  %v12181_v35 = vld [vmem:[#allocation14_spill] sm:$0xff]  ;;  %v4372_v20 = vsel %vm4138_vm0, %v4110_v30, -inf }
 0x515   : > { %v6243_v21 = vperm.slane %v5418_v62, %v9996_v58  ;;  %v5416_v15 = vpop.xlane.xlu0 %5415  ;;  %v6126_v8 = vperm.slane %v12179_v54, %v9780_v57  ;;  %4883 = vst [vmem:[#allocation2 + $0x7c8] sm:$0xff] %v10402_v16  ;;  %v6065_v18 = vsel %vm5978_vm3, %v6064_v48, %v6063_v38  ;;  %v12185_v48 = vld [vmem:[#allocation28_spill] sm:$0xff]  ;;  %v12186_v38 = vld [vmem:[#allocation47_spill] sm:$0xff] }
 0x516   : > { %v6241_v19 = vperm.slane %v5416_v15, %v9990_v51  ;;  %4852 = vst [vmem:[#allocation2 + $0x8] sm:$0xff] %v10409_v0  ;;  %v12182_v15 = vld [vmem:[#allocation29_spill] sm:$0xff]  ;;  %v6070_v36 = vperm.slane %v12185_v48, %v9832_v59  ;;  %v3792_v54 = vld [vmem:[#allocation2 + $0x510] sm:$0xff]  ;;  %v12190_v48 = vld [vmem:[#allocation32_spill] sm:$0xff] }
 0x518   : > { %v6242_v13 = vsel %vm12177_vm14, %v6241_v19, %v6240_v53  ;;  %v10415_v53 = vmax.f32 %v3791_v1, %v4309_v12  ;;  %v4079_v1 = vld [vmem:[%s8201_s26 + $0x650] sm:$0xff]  ;;  %v4048_v12 = vld [vmem:[%s8201_s26 + $0x558] sm:$0xff]  ;;  %vm12202_vm14 = vcmask 786112  }
 0x519   : > { %v6244_v62 = vsel %vm6026_vm15, %v6243_v21, %v6242_v13  ;;  %5619 = vmax.xlane.f32.xlu2 %v10254_v46  ;;  %5557 = vmax.xlane.f32.xlu1 %v10259_v42  ;;  %v5997_v46 = vperm.slane %v12181_v35, %v9871_v41  ;;  %v6125_v42 = vsel %vm5974_vm2, %v6124_v55, %v6123_v17  ;;  %v3854_v13 = vld [vmem:[#allocation2 + $0x430] sm:$0xff] }
 0x51a   : > { %5495 = vmax.xlane.f32.xlu0 %v10264_v24  ;;  %v10419_v49 = vsel %vm6497_vm11, %v6244_v62, %v10076_v47  ;;  %v5995_v21 = vsel %vm5994_vm7, %v5993_v52, %v5991_v2  ;;  %v6068_v24 = vperm.slane %v12182_v15, %v9817_v26  ;;  %v6245_v47 = vperm.slane %v10376_v14, %v8720_v3  ;;  %v12184_v2 = vld [vmem:[#allocation42_spill] sm:$0xff] }
 0x51b   : > { %12180 = vst [vmem:[#allocation13_spill] sm:$0xff] %v10419_v49  ;;  %v6067_v52 = vsel %vm5982_vm4, %v6066_v25, %v6065_v18  ;;  %v6128_v60 = vperm.slane %v12184_v2, %v9807_v44  ;;  %v6127_v14 = vsel %vm5978_vm3, %v6126_v8, %v6125_v42  ;;  %v6130_v17 = vperm.slane %v12186_v38, %v9817_v26  ;;  %v3823_v25 = vld [vmem:[#allocation2 + $0x428] sm:$0xff]  ;;  %v12187_v42 = vld [vmem:[#allocation33_spill] sm:$0xff] }
 0x51c   : > { %v5426_v33 = vpop.xlane.xlu2 %5425  ;;  %v5424_v19 = vpop.xlane.xlu1 %5423  ;;  %4821 = vst [vmem:[#allocation2 + $0x1d0] sm:$0xff] %v10415_v53  ;;  %v4341_v62 = vsel %vm4138_vm0, %v4079_v1, -inf  ;;  %v4310_v8 = vsel %vm4138_vm0, %v4048_v12, -inf  ;;  %v6069_v35 = vsel %vm5986_vm5, %v6068_v24, %v6067_v52  ;;  %v6072_v15 = vperm.slane %v12187_v42, %v9861_v32  ;;  %v12191_v12 = vld [vmem:[#allocation45_spill] sm:$0xff]  ;;  %v3855_v42 = vld [vmem:[#allocation2 + $0x578] sm:$0xff]  ;;  %v4094_v49 = vld [vmem:[%s8201_s26 + $0x6c8] sm:$0xff] }
 0x51d   : > { %v6248_v9 = vperm.slane %v5424_v19, %v9770_v29  ;;  %v5422_v55 = vpop.xlane.xlu0 %5421  ;;  %v6250_v61 = vperm.slane %v5426_v33, %v9780_v57  ;;  %v10458_v33 = vmax.f32 %v3854_v13, %v4372_v20  ;;  %v6129_v19 = vsel %vm5982_vm4, %v6128_v60, %v6127_v14 }
 0x51e   : > { %v6246_v7 = vperm.slane %v5422_v55, %v9752_v5  ;;  %v10464_v2 = vmax.f32 %v3823_v25, %v4341_v62  ;;  %v12188_v55 = vld [vmem:[#allocation46_spill] sm:$0xff]  ;;  %v6131_v60 = vsel %vm5986_vm5, %v6130_v17, %v6129_v19  ;;  %v6071_v14 = vsel %vm5990_vm6, %v6070_v36, %v6069_v35  ;;  %v12192_v17 = vld [vmem:[#allocation31_spill] sm:$0xff] }
 0x51f   : > { %v6132_v24 = vperm.slane %v12188_v55, %v9832_v59  ;;  %4884 = vst [vmem:[#allocation2 + $0x430] sm:$0xff] %v10458_v33  ;;  %v6073_v1 = vsel %vm5994_vm7, %v6072_v15, %v6071_v14  ;;  %v6134_v38 = vperm.slane %v12191_v12, %v9861_v32  ;;  %v6076_v13 = vperm.slane %v12192_v17, %v9884_v31  ;;  %v4111_v62 = vld [vmem:[%s8201_s26 + $0x750] sm:$0xff]  ;;  %v12195_v12 = vld [vmem:[#allocation49_spill] sm:$0xff] }
 0x520   : > { %v6247_v18 = vsel %vm5970_vm1, %v6246_v7, %v6245_v47  ;;  %v10471_v47 = vmax.f32 %v3792_v54, %v4310_v8  ;;  %4853 = vst [vmem:[#allocation2 + $0x428] sm:$0xff] %v10464_v2  ;;  %v4080_v54 = vld [vmem:[%s8201_s26 + $0x658] sm:$0xff]  ;;  %v12193_v8 = vld [vmem:[#allocation50_spill] sm:$0xff]  ;;  %v4373_v15 = vsel %vm4138_vm0, %v4111_v62, -inf }
 0x521   : > { %v6249_v39 = vsel %vm5974_vm2, %v6248_v9, %v6247_v18  ;;  %5621 = vmax.xlane.f32.xlu2 %v10281_v50  ;;  %5559 = vmax.xlane.f32.xlu1 %v10286_v10  ;;  %v12189_v50 = vld [vmem:[#allocation18_spill] sm:$0xff]  ;;  %v5999_v9 = vsel %vm12037_vm8, %v5997_v46, %v5995_v21  ;;  %v6133_v20 = vsel %vm5990_vm6, %v6132_v24, %v6131_v60  ;;  %v3824_v18 = vld [vmem:[#allocation2 + $0x170] sm:$0xff]  ;;  %v4342_v19 = vsel %vm4138_vm0, %v4080_v54, -inf  ;;  %v12194_v60 = vld [vmem:[#allocation36_spill] sm:$0xff] }
 0x522   : > { %5497 = vmax.xlane.f32.xlu0 %v10291_v28  ;;  %v6251_v52 = vsel %vm5978_vm3, %v6250_v61, %v6249_v39  ;;  %v6005_v10 = vperm.slane %v12189_v50, %v9919_v22  ;;  %v6074_v28 = vperm.slane %v12190_v48, %v9871_v41  ;;  %4822 = vst [vmem:[#allocation2 + $0x510] sm:$0xff] %v10471_v47  ;;  %v3793_v39 = vld [vmem:[#allocation2 + $0x750] sm:$0xff] }
 0x523   : > { %v6003_v30 = vsel %vm6002_vm9, %v6001_v23, %v5999_v9  ;;  %v4049_v23 = vld [vmem:[%s8201_s26 + $0x560] sm:$0xff]  ;;  %v6136_v35 = vperm.slane %v12193_v8, %v9871_v41  ;;  %v6078_v50 = vperm.slane %v12194_v60, %v9919_v22  ;;  %v10507_v48 = vmax.f32 %v3855_v42, %v4373_v15 }
 0x524   : > { %v5432_v61 = vpop.xlane.xlu2 %5431  ;;  %v5430_v7 = vpop.xlane.xlu1 %5429  ;;  %v4311_v55 = vsel %vm4138_vm0, %v4049_v23, -inf  ;;  %v6075_v24 = vsel %vm12037_vm8, %v6074_v28, %v6073_v1  ;;  %v6135_v14 = vsel %vm5994_vm7, %v6134_v38, %v6133_v20  ;;  %v6138_v28 = vperm.slane %v12195_v12, %v9884_v31  ;;  %v12199_v23 = vld [vmem:[#allocation48_spill] sm:$0xff]  ;;  %v3794_v12 = vld [vmem:[#allocation2 + $0x130] sm:$0xff] }
 0x525   : > { %v6254_v46 = vperm.slane %v5430_v7, %v9817_v26  ;;  %v5428_v21 = vpop.xlane.xlu0 %5427  ;;  %v6256_v36 = vperm.slane %v5432_v61, %v9832_v59  ;;  %v10513_v7 = vmax.f32 %v3824_v18, %v4342_v19  ;;  %4885 = vst [vmem:[#allocation2 + $0x578] sm:$0xff] %v10507_v48  ;;  %v6137_v38 = vsel %vm12037_vm8, %v6136_v35, %v6135_v14  ;;  %v12200_v35 = vld [vmem:[#allocation34_spill] sm:$0xff]  ;;  %v4112_v19 = vld [vmem:[%s8201_s26 + $0x758] sm:$0xff]  ;;  %v3825_v14 = vld [vmem:[#allocation2 + $0x7e0] sm:$0xff] }
 0x526   : > { %v6252_v25 = vperm.slane %v5428_v21, %v9807_v44  ;;  %v12197_v21 = vld [vmem:[#allocation35_spill] sm:$0xff]  ;;  %v6077_v17 = vsel %vm6002_vm9, %v6076_v13, %v6075_v24  ;;  %v6140_v8 = vperm.slane %v12199_v23, %v9919_v22  ;;  %v6082_v42 = vperm.slane %v12200_v35, %v9941_v45  ;;  %v12201_v24 = vld [vmem:[#allocation53_spill] sm:$0xff]  ;;  %v12207_v35 = vld [vmem:[#allocation38_spill] sm:$0xff] }
 0x527   : > { %4854 = vst [vmem:[#allocation2 + $0x170] sm:$0xff] %v10513_v7  ;;  %v6079_v54 = vsel %vm12039_vm10, %v6078_v50, %v6077_v17  ;;  %v6139_v13 = vsel %vm6002_vm9, %v6138_v28, %v6137_v38  ;;  %v6142_v60 = vperm.slane %v12201_v24, %v9931_v4  ;;  %v3856_v50 = vld [vmem:[#allocation2 + $0x608] sm:$0xff]  ;;  %v12209_v24 = vld [vmem:[#allocation51_spill] sm:$0xff] }
 0x528   : > { %v6253_v9 = vsel %vm5982_vm4, %v6252_v25, %v6251_v52  ;;  %v10520_v52 = vmax.f32 %v3793_v39, %v4311_v55  ;;  %v12198_v25 = vld [vmem:[#allocation22_spill] sm:$0xff]  ;;  %v4081_v39 = vld [vmem:[%s8201_s26 + $0x660] sm:$0xff] }
 0x529   : > { %v6255_v61 = vsel %vm5986_vm5, %v6254_v46, %v6253_v9  ;;  %5623 = vmax.xlane.f32.xlu2 %v10315_v27  ;;  %5561 = vmax.xlane.f32.xlu1 %v10322_v11  ;;  %v12196_v27 = vld [vmem:[#allocation17_spill] sm:$0xff]  ;;  %v6007_v46 = vsel %vm12039_vm10, %v6005_v10, %v6003_v30  ;;  %v6013_v62 = vperm.slane %v12198_v25, %v9941_v45  ;;  %v4050_v55 = vld [vmem:[%s8201_s26 + $0x568] sm:$0xff]  ;;  %v4374_v9 = vsel %vm4138_vm0, %v4112_v19, -inf }
 0x52a   : > { %5499 = vmax.xlane.f32.xlu0 %v10328_v34  ;;  %v6257_v1 = vsel %vm5990_vm6, %v6256_v36, %v6255_v61  ;;  %v6009_v11 = vperm.slane %v12196_v27, %v9931_v4  ;;  %v6080_v34 = vperm.slane %v12197_v21, %v9931_v4  ;;  %4823 = vst [vmem:[#allocation2 + $0x750] sm:$0xff] %v10520_v52  ;;  %v4343_v61 = vsel %vm4138_vm0, %v4081_v39, -inf  ;;  %v12203_v27 = vld [vmem:[#allocation39_spill] sm:$0xff]  ;;  %v12208_v19 = vld [vmem:[#allocation21_spill] sm:$0xff] }
 0x52b   : > { %v4312_v28 = vsel %vm4138_vm0, %v4050_v55, -inf  ;;  %v6084_v21 = vperm.slane %v12203_v27, %v9982_v40  ;;  %v10563_v23 = vmax.f32 %v3825_v14, %v4343_v61  ;;  %v6017_v39 = vperm.slane %v12208_v19, %v9982_v40  ;;  %v4113_v61 = vld [vmem:[%s8201_s26 + $0x760] sm:$0xff]  ;;  %v12213_v19 = vld [vmem:[#allocation56_spill] sm:$0xff] }
 0x52c   : > { %v5438_v20 = vpop.xlane.xlu2 %5437  ;;  %v5436_v36 = vpop.xlane.xlu1 %5435  ;;  %v6081_v38 = vsel %vm12202_vm14, %v6080_v34, %v6079_v54 }
 0x52d   : > { %v6260_v10 = vperm.slane %v5436_v36, %v9871_v41  ;;  %v5434_v30 = vpop.xlane.xlu0 %5433  ;;  %v6262_v15 = vperm.slane %v5438_v20, %v9884_v31  ;;  %v10557_v20 = vmax.f32 %v3856_v50, %v4374_v9  ;;  %v6141_v36 = vsel %vm12039_vm10, %v6140_v8, %v6139_v13  ;;  %4855 = vst [vmem:[#allocation2 + $0x7e0] sm:$0xff] %v10563_v23 }
 0x52e   : > { %v6258_v18 = vperm.slane %v5434_v30, %v9861_v32  ;;  %v12204_v30 = vld [vmem:[#allocation52_spill] sm:$0xff]  ;;  %v6143_v8 = vsel %vm12202_vm14, %v6142_v60, %v6141_v36  ;;  %v6083_v13 = vsel %vm12038_vm12, %v6082_v42, %v6081_v38  ;;  %v6146_v60 = vperm.slane %v12209_v24, %v9982_v40  ;;  %v12210_v38 = vld [vmem:[#allocation57_spill] sm:$0xff] }
 0x52f   : > { %v6144_v34 = vperm.slane %v12204_v30, %v9941_v45  ;;  %4886 = vst [vmem:[#allocation2 + $0x608] sm:$0xff] %v10557_v20  ;;  %v6085_v55 = vsel %vm6018_vm13, %v6084_v21, %v6083_v13  ;;  %v6148_v27 = vperm.slane %v12210_v38, %v9990_v51  ;;  %v3857_v21 = vld [vmem:[#allocation2 + $0x638] sm:$0xff]  ;;  %v3826_v36 = vld [vmem:[#allocation2 + $0x20] sm:$0xff]  ;;  %v6150_v24 = vperm.slane %v12213_v19, %v9996_v58 }
 0x530   : > { %v6259_v17 = vsel %vm5994_vm7, %v6258_v18, %v6257_v1  ;;  %v10570_v1 = vmax.f32 %v3794_v12, %v4312_v28  ;;  %v4082_v12 = vld [vmem:[%s8201_s26 + $0x668] sm:$0xff]  ;;  %v4051_v28 = vld [vmem:[%s8201_s26 + $0x570] sm:$0xff]  ;;  %v4052_v38 = vld [vmem:[%s8201_s26 + $0x578] sm:$0xff] }
 0x531   : > { %v6261_v25 = vsel %vm12037_vm8, %v6260_v10, %v6259_v17  ;;  %5625 = vmax.xlane.f32.xlu2 %v10353_v37  ;;  %5563 = vmax.xlane.f32.xlu1 %v10360_v43  ;;  %v12205_v37 = vld [vmem:[#allocation20_spill] sm:$0xff]  ;;  %vm12206_vm8 = vmmov %vm12202_vm14  ;;  %v6145_v9 = vsel %vm12038_vm12, %v6144_v34, %v6143_v8  ;;  %v4375_v17 = vsel %vm4138_vm0, %v4113_v61, -inf  ;;  %v4313_v30 = vsel %vm4138_vm0, %v4051_v28, -inf  ;;  %v12211_v34 = vld [vmem:[#allocation37_spill] sm:$0xff] }
 0x532   : > { %5501 = vmax.xlane.f32.xlu0 %v10367_v63  ;;  %v6263_v54 = vsel %vm6002_vm9, %v6262_v15, %v6261_v25  ;;  %v6021_v43 = vperm.slane %v12205_v37, %v9990_v51  ;;  %v6011_v10 = vsel %vm12206_vm8, %v6009_v11, %v6007_v46  ;;  %v6086_v63 = vperm.slane %v12207_v35, %v9990_v51  ;;  %v3795_v25 = vld [vmem:[#allocation2 + $0x28] sm:$0xff]  ;;  %v4083_v28 = vld [vmem:[%s8201_s26 + $0x670] sm:$0xff] }
 0x533   : > { %4824 = vst [vmem:[#allocation2 + $0x130] sm:$0xff] %v10570_v1  ;;  %v6015_v50 = vsel %vm12038_vm12, %v6013_v62, %v6011_v10  ;;  %v4344_v62 = vsel %vm4138_vm0, %v4082_v12, -inf  ;;  %v6088_v8 = vperm.slane %v12211_v34, %v9996_v58  ;;  %vm12212_vm8 = vcmask 982912   ;;  %v4114_v12 = vld [vmem:[%s8201_s26 + $0x768] sm:$0xff] }
 0x534   : > { %v5444_v15 = vpop.xlane.xlu2 %5443  ;;  %v5442_v18 = vpop.xlane.xlu1 %5441  ;;  %v6087_v37 = vsel %vm12212_vm8, %v6086_v63, %v6085_v55  ;;  %v10606_v35 = vmax.f32 %v3857_v21, %v4375_v17  ;;  %v6147_v13 = vsel %vm6018_vm13, %v6146_v60, %v6145_v9  ;;  %v6019_v55 = vsel %vm6018_vm13, %v6017_v39, %v6015_v50  ;;  %v3858_v21 = vld [vmem:[#allocation2 + $0x4b8] sm:$0xff] }
 0x535   : > { %v6266_v11 = vperm.slane %v5442_v18, %v9931_v4  ;;  %v5440_v46 = vpop.xlane.xlu0 %5439  ;;  %v6268_v42 = vperm.slane %v5444_v15, %v9941_v45  ;;  %v10612_v18 = vmax.f32 %v3826_v36, %v4344_v62  ;;  %v6149_v60 = vsel %vm12212_vm8, %v6148_v27, %v6147_v13  ;;  %v3827_v36 = vld [vmem:[#allocation2 + $0x308] sm:$0xff] }
 0x536   : > { %v6264_v14 = vperm.slane %v5440_v46, %v9919_v22  ;;  %4887 = vst [vmem:[#allocation2 + $0x638] sm:$0xff] %v10606_v35  ;;  %v6089_v46 = vsel %vm6026_vm15, %v6088_v8, %v6087_v37  ;;  %v6151_v39 = vsel %vm6026_vm15, %v6150_v24, %v6149_v60  ;;  %v4376_v17 = vsel %vm4138_vm0, %v4114_v12, -inf  ;;  %v4115_v60 = vld [vmem:[%s8201_s26 + $0x770] sm:$0xff]  ;;  %v3839_v45 = vld [vmem:[#allocation2 + $0x7e8] sm:$0xff] }
 0x537   : > { %4856 = vst [vmem:[#allocation2 + $0x20] sm:$0xff] %v10612_v18  ;;  %v4345_v62 = vsel %vm4138_vm0, %v4083_v28, -inf  ;;  %v10645_v8 = vmax.f32 %v3858_v21, %v4376_v17 }
 0x538   : > { %v6265_v10 = vsel %vm12039_vm10, %v6264_v14, %v6263_v54  ;;  %v10619_v54 = vmax.f32 %v3795_v25, %v4313_v30  ;;  %v4314_v25 = vsel %vm4138_vm0, %v4052_v38, -inf  ;;  %vm12218_vm10 = vcmask 982912  }
 0x539   : > { %v6267_v15 = vsel %vm12202_vm14, %v6266_v11, %v6265_v10  ;;  %5627 = vmax.xlane.f32.xlu2 %v10402_v16  ;;  %5565 = vmax.xlane.f32.xlu1 %v10409_v0  ;;  %v12214_v16 = vld [vmem:[#allocation23_spill] sm:$0xff]  ;;  %vm12215_vm14 = vmmov %vm12212_vm8  ;;  %vm12216_vm8 = vcmask 1041409   ;;  %v10651_v13 = vmax.f32 %v3827_v36, %v4345_v62  ;;  %4888 = vst [vmem:[#allocation2 + $0x4b8] sm:$0xff] %v10645_v8 }
 0x53a   : > { %5503 = vmax.xlane.f32.xlu0 %v10415_v53  ;;  %v6269_v63 = vsel %vm12038_vm12, %v6268_v42, %v6267_v15  ;;  %v6025_v0 = vperm.slane %v12214_v16, %v9996_v58  ;;  %4825 = vst [vmem:[#allocation2 + $0x28] sm:$0xff] %v10619_v54  ;;  %v6023_v14 = vsel %vm12215_vm14, %v6021_v43, %v6019_v55  ;;  %v3796_v43 = vld [vmem:[#allocation2 + $0x760] sm:$0xff]  ;;  %vm12081_vm14 = vcmask 1044484   ;;  %v4055_v62 = vld [vmem:[%s8201_s26 + $0x590] sm:$0xff] }
 0x53b   : > { %vm12217_vm12 = vcmask 1042434   ;;  %v10658_v24 = vmax.f32 %v3796_v43, %v4314_v25  ;;  %4857 = vst [vmem:[#allocation2 + $0x308] sm:$0xff] %v10651_v13  ;;  %v4054_v43 = vld [vmem:[%s8201_s26 + $0x588] sm:$0xff] }
 0x53c   : > { %v5450_v11 = vpop.xlane.xlu2 %5449  ;;  %v5448_v53 = vpop.xlane.xlu1 %5447  ;;  %v6027_v27 = vsel %vm6026_vm15, %v6025_v0, %v6023_v14  ;;  %v4116_v0 = vld [vmem:[%s8201_s26 + $0x778] sm:$0xff]  ;;  %v3828_v14 = vld [vmem:[#allocation2 + $0x88] sm:$0xff] }
 0x53d   : > { %v6272_v9 = vperm.slane %v5448_v53, %v9990_v51  ;;  %v5446_v42 = vpop.xlane.xlu0 %5445  ;;  %v6274_v50 = vperm.slane %v5450_v11, %v9996_v58  ;;  %v6494_v30 = vsel %vm12216_vm8, %v6089_v46, %v6027_v27  ;;  %4826 = vst [vmem:[#allocation2 + $0x760] sm:$0xff] %v10658_v24  ;;  %v4084_v11 = vld [vmem:[%s8201_s26 + $0x678] sm:$0xff]  ;;  %v3860_v53 = vld [vmem:[#allocation2 + $0x1f0] sm:$0xff]  ;;  %v4378_v46 = vsel %vm4138_vm0, %v4116_v0, -inf  ;;  %v3799_v25 = vld [vmem:[#allocation2 + $0x208] sm:$0xff] }
 0x53e   : > { %v6270_v61 = vperm.slane %v5446_v42, %v9982_v40  ;;  %v6496_v37 = vsel %vm12217_vm12, %v6151_v39, %v6494_v30  ;;  %v4377_v42 = vsel %vm4138_vm0, %v4115_v60, -inf  ;;  %v4346_v39 = vsel %vm4138_vm0, %v4084_v11, -inf  ;;  %v4095_v58 = vld [vmem:[%s8201_s26 + $0x6d0] sm:$0xff]  ;;  %v4064_v51 = vld [vmem:[%s8201_s26 + $0x5d8] sm:$0xff]  ;;  %v4033_v40 = vld [vmem:[%s8201_s26 + $0x4e0] sm:$0xff] }
 0x53f   : > { %v6498_v15 = vsel %vm6497_vm11, %v10227_v56, %v6496_v37  ;;  %v10687_v38 = vmax.f32 %v3828_v14, %v4346_v39  ;;  %v4317_v30 = vsel %vm4138_vm0, %v4055_v62, -inf  ;;  %v4316_v37 = vsel %vm4138_vm0, %v4054_v43, -inf  ;;  %v3830_v14 = vld [vmem:[#allocation2 + $0x6b0] sm:$0xff] }
 0x540   : > { %v6271_v34 = vsel %vm6018_vm13, %v6270_v61, %v6269_v63  ;;  %v10678_v61 = vmax.f32 %v3860_v53, %v4378_v46  ;;  %v4086_v53 = vld [vmem:[%s8201_s26 + $0x688] sm:$0xff]  ;;  %v4085_v46 = vld [vmem:[%s8201_s26 + $0x680] sm:$0xff]  ;;  %vm12221_vm11 = vcmask 720512   ;;  %vm12222_vm12 = vcmask 786112  }
 0x541   : > { %v6273_v10 = vsel %vm12218_vm10, %v6272_v9, %v6271_v34  ;;  %5629 = vmax.xlane.f32.xlu2 %v10458_v33  ;;  %5567 = vmax.xlane.f32.xlu1 %v10464_v2  ;;  %v3859_v9 = vld [vmem:[#allocation2 + $0x298] sm:$0xff]  ;;  %4858 = vst [vmem:[#allocation2 + $0x88] sm:$0xff] %v10687_v38  ;;  %v3798_v34 = vld [vmem:[#allocation2 + $0x228] sm:$0xff]  ;;  %v4348_v39 = vsel %vm4138_vm0, %v4086_v53, -inf  ;;  %vm12220_vm10 = vcmask 589312  }
 0x542   : > { %v6275_v19 = vsel %vm6026_vm15, %v6274_v50, %v6273_v10  ;;  %5505 = vmax.xlane.f32.xlu0 %v10471_v47  ;;  %v10683_v28 = vmax.f32 %v3859_v9, %v4377_v42  ;;  %4890 = vst [vmem:[#allocation2 + $0x1f0] sm:$0xff] %v10678_v61  ;;  %v3797_v10 = vld [vmem:[#allocation2 + $0x5d0] sm:$0xff]  ;;  %vm12259_vm8 = vmmov %vm12220_vm10 }
 0x543   : > { %v10662_v33 = vsel %vm12081_vm14, %v6275_v19, %v6498_v15  ;;  %v3800_v9 = vld [vmem:[#allocation2 + $0x290] sm:$0xff] }
 0x544   : > { %12219 = vst [vmem:[#allocation10_spill] sm:$0xff] %v10662_v33  ;;  %v5456_v2 = vpop.xlane.xlu2 %5455  ;;  %v5454_v63 = vpop.xlane.xlu1 %5453  ;;  %v3777_v33 = vld [vmem:[#allocation2 + $0x590] sm:$0xff] }
 0x545   : > { %v6279_v56 = vperm.slane %v5456_v2, %v9770_v29  ;;  %v6277_v55 = vperm.slane %v5454_v63, %v9752_v5  ;;  %v5452_v16 = vpop.xlane.xlu0 %5451  ;;  %4889 = vst [vmem:[#allocation2 + $0x298] sm:$0xff] %v10683_v28  ;;  %v10704_v2 = vmax.f32 %v3799_v25, %v4317_v30  ;;  %v4117_v30 = vld [vmem:[%s8201_s26 + $0x780] sm:$0xff] }
 0x546   : > { %v6276_v47 = vperm.slane %v5452_v16, %v8720_v3 }
 0x547   : > { %4829 = vst [vmem:[#allocation2 + $0x208] sm:$0xff] %v10704_v2 }
 0x548   : > { %v6278_v50 = vsel %vm5970_vm1, %v6277_v55, %v6276_v47 }
 0x549   : > { %5631 = vmax.xlane.f32.xlu2 %v10507_v48  ;;  %5569 = vmax.xlane.f32.xlu1 %v10513_v7  ;;  %v6280_v12 = vsel %vm5974_vm2, %v6279_v56, %v6278_v50  ;;  %v10709_v56 = vmax.f32 %v3798_v34, %v4316_v37  ;;  %v3829_v50 = vld [vmem:[#allocation2 + $0x6e8] sm:$0xff]  ;;  %v4087_v34 = vld [vmem:[%s8201_s26 + $0x690] sm:$0xff] }
 0x54a   : > { %5507 = vmax.xlane.f32.xlu0 %v10520_v52  ;;  %v4053_v52 = vld [vmem:[%s8201_s26 + $0x580] sm:$0xff]  ;;  %v3862_v37 = vld [vmem:[#allocation2 + $0x2d0] sm:$0xff] }
 0x54b   : > { %v4315_v15 = vsel %vm4138_vm0, %v4053_v52, -inf  ;;  %4828 = vst [vmem:[#allocation2 + $0x228] sm:$0xff] %v10709_v56 }
 0x54c   : > { %v5462_v27 = vpop.xlane.xlu2 %5461  ;;  %v5460_v21 = vpop.xlane.xlu1 %5459  ;;  %v10714_v16 = vmax.f32 %v3797_v10, %v4315_v15  ;;  %v3861_v15 = vld [vmem:[#allocation2] sm:$0xff] }
 0x54d   : > { %v6283_v48 = vperm.slane %v5460_v21, %v9807_v44  ;;  %v5458_v7 = vpop.xlane.xlu0 %5457  ;;  %v6285_v17 = vperm.slane %v5462_v27, %v9817_v26 }
 0x54e   : > { %v6281_v36 = vperm.slane %v5458_v7, %v9780_v57  ;;  %4827 = vst [vmem:[#allocation2 + $0x5d0] sm:$0xff] %v10714_v16  ;;  %v10736_v7 = vmax.f32 %v3830_v14, %v4348_v39  ;;  %v4057_v14 = vld [vmem:[%s8201_s26 + $0x5a0] sm:$0xff]  ;;  %v3863_v39 = vld [vmem:[#allocation2 + $0x650] sm:$0xff] }
 0x550   : > { %v6282_v19 = vsel %vm5978_vm3, %v6281_v36, %v6280_v12  ;;  %v4347_v12 = vsel %vm4138_vm0, %v4085_v46, -inf  ;;  %4860 = vst [vmem:[#allocation2 + $0x6b0] sm:$0xff] %v10736_v7 }
 0x551   : > { %v6284_v63 = vsel %vm5982_vm4, %v6283_v48, %v6282_v19  ;;  %5633 = vmax.xlane.f32.xlu2 %v10557_v20  ;;  %5571 = vmax.xlane.f32.xlu1 %v10563_v23  ;;  %v10741_v36 = vmax.f32 %v3829_v50, %v4347_v12  ;;  %v4379_v19 = vsel %vm4138_vm0, %v4117_v30, -inf  ;;  %v3832_v12 = vld [vmem:[#allocation2 + $0x108] sm:$0xff] }
 0x552   : > { %5509 = vmax.xlane.f32.xlu0 %v10570_v1  ;;  %v6286_v55 = vsel %vm5986_vm5, %v6285_v17, %v6284_v63  ;;  %v4056_v1 = vld [vmem:[%s8201_s26 + $0x598] sm:$0xff]  ;;  %v3831_v63 = vld [vmem:[#allocation2 + $0x300] sm:$0xff] }
 0x553   : > { %v4318_v42 = vsel %vm4138_vm0, %v4056_v1, -inf  ;;  %4859 = vst [vmem:[#allocation2 + $0x6e8] sm:$0xff] %v10741_v36 }
 0x554   : > { %v5468_v47 = vpop.xlane.xlu2 %5467  ;;  %v5466_v0 = vpop.xlane.xlu1 %5465  ;;  %v10731_v21 = vmax.f32 %v3800_v9, %v4318_v42  ;;  %v4119_v9 = vld [vmem:[%s8201_s26 + $0x790] sm:$0xff]  ;;  %v4088_v42 = vld [vmem:[%s8201_s26 + $0x698] sm:$0xff] }
 0x555   : > { %v6289_v20 = vperm.slane %v5466_v0, %v9861_v32  ;;  %v5464_v23 = vpop.xlane.xlu0 %5463  ;;  %v6291_v60 = vperm.slane %v5468_v47, %v9871_v41  ;;  %v4381_v50 = vsel %vm4138_vm0, %v4119_v9, -inf }
 0x556   : > { %v6287_v11 = vperm.slane %v5464_v23, %v9832_v59  ;;  %4830 = vst [vmem:[#allocation2 + $0x290] sm:$0xff] %v10731_v21  ;;  %v10763_v23 = vmax.f32 %v3861_v15, %v4379_v19  ;;  %v3864_v19 = vld [vmem:[#allocation2 + $0x480] sm:$0xff] }
 0x558   : > { %v6288_v27 = vsel %vm5990_vm6, %v6287_v11, %v6286_v55  ;;  %v4349_v55 = vsel %vm4138_vm0, %v4087_v34, -inf  ;;  %4891 = vst [vmem:[#allocation2] sm:$0xff] %v10763_v23 }
 0x559   : > { %v6290_v48 = vsel %vm5994_vm7, %v6289_v20, %v6288_v27  ;;  %5635 = vmax.xlane.f32.xlu2 %v10606_v35  ;;  %5573 = vmax.xlane.f32.xlu1 %v10612_v18  ;;  %v4350_v27 = vsel %vm4138_vm0, %v4088_v42, -inf }
 0x55a   : > { %5511 = vmax.xlane.f32.xlu0 %v10619_v54  ;;  %v6292_v17 = vsel %vm12220_vm10, %v6291_v60, %v6290_v48  ;;  %v4118_v54 = vld [vmem:[%s8201_s26 + $0x788] sm:$0xff]  ;;  %v10767_v60 = vmax.f32 %v3831_v63, %v4349_v55  ;;  %v3801_v48 = vld [vmem:[#allocation2 + $0x7a0] sm:$0xff]  ;;  %vm12271_vm10 = vmmov %vm12221_vm11 }
 0x55b   : > { %v4380_v10 = vsel %vm4138_vm0, %v4118_v54, -inf  ;;  %v3833_v55 = vld [vmem:[#allocation2 + $0x180] sm:$0xff] }
 0x55c   : > { %v5474_v62 = vpop.xlane.xlu2 %5473  ;;  %v5472_v43 = vpop.xlane.xlu1 %5471  ;;  %v10758_v0 = vmax.f32 %v3862_v37, %v4380_v10  ;;  %4861 = vst [vmem:[#allocation2 + $0x300] sm:$0xff] %v10767_v60  ;;  %v4120_v37 = vld [vmem:[%s8201_s26 + $0x798] sm:$0xff]  ;;  %v4089_v10 = vld [vmem:[%s8201_s26 + $0x6a0] sm:$0xff] }
 0x55d   : > { %v6295_v35 = vperm.slane %v5472_v43, %v9919_v22  ;;  %v5470_v18 = vpop.xlane.xlu0 %5469  ;;  %v6297_v52 = vperm.slane %v5474_v62, %v9931_v4  ;;  %v10787_v43 = vmax.f32 %v3863_v39, %v4381_v50  ;;  %v4382_v63 = vsel %vm4138_vm0, %v4120_v37, -inf  ;;  %v4121_v39 = vld [vmem:[%s8201_s26 + $0x7a0] sm:$0xff]  ;;  %v4090_v50 = vld [vmem:[%s8201_s26 + $0x6a8] sm:$0xff] }
 0x55e   : > { %v6293_v25 = vperm.slane %v5470_v18, %v9884_v31  ;;  %4892 = vst [vmem:[#allocation2 + $0x2d0] sm:$0xff] %v10758_v0  ;;  %v10792_v18 = vmax.f32 %v3832_v12, %v4350_v27  ;;  %v3865_v27 = vld [vmem:[#allocation2 + $0x3d8] sm:$0xff]  ;;  %v4357_v4 = vsel %vm4138_vm0, %v4095_v58, -inf  ;;  %v3808_v22 = vld [vmem:[#allocation2 + $0x260] sm:$0xff]  ;;  %v5677_v58 = vld [vmem:[%s12224_s1 + $0x10] sm:$0xff] }
 0x55f   : > { %4893 = vst [vmem:[#allocation2 + $0x650] sm:$0xff] %v10787_v43 }
 0x560   : > { %v6294_v47 = vsel %vm6002_vm9, %v6293_v25, %v6292_v17  ;;  %v4319_v17 = vsel %vm4138_vm0, %v4057_v14, -inf  ;;  %4862 = vst [vmem:[#allocation2 + $0x108] sm:$0xff] %v10792_v18 }
 0x561   : > { %v6296_v20 = vsel %vm12221_vm11, %v6295_v35, %v6294_v47  ;;  %5637 = vmax.xlane.f32.xlu2 %v10645_v8  ;;  %5575 = vmax.xlane.f32.xlu1 %v10651_v13  ;;  %v4351_v47 = vsel %vm4138_vm0, %v4089_v10, -inf  ;;  %vm12274_vm11 = vmmov %vm12259_vm8 }
 0x562   : > { %5513 = vmax.xlane.f32.xlu0 %v10658_v24  ;;  %v10770_v11 = vsel %vm12222_vm12, %v6297_v52, %v6296_v20  ;;  %v10796_v52 = vmax.f32 %v3801_v48, %v4319_v17  ;;  %v3802_v20 = vld [vmem:[#allocation2 + $0x80] sm:$0xff]  ;;  %v4383_v48 = vsel %vm4138_vm0, %v4121_v39, -inf  ;;  %v3834_v17 = vld [vmem:[#allocation2 + $0x490] sm:$0xff] }
 0x563   : > { %12223 = vst [vmem:[#allocation9_spill] sm:$0xff] %v10770_v11  ;;  %v4063_v11 = vld [vmem:[%s8201_s26 + $0x5d0] sm:$0xff] }
 0x564   : > { %v5488_v1 = vpop.xlane.xlu2 %5487  ;;  %v5486_v53 = vpop.xlane.xlu1 %5485  ;;  %4831 = vst [vmem:[#allocation2 + $0x7a0] sm:$0xff] %v10796_v52 }
 0x565   : > { %v6310_v8 = vperm.slane %v5488_v1, %v9770_v29  ;;  %v6308_v13 = vperm.slane %v5486_v53, %v9752_v5  ;;  %v5484_v46 = vpop.xlane.xlu0 %5483 }
 0x566   : > { %v6307_v24 = vperm.slane %v5484_v46, %v8720_v3 }
 0x568   : > { %v6309_v62 = vsel %vm5970_vm1, %v6308_v13, %v6307_v24  ;;  %v10818_v13 = vmax.f32 %v3833_v55, %v4351_v47 }
 0x569   : > { %5641 = vmax.xlane.f32.xlu2 %v10678_v61  ;;  %5639 = vmax.xlane.f32.xlu1 %v10683_v28  ;;  %v6311_v35 = vsel %vm5974_vm2, %v6310_v8, %v6309_v62  ;;  %v10814_v8 = vmax.f32 %v3864_v19, %v4382_v63  ;;  %v4352_v62 = vsel %vm4138_vm0, %v4090_v50, -inf  ;;  %v4122_v19 = vld [vmem:[%s8201_s26 + $0x7a8] sm:$0xff]  ;;  %v4091_v63 = vld [vmem:[%s8201_s26 + $0x6b0] sm:$0xff] }
 0x56a   : > { %5577 = vmax.xlane.f32.xlu0 %v10687_v38  ;;  %v4058_v38 = vld [vmem:[%s8201_s26 + $0x5a8] sm:$0xff]  ;;  %4863 = vst [vmem:[#allocation2 + $0x180] sm:$0xff] %v10818_v13 }
 0x56b   : > { %v4320_v1 = vsel %vm4138_vm0, %v4058_v38, -inf  ;;  %4894 = vst [vmem:[#allocation2 + $0x480] sm:$0xff] %v10814_v8 }
 0x56c   : > { %v5490_v25 = vpop.xlane.xlu2 %5489  ;;  %v5550_v54 = vpop.xlane.xlu1 %5549  ;;  %v10822_v46 = vmax.f32 %v3802_v20, %v4320_v1  ;;  %v3866_v20 = vld [vmem:[#allocation2 + $0x718] sm:$0xff]  ;;  %v4384_v1 = vsel %vm4138_vm0, %v4122_v19, -inf }
 0x56d   : > { %v6312_v61 = vperm.slane %v5490_v25, %v9780_v57  ;;  %v6370_v28 = vperm.slane %v5550_v54, %v9752_v5  ;;  %v5548_v30 = vpop.xlane.xlu0 %5547 }
 0x56e   : > { %v6369_v34 = vperm.slane %v5548_v30, %v8720_v3  ;;  %4832 = vst [vmem:[#allocation2 + $0x80] sm:$0xff] %v10822_v46 }
 0x56f   : > { %v6313_v15 = vsel %vm5978_vm3, %v6312_v61, %v6311_v35  ;;  %v3803_v35 = vld [vmem:[#allocation2 + $0x4c8] sm:$0xff]  ;;  %v10840_v61 = vmax.f32 %v3865_v27, %v4383_v48  ;;  %v4123_v48 = vld [vmem:[%s8201_s26 + $0x7b0] sm:$0xff] }
 0x570   : > { %v6371_v53 = vsel %vm5970_vm1, %v6370_v28, %v6369_v34  ;;  %v10844_v28 = vmax.f32 %v3834_v17, %v4352_v62  ;;  %v4092_v17 = vld [vmem:[%s8201_s26 + $0x6b8] sm:$0xff]  ;;  %v4061_v62 = vld [vmem:[%s8201_s26 + $0x5c0] sm:$0xff] }
 0x571   : > { %5519 = vmax.xlane.f32.xlu2 %v10704_v2  ;;  %5517 = vmax.xlane.f32.xlu1 %v10709_v56  ;;  %4895 = vst [vmem:[#allocation2 + $0x3d8] sm:$0xff] %v10840_v61  ;;  %v4323_v19 = vsel %vm4138_vm0, %v4061_v62, -inf  ;;  %v4062_v62 = vld [vmem:[%s8201_s26 + $0x5c8] sm:$0xff] }
 0x572   : > { %5515 = vmax.xlane.f32.xlu0 %v10714_v16  ;;  %v4059_v16 = vld [vmem:[%s8201_s26 + $0x5b0] sm:$0xff]  ;;  %4864 = vst [vmem:[#allocation2 + $0x490] sm:$0xff] %v10844_v28 }
 0x573   : > { %v4321_v25 = vsel %vm4138_vm0, %v4059_v16, -inf }
 0x574   : > { %v5614_v24 = vpop.xlane.xlu2 %5613  ;;  %v5612_v9 = vpop.xlane.xlu1 %5611  ;;  %v10848_v30 = vmax.f32 %v3803_v35, %v4321_v25 }
 0x575   : > { %v6432_v42 = vperm.slane %v5614_v24, %v9752_v5  ;;  %v6431_v2 = vperm.slane %v5612_v9, %v8720_v3  ;;  %v5552_v14 = vpop.xlane.xlu0 %5551  ;;  %v4353_v24 = vsel %vm4138_vm0, %v4091_v63, -inf  ;;  %v3804_v9 = vld [vmem:[#allocation2 + $0x3f0] sm:$0xff] }
 0x576   : > { %v6372_v56 = vperm.slane %v5552_v14, %v9770_v29  ;;  %4833 = vst [vmem:[#allocation2 + $0x4c8] sm:$0xff] %v10848_v30  ;;  %v5689_v63 = vld [vmem:[%s12224_s1 + $0x70] sm:$0xff] }
 0x577   : > { %v6433_v12 = vsel %vm5970_vm1, %v6432_v42, %v6431_v2  ;;  %v10865_v2 = vmax.f32 %v3866_v20, %v4384_v1  ;;  %v10916_v20 = vand.u32 4294901760, %v5689_v63 }
 0x578   : > { %v6373_v54 = vsel %vm5974_vm2, %v6372_v56, %v6371_v53  ;;  %v3835_v53 = vld [vmem:[#allocation2 + $0x570] sm:$0xff] }
 0x579   : > { %5521 = vmax.xlane.f32.xlu2 %v10731_v21  ;;  %5581 = vmax.xlane.f32.xlu1 %v10736_v7  ;;  %v10871_v56 = vmax.f32 %v3835_v53, %v4353_v24  ;;  %4896 = vst [vmem:[#allocation2 + $0x718] sm:$0xff] %v10865_v2  ;;  %v10930_v24 = vsub.f32 %v5689_v63, %v10916_v20 }
 0x57a   : > { %5579 = vmax.xlane.f32.xlu0 %v10741_v36  ;;  %v4060_v36 = vld [vmem:[%s8201_s26 + $0x5b8] sm:$0xff] }
 0x57b   : > { %v4322_v14 = vsel %vm4138_vm0, %v4060_v36, -inf  ;;  %4865 = vst [vmem:[#allocation2 + $0x570] sm:$0xff] %v10871_v56  ;;  %v5688_v36 = vld [vmem:[%s12224_s1 + $0x68] sm:$0xff] }
 0x57c   : > { %v5616_v34 = vpop.xlane.xlu2 %5615  ;;  %v5554_v37 = vpop.xlane.xlu1 %5553  ;;  %v10875_v39 = vmax.f32 %v3804_v9, %v4322_v14  ;;  %v10918_v1 = vand.u32 4294901760, %v5688_v36 }
 0x57d   : > { %v6434_v10 = vperm.slane %v5616_v34, %v9770_v29  ;;  %v6374_v21 = vperm.slane %v5554_v37, %v9780_v57  ;;  %v5492_v38 = vpop.xlane.xlu0 %5491  ;;  %v4385_v34 = vsel %vm4138_vm0, %v4123_v48, -inf  ;;  %v3836_v37 = vld [vmem:[#allocation2 + $0x500] sm:$0xff]  ;;  %v4124_v48 = vld [vmem:[%s8201_s26 + $0x7b8] sm:$0xff] }
 0x57e   : > { %v6314_v7 = vperm.slane %v5492_v38, %v9807_v44  ;;  %4834 = vst [vmem:[#allocation2 + $0x3f0] sm:$0xff] %v10875_v39  ;;  %v10933_v9 = vsub.f32 %v5688_v36, %v10918_v1  ;;  %v3868_v36 = vld [vmem:[#allocation2 + $0x190] sm:$0xff] }
 0x57f   : > { %v6435_v55 = vsel %vm5974_vm2, %v6434_v10, %v6433_v12  ;;  %v6375_v47 = vsel %vm5978_vm3, %v6374_v21, %v6373_v54  ;;  %v3867_v54 = vld [vmem:[#allocation2 + $0x7d0] sm:$0xff]  ;;  %v4354_v10 = vsel %vm4138_vm0, %v4092_v17, -inf  ;;  %v3805_v21 = vld [vmem:[#allocation2 + $0x798] sm:$0xff]  ;;  %v4093_v17 = vld [vmem:[%s8201_s26 + $0x6c0] sm:$0xff] }
 0x580   : > { %v6315_v42 = vsel %vm5982_vm4, %v6314_v7, %v6313_v15  ;;  %v10899_v7 = vmax.f32 %v3867_v54, %v4385_v34  ;;  %v10922_v53 = vmax.f32 %v3805_v21, %v4323_v19  ;;  %v12041_v54 = vand.u32 4294901760, %v10933_v9 }
 0x581   : > { %5645 = vmax.xlane.f32.xlu2 %v10758_v0  ;;  %5643 = vmax.xlane.f32.xlu1 %v10763_v23  ;;  %v5690_v0 = vld [vmem:[%s12224_s1 + $0x78] sm:$0xff] }
 0x582   : > { %5583 = vmax.xlane.f32.xlu0 %v10767_v60  ;;  %v10884_v60 = vand.u32 4294901760, %v5690_v0  ;;  %4897 = vst [vmem:[#allocation2 + $0x7d0] sm:$0xff] %v10899_v7 }
 0x583   : > { %4835 = vst [vmem:[#allocation2 + $0x798] sm:$0xff] %v10922_v53 }
 0x584   : > { %v5618_v15 = vpop.xlane.xlu2 %5617  ;;  %v5556_v50 = vpop.xlane.xlu1 %5555  ;;  %6517 = vmatpush.msra.mxu0 %v10884_v60  ;;  %6713 = vmatpush.msra.mxu3 %v10884_v60 }
 0x585   : > { %v6436_v23 = vperm.slane %v5618_v15, %v9780_v57  ;;  %v6376_v16 = vperm.slane %v5556_v50, %v9807_v44  ;;  %v5494_v12 = vpop.xlane.xlu0 %5493  ;;  %v5686_v15 = vld [vmem:[%s12224_s1 + $0x58] sm:$0xff] }
 0x586   : > { %v6316_v27 = vperm.slane %v5494_v12, %v9817_v26  ;;  %6519 = vmatpush.msra.mxu0 %v10916_v20  ;;  %6715 = vmatpush.msra.mxu3 %v10916_v20  ;;  %v12042_v12 = vand.u32 4294901760, %v10930_v24 }
 0x587   : > { %v6437_v35 = vsel %vm5978_vm3, %v6436_v23, %v6435_v55  ;;  %v6377_v25 = vsel %vm5982_vm4, %v6376_v16, %v6375_v47  ;;  %v10911_v55 = vmax.f32 %v3836_v37, %v4354_v10  ;;  %v10914_v47 = vsub.f32 %v5690_v0, %v10884_v60 }
 0x588   : > { %v6317_v38 = vsel %vm5986_vm5, %v6316_v27, %v6315_v42  ;;  %6521 = vmatpush.msra.mxu0 %v10918_v1  ;;  %v10960_v37 = vand.u32 4294901760, %v5686_v15  ;;  %6717 = vmatpush.msra.mxu3 %v10918_v1  ;;  %v6566_v63 = vsub.f32 %v10930_v24, %v12042_v12 }
 0x589   : > { %5647 = vmax.xlane.f32.xlu2 %v10787_v43  ;;  %5585 = vmax.xlane.f32.xlu1 %v10792_v18  ;;  %v5687_v43 = vld [vmem:[%s12224_s1 + $0x60] sm:$0xff]  ;;  %4866 = vst [vmem:[#allocation2 + $0x500] sm:$0xff] %v10911_v55  ;;  %v12043_v18 = vand.u32 4294901760, %v10914_v47 }
 0x58a   : > { %5523 = vmax.xlane.f32.xlu0 %v10796_v52  ;;  %v10935_v42 = vand.u32 4294901760, %v5687_v43  ;;  %6660 = vmatpush.msra.mxu2 %v10914_v47 }
 0x58b   : > { %v6560_v16 = vsub.f32 %v10914_v47, %v12043_v18  ;;  %v4125_v18 = vld [vmem:[%s8201_s26 + $0x7c0] sm:$0xff] }
 0x58c   : > { %v5620_v52 = vpop.xlane.xlu2 %5619  ;;  %v5558_v14 = vpop.xlane.xlu1 %5557  ;;  %6663 = vmatpush.msra.mxu2 %v10930_v24  ;;  %v10958_v34 = vsub.f32 %v5687_v43, %v10935_v42  ;;  %6523 = vmatpush.msra.mxu0 %v10935_v42 }
 0x58d   : > { %v6438_v50 = vperm.slane %v5620_v52, %v9807_v44  ;;  %v6378_v0 = vperm.slane %v5558_v14, %v9817_v26  ;;  %v5496_v23 = vpop.xlane.xlu0 %5495  ;;  %v6561_v19 = vand.u32 4294901760, %v6560_v16  ;;  %v3837_v52 = vld [vmem:[#allocation2 + $0xe8] sm:$0xff]  ;;  %v3806_v14 = vld [vmem:[#allocation2 + $0x378] sm:$0xff]  ;;  %6719 = vmatpush.msra.mxu3 %v10935_v42  ;;  %v3838_v44 = vld [vmem:[#allocation2 + $0x2f0] sm:$0xff] }
 0x58e   : > { %v6318_v27 = vperm.slane %v5496_v23, %v9832_v59  ;;  %6666 = vmatpush.msra.mxu2 %v10933_v9  ;;  %v5684_v23 = vld [vmem:[%s12224_s1 + $0x48] sm:$0xff]  ;;  %6525 = vmatpush.msra.mxu0 %v10960_v37 }
 0x58f   : > { %v10964_v10 = vsel %vm5982_vm4, %v6438_v50, %v6437_v35  ;;  %v10967_v21 = vsel %vm5986_vm5, %v6378_v0, %v6377_v25  ;;  %v4386_v35 = vsel %vm4138_vm0, %v4124_v48, -inf  ;;  %v4355_v25 = vsel %vm4138_vm0, %v4093_v17, -inf  ;;  %v5685_v0 = vld [vmem:[%s12224_s1 + $0x50] sm:$0xff]  ;;  %6562 = vmatpush.msra.mxu1 %v6561_v19  ;;  %6721 = vmatpush.msra.mxu3 %v10960_v37 }
 0x590   : > { %12225 = vst [vmem:[#allocation12_spill] sm:$0xff] %v10964_v10  ;;  %v10975_v43 = vsel %vm5990_vm6, %v6318_v27, %v6317_v38  ;;  %v4324_v50 = vsel %vm4138_vm0, %v4062_v62, -inf  ;;  %v6567_v38 = vand.u32 4294901760, %v6566_v63  ;;  %v10992_v16 = vmax.f32 %v3868_v36, %v4386_v35  ;;  %6669 = vmatpush.msra.mxu2 %v10958_v34  ;;  %v4034_v10 = vld [vmem:[%s8201_s26 + $0x4e8] sm:$0xff] }
 0x591   : > { %12226 = vst [vmem:[#allocation8_spill] sm:$0xff] %v10967_v21  ;;  %5649 = vmax.xlane.f32.xlu2 %v10814_v8  ;;  %5587 = vmax.xlane.f32.xlu1 %v10818_v13  ;;  %v10994_v27 = vmax.f32 %v3837_v52, %v4355_v25  ;;  %v6572_v48 = vsub.f32 %v10933_v9, %v12041_v54  ;;  %v12040_v17 = vand.u32 4294901760, %v10958_v34  ;;  %v11004_v8 = vand.u32 4294901760, %v5685_v0  ;;  %v5683_v13 = vld [vmem:[%s12224_s1 + $0x40] sm:$0xff] }
 0x592   : > { %12227 = vst [vmem:[#allocation11_spill] sm:$0xff] %v10975_v43  ;;  %5525 = vmax.xlane.f32.xlu0 %v10822_v46  ;;  %v11002_v62 = vsub.f32 %v5686_v15, %v10960_v37  ;;  %v11010_v63 = vmax.f32 %v3806_v14, %v4324_v50  ;;  %v11012_v46 = vand.u32 4294901760, %v5684_v23  ;;  %v11014_v19 = vand.u32 4294901760, %v5683_v13  ;;  %6568 = vmatpush.msra.mxu1 %v6567_v38 }
 0x593   : > { %4898 = vst [vmem:[#allocation2 + $0x190] sm:$0xff] %v10992_v16  ;;  %v6573_v52 = vand.u32 4294901760, %v6572_v48  ;;  %v6578_v35 = vsub.f32 %v10958_v34, %v12040_v17  ;;  %v11028_v14 = vsub.f32 %v5685_v0, %v11004_v8  ;;  %v5682_v17 = vld [vmem:[%s12224_s1 + $0x38] sm:$0xff]  ;;  %6527 = vmatpush.msra.mxu0 %v11004_v8  ;;  %6723 = vmatpush.msra.mxu3 %v11004_v8 }
 0x594   : > { %v11018_v15 = vpop.xlane.xlu2 %5621  ;;  %v11020_v36 = vpop.xlane.xlu1 %5559  ;;  %4867 = vst [vmem:[#allocation2 + $0xe8] sm:$0xff] %v10994_v27  ;;  %v12046_v25 = vand.u32 4294901760, %v11002_v62  ;;  %v11035_v38 = vsub.f32 %v5684_v23, %v11012_v46  ;;  %v11038_v48 = vsub.f32 %v5683_v13, %v11014_v19  ;;  %v3869_v23 = vld [vmem:[#allocation2 + $0x710] sm:$0xff]  ;;  %v4387_v13 = vsel %vm4138_vm0, %v4125_v18, -inf  ;;  %6672 = vmatpush.msra.mxu2 %v11002_v62 }
 0x595   : > { %v11031_v50 = vpop.xlane.xlu0 %5497  ;;  %4836 = vst [vmem:[#allocation2 + $0x378] sm:$0xff] %v11010_v63  ;;  %6574 = vmatpush.msra.mxu1 %v6573_v52  ;;  %v6579_v54 = vand.u32 4294901760, %v6578_v35  ;;  %v12051_v12 = vand.u32 4294901760, %v11028_v14  ;;  %v4356_v52 = vsel %vm4138_vm0, %v4094_v49, -inf  ;;  %v3807_v35 = vld [vmem:[#allocation2 + $0x160] sm:$0xff]  ;;  %v11060_v3 = vmax.f32 %v3869_v23, %v4387_v13  ;;  %v5681_v18 = vld [vmem:[%s12224_s1 + $0x30] sm:$0xff]  ;;  %6529 = vmatpush.msra.mxu0 %v11012_v46 }
 0x596   : > { %12228 = vst [vmem:[#allocation24_spill] sm:$0xff] %v11031_v50  ;;  %v6584_v0 = vsub.f32 %v11002_v62, %v12046_v25  ;;  %v5680_v49 = vld [vmem:[%s12224_s1 + $0x28] sm:$0xff]  ;;  %v12055_v23 = vand.u32 4294901760, %v11035_v38  ;;  %v12054_v13 = vand.u32 4294901760, %v11038_v48  ;;  %6675 = vmatpush.msra.mxu2 %v11028_v14  ;;  %6725 = vmatpush.msra.mxu3 %v11012_v46 }
 0x597   : > { %6580 = vmatpush.msra.mxu1 %v6579_v54  ;;  %v6590_v57 = vsub.f32 %v11028_v14, %v12051_v12  ;;  %v11071_v54 = vmax.f32 %v3838_v44, %v4356_v52  ;;  %4899 = vst [vmem:[#allocation2 + $0x710] sm:$0xff] %v11060_v3  ;;  %v5679_v44 = vld [vmem:[%s12224_s1 + $0x20] sm:$0xff]  ;;  %6531 = vmatpush.msra.mxu0 %v11014_v19  ;;  %v3870_v50 = vld [vmem:[#allocation2 + $0xa8] sm:$0xff] }
 0x598   : > { %v6585_v25 = vand.u32 4294901760, %v6584_v0  ;;  %v4325_v0 = vsel %vm4138_vm0, %v4063_v11, -inf  ;;  %v6596_v11 = vsub.f32 %v11035_v38, %v12055_v23  ;;  %v11113_v29 = vand.u32 4294901760, %v5679_v44  ;;  %6678 = vmatpush.msra.mxu2 %v11035_v38  ;;  %6727 = vmatpush.msra.mxu3 %v11014_v19 }
 0x599   : > { %5651 = vmax.xlane.f32.xlu2 %v10840_v61  ;;  %5589 = vmax.xlane.f32.xlu1 %v10844_v28  ;;  %v6591_v12 = vand.u32 4294901760, %v6590_v57  ;;  %v11079_v5 = vmax.f32 %v3807_v35, %v4325_v0  ;;  %v11081_v61 = vand.u32 4294901760, %v5682_v17  ;;  %v11083_v28 = vand.u32 4294901760, %v5681_v18  ;;  %4868 = vst [vmem:[#allocation2 + $0x2f0] sm:$0xff] %v11071_v54 }
 0x59a   : > { %5527 = vmax.xlane.f32.xlu0 %v10848_v30  ;;  %6586 = vmatpush.msra.mxu1 %v6585_v25  ;;  %v6602_v57 = vsub.f32 %v11038_v48, %v12054_v13  ;;  %v11095_v30 = vand.u32 4294901760, %v5680_v49  ;;  %v6597_v23 = vand.u32 4294901760, %v6596_v11 }
 0x59b   : > { %4837 = vst [vmem:[#allocation2 + $0x160] sm:$0xff] %v11079_v5  ;;  %v11105_v35 = vsub.f32 %v5682_v17, %v11081_v61  ;;  %v11108_v0 = vsub.f32 %v5681_v18, %v11083_v28  ;;  %6533 = vmatpush.msra.mxu0 %v11081_v61  ;;  %6681 = vmatpush.msra.mxu2 %v11038_v48 }
 0x59c   : > { %v11099_v25 = vpop.xlane.xlu2 %5623  ;;  %v11101_v52 = vpop.xlane.xlu1 %5561  ;;  %6592 = vmatpush.msra.mxu1 %v6591_v12  ;;  %v5678_v12 = vld [vmem:[%s12224_s1 + $0x18] sm:$0xff]  ;;  %v6603_v17 = vand.u32 4294901760, %v6602_v57  ;;  %v11126_v11 = vsub.f32 %v5680_v49, %v11095_v30  ;;  %v4326_v57 = vsel %vm4138_vm0, %v4064_v51, -inf  ;;  %v5676_v51 = vld [vmem:[%s12224_s1 + $0x8] sm:$0xff]  ;;  %6729 = vmatpush.msra.mxu3 %v11081_v61 }
 0x59d   : > { %12229 = vst [vmem:[#allocation27_spill] sm:$0xff] %v11099_v25  ;;  %v11111_v13 = vpop.xlane.xlu0 %5499  ;;  %6535 = vmatpush.msra.mxu0 %v11083_v28  ;;  %v12232_v18 = vand.u32 4294901760, %v11105_v35  ;;  %v12233_v49 = vand.u32 4294901760, %v11108_v0  ;;  %6684 = vmatpush.msra.mxu2 %v11105_v35  ;;  %v3778_v25 = vld [vmem:[#allocation2 + $0x660] sm:$0xff] }
 0x59e   : > { %12230 = vst [vmem:[#allocation16_spill] sm:$0xff] %v11101_v52  ;;  %6598 = vmatpush.msra.mxu1 %v6597_v23  ;;  %v11140_v23 = vmax.f32 %v3839_v45, %v4357_v4  ;;  %v4295_v4 = vsel %vm4138_vm0, %v4033_v40, -inf  ;;  %v12072_v45 = vand.u32 4294901760, %v11126_v11  ;;  %6731 = vmatpush.msra.mxu3 %v11083_v28 }
 0x59f   : > { %12231 = vst [vmem:[#allocation26_spill] sm:$0xff] %v11111_v13  ;;  %v6608_v31 = vsub.f32 %v11105_v35, %v12232_v18  ;;  %v6614_v52 = vsub.f32 %v11108_v0, %v12233_v49  ;;  %v11151_v18 = vmax.f32 %v3808_v22, %v4326_v57  ;;  %v11157_v49 = vsub.f32 %v5679_v44, %v11113_v29  ;;  %v5675_v22 = vld [vmem:[%s12224_s1] sm:$0xff]  ;;  %v3809_v13 = vld [vmem:[#allocation2 + $0x728] sm:$0xff] }
 0x5a0   : > { %6604 = vmatpush.msra.mxu1 %v6603_v17  ;;  %4869 = vst [vmem:[#allocation2 + $0x7e8] sm:$0xff] %v11140_v23  ;;  %v6620_v40 = vsub.f32 %v11126_v11, %v12072_v45  ;;  %6537 = vmatpush.msra.mxu0 %v11095_v30 }
 0x5a1   : > { %5653 = vmax.xlane.f32.xlu2 %v10865_v2  ;;  %5591 = vmax.xlane.f32.xlu1 %v10871_v56  ;;  %v6609_v43 = vand.u32 4294901760, %v6608_v31  ;;  %v6615_v21 = vand.u32 4294901760, %v6614_v52  ;;  %v11161_v2 = vmax.f32 %v3777_v33, %v4295_v4  ;;  %v11163_v56 = vand.u32 4294901760, %v5678_v12  ;;  %4838 = vst [vmem:[#allocation2 + $0x260] sm:$0xff] %v11151_v18 }
 0x5a2   : > { %5529 = vmax.xlane.f32.xlu0 %v10875_v39  ;;  %v12073_v39 = vand.u32 4294901760, %v11157_v49  ;;  %v11173_v31 = vand.u32 4294901760, %v5677_v58  ;;  %v11176_v33 = vand.u32 4294901760, %v5676_v51  ;;  %v6621_v4 = vand.u32 4294901760, %v6620_v40  ;;  %6539 = vmatpush.msra.mxu0 %v11113_v29 }
 0x5a3   : > { %6610 = vmatpush.msra.mxu1 %v6609_v43  ;;  %4807 = vst [vmem:[#allocation2 + $0x590] sm:$0xff] %v11161_v2  ;;  %v11185_v17 = vsub.f32 %v5678_v12, %v11163_v56  ;;  %6687 = vmatpush.msra.mxu2 %v11108_v0 }
 0x5a4   : > { %v11179_v44 = vpop.xlane.xlu2 %5625  ;;  %v11181_v52 = vpop.xlane.xlu1 %5563  ;;  %v6626_v45 = vsub.f32 %v11157_v49, %v12073_v39  ;;  %v11199_v12 = vsub.f32 %v5677_v58, %v11173_v31  ;;  %v11205_v40 = vsub.f32 %v5676_v51, %v11176_v33  ;;  %6541 = vmatpush.msra.mxu0 %v11163_v56  ;;  %6733 = vmatpush.msra.mxu3 %v11095_v30 }
 0x5a5   : > { %12234 = vst [vmem:[#allocation40_spill] sm:$0xff] %v11179_v44  ;;  %v11188_v57 = vpop.xlane.xlu0 %5501  ;;  %v11194_v44 = vand.u32 4294901760, %v5675_v22  ;;  %6616 = vmatpush.msra.mxu1 %v6615_v21  ;;  %v12076_v43 = vand.u32 4294901760, %v11185_v17  ;;  %6690 = vmatpush.msra.mxu2 %v11126_v11 }
 0x5a6   : > { %12235 = vst [vmem:[#allocation41_spill] sm:$0xff] %v11181_v52  ;;  %v4065_v52 = vld [vmem:[%s8201_s26 + $0x5e0] sm:$0xff]  ;;  %v6627_v39 = vand.u32 4294901760, %v6626_v45  ;;  %v12078_v58 = vand.u32 4294901760, %v11199_v12  ;;  %v4296_v45 = vsel %vm4138_vm0, %v4034_v10, -inf  ;;  %6543 = vmatpush.msra.mxu0 %v11173_v31  ;;  %6735 = vmatpush.msra.mxu3 %v11113_v29 }
 0x5a7   : > { %12236 = vst [vmem:[#allocation15_spill] sm:$0xff] %v11188_v57  ;;  %v4126_v57 = vld [vmem:[%s8201_s26 + $0x7c8] sm:$0xff]  ;;  %v4327_v41 = vsel %vm4138_vm0, %v4065_v52, -inf  ;;  %6622 = vmatpush.msra.mxu1 %v6621_v4  ;;  %v6632_v21 = vsub.f32 %v11185_v17, %v12076_v43  ;;  %v12077_v4 = vand.u32 4294901760, %v11205_v40  ;;  %v11227_v43 = vsub.f32 %v5675_v22, %v11194_v44  ;;  %6693 = vmatpush.msra.mxu2 %v11157_v49 }
 0x5a8   : > { %v11216_v51 = vmax.f32 %v3809_v13, %v4327_v41  ;;  %v4388_v52 = vsel %vm4138_vm0, %v4126_v57, -inf  ;;  %6545 = vmatpush.msra.mxu0 %v11176_v33  ;;  %6737 = vmatpush.msra.mxu3 %v11163_v56 }
 0x5a9   : > { %5655 = vmax.xlane.f32.xlu2 %v10899_v7  ;;  %5593 = vmax.xlane.f32.xlu1 %v10911_v55  ;;  %v6633_v41 = vand.u32 4294901760, %v6632_v21  ;;  %v6638_v7 = vsub.f32 %v11199_v12, %v12078_v58  ;;  %v11234_v55 = vmax.f32 %v3778_v25, %v4296_v45  ;;  %v11236_v10 = vmax.f32 %v3870_v50, %v4388_v52  ;;  %v4035_v45 = vld [vmem:[%s8201_s26 + $0x4f0] sm:$0xff] }
 0x5aa   : > { %5531 = vmax.xlane.f32.xlu0 %v10922_v53  ;;  %6628 = vmatpush.msra.mxu1 %v6627_v39  ;;  %4839 = vst [vmem:[#allocation2 + $0x728] sm:$0xff] %v11216_v51  ;;  %v6644_v13 = vsub.f32 %v11205_v40, %v12077_v4  ;;  %v12079_v22 = vand.u32 4294901760, %v11227_v43  ;;  %v4127_v52 = vld [vmem:[%s8201_s26 + $0x7d0] sm:$0xff]  ;;  %v3779_v4 = vld [vmem:[#allocation2 + $0x358] sm:$0xff]  ;;  %v4297_v58 = vsel %vm4138_vm0, %v4035_v45, -inf }
 0x5ab   : > { %v6639_v50 = vand.u32 4294901760, %v6638_v7  ;;  %4808 = vst [vmem:[#allocation2 + $0x660] sm:$0xff] %v11234_v55  ;;  %6696 = vmatpush.msra.mxu2 %v11185_v17  ;;  %6547 = vmatpush.msra.mxu0 %v11194_v44 }
 0x5ac   : > { %v11244_v53 = vpop.xlane.xlu2 %5627  ;;  %v11246_v39 = vpop.xlane.xlu1 %5565  ;;  %6634 = vmatpush.msra.mxu1 %v6633_v41  ;;  %4900 = vst [vmem:[#allocation2 + $0xa8] sm:$0xff] %v11236_v10  ;;  %v6645_v57 = vand.u32 4294901760, %v6644_v13  ;;  %v6650_v21 = vsub.f32 %v11227_v43, %v12079_v22  ;;  %v4096_v41 = vld [vmem:[%s8201_s26 + $0x6d8] sm:$0xff]  ;;  %v11265_v13 = vmax.f32 %v3779_v4, %v4297_v58  ;;  %6739 = vmatpush.msra.mxu3 %v11173_v31 }
 0x5ad   : > { %12237 = vst [vmem:[#allocation25_spill] sm:$0xff] %v11244_v53  ;;  %v11250_v25 = vpop.xlane.xlu0 %5503  ;;  %v3840_v53 = vld [vmem:[#allocation2 + $0x360] sm:$0xff]  ;;  %v4358_v22 = vsel %vm4138_vm0, %v4096_v41, -inf  ;;  %6699 = vmatpush.msra.mxu2 %v11199_v12  ;;  %v4128_v4 = vld [vmem:[%s8201_s26 + $0x7d8] sm:$0xff] }
 0x5ae   : > { %12238 = vst [vmem:[#allocation44_spill] sm:$0xff] %v11246_v39  ;;  %6640 = vmatpush.msra.mxu1 %v6639_v50  ;;  %v6651_v7 = vand.u32 4294901760, %v6650_v21  ;;  %v3871_v39 = vld [vmem:[#allocation2 + $0x2b8] sm:$0xff]  ;;  %v4389_v50 = vsel %vm4138_vm0, %v4127_v52, -inf  ;;  %v12239_v21 = vand.u32 4294901760, %v10914_v47  ;;  %v11279_v58 = vmax.f32 %v3840_v53, %v4358_v22  ;;  %v4066_v22 = vld [vmem:[%s8201_s26 + $0x5e8] sm:$0xff]  ;;  %6741 = vmatpush.msra.mxu3 %v11176_v33 }
 0x5af   : > { %v11275_v45 = vmax.f32 %v3871_v39, %v4389_v50  ;;  %4809 = vst [vmem:[#allocation2 + $0x358] sm:$0xff] %v11265_v13  ;;  %v12240_v47 = vand.u32 4294901760, %v10930_v24  ;;  %v4097_v24 = vld [vmem:[%s8201_s26 + $0x6e0] sm:$0xff]  ;;  %6702 = vmatpush.msra.mxu2 %v11205_v40  ;;  %v3872_v53 = vld [vmem:[#allocation2 + $0x238] sm:$0xff]  ;;  %v4390_v39 = vsel %vm4138_vm0, %v4128_v4, -inf  ;;  %v3810_v52 = vld [vmem:[#allocation2 + $0x288] sm:$0xff] }
 0x5b0   : > { %6646 = vmatpush.msra.mxu1 %v6645_v57  ;;  %6754 = vmatpush.msrb.mxu0 %v12239_v21  ;;  %4870 = vst [vmem:[#allocation2 + $0x360] sm:$0xff] %v11279_v58  ;;  %v3841_v57 = vld [vmem:[#allocation2 + $0x60] sm:$0xff]  ;;  %v4359_v41 = vsel %vm4138_vm0, %v4097_v24, -inf  ;;  %v12243_v50 = vand.u32 4294901760, %v11002_v62  ;;  %v4098_v21 = vld [vmem:[%s8201_s26 + $0x6e8] sm:$0xff]  ;;  %v12245_v62 = vand.u32 4294901760, %v11035_v38 }
 0x5b1   : > { %5657 = vmax.xlane.f32.xlu2 %v10992_v16  ;;  %5595 = vmax.xlane.f32.xlu1 %v10994_v27  ;;  %4901 = vst [vmem:[#allocation2 + $0x2b8] sm:$0xff] %v11275_v45  ;;  %v3842_v4 = vld [vmem:[#allocation2 + $0x210] sm:$0xff]  ;;  %v4360_v24 = vsel %vm4138_vm0, %v4098_v21, -inf  ;;  %v6380_v21 = vperm.slane %v11020_v36, %v9832_v59 }
 0x5b2   : > { %5533 = vmax.xlane.f32.xlu0 %v11010_v63  ;;  %6652 = vmatpush.msra.mxu1 %v6651_v7  ;;  %v4328_v7 = vsel %vm4138_vm0, %v4066_v22, -inf }
 0x5b3   : > { %6758 = vmatpush.msrb.mxu0 %v12240_v47  ;;  %6705 = vmatpush.msra.mxu2 %v11227_v43  ;;  %v4067_v47 = vld [vmem:[%s8201_s26 + $0x5f0] sm:$0xff] }
 0x5b4   : > { %6821 = vmatpush.msrb.mxu1 %v10884_v60  ;;  %v11285_v16 = vpop.xlane.xlu2 %5629  ;;  %v11287_v27 = vpop.xlane.xlu1 %5567  ;;  %v12241_v60 = vand.u32 4294901760, %v10933_v9  ;;  %v11307_v9 = vmax.f32 %v3872_v53, %v4390_v39  ;;  %6743 = vmatpush.msra.mxu3 %v11194_v44  ;;  %v4329_v22 = vsel %vm4138_vm0, %v4067_v47, -inf  ;;  %v3780_v53 = vld [vmem:[#allocation2 + $0x700] sm:$0xff]  ;;  %v12249_v47 = vld [vmem:[#allocation24_spill] sm:$0xff] }
 0x5b5   : > { %v11292_v63 = vpop.xlane.xlu0 %5505 }
 0x5b6   : > { %6823 = vmatpush.msrb.mxu1 %v10916_v20  ;;  %6762 = vmatpush.msrb.mxu0 %v12241_v60  ;;  %v12242_v20 = vand.u32 4294901760, %v10958_v34  ;;  %4902 = vst [vmem:[#allocation2 + $0x238] sm:$0xff] %v11307_v9  ;;  %v11322_v34 = vmax.f32 %v3810_v52, %v4328_v7  ;;  %v4036_v60 = vld [vmem:[%s8201_s26 + $0x4f8] sm:$0xff] }
 0x5b7   : > { %v4298_v38 = vsel %vm4138_vm0, %v4036_v60, -inf  ;;  %v4068_v52 = vld [vmem:[%s8201_s26 + $0x5f8] sm:$0xff]  ;;  %v6320_v60 = vperm.slane %v12249_v47, %v9861_v32 }
 0x5b8   : > { %6825 = vmatpush.msrb.mxu1 %v10918_v1  ;;  %6766 = vmatpush.msrb.mxu0 %v12242_v20  ;;  %v11317_v1 = vmax.f32 %v3841_v57, %v4359_v41  ;;  %4840 = vst [vmem:[#allocation2 + $0x288] sm:$0xff] %v11322_v34  ;;  %v4099_v57 = vld [vmem:[%s8201_s26 + $0x6f0] sm:$0xff]  ;;  %v4129_v20 = vld [vmem:[%s8201_s26 + $0x7e0] sm:$0xff] }
 0x5b9   : > { %5659 = vmax.xlane.f32.xlu2 %v11060_v3  ;;  %5597 = vmax.xlane.f32.xlu1 %v11071_v54  ;;  %v3843_v41 = vld [vmem:[#allocation2 + $0x4a0] sm:$0xff]  ;;  %v4361_v7 = vsel %vm4138_vm0, %v4099_v57, -inf }
 0x5ba   : > { %5535 = vmax.xlane.f32.xlu0 %v11079_v5  ;;  %6827 = vmatpush.msrb.mxu1 %v10935_v42  ;;  %4871 = vst [vmem:[#allocation2 + $0x60] sm:$0xff] %v11317_v1  ;;  %v12244_v42 = vand.u32 4294901760, %v11028_v14  ;;  %v11348_v14 = vmax.f32 %v3842_v4, %v4360_v24  ;;  %v12251_v4 = vld [vmem:[#allocation60_spill] sm:$0xff]  ;;  %v12252_v24 = vld [vmem:[#allocation26_spill] sm:$0xff] }
 0x5bb   : > { %6770 = vmatpush.msrb.mxu0 %v12243_v50  ;;  %v4330_v50 = vsel %vm4138_vm0, %v4068_v52, -inf }
 0x5bc   : > { %v11327_v3 = vpop.xlane.xlu2 %5631  ;;  %v11329_v54 = vpop.xlane.xlu1 %5569  ;;  %6829 = vmatpush.msrb.mxu1 %v10960_v37  ;;  %v3811_v37 = vld [vmem:[#allocation2 + $0x188] sm:$0xff]  ;;  %4872 = vst [vmem:[#allocation2 + $0x210] sm:$0xff] %v11348_v14 }
 0x5bd   : > { %v11333_v5 = vpop.xlane.xlu0 %5507  ;;  %6774 = vmatpush.msrb.mxu0 %v12244_v42  ;;  %v3873_v42 = vld [vmem:[#allocation2 + $0x1b0] sm:$0xff] }
 0x5be   : > { %6831 = vmatpush.msrb.mxu1 %v11004_v8  ;;  %v11352_v8 = vmax.f32 %v3811_v37, %v4329_v22  ;;  %v6322_v37 = vperm.slane %v12252_v24, %v12251_v4 }
 0x5bf   : > { %6778 = vmatpush.msrb.mxu0 %v12245_v62 }
 0x5c0   : > { %6833 = vmatpush.msrb.mxu1 %v11012_v46  ;;  %v11359_v46 = vmax.f32 %v3780_v53, %v4298_v38  ;;  %4841 = vst [vmem:[#allocation2 + $0x188] sm:$0xff] %v11352_v8  ;;  %v12255_v53 = vld [vmem:[#allocation8_spill] sm:$0xff] }
 0x5c1   : > { %5599 = vmax.xlane.f32.xlu2 %v11140_v23  ;;  %5537 = vmax.xlane.f32.xlu1 %v11151_v18  ;;  %v12246_v23 = vand.u32 4294901760, %v11038_v48  ;;  %v12248_v48 = vand.u32 4294901760, %v11108_v0  ;;  %v4391_v0 = vsel %vm4138_vm0, %v4129_v20, -inf  ;;  %v6381_v38 = vsel %vm5990_vm6, %v6380_v21, %v12255_v53  ;;  %v12263_v21 = vld [vmem:[#allocation41_spill] sm:$0xff]  ;;  %v12267_v53 = vld [vmem:[#allocation63_spill] sm:$0xff] }
 0x5c2   : > { %5475 = vmax.xlane.f32.xlu0 %v11161_v2  ;;  %6835 = vmatpush.msrb.mxu1 %v11014_v19  ;;  %4810 = vst [vmem:[#allocation2 + $0x700] sm:$0xff] %v11359_v46  ;;  %v12247_v19 = vand.u32 4294901760, %v11105_v35  ;;  %v6440_v35 = vperm.slane %v11018_v15, %v9817_v26  ;;  %v12250_v15 = vld [vmem:[#allocation27_spill] sm:$0xff]  ;;  %v11406_v36 = vmax.f32 %v3873_v42, %v4391_v0  ;;  %v12258_v20 = vand.u32 4294901760, %v11157_v49  ;;  %v4130_v0 = vld [vmem:[%s8201_s26 + $0x7e8] sm:$0xff] }
 0x5c3   : > { %6782 = vmatpush.msrb.mxu0 %v12246_v23  ;;  %v6384_v47 = vperm.slane %v12263_v21, %v12251_v4  ;;  %v12264_v49 = vld [vmem:[#allocation62_spill] sm:$0xff] }
 0x5c4   : > { %v11364_v18 = vpop.xlane.xlu2 %5633  ;;  %v11366_v39 = vpop.xlane.xlu1 %5571  ;;  %6837 = vmatpush.msrb.mxu1 %v11081_v61  ;;  %v3812_v61 = vld [vmem:[#allocation2 + $0x408] sm:$0xff]  ;;  %4903 = vst [vmem:[#allocation2 + $0x1b0] sm:$0xff] %v11406_v36 }
 0x5c5   : > { %v11370_v2 = vpop.xlane.xlu0 %5509  ;;  %6786 = vmatpush.msrb.mxu0 %v12247_v19  ;;  %v11397_v62 = vmax.f32 %v3812_v61, %v4330_v50  ;;  %v12257_v19 = vld [vmem:[#allocation16_spill] sm:$0xff]  ;;  %v12261_v61 = vld [vmem:[#allocation61_spill] sm:$0xff]  ;;  %v12262_v50 = vld [vmem:[#allocation15_spill] sm:$0xff] }
 0x5c6   : > { %6839 = vmatpush.msrb.mxu1 %v11083_v28  ;;  %v11387_v28 = vmax.f32 %v3843_v41, %v4361_v7  ;;  %v6382_v57 = vperm.slane %v12257_v19, %v9861_v32  ;;  %v12260_v41 = vld [vmem:[#allocation40_spill] sm:$0xff]  ;;  %v6324_v42 = vperm.slane %v12262_v50, %v12261_v61 }
 0x5c7   : > { %6790 = vmatpush.msrb.mxu0 %v12248_v48  ;;  %4842 = vst [vmem:[#allocation2 + $0x408] sm:$0xff] %v11397_v62  ;;  %v6444_v7 = vperm.slane %v12260_v41, %v9861_v32  ;;  %v12268_v19 = vld [vmem:[#allocation44_spill] sm:$0xff] }
 0x5c8   : > { %6841 = vmatpush.msrb.mxu1 %v11095_v30  ;;  %v6442_v30 = vperm.slane %v12250_v15, %v9832_v59  ;;  %4873 = vst [vmem:[#allocation2 + $0x4a0] sm:$0xff] %v11387_v28  ;;  %v12265_v15 = vand.u32 4294901760, %v11185_v17  ;;  %v3875_v17 = vld [vmem:[#allocation2 + $0x580] sm:$0xff]  ;;  %v12269_v41 = vld [vmem:[#allocation64_spill] sm:$0xff] }
 0x5c9   : > { %5539 = vmax.xlane.f32.xlu2 %v11216_v51  ;;  %5477 = vmax.xlane.f32.xlu1 %v11234_v55  ;;  %v12253_v51 = vand.u32 4294901760, %v11126_v11  ;;  %v12256_v11 = vld [vmem:[#allocation11_spill] sm:$0xff]  ;;  %v6330_v50 = vperm.slane %v11333_v5, %v12269_v41  ;;  %v6383_v5 = vsel %vm5994_vm7, %v6382_v57, %v6381_v38 }
 0x5ca   : > { %5661 = vmax.xlane.f32.xlu0 %v11236_v10  ;;  %6843 = vmatpush.msrb.mxu1 %v11113_v29  ;;  %v12254_v29 = vld [vmem:[#allocation12_spill] sm:$0xff]  ;;  %v6321_v23 = vsel %vm5994_vm7, %v6320_v60, %v12256_v11  ;;  %v6326_v60 = vperm.slane %v11250_v25, %v12264_v49  ;;  %v6328_v11 = vperm.slane %v11292_v63, %v12267_v53  ;;  %v12270_v63 = vld [vmem:[#allocation65_spill] sm:$0xff] }
 0x5cb   : > { %6794 = vmatpush.msrb.mxu0 %v12253_v51  ;;  %v6441_v10 = vsel %vm5986_vm5, %v6440_v35, %v12254_v29  ;;  %v6323_v48 = vsel %vm12259_vm8, %v6322_v37, %v6321_v23  ;;  %v4100_v35 = vld [vmem:[%s8201_s26 + $0x6f8] sm:$0xff]  ;;  %v3874_v37 = vld [vmem:[#allocation2 + $0x5e0] sm:$0xff]  ;;  %v4392_v51 = vsel %vm4138_vm0, %v4130_v0, -inf  ;;  %v6332_v0 = vperm.slane %v11370_v2, %v12270_v63 }
 0x5cc   : > { %v11411_v55 = vpop.xlane.xlu2 %5635  ;;  %v11413_v22 = vpop.xlane.xlu1 %5573  ;;  %6845 = vmatpush.msrb.mxu1 %v11163_v56  ;;  %v6443_v56 = vsel %vm5990_vm6, %v6442_v30, %v6441_v10  ;;  %v3844_v30 = vld [vmem:[#allocation2 + $0x748] sm:$0xff]  ;;  %v4362_v24 = vsel %vm4138_vm0, %v4100_v35, -inf  ;;  %v12266_v29 = vld [vmem:[#allocation25_spill] sm:$0xff]  ;;  %v11462_v35 = vmax.f32 %v3874_v37, %v4392_v51  ;;  %v4132_v37 = vld [vmem:[%s8201_s26 + $0x7f8] sm:$0xff]  ;;  %v6388_v51 = vperm.slane %v11287_v27, %v12264_v49 }
 0x5cd   : > { %v5512_v52 = vpop.xlane.xlu0 %5511  ;;  %6798 = vmatpush.msrb.mxu0 %v12258_v20  ;;  %v6446_v10 = vperm.slane %v12266_v29, %v12251_v4  ;;  %v11452_v25 = vmax.f32 %v3844_v30, %v4362_v24  ;;  %v6386_v20 = vperm.slane %v12268_v19, %v12261_v61  ;;  %v12273_v30 = vand.u32 4294901760, %v11199_v12  ;;  %v12280_v19 = vld [vmem:[#allocation10_spill] sm:$0xff] }
 0x5ce   : > { %6847 = vmatpush.msrb.mxu1 %v11173_v31  ;;  %v4131_v31 = vld [vmem:[%s8201_s26 + $0x7f0] sm:$0xff]  ;;  %4904 = vst [vmem:[#allocation2 + $0x5e0] sm:$0xff] %v11462_v35 }
 0x5cf   : > { %6802 = vmatpush.msrb.mxu0 %v12265_v15  ;;  %v4393_v23 = vsel %vm4138_vm0, %v4131_v31, -inf  ;;  %4874 = vst [vmem:[#allocation2 + $0x748] sm:$0xff] %v11452_v25  ;;  %v6450_v31 = vperm.slane %v11327_v3, %v12264_v49  ;;  %v6392_v3 = vperm.slane %v11366_v39, %v12269_v41 }
 0x5d0   : > { %6849 = vmatpush.msrb.mxu1 %v11176_v33  ;;  %v6325_v33 = vsel %vm6002_vm9, %v6324_v42, %v6323_v48  ;;  %v11470_v21 = vmax.f32 %v3875_v17, %v4393_v23  ;;  %v6452_v17 = vperm.slane %v11364_v18, %v12267_v53  ;;  %v6394_v18 = vperm.slane %v11413_v22, %v12270_v63 }
 0x5d1   : > { %5479 = vmax.xlane.f32.xlu2 %v11265_v13  ;;  %5663 = vmax.xlane.f32.xlu1 %v11275_v45  ;;  %v6327_v13 = vsel %vm12271_vm10, %v6326_v60, %v6325_v33  ;;  %v12272_v45 = vld [vmem:[#allocation66_spill] sm:$0xff]  ;;  %vm12275_vm10 = vcmask 851712   ;;  %v12276_v60 = vand.u32 4294901760, %v11205_v40  ;;  %v12279_v40 = vand.u32 4294901760, %v11227_v43 }
 0x5d2   : > { %5601 = vmax.xlane.f32.xlu0 %v11279_v58  ;;  %6851 = vmatpush.msrb.mxu1 %v11194_v44  ;;  %v6334_v15 = vperm.slane %v5512_v52, %v12272_v45  ;;  %v6445_v58 = vsel %vm5994_vm7, %v6444_v7, %v6443_v56  ;;  %v6385_v44 = vsel %vm12274_vm11, %v6384_v47, %v6383_v5  ;;  %vm12080_vm11 = vcmask 1045509   ;;  %v12277_v47 = vld [vmem:[#allocation67_spill] sm:$0xff] }
 0x5d3   : > { %6806 = vmatpush.msrb.mxu0 %v12273_v30  ;;  %v6329_v2 = vsel %vm12222_vm12, %v6328_v11, %v6327_v13  ;;  %4905 = vst [vmem:[#allocation2 + $0x580] sm:$0xff] %v11470_v21  ;;  %v6447_v38 = vsel %vm12259_vm8, %v6446_v10, %v6445_v58  ;;  %v6387_v57 = vsel %vm6002_vm9, %v6386_v20, %v6385_v44  ;;  %vm12278_vm12 = vcmask 982912   ;;  %v3876_v10 = vld [vmem:[#allocation2 + $0x150] sm:$0xff] }
 0x5d4   : > { %v5638_v48 = vpop.xlane.xlu2 %5637  ;;  %v5576_v42 = vpop.xlane.xlu1 %5575  ;;  %v6331_v12 = vsel %vm12275_vm10, %v6330_v50, %v6329_v2  ;;  %v6448_v56 = vperm.slane %v11285_v16, %v12261_v61  ;;  %v4394_v16 = vsel %vm4138_vm0, %v4132_v37, -inf  ;;  %v6390_v11 = vperm.slane %v11329_v54, %v12267_v53  ;;  %v12290_v37 = vld [vmem:[#allocation54_spill] sm:$0xff] }
 0x5d5   : > { %v5514_v52 = vpop.xlane.xlu0 %5513  ;;  %6810 = vmatpush.msrb.mxu0 %v12276_v60  ;;  %v6333_v7 = vsel %vm6018_vm13, %v6332_v0, %v6331_v12  ;;  %v11506_v23 = vmax.f32 %v3876_v10, %v4394_v16  ;;  %v6454_v43 = vperm.slane %v11411_v55, %v12269_v41  ;;  %v6456_v20 = vperm.slane %v5638_v48, %v12270_v63 }
 0x5d6   : > { %v6336_v24 = vperm.slane %v5514_v52, %v12277_v47  ;;  %v6335_v29 = vsel %vm12278_vm12, %v6334_v15, %v6333_v7  ;;  %v6449_v54 = vsel %vm6002_vm9, %v6448_v56, %v6447_v38  ;;  %vm12281_vm0 = vcmask 720512   ;;  %v12289_v7 = vld [vmem:[#allocation55_spill] sm:$0xff] }
 0x5d7   : > { %6814 = vmatpush.msrb.mxu0 %v12279_v40  ;;  %4906 = vst [vmem:[#allocation2 + $0x150] sm:$0xff] %v11506_v23  ;;  %v6389_v39 = vsel %vm12281_vm0, %v6388_v51, %v6387_v57  ;;  %vm12282_vm8 = vmmov %vm12281_vm0  ;;  %v6396_v50 = vperm.slane %v5576_v42, %v12272_v45  ;;  %vm12283_vm10 = vcmask 786112   ;;  %vm6503_vm0 = vcmask 1046534   ;;  %v12291_v40 = vld [vmem:[#allocation7_spill] sm:$0xff] }
 0x5d8   : > { %v6337_v27 = vsel %vm6026_vm15, %v6336_v24, %v6335_v29  ;;  %v6451_v55 = vsel %vm12282_vm8, %v6450_v31, %v6449_v54  ;;  %vm12284_vm12 = vmmov %vm12283_vm10  ;;  %vm12287_vm8 = vcmask 982912  }
 0x5d9   : > { %v6502_v6 = vsel %vm12080_vm11, %v6337_v27, %v12280_v19  ;;  %5665 = vmax.xlane.f32.xlu2 %v11307_v9  ;;  %5603 = vmax.xlane.f32.xlu1 %v11317_v1  ;;  %v6391_v9 = vsel %vm12283_vm10, %v6390_v11, %v6389_v39  ;;  %v6453_v1 = vsel %vm12284_vm12, %v6452_v17, %v6451_v55  ;;  %vm12285_vm11 = vcmask 851712   ;;  %vm12288_vm10 = vmmov %vm12287_vm8 }
 0x5da   : > { %5541 = vmax.xlane.f32.xlu0 %v11322_v34  ;;  %v6393_v22 = vsel %vm12285_vm11, %v6392_v3, %v6391_v9  ;;  %vm12286_vm14 = vmmov %vm12285_vm11  ;;  %vm6505_vm12 = vcmask 1047559   ;;  %v12292_v3 = vld [vmem:[#allocation58_spill] sm:$0xff] }
 0x5db   : > { %v6455_v5 = vsel %vm12286_vm14, %v6454_v43, %v6453_v1  ;;  %v6395_v30 = vsel %vm6018_vm13, %v6394_v18, %v6393_v22  ;;  %v12293_v22 = vld [vmem:[#allocation59_spill] sm:$0xff] }
 0x5dc   : > { %v5642_v33 = vpop.xlane.xlu2 %5641  ;;  %v5640_v0 = vpop.xlane.xlu1 %5639  ;;  %v6457_v58 = vsel %vm6018_vm13, %v6456_v20, %v6455_v5  ;;  %v6397_v2 = vsel %vm12287_vm8, %v6396_v50, %v6395_v30 }
 0x5dd   : > { %v6460_v34 = vperm.slane %v5642_v33, %v12277_v47  ;;  %v6458_v13 = vperm.slane %v5640_v0, %v12272_v45  ;;  %v5578_v15 = vpop.xlane.xlu0 %5577 }
 0x5de   : > { %v6398_v44 = vperm.slane %v5578_v15, %v12277_v47 }
 0x5df   : > { %v6459_v48 = vsel %vm12288_vm10, %v6458_v13, %v6457_v58  ;;  %vm12315_vm10 = vcmask 1045509  }
 0x5e0   : > { %v6461_v42 = vsel %vm6026_vm15, %v6460_v34, %v6459_v48  ;;  %v6399_v38 = vsel %vm6026_vm15, %v6398_v44, %v6397_v2 }
 0x5e1   : > { %v6504_v57 = vsel %vm6503_vm0, %v6399_v38, %v6502_v6  ;;  %5605 = vmax.xlane.f32.xlu2 %v11348_v14  ;;  %5543 = vmax.xlane.f32.xlu1 %v11352_v8 }
 0x5e2   : > { %5481 = vmax.xlane.f32.xlu0 %v11359_v46  ;;  %v6506_v12 = vsel %vm6505_vm12, %v6461_v42, %v6504_v57 }
 0x5e3   : > { %v6548_v52 = vand.u32 4294901760, %v6506_v12 }
 0x5e4   : > { %v5520_v60 = vpop.xlane.xlu2 %5519  ;;  %v5518_v56 = vpop.xlane.xlu1 %5517 }
 0x5e5   : > { %v6341_v24 = vperm.slane %v5520_v60, %v12289_v7  ;;  %v6339_v51 = vperm.slane %v5518_v56, %v12290_v37  ;;  %6654 = vmatmul.f32.vlgmr.msra.gmra.mxu1 %v6548_v52  ;;  %v5516_v31 = vpop.xlane.xlu0 %5515  ;;  %v6549_v29 = vsub.f32 %v6506_v12, %v6548_v52 }
 0x5e6   : > { %v6338_v10 = vperm.slane %v5516_v31, %v12291_v40 }
 0x5e7   : > { %6708 = vmatmul.f32.vlgmr.msra.gmra.mxu2 %v6549_v29  ;;  %v6550_v14 = vand.u32 4294901760, %v6549_v29 }
 0x5e8   : > { %v6340_v8 = vsel %vm5970_vm1, %v6339_v51, %v6338_v10 }
 0x5e9   : > { %6747 = vmatmul.f32.vlgmr.msra.gmra.mxu3 %v6550_v14  ;;  %5607 = vmax.xlane.f32.xlu2 %v11387_v28  ;;  %v6342_v46 = vsel %vm5974_vm2, %v6341_v24, %v6340_v8  ;;  %v6551_v16 = vsub.f32 %v6549_v29, %v6550_v14  ;;  %v5706_v29 = vld [vmem:[%s12224_s1 + $0xf8] sm:$0xff] }
 0x5ea   : > { %5545 = vmax.xlane.f32.xlu1 %v11397_v62  ;;  %5667 = vmax.xlane.f32.xlu0 %v11406_v36  ;;  %v11586_v14 = vand.u32 4294901760, %v5706_v29 }
 0x5eb   : > { %v6552_v11 = vand.u32 4294901760, %v6551_v16 }
 0x5ec   : > { %v5522_v17 = vpop.xlane.xlu2 %5521  ;;  %v5582_v27 = vpop.xlane.xlu1 %5581  ;;  %6858 = vmatpush.msrb.mxu2 %v11586_v14  ;;  %7054 = vmatpush.msra.mxu1 %v11586_v14 }
 0x5ed   : > { %v6343_v43 = vperm.slane %v5522_v17, %v12292_v3  ;;  %v6401_v19 = vperm.slane %v5582_v27, %v12290_v37  ;;  %6553 = vmatmul.f32.vlgmr.msra.gmra.mxu0 %v6552_v11  ;;  %6853 = vmatmul.f32.vlgmr.msrb.gmra.mxu1 %v6548_v52  ;;  %v5580_v6 = vpop.xlane.xlu0 %5579  ;;  %v5705_v11 = vld [vmem:[%s12224_s1 + $0xf0] sm:$0xff]  ;;  %v11595_v27 = vsub.f32 %v5706_v29, %v11586_v14 }
 0x5ee   : > { %v6400_v54 = vperm.slane %v5580_v6, %v12291_v40 }
 0x5ef   : > { %v6344_v28 = vsel %vm5978_vm3, %v6343_v43, %v6342_v46  ;;  %7001 = vmatpush.msra.mxu0 %v11595_v27 }
 0x5f0   : > { %v6402_v18 = vsel %vm5970_vm1, %v6401_v19, %v6400_v54  ;;  %v5704_v19 = vld [vmem:[%s12224_s1 + $0xe8] sm:$0xff]  ;;  %v6900_v54 = vand.u32 4294901760, %v11595_v27 }
 0x5f1   : > { %5671 = vmax.xlane.f32.xlu2 %v11470_v21 }
 0x5f2   : > { %5609 = vmax.xlane.f32.xlu1 %v11452_v25  ;;  %5669 = vmax.xlane.f32.xlu0 %v11462_v35 }
 0x5f4   : > { %v5646_v62 = vpop.xlane.xlu2 %5645  ;;  %v5644_v36 = vpop.xlane.xlu1 %5643 }
 0x5f5   : > { %v6463_v20 = vperm.slane %v5646_v62, %v12290_v37  ;;  %v6462_v39 = vperm.slane %v5644_v36, %v12291_v40  ;;  %6816 = vmatmul.f32.vlgmr.msrb.gmra.mxu0 %v6548_v52  ;;  %v5584_v55 = vpop.xlane.xlu0 %5583  ;;  %v5703_v62 = vld [vmem:[%s12224_s1 + $0xe0] sm:$0xff]  ;;  %v6901_v36 = vsub.f32 %v11595_v27, %v6900_v54 }
 0x5f6   : > { %v6403_v50 = vperm.slane %v5584_v55, %v12289_v7  ;;  %v11626_v55 = vand.u32 4294901760, %v5703_v62 }
 0x5f7   : > { %v6464_v9 = vsel %vm5970_vm1, %v6463_v20, %v6462_v39  ;;  %vm12294_vm1 = vcmask 589312  }
 0x5f8   : > { %v6404_v1 = vsel %vm5974_vm2, %v6403_v50, %v6402_v18  ;;  %v11611_v18 = vand.u32 4294901760, %v5704_v19  ;;  %v5702_v50 = vld [vmem:[%s12224_s1 + $0xd8] sm:$0xff] }
 0x5fa   : > { %5673 = vmax.xlane.f32.xlu0 %v11506_v23  ;;  %v11624_v39 = vsub.f32 %v5704_v19, %v11611_v18  ;;  %v5697_v19 = vld [vmem:[%s12224_s1 + $0xb0] sm:$0xff] }
 0x5fc   : > { %v5648_v21 = vpop.xlane.xlu2 %5647  ;;  %v5586_v25 = vpop.xlane.xlu1 %5585 }
 0x5fd   : > { %v6465_v35 = vperm.slane %v5648_v21, %v12289_v7  ;;  %v6405_v33 = vperm.slane %v5586_v25, %v12292_v3  ;;  %v5524_v0 = vpop.xlane.xlu0 %5523  ;;  %v6902_v21 = vand.u32 4294901760, %v6901_v36 }
 0x5fe   : > { %v6345_v5 = vperm.slane %v5524_v0, %v12293_v22 }
 0x5ff   : > { %v6466_v34 = vsel %vm5974_vm2, %v6465_v35, %v6464_v9  ;;  %v6406_v13 = vsel %vm5978_vm3, %v6405_v33, %v6404_v1  ;;  %v6912_v35 = vand.u32 4294901760, %v11624_v39  ;;  %v11639_v33 = vsub.f32 %v5703_v62, %v11626_v55  ;;  %6903 = vmatpush.msrb.mxu3 %v6902_v21  ;;  %v5696_v21 = vld [vmem:[%s12224_s1 + $0xa8] sm:$0xff]  ;;  %vm12306_vm2 = vmmov %vm12285_vm11 }
 0x600   : > { %v6346_v15 = vsel %vm5982_vm4, %v6345_v5, %v6344_v28  ;;  %vm12312_vm14 = vmmov %vm12306_vm2 }
 0x604   : > { %v5650_v30 = vpop.xlane.xlu2 %5649  ;;  %v5588_v58 = vpop.xlane.xlu1 %5587 }
 0x605   : > { %v6467_v44 = vperm.slane %v5650_v30, %v12292_v3  ;;  %v6407_v23 = vperm.slane %v5588_v58, %v12293_v22  ;;  %v5526_v2 = vpop.xlane.xlu0 %5525  ;;  %v11597_v3 = vand.u32 4294901760, %v5705_v11  ;;  %v6913_v58 = vsub.f32 %v11624_v39, %v6912_v35 }
 0x606   : > { %v6347_v48 = vperm.slane %v5526_v2, %v9817_v26 }
 0x607   : > { %v6468_v42 = vsel %vm5978_vm3, %v6467_v44, %v6466_v34  ;;  %v6408_v38 = vsel %vm5982_vm4, %v6407_v23, %v6406_v13  ;;  %v11609_v28 = vsub.f32 %v5705_v11, %v11597_v3  ;;  %6860 = vmatpush.msrb.mxu2 %v11597_v3  ;;  %7056 = vmatpush.msra.mxu1 %v11597_v3  ;;  %v11645_v34 = vand.u32 4294901760, %v5702_v50  ;;  %v5701_v13 = vld [vmem:[%s12224_s1 + $0xd0] sm:$0xff]  ;;  %vm12307_vm3 = vmmov %vm12287_vm8 }
 0x608   : > { %v6348_v57 = vsel %vm5986_vm5, %v6347_v48, %v6346_v15  ;;  %v11666_v48 = vand.u32 4294901760, %v5701_v13  ;;  %vm12313_vm11 = vmmov %vm12307_vm3 }
 0x609   : > { %v6906_v20 = vand.u32 4294901760, %v11609_v28  ;;  %6862 = vmatpush.msrb.mxu2 %v11611_v18  ;;  %7004 = vmatpush.msra.mxu0 %v11609_v28  ;;  %v11664_v2 = vsub.f32 %v5702_v50, %v11645_v34  ;;  %vm12314_vm8 = vmmov %vm12294_vm1 }
 0x60a   : > { %7058 = vmatpush.msra.mxu1 %v11611_v18 }
 0x60b   : > { %v6907_v25 = vsub.f32 %v11609_v28, %v6906_v20  ;;  %6864 = vmatpush.msrb.mxu2 %v11626_v55  ;;  %7007 = vmatpush.msra.mxu0 %v11624_v39  ;;  %v12296_v28 = vand.u32 4294901760, %v11664_v2 }
 0x60c   : > { %v5652_v12 = vpop.xlane.xlu2 %5651  ;;  %v5590_v52 = vpop.xlane.xlu1 %5589  ;;  %7060 = vmatpush.msra.mxu1 %v11626_v55 }
 0x60d   : > { %v6469_v60 = vperm.slane %v5652_v12, %v12293_v22  ;;  %v6409_v56 = vperm.slane %v5590_v52, %v9817_v26  ;;  %v5528_v7 = vpop.xlane.xlu0 %5527  ;;  %v6908_v30 = vand.u32 4294901760, %v6907_v25  ;;  %7010 = vmatpush.msra.mxu0 %v11639_v33  ;;  %6866 = vmatpush.msrb.mxu2 %v11645_v34 }
 0x60e   : > { %v6349_v24 = vperm.slane %v5528_v7, %v9832_v59  ;;  %7062 = vmatpush.msra.mxu1 %v11645_v34  ;;  %v5699_v7 = vld [vmem:[%s12224_s1 + $0xc0] sm:$0xff] }
 0x60f   : > { %v6470_v37 = vsel %vm5982_vm4, %v6469_v60, %v6468_v42  ;;  %v6410_v51 = vsel %vm5986_vm5, %v6409_v56, %v6408_v38  ;;  %v5700_v42 = vld [vmem:[%s12224_s1 + $0xc8] sm:$0xff]  ;;  %6909 = vmatpush.msrb.mxu3 %v6908_v30  ;;  %v12090_v60 = vand.u32 4294901760, %v11664_v2  ;;  %v11681_v56 = vsub.f32 %v5701_v13, %v11666_v48  ;;  %6868 = vmatpush.msrb.mxu2 %v11666_v48  ;;  %v5695_v30 = vld [vmem:[%s12224_s1 + $0xa0] sm:$0xff] }
 0x610   : > { %v6350_v31 = vsel %vm5990_vm6, %v6349_v24, %v6348_v57  ;;  %v6914_v57 = vand.u32 4294901760, %v6913_v58  ;;  %v11677_v52 = vand.u32 4294901760, %v5700_v42  ;;  %7013 = vmatpush.msra.mxu0 %v11664_v2  ;;  %7064 = vmatpush.msra.mxu1 %v11666_v48  ;;  %vm12309_vm4 = vcmask 1044484  }
 0x611   : > { %v12089_v29 = vand.u32 4294901760, %v11681_v56 }
 0x612   : > { %6915 = vmatpush.msrb.mxu3 %v6914_v57  ;;  %6870 = vmatpush.msrb.mxu2 %v11677_v52 }
 0x613   : > { %7016 = vmatpush.msra.mxu0 %v11681_v56  ;;  %7066 = vmatpush.msra.mxu1 %v11677_v52 }
 0x614   : > { %v5654_v40 = vpop.xlane.xlu2 %5653  ;;  %v5592_v10 = vpop.xlane.xlu1 %5591 }
 0x615   : > { %v6471_v8 = vperm.slane %v5654_v40, %v9817_v26  ;;  %v6411_v46 = vperm.slane %v5592_v10, %v9832_v59  ;;  %v5530_v16 = vpop.xlane.xlu0 %5529  ;;  %v5698_v40 = vld [vmem:[%s12224_s1 + $0xb8] sm:$0xff] }
 0x616   : > { %v6351_v17 = vperm.slane %v5530_v16, %v9861_v32  ;;  %v11711_v11 = vand.u32 4294901760, %v5698_v40 }
 0x617   : > { %v6472_v26 = vsel %vm5986_vm5, %v6471_v8, %v6470_v37  ;;  %v6412_v43 = vsel %vm5990_vm6, %v6411_v46, %v6410_v51  ;;  %v11689_v37 = vsub.f32 %v5700_v42, %v11677_v52  ;;  %v11691_v51 = vand.u32 4294901760, %v5699_v7 }
 0x618   : > { %v6352_v6 = vsel %vm5994_vm7, %v6351_v17, %v6350_v31  ;;  %v6925_v31 = vsub.f32 %v11664_v2, %v12090_v60  ;;  %v11728_v50 = vsub.f32 %v5698_v40, %v11711_v11  ;;  %vm12310_vm5 = vcmask 720512  }
 0x619   : > { %v12087_v46 = vand.u32 4294901760, %v11689_v37  ;;  %v11709_v16 = vsub.f32 %v5699_v7, %v11691_v51  ;;  %6872 = vmatpush.msrb.mxu2 %v11691_v51  ;;  %7019 = vmatpush.msra.mxu0 %v11689_v37  ;;  %v5694_v7 = vld [vmem:[%s12224_s1 + $0x98] sm:$0xff]  ;;  %v12298_v39 = vand.u32 4294901760, %v11689_v37 }
 0x61a   : > { %7068 = vmatpush.msra.mxu1 %v11691_v51 }
 0x61b   : > { %v6937_v62 = vsub.f32 %v11689_v37, %v12087_v46  ;;  %v12086_v36 = vand.u32 4294901760, %v11709_v16  ;;  %6874 = vmatpush.msrb.mxu2 %v11711_v11  ;;  %7022 = vmatpush.msra.mxu0 %v11709_v16 }
 0x61c   : > { %v5656_v9 = vpop.xlane.xlu2 %5655  ;;  %v5594_v1 = vpop.xlane.xlu1 %5593  ;;  %7070 = vmatpush.msra.mxu1 %v11711_v11 }
 0x61d   : > { %v6473_v0 = vperm.slane %v5656_v9, %v9832_v59  ;;  %v6413_v22 = vperm.slane %v5594_v1, %v9861_v32  ;;  %v5532_v5 = vpop.xlane.xlu0 %5531  ;;  %v12091_v59 = vand.u32 4294901760, %v11639_v33  ;;  %v11731_v1 = vand.u32 4294901760, %v5697_v19  ;;  %7025 = vmatpush.msra.mxu0 %v11728_v50 }
 0x61e   : > { %v6353_v15 = vperm.slane %v5532_v5, %v12251_v4  ;;  %v12085_v5 = vand.u32 4294901760, %v11728_v50 }
 0x61f   : > { %v11658_v44 = vsel %vm5990_vm6, %v6473_v0, %v6472_v26  ;;  %v11661_v23 = vsel %vm5994_vm7, %v6413_v22, %v6412_v43  ;;  %v6919_v12 = vsub.f32 %v11639_v33, %v12091_v59  ;;  %v6926_v26 = vand.u32 4294901760, %v6925_v31  ;;  %6876 = vmatpush.msrb.mxu2 %v11731_v1  ;;  %7072 = vmatpush.msra.mxu1 %v11731_v1 }
 0x620   : > { %v6354_v38 = vsel %vm12294_vm1, %v6353_v15, %v6352_v6  ;;  %v6931_v43 = vsub.f32 %v11681_v56, %v12089_v29  ;;  %v6938_v0 = vand.u32 4294901760, %v6937_v62  ;;  %v6943_v22 = vsub.f32 %v11709_v16, %v12086_v36  ;;  %v5693_v62 = vld [vmem:[%s12224_s1 + $0x90] sm:$0xff]  ;;  %vm12316_vm1 = vmmov %vm12310_vm5 }
 0x621   : > { %v6920_v24 = vand.u32 4294901760, %v6919_v12  ;;  %v11747_v13 = vsub.f32 %v5697_v19, %v11731_v1  ;;  %v11749_v15 = vand.u32 4294901760, %v5696_v21  ;;  %v6949_v42 = vsub.f32 %v11728_v50, %v12085_v5 }
 0x622   : > { %v6932_v9 = vand.u32 4294901760, %v6931_v43  ;;  %v6944_v58 = vand.u32 4294901760, %v6943_v22  ;;  %vm12311_vm6 = vcmask 786112  }
 0x623   : > { %6921 = vmatpush.msrb.mxu3 %v6920_v24  ;;  %v12082_v57 = vand.u32 4294901760, %v11747_v13  ;;  %v11764_v12 = vsub.f32 %v5696_v21, %v11749_v15  ;;  %6878 = vmatpush.msrb.mxu2 %v11749_v15  ;;  %v6950_v40 = vand.u32 4294901760, %v6949_v42 }
 0x624   : > { %v11703_v10 = vpop.xlane.xlu2 %5657  ;;  %v11705_v8 = vpop.xlane.xlu1 %5595  ;;  %7028 = vmatpush.msra.mxu0 %v11747_v13  ;;  %7074 = vmatpush.msra.mxu1 %v11749_v15 }
 0x625   : > { %v5534_v17 = vpop.xlane.xlu0 %5533  ;;  %6927 = vmatpush.msrb.mxu3 %v6926_v26  ;;  %v11777_v26 = vand.u32 4294901760, %v5694_v7  ;;  %v6955_v19 = vsub.f32 %v11747_v13, %v12082_v57 }
 0x626   : > { %v6355_v6 = vperm.slane %v5534_v17, %v12261_v61  ;;  %7031 = vmatpush.msra.mxu0 %v11764_v12 }
 0x627   : > { %6933 = vmatpush.msrb.mxu3 %v6932_v9  ;;  %v11793_v21 = vsub.f32 %v5694_v7, %v11777_v26  ;;  %v6956_v22 = vand.u32 4294901760, %v6955_v19 }
 0x628   : > { %v11738_v25 = vsel %vm6002_vm9, %v6355_v6, %v6354_v38  ;;  %v11758_v38 = vand.u32 4294901760, %v5695_v30  ;;  %v12083_v6 = vand.u32 4294901760, %v11764_v12 }
 0x629   : > { %6939 = vmatpush.msrb.mxu3 %v6938_v0  ;;  %v11795_v0 = vand.u32 4294901760, %v5693_v62  ;;  %v12088_v7 = vand.u32 4294901760, %v11793_v21 }
 0x62a   : > { %v11775_v17 = vsub.f32 %v5695_v30, %v11758_v38  ;;  %6880 = vmatpush.msrb.mxu2 %v11758_v38  ;;  %7076 = vmatpush.msra.mxu1 %v11758_v38  ;;  %v6961_v30 = vsub.f32 %v11764_v12, %v12083_v6  ;;  %v5691_v6 = vld [vmem:[%s12224_s1 + $0x80] sm:$0xff] }
 0x62b   : > { %6945 = vmatpush.msrb.mxu3 %v6944_v58  ;;  %v5692_v58 = vld [vmem:[%s12224_s1 + $0x88] sm:$0xff]  ;;  %v11811_v57 = vsub.f32 %v5693_v62, %v11795_v0  ;;  %v6973_v62 = vsub.f32 %v11793_v21, %v12088_v7  ;;  %v11825_v36 = vand.u32 4294901760, %v5691_v6 }
 0x62c   : > { %v11770_v24 = vpop.xlane.xlu2 %5659  ;;  %v11772_v31 = vpop.xlane.xlu1 %5597  ;;  %v12084_v9 = vand.u32 4294901760, %v11775_v17  ;;  %6882 = vmatpush.msrb.mxu2 %v11777_v26  ;;  %7034 = vmatpush.msra.mxu0 %v11775_v17  ;;  %v11815_v19 = vand.u32 4294901760, %v5692_v58 }
 0x62d   : > { %v11781_v43 = vpop.xlane.xlu0 %5535  ;;  %6951 = vmatpush.msrb.mxu3 %v6950_v40  ;;  %7078 = vmatpush.msra.mxu1 %v11777_v26  ;;  %v6962_v40 = vand.u32 4294901760, %v6961_v30  ;;  %v6978_v5 = vand.u32 4294901760, %v11811_v57  ;;  %v6974_v46 = vand.u32 4294901760, %v6973_v62  ;;  %v6989_v29 = vsub.f32 %v5691_v6, %v11825_v36 }
 0x62e   : > { %v6967_v42 = vsub.f32 %v11775_v17, %v12084_v9  ;;  %6884 = vmatpush.msrb.mxu2 %v11795_v0  ;;  %7037 = vmatpush.msra.mxu0 %v11793_v21 }
 0x62f   : > { %6957 = vmatpush.msrb.mxu3 %v6956_v22  ;;  %7080 = vmatpush.msra.mxu1 %v11795_v0  ;;  %v6983_v22 = vsub.f32 %v5692_v58, %v11815_v19  ;;  %v6979_v7 = vsub.f32 %v11811_v57, %v6978_v5  ;;  %v6990_v59 = vand.u32 4294901760, %v6989_v29 }
 0x630   : > { %v6968_v9 = vand.u32 4294901760, %v6967_v42  ;;  %6886 = vmatpush.msrb.mxu2 %v11815_v19  ;;  %7040 = vmatpush.msra.mxu0 %v11811_v57 }
 0x631   : > { %6963 = vmatpush.msrb.mxu3 %v6962_v40  ;;  %7082 = vmatpush.msra.mxu1 %v11815_v19  ;;  %v6984_v40 = vand.u32 4294901760, %v6983_v22  ;;  %v6980_v58 = vand.u32 4294901760, %v6979_v7  ;;  %v6991_v6 = vsub.f32 %v6989_v29, %v6990_v59 }
 0x632   : > { %6888 = vmatpush.msrb.mxu2 %v11825_v36  ;;  %7043 = vmatpush.msra.mxu0 %v6983_v22 }
 0x633   : > { %6969 = vmatpush.msrb.mxu3 %v6968_v9  ;;  %v6985_v62 = vsub.f32 %v6983_v22, %v6984_v40  ;;  %7084 = vmatpush.msra.mxu1 %v11825_v36  ;;  %v6992_v9 = vand.u32 4294901760, %v6991_v6  ;;  %v12308_v22 = vld [vmem:[#allocation13_spill] sm:$0xff] }
 0x634   : > { %v11831_v30 = vpop.xlane.xlu2 %5599  ;;  %v11833_v42 = vpop.xlane.xlu1 %5537  ;;  %7095 = vmatpush.msra.mxu2 %v6900_v54  ;;  %7046 = vmatpush.msra.mxu0 %v6989_v29  ;;  %v12295_v54 = vand.u32 4294901760, %v11639_v33 }
 0x635   : > { %v5476_v60 = vpop.xlane.xlu0 %5475  ;;  %6975 = vmatpush.msrb.mxu3 %v6974_v46  ;;  %v6986_v57 = vand.u32 4294901760, %v6985_v62 }
 0x636   : > { %7099 = vmatpush.msra.mxu2 %v6906_v20  ;;  %v12297_v20 = vand.u32 4294901760, %v11681_v56  ;;  %v12302_v56 = vand.u32 4294901760, %v11764_v12 }
 0x637   : > { %6981 = vmatpush.msrb.mxu3 %v6980_v58 }
 0x638   : > { %7103 = vmatpush.msra.mxu2 %v6912_v35 }
 0x639   : > { %6987 = vmatpush.msrb.mxu3 %v6986_v57 }
 0x63a   : > { %7107 = vmatpush.msra.mxu2 %v12295_v54 }
 0x63b   : > { %6993 = vmatpush.msrb.mxu3 %v6992_v9  ;;  %v6417_v9 = vperm.slane %v11772_v31, %v12261_v61 }
 0x63c   : > { %v5540_v7 = vpop.xlane.xlu2 %5539  ;;  %v5478_v27 = vpop.xlane.xlu1 %5477  ;;  %7111 = vmatpush.msra.mxu2 %v12296_v28 }
 0x63d   : > { %v11849_v46 = vpop.xlane.xlu0 %5661  ;;  %7162 = vmatpush.msra.mxu3 %v11586_v14  ;;  %v12299_v14 = vand.u32 4294901760, %v11709_v16  ;;  %v6301_v16 = vperm.slane %v5478_v27, %v12270_v63  ;;  %v6419_v27 = vperm.slane %v11831_v30, %v12264_v49 }
 0x63e   : > { %7115 = vmatpush.msra.mxu2 %v12297_v20 }
 0x63f   : > { %7164 = vmatpush.msra.mxu3 %v11597_v3  ;;  %v12300_v3 = vand.u32 4294901760, %v11728_v50 }
 0x640   : > { %7119 = vmatpush.msra.mxu2 %v12298_v39  ;;  %v6475_v39 = vperm.slane %v11703_v10, %v9861_v32 }
 0x641   : > { %7166 = vmatpush.msra.mxu3 %v11611_v18  ;;  %v12301_v18 = vand.u32 4294901760, %v11747_v13 }
 0x642   : > { %7123 = vmatpush.msra.mxu2 %v12299_v14  ;;  %v6477_v14 = vperm.slane %v11770_v24, %v12251_v4 }
 0x643   : > { %7168 = vmatpush.msra.mxu3 %v11626_v55 }
 0x644   : > { %v5480_v35 = vpop.xlane.xlu2 %5479  ;;  %v11860_v33 = vpop.xlane.xlu1 %5663  ;;  %7127 = vmatpush.msra.mxu2 %v12300_v3 }
 0x645   : > { %v11865_v2 = vpop.xlane.xlu0 %5601  ;;  %7170 = vmatpush.msra.mxu3 %v11645_v34  ;;  %v12303_v34 = vand.u32 4294901760, %v11775_v17 }
 0x646   : > { %7131 = vmatpush.msra.mxu2 %v12301_v18 }
 0x647   : > { %7172 = vmatpush.msra.mxu3 %v11666_v48  ;;  %v12304_v48 = vand.u32 4294901760, %v11793_v21  ;;  %v6359_v21 = vperm.slane %v11833_v42, %v12267_v53 }
 0x648   : > { %7135 = vmatpush.msra.mxu2 %v12302_v56  ;;  %v6481_v56 = vperm.slane %v11860_v33, %v12264_v49 }
 0x649   : > { %7174 = vmatpush.msra.mxu3 %v11677_v52  ;;  %v6299_v52 = vperm.slane %v5476_v60, %v12269_v41 }
 0x64a   : > { %7139 = vmatpush.msra.mxu2 %v12303_v34  ;;  %v6476_v34 = vsel %vm5994_vm7, %v6475_v39, %v11658_v44  ;;  %vm12321_vm7 = vmmov %vm12316_vm1 }
 0x64b   : > { %7176 = vmatpush.msra.mxu3 %v11691_v51  ;;  %v6303_v51 = vperm.slane %v5480_v35, %v12272_v45 }
 0x64c   : > { %v11876_v55 = vpop.xlane.xlu2 %5665  ;;  %v5604_v37 = vpop.xlane.xlu1 %5603  ;;  %7143 = vmatpush.msra.mxu2 %v12304_v48 }
 0x64d   : > { %v5542_v29 = vpop.xlane.xlu0 %5541  ;;  %7178 = vmatpush.msra.mxu3 %v11711_v11  ;;  %v12305_v11 = vld [vmem:[#allocation9_spill] sm:$0xff]  ;;  %v6423_v31 = vperm.slane %v5604_v37, %v12269_v41 }
 0x64e   : > { %7147 = vmatpush.msra.mxu2 %v6978_v5  ;;  %v6300_v12 = vsel %vm12306_vm2, %v6299_v52, %v12305_v11  ;;  %v6357_v5 = vperm.slane %v11781_v43, %v12264_v49  ;;  %v6363_v58 = vperm.slane %v5542_v29, %v12270_v63  ;;  %vm12317_vm2 = vmmov %vm12311_vm6 }
 0x64f   : > { %7180 = vmatpush.msra.mxu3 %v11731_v1  ;;  %v6302_v1 = vsel %vm6018_vm13, %v6301_v16, %v6300_v12 }
 0x650   : > { %7151 = vmatpush.msra.mxu2 %v6984_v40 }
 0x651   : > { %7182 = vmatpush.msra.mxu3 %v11749_v15  ;;  %v6304_v15 = vsel %vm12307_vm3, %v6303_v51, %v6302_v1  ;;  %vm12318_vm3 = vmmov %vm12312_vm14 }
 0x652   : > { %7155 = vmatpush.msra.mxu2 %v6990_v59 }
 0x653   : > { %7184 = vmatpush.msra.mxu3 %v11758_v38  ;;  %v6361_v38 = vperm.slane %v5540_v7, %v12269_v41 }
 0x654   : > { %v5606_v50 = vpop.xlane.xlu2 %5605  ;;  %v5544_v13 = vpop.xlane.xlu1 %5543 }
 0x655   : > { %v5482_v17 = vpop.xlane.xlu0 %5481  ;;  %7186 = vmatpush.msra.mxu3 %v11777_v26  ;;  %v6358_v26 = vsel %vm12310_vm5, %v6357_v5, %v11738_v25  ;;  %v6365_v43 = vperm.slane %v5544_v13, %v12272_v45  ;;  %v6425_v30 = vperm.slane %v5606_v50, %v12270_v63  ;;  %vm12320_vm5 = vmmov %vm12313_vm11 }
 0x656   : > { %v6305_v60 = vperm.slane %v5482_v17, %v12277_v47  ;;  %v6360_v42 = vsel %vm12311_vm6, %v6359_v21, %v6358_v26  ;;  %vm12322_vm6 = vmmov %vm12317_vm2 }
 0x657   : > { %7188 = vmatpush.msra.mxu3 %v11795_v0  ;;  %v6415_v0 = vperm.slane %v11705_v8, %v12251_v4  ;;  %v6362_v62 = vsel %vm12312_vm14, %v6361_v38, %v6360_v42  ;;  %v6421_v8 = vperm.slane %v11865_v2, %v12267_v53  ;;  %v6483_v4 = vperm.slane %v11876_v55, %v12267_v53  ;;  %vm12323_vm14 = vmmov %vm12318_vm3 }
 0x658   : > { %v6306_v59 = vsel %vm6026_vm15, %v6305_v60, %v6304_v15 }
 0x659   : > { %v6510_v40 = vsel %vm12309_vm4, %v6306_v59, %v12308_v22  ;;  %7190 = vmatpush.msra.mxu3 %v11815_v19  ;;  %v6364_v19 = vsel %vm6018_vm13, %v6363_v58, %v6362_v62  ;;  %v6416_v28 = vsel %vm12314_vm8, %v6415_v0, %v11661_v23  ;;  %v6479_v23 = vperm.slane %v11849_v46, %v12261_v61  ;;  %vm12319_vm4 = vmmov %vm12314_vm8 }
 0x65a   : > { %v6418_v35 = vsel %vm6002_vm9, %v6417_v9, %v6416_v28  ;;  %v6478_v61 = vsel %vm12319_vm4, %v6477_v14, %v6476_v34 }
 0x65b   : > { %7192 = vmatpush.msra.mxu3 %v11825_v36  ;;  %v6366_v36 = vsel %vm12313_vm11, %v6365_v43, %v6364_v19  ;;  %v6420_v2 = vsel %vm12316_vm1, %v6419_v27, %v6418_v35  ;;  %v6480_v33 = vsel %vm6002_vm9, %v6479_v23, %v6478_v61  ;;  %vm12324_vm9 = vmmov %vm12320_vm5 }
 0x65c   : > { %v5608_v7 = vpop.xlane.xlu2 %5607  ;;  %v6422_v18 = vsel %vm12317_vm2, %v6421_v8, %v6420_v2  ;;  %v6482_v16 = vsel %vm12321_vm7, %v6481_v56, %v6480_v33 }
 0x65d   : > { %v5546_v6 = vpop.xlane.xlu1 %5545  ;;  %v5668_v57 = vpop.xlane.xlu0 %5667  ;;  %v6427_v3 = vperm.slane %v5608_v7, %v12272_v45  ;;  %v6424_v32 = vsel %vm12318_vm3, %v6423_v31, %v6422_v18  ;;  %v6484_v55 = vsel %vm12322_vm6, %v6483_v4, %v6482_v16  ;;  %v7437_v31 = vld [vmem:[%s12031_s3] ss:$0 sm:$0xff] }
 0x65e   : > { %v6367_v25 = vperm.slane %v5546_v6, %v12277_v47  ;;  %v6426_v24 = vsel %vm6018_vm13, %v6425_v30, %v6424_v32  ;;  %v6485_v49 = vperm.slane %v5668_v57, %v12269_v41  ;;  %v7198_v18 = vld [vmem:[%s12031_s3] sm:$0x1] }
 0x65f   : > { %v6428_v46 = vsel %vm12320_vm5, %v6427_v3, %v6426_v24 }
 0x660   : > { %v6368_v54 = vsel %vm6026_vm15, %v6367_v25, %v6366_v36  ;;  %v6486_v51 = vsel %vm12323_vm14, %v6485_v49, %v6484_v55 }
 0x661   : > { %v6511_v20 = vsel %vm12315_vm10, %v6368_v54, %v6510_v40 }
 0x662   : > { %v6655_v38 = vpop.f32.mrf.mxu1 }
 0x664   : > { %v5672_v44 = vpop.xlane.xlu2 %5671 }
 0x665   : > { %v5610_v10 = vpop.xlane.xlu1 %5609  ;;  %v5670_v37 = vpop.xlane.xlu0 %5669  ;;  %v6489_v50 = vperm.slane %v5672_v44, %v12272_v45  ;;  %v7436_v45 = vld [vmem:[%s12030_s2] ss:$0 sm:$0xff] }
 0x666   : > { %v6429_v29 = vperm.slane %v5610_v10, %v12277_v47  ;;  %v6487_v52 = vperm.slane %v5670_v37, %v12270_v63  ;;  %v7218_v10 = vsub.f32 1.0, %v7198_v18 }
 0x668   : > { %v6430_v48 = vsel %vm6026_vm15, %v6429_v29, %v6428_v46  ;;  %v6488_v13 = vsel %vm6018_vm13, %v6487_v52, %v6486_v51  ;;  %v7220_v4 = vperm.slane %v7218_v10, 0 }
 0x669   : > { %v6512_v53 = vsel %vm6503_vm0, %v6430_v48, %v6511_v20  ;;  %v6490_v12 = vsel %vm12324_vm9, %v6489_v50, %v6488_v13 }
 0x66a   : > { %v6709_v40 = vpop.f32.mrf.mxu2  ;;  %v6854_v62 = vpop.f32.mrf.mxu1 }
 0x66c   : > { %v6748_v26 = vpop.f32.mrf.mxu3 }
 0x66d   : > { %v5674_v41 = vpop.xlane.xlu0 %5673 }
 0x66e   : > { %v6491_v11 = vperm.slane %v5674_v41, %v12277_v47  ;;  %v6554_v47 = vpop.f32.mrf.mxu0 }
 0x66f   : > { %v6555_v59 = vadd.f32 %v7436_v45, %v6554_v47 }
 0x670   : > { %v6492_v63 = vsel %vm6026_vm15, %v6491_v11, %v6490_v12 }
 0x671   : > { %v6513_v17 = vsel %vm6505_vm12, %v6492_v63, %v6512_v53  ;;  %v6656_v22 = vadd.f32 %v6655_v38, %v6555_v59 }
 0x672   : > { %v6889_v1 = vand.u32 4294901760, %v6513_v17 }
 0x673   : > { %v6710_v58 = vadd.f32 %v6709_v40, %v6656_v22 }
 0x674   : > { %6995 = vmatmul.f32.vlgmr.msrb.gmra.mxu3 %v6889_v1  ;;  %v6890_v60 = vsub.f32 %v6513_v17, %v6889_v1 }
 0x675   : > { %v6749_v43 = vadd.f32 %v6748_v26, %v6710_v58 }
 0x676   : > { %7049 = vmatmul.f32.vlgmr.msra.gmra.mxu0 %v6890_v60  ;;  %v6891_v5 = vand.u32 4294901760, %v6890_v60  ;;  %v6817_v42 = vpop.f32.mrf.mxu0 }
 0x677   : > { %v6818_v0 = vadd.f32 %v6817_v42, %v6749_v43 }
 0x678   : > { %7088 = vmatmul.f32.vlgmr.msra.gmra.mxu1 %v6891_v5  ;;  %v6892_v15 = vsub.f32 %v6890_v60, %v6891_v5 }
 0x679   : > { %v6855_v6 = vadd.f32 %v6854_v62, %v6818_v0 }
 0x67a   : > { %v6893_v21 = vand.u32 4294901760, %v6892_v15 }
 0x67c   : > { %6894 = vmatmul.f32.vlgmr.msrb.gmra.mxu2 %v6893_v21  ;;  %7194 = vmatmul.f32.vlgmr.msra.gmra.mxu3 %v6889_v1 }
 0x684   : > { %7157 = vmatmul.f32.vlgmr.msra.gmra.mxu2 %v6889_v1 }
 0x6f3   : > { %v7050_v25 = vpop.f32.mrf.mxu0 }
 0x6f5   : > { %v7089_v36 = vpop.f32.mrf.mxu1 }
 0x6f7   : > { %v6996_v57 = vpop.f32.mrf.mxu3 }
 0x6ff   : > { %v6895_v9 = vpop.f32.mrf.mxu2  ;;  %v7195_v20 = vpop.f32.mrf.mxu3 }
 0x700   : > { %v6896_v19 = vadd.f32 %v6895_v9, %v6855_v6 }
 0x702   : > { %v6997_v7 = vadd.f32 %v6996_v57, %v6896_v19 }
 0x704   : > { %v7051_v27 = vadd.f32 %v7050_v25, %v6997_v7 }
 0x706   : > { %v7090_v8 = vadd.f32 %v7089_v36, %v7051_v27 }
 0x707   : > { %v7158_v54 = vpop.f32.mrf.mxu2 }
 0x708   : > { %v7159_v28 = vadd.f32 %v7158_v54, %v7090_v8 }
 0x70a   : > { %v7196_v39 = vadd.f32 %v7195_v20, %v7159_v28 }
 0x70c   : > { %v7202_v35 = vmul.f32 %v7437_v31, %v7196_v39 }
 0x70e   : > { %v7203_v30 = vmul.f32 %v7202_v35, %v7202_v35 }
 0x710   : > { %7204 = vadd.xlane.f32.xlu1 %v7203_v30 }
 0x783   : > { %v7205_v14 = vpop.xlane.xlu1 %7204 }
 0x784   : > { %v7206_v2 = vmax.f32 %v7205_v14, 1e-24 }
 0x786   : > { %7438 = vrsqrt.f32 %v7206_v2  ;;  %vm7213_vm15 = vweird.f32 %v7206_v2 }
 0x78c   : > { %v7439_v3 = vpop.eup %7438 }
 0x78d   : > { %v7208_v23 = vmul.f32 %v7439_v3, %v7206_v2  ;;  %vm7214_vm13 = vweird.f32 %v7439_v3 }
 0x78e   : > { %vm7215_vm0 = vmor %vm7213_vm15, %vm7214_vm13 }
 0x78f   : > { %v7209_v56 = vmul.f32 %v7439_v3, %v7208_v23 }
 0x791   : > { %v7210_v32 = vmul.f32 0.5, %v7209_v56 }
 0x793   : > { %v7211_v37 = vsub.f32 1.5, %v7210_v32 }
 0x795   : > { %v7212_v34 = vmul.f32 %v7439_v3, %v7211_v37 }
 0x797   : > { %v7216_v24 = vsel %vm7215_vm0, %v7439_v3, %v7212_v34 }
 0x798   : > { %v7217_v29 = vmul.f32 %v7437_v31, %v7216_v24 }
 0x79a   : > { %v7222_v61 = vadd.f32 %v7220_v4, %v7217_v29 }
 0x79c   : > { %v7223_v46 = vmul.f32 %v7222_v61, %v7196_v39 }
 0x79e   : > { %7224 = vst [vmem:[%s2327_s30] sm:$0xff] %v7223_v46 }
 0x79f PF: > { %s7344_s8 = sshll.u32 %s7538_s21, 3  ;;  %s7238_s5 = sshll.u32 %s2327_s30, 4  ;;  %s7239_s5 = int_to_ptr.vmem [resolvable:$true] %s7238_s5 }
 0x7a0   : > { %s7236_s29 = scalar_lea.hbm %s12032_s4, %s7344_s8  ;;  %s7226_s18 = scalar_lea.sflag [#allocation5], %s2325_s13 }
 0x7a1   : > { %s7240_s14 = sshll.u32 %s7236_s29, 4  ;;  %s7460_s1 = scalar_lea.hbm %s12032_s4, 16  ;;  %s7241_s14 = int_to_ptr.hbm [resolvable:$true] %s7240_s14 }
 0x7a2   : > { %s7454_s26 = sshra.s32 %s7241_s14, 4  ;;  %s7455_s26 = int_to_ptr.hbm [resolvable:$true] %s7454_s26 }
 0x7a3   : > { %s7456_s20 = scalar_lea.hbm %s7455_s26, 8  ;;  %p7461_p10 = scmp.lt.s32.totalorder %s7455_s26, %s12032_s4 }
 0x7a4   : > { %p7457_p6 = scmp.ne.s32.totalorder %s7455_s26, %s7456_s20  ;;  %p7462_p11 = scmp.lt.s32.totalorder %s7460_s1, %s7456_s20 }
 0x7a6   : > { %p7458_p8 = pnand %p7457_p6, %p7650_p7  ;;  %p7463_p13 = por %p7462_p11, %p7461_p10 }
 0x7a8   : > { %p7459_p9 = pneg %p7458_p8 }
 0x7aa   : > { %p7464_p0 = pnand %p7463_p13, %p7459_p9 }
 0x7ac   : > { %7467 = shalt.err (!%p7464_p0)
}
 0x7ad   : > { %7348 = dma.vmem_to_hbm [thread:$0]  (%p7650_p7), %s7239_s5, 128, %s7241_s14, %s7226_s18  }
 0x7ae PF: > { %p7354_p1 = scmp.ge.s32.totalorder %s7550_s24, 2  ;;  %s7252_s13 = sand.u32 1, %s7514_s15  }
 0x7af   : > { %s7253_s0 = scalar_lea.sflag [#allocation5], %s7252_s13 }
 0x7b0   : > { %p7351_p2 = pnand %p7354_p1, %p7658_p12 }
 0x7b2   : > { %p7352_p3 = pneg %p7351_p2 }
 0x7b4   : > { %7509 = dma.done.wait (%p7352_p3), %s7253_s0, 128  }
 0x7b5   : > { %7511 = vsyncadd (%p7352_p3), %s7253_s0, 4294967168  ;;  %s17_s24 = sadd.s32 1, %s7550_s24   ;;  %s12325_s15 = smov %s7518_s16 }
 0x7b6   : > { %p14_p4 = scmp.ge.s32.totalorder %s17_s24, 6   ;;  %s12326_s16 = smov %s7522_s17 }
 0x7b7   : > { %s12327_s17 = smov %s7663_s11  ;;  %s12328_s18 = smov %s7530_s19 }
 0x7b8   : > { %s12329_s19 = smov %s7666_s12  ;;  %s12330_s20 = smov %s7542_s22 }
 0x7b9   : > { %s12331_s21 = smov %s7546_s23  ;;  %s12332_s22 = smov %s12335_s27 }
 0x7ba   : > { %s12333_s23 = smov %s12339_s28  ;;  %16 = sbr.rel (!%p14_p4) target bundleno = 9 (0x9), region = 146 }
 0x7bf   :  { %7259 = vsyncpa [#allocation5], 1 }
 0x7c0   :  { %7261 = vsyncpa [#allocation5 + $0x1], 1 }

</bundles_post_ra>
